<compile_context>
chip_gen: v7x
topology: tpu7x:2x2x1
jax: 0.10.0
libtpu: 0.0.40
codegen_flags: <defaults>
</compile_context>

<pallas_src>
import functools

import numpy as np
import jax
import jax.numpy as jnp
from jax import lax
from jax.experimental import pallas as pl
from jax.experimental.pallas import tpu as pltpu

_BIG = 1e30        # +inf stand-in when masking d2 (real d2 <= H^2 + W^2 << _BIG; keep f32)
_PAD_COORD = 1e16  # coordinate for padded pixels: (1e16)^2 = 1e32 > _BIG, so padded
                   # candidates can never win a masked min for a real query pixel.


def _hausdorff_kernel(rcol_ref, ccol_ref, rrow_ref, crow_ref,
                      pm_ref, gm_ref, err_ref, out_ref,
                      p2b_ref, p2f_ref, g2b_ref, g2f_ref,
                      *, Bt, n_chunks, alpha):
    pi = pl.program_id(1)

    @pl.when(pi == 0)
    def _init():
        big = jnp.full(p2b_ref.shape, _BIG, dtype=jnp.float32)
        p2b_ref[...] = big
        p2f_ref[...] = big
        g2b_ref[...] = big
        g2f_ref[...] = big

    # Query-pixel coordinates, lane-dense, loaded once per grid step (tiny).
    r_q = rrow_ref[...]                                 # (1, Np)
    c_q = crow_ref[...]                                 # (1, Np)

    def chunk_update(s):
        # One 8-row (single sublane-group) chunk of candidate pixels.  d2 is generated on
        # the fly (no N x N matrix anywhere) and this single value feeds all 4 * Bt
        # select+min chains before the next chunk is touched (fused single pass).
        r_p = rcol_ref[pl.ds(s, 8), :]                  # (8, 1) candidate coords (sublanes)
        c_p = ccol_ref[pl.ds(s, 8), :]
        dr = r_p - r_q
        dc = c_p - c_q
        d2 = dr * dr + dc * dc                          # (8, Np)
        for b in range(Bt):                             # Bt <= 4: small static unroll
            # Hoisted (8,1)->(8,Np) mask broadcasts, reused by both jnp.where calls.
            pm = jnp.broadcast_to(pm_ref[b, pl.ds(s, 8), :], d2.shape) > 0.5
            gm = jnp.broadcast_to(gm_ref[b, pl.ds(s, 8), :], d2.shape) > 0.5
            # 8-row running-min accumulators: vreg-wise VPU mins, full-width stores; the
            # 8 -> 1 cross-sublane collapse happens once, in the finalize branch.
            p2b_ref[b] = jnp.minimum(p2b_ref[b], jnp.where(pm, _BIG, d2))
            p2f_ref[b] = jnp.minimum(p2f_ref[b], jnp.where(pm, d2, _BIG))
            g2b_ref[b] = jnp.minimum(g2b_ref[b], jnp.where(gm, _BIG, d2))
            g2f_ref[b] = jnp.minimum(g2f_ref[b], jnp.where(gm, d2, _BIG))

    if n_chunks * Bt <= 64:
        # Small trip count: static unroll, aligned static slices.
        for ci in range(n_chunks):
            chunk_update(ci * 8)
    else:
        # Large trip count: rolled in-kernel loop keeps compile time and live ranges bounded.
        def body(ci, carry):
            chunk_update(pl.multiple_of(ci * 8, 8))
            return carry
        lax.fori_loop(0, n_chunks, body, 0)

    @pl.when(pi == pl.num_programs(1) - 1)
    def _finalize():
        def field(to_bg8, to_fg8):
            # Single cross-sublane (XLU) collapse per chain per batch element.
            to_bg = jnp.min(to_bg8, axis=0, keepdims=True)       # (1, Np)
            to_fg = jnp.min(to_fg8, axis=0, keepdims=True)
            # TODO(synk): scipy's EDT is ill-defined when a mask has no zeros; an empty
            # candidate set contributes 0 here, which also reproduces the reference's
            # `if fg_mask.any()` skip (an all-background image yields a zero field).
            fg_dist = jnp.where(to_bg >= _BIG * 0.5, 0.0, jnp.sqrt(to_bg))
            bg_dist = jnp.where(to_fg >= _BIG * 0.5, 0.0, jnp.sqrt(to_fg))
            return fg_dist + bg_dist                             # (1, Np)

        def pow_alpha(x):
            if float(alpha) == 2.0:
                return x * x
            return jnp.power(x, jnp.float32(alpha))

        total = jnp.zeros((1, 1), jnp.float32)
        for b in range(Bt):
            pdt = field(p2b_ref[b], p2f_ref[b])                  # pred distance field
            gdt = field(g2b_ref[b], g2f_ref[b])                  # gt   distance field
            dist = pow_alpha(pdt) + pow_alpha(gdt)               # (1, Np)
            # Lane-dense VPU multiply + lane reduce (padded query lanes have err == 0).
            total = total + jnp.sum(err_ref[b] * dist, axis=-1, keepdims=True)
        out_ref[0] = total


def _round_up(x, m):
    return ((x + m - 1) // m) * m


def _pick_bt(batch):
    # Keep vreg/VMEM pressure modest (Bt <= 4) and leave >= 2 batch groups so the
    # "parallel" grid axis can span both TensorCores on v7x.
    for cand in (4, 2):
        if batch % cand == 0 and batch // cand >= 2:
            return cand
    return 1 if batch >= 2 else max(batch, 1)


def _pick_row_block(n):
    # Candidate-row block size: multiple of 8, large enough to amortize the ~0.35us
    # per-grid-step overhead, chosen to minimize padded rows for arbitrary H*W.
    n8 = _round_up(n, 8)
    if n8 <= 512:
        return n8
    best_tp, best_pad = 512, _round_up(n8, 512) - n8
    for tp in (512, 448, 384, 320, 256):
        pad = _round_up(n8, tp) - n8
        if pad < best_pad:
            best_tp, best_pad = tp, pad
    return best_tp


def _vmem_limit_bytes(Bt, TP, Np):
    # Explicit scoped-VMEM budget (default is only 16 MiB on v5e / 32 MiB on v6e/v7x),
    # capped below v7x's 64 MiB physical VMEM.
    acc = 4 * Bt * 8 * Np * 4                   # four (Bt, 8, Np) f32 accumulators
    masks = 2 * 2 * Bt * TP * 128 * 4           # two (Bt,TP,1) blocks, lane-padded, 2x buffered
    errb = 2 * Bt * 8 * Np * 4                  # (Bt,1,Np) block, sublane-padded, 2x buffered
    coords = 2 * 2 * TP * 128 * 4 + 2 * 2 * 8 * Np * 4
    headroom = 8 << 20                          # Mosaic temporaries ((8,Np) d2 chunks etc.)
    est = acc + masks + errb + coords + headroom
    return int(min(48 << 20, max(24 << 20, est)))


def hausdorff_dt_loss(model_output, ground_truth, alpha=2.0):
    """model_output: (B, C, H, W) logits; ground_truth: (B, 1, H, W) binary."""
    B, C, H, W = model_output.shape
    assert ground_truth.shape == (B, 1, H, W)
    N = H * W

    # Glue (plain XLA, O(B*N)): channel argmax (torch.max(.,1).indices), the error term with
    # raw class indices, and the >0.5 foreground masks in the layouts the kernel wants.
    pred = jnp.argmax(model_output, axis=1).astype(jnp.float32).reshape(B, N)
    gt = ground_truth.astype(jnp.float32).reshape(B, N)

    Bt = _pick_bt(B)
    TP = _pick_row_block(N)
    Np = _round_up(N, TP)                 # pad pixel count to a whole number of row blocks
    pad = Np - N

    err = (pred - gt) ** 2
    pm = (pred > 0.5).astype(jnp.float32)
    gm = (gt > 0.5).astype(jnp.float32)
    if pad:
        err = jnp.pad(err, ((0, 0), (0, pad)))        # padded query lanes contribute 0
        pm = jnp.pad(pm, ((0, 0), (0, pad)))          # padded candidates: background mask
        gm = jnp.pad(gm, ((0, 0), (0, pad)))

    err_row = err.reshape(B, 1, Np)                   # lane-dense rows
    pm_col = pm.reshape(B, Np, 1)                     # sublane/column layout
    gm_col = gm.reshape(B, Np, 1)

    # Pixel coordinates (tiny O(N) arrays); padded pixels get a huge coordinate so they can
    # never win a masked min against a real query pixel.
    idx = jnp.arange(N, dtype=jnp.int32)
    r = (idx // W).astype(jnp.float32)
    c = (idx % W).astype(jnp.float32)
    if pad:
        r = jnp.concatenate([r, jnp.full((pad,), _PAD_COORD, jnp.float32)])
        c = jnp.concatenate([c, jnp.full((pad,), _PAD_COORD, jnp.float32)])
    r_col = r.reshape(Np, 1)
    c_col = c.reshape(Np, 1)
    r_row = r.reshape(1, Np)
    c_row = c.reshape(1, Np)

    grid = (B // Bt, Np // TP)            # batch groups (parallel) x candidate-row blocks
    n_chunks = TP // 8

    kernel = functools.partial(_hausdorff_kernel, Bt=Bt, n_chunks=n_chunks, alpha=alpha)
    per_group_sums = pl.pallas_call(
        kernel,
        out_shape=jax.ShapeDtypeStruct((B // Bt, 1, 1), jnp.float32),
        grid=grid,
        in_specs=[
            pl.BlockSpec((TP, 1), lambda bi, pi: (pi, 0)),          # candidate row coords
            pl.BlockSpec((TP, 1), lambda bi, pi: (pi, 0)),          # candidate col coords
            pl.BlockSpec((1, Np), lambda bi, pi: (0, 0)),           # query row coords
            pl.BlockSpec((1, Np), lambda bi, pi: (0, 0)),           # query col coords
            pl.BlockSpec((Bt, TP, 1), lambda bi, pi: (bi, pi, 0)),  # pred fg mask (columns)
            pl.BlockSpec((Bt, TP, 1), lambda bi, pi: (bi, pi, 0)),  # gt   fg mask (columns)
            pl.BlockSpec((Bt, 1, Np), lambda bi, pi: (bi, 0, 0)),   # (pred-gt)^2 (rows)
        ],
        out_specs=pl.BlockSpec((1, 1, 1), lambda bi, pi: (bi, 0, 0)),
        scratch_shapes=[pltpu.VMEM((Bt, 8, Np), jnp.float32)] * 4,  # running-min accumulators
        compiler_params=pltpu.CompilerParams(
            dimension_semantics=("parallel", "arbitrary"),
            vmem_limit_bytes=_vmem_limit_bytes(Bt, TP, Np)),
    )(r_col, c_col, r_row, c_row, pm_col, gm_col, err_row)

    # mean over (B, 1, H, W) -- the original, unpadded element count.
    return jnp.sum(per_group_sums) / (B * 1 * H * W)


# ----------------------- pure NumPy reference (for checking) -----------------------
def _edt_bruteforce(mask):
    # mask: (H, W) bool; exact distance from each pixel to the nearest False pixel.
    H, W = mask.shape
    ys, xs = np.mgrid[0:H, 0:W]
    coords = np.stack([ys.ravel(), xs.ravel()], -1).astype(np.float64)
    d2 = ((coords[:, None, :] - coords[None, :, :]) ** 2).sum(-1)
    bg = ~mask.ravel()
    if not bg.any():
        return np.zeros((H, W))
    return np.sqrt(d2[:, bg].min(axis=1)).reshape(H, W)


def reference_loss(model_output, ground_truth, alpha=2.0):
    pred = model_output.argmax(axis=1)[:, None].astype(np.float64)  # (B,1,H,W)
    gt = ground_truth.astype(np.float64)

    def field(img):
        out = np.zeros_like(img, dtype=np.float64)
        for b in range(img.shape[0]):
            fg = img[b, 0] > 0.5
            if fg.any():
                out[b, 0] = _edt_bruteforce(fg) + _edt_bruteforce(~fg)
        return out

    pdt = field(pred)
    gdt = field(gt)
    err = (pred - gt) ** 2
    dist = pdt ** alpha + gdt ** alpha
    return (err * dist).mean()


if __name__ == "__main__":
    key = jax.random.PRNGKey(0)
    k1, k2 = jax.random.split(key)
    B, C, H, W = 2, 4, 16, 16
    model_output = jax.random.normal(k1, (B, C, H, W), dtype=jnp.float32)
    ground_truth = (jax.random.uniform(k2, (B, 1, H, W)) > 0.5).astype(jnp.float32)

    loss = hausdorff_dt_loss(model_output, ground_truth, alpha=2.0)
    loss = jax.block_until_ready(loss)

    ref = reference_loss(np.asarray(model_output), np.asarray(ground_truth), alpha=2.0)
    np.testing.assert_allclose(float(loss), float(ref), rtol=1e-4, atol=1e-4)
    print("KERNEL_OK")
</pallas_src>

<mosaic_0001>
module attributes {stable_mosaic.version = 11 : i64} {
  func.func @_hausdorff_kernel(%arg0: i32, %arg1: i32, %arg2: memref<256x1xf32, #tpu.memory_space<vmem>>, %arg3: memref<256x1xf32, #tpu.memory_space<vmem>>, %arg4: memref<1x256xf32, #tpu.memory_space<vmem>>, %arg5: memref<1x256xf32, #tpu.memory_space<vmem>>, %arg6: memref<1x256x1xf32, #tpu.memory_space<vmem>>, %arg7: memref<1x256x1xf32, #tpu.memory_space<vmem>>, %arg8: memref<1x1x256xf32, #tpu.memory_space<vmem>>, %arg9: memref<1x1x1xf32, #tpu.memory_space<vmem>>, %arg10: memref<1x8x256xf32, #tpu.memory_space<vmem>>, %arg11: memref<1x8x256xf32, #tpu.memory_space<vmem>>, %arg12: memref<1x8x256xf32, #tpu.memory_space<vmem>>, %arg13: memref<1x8x256xf32, #tpu.memory_space<vmem>>) attributes {dimension_semantics = [#tpu.dimension_semantics<parallel>, #tpu.dimension_semantics<arbitrary>], iteration_bounds = array<i64: 2, 1>, scalar_prefetch = 0 : i64, scratch_operands = 4 : i64, tpu.core_type = #tpu.core_type<tc>, window_params = [{transform_indices = @transform_0, window_bounds = array<i64: 256, 1>}, {transform_indices = @transform_1, window_bounds = array<i64: 256, 1>}, {pipeline_mode = #tpu.pipeline_mode<synchronous>, transform_indices = @transform_2, window_bounds = array<i64: 1, 256>}, {pipeline_mode = #tpu.pipeline_mode<synchronous>, transform_indices = @transform_3, window_bounds = array<i64: 1, 256>}, {transform_indices = @transform_4, window_bounds = array<i64: 1, 256, 1>}, {transform_indices = @transform_5, window_bounds = array<i64: 1, 256, 1>}, {transform_indices = @transform_6, window_bounds = array<i64: 1, 1, 256>}, {transform_indices = @transform_7, window_bounds = array<i64: 1, 1, 1>}]} {
    %c0_i32 = arith.constant 0 : i32
    %0 = arith.cmpi eq, %arg1, %c0_i32 : i32
    %1 = arith.extui %0 : i1 to i32
    %c0_i32_0 = arith.constant 0 : i32
    %2 = arith.cmpi ne, %1, %c0_i32_0 : i32
    scf.if %2 {
      %cst_1254 = arith.constant 1.000000e+30 : f32
      %1768 = vector.broadcast %cst_1254 : f32 to vector<1x8x256xf32>
      %c0_1255 = arith.constant 0 : index
      %c0_1256 = arith.constant 0 : index
      %c0_1257 = arith.constant 0 : index
      %1769 = vector.load %arg10[%c0_1255, %c0_1256, %c0_1257] : memref<1x8x256xf32, #tpu.memory_space<vmem>>, vector<1x8x256xf32>
      tpu.vector_store %arg10[%c0_1255, %c0_1256, %c0_1257], %1768 {strides = array<i32>} : memref<1x8x256xf32, #tpu.memory_space<vmem>>, vector<1x8x256xf32>,
      %c0_1258 = arith.constant 0 : index
      %c0_1259 = arith.constant 0 : index
      %c0_1260 = arith.constant 0 : index
      %1770 = vector.load %arg11[%c0_1258, %c0_1259, %c0_1260] : memref<1x8x256xf32, #tpu.memory_space<vmem>>, vector<1x8x256xf32>
      tpu.vector_store %arg11[%c0_1258, %c0_1259, %c0_1260], %1768 {strides = array<i32>} : memref<1x8x256xf32, #tpu.memory_space<vmem>>, vector<1x8x256xf32>,
      %c0_1261 = arith.constant 0 : index
      %c0_1262 = arith.constant 0 : index
      %c0_1263 = arith.constant 0 : index
      %1771 = vector.load %arg12[%c0_1261, %c0_1262, %c0_1263] : memref<1x8x256xf32, #tpu.memory_space<vmem>>, vector<1x8x256xf32>
      tpu.vector_store %arg12[%c0_1261, %c0_1262, %c0_1263], %1768 {strides = array<i32>} : memref<1x8x256xf32, #tpu.memory_space<vmem>>, vector<1x8x256xf32>,
      %c0_1264 = arith.constant 0 : index
      %c0_1265 = arith.constant 0 : index
      %c0_1266 = arith.constant 0 : index
      %1772 = vector.load %arg13[%c0_1264, %c0_1265, %c0_1266] : memref<1x8x256xf32, #tpu.memory_space<vmem>>, vector<1x8x256xf32>
      tpu.vector_store %arg13[%c0_1264, %c0_1265, %c0_1266], %1768 {strides = array<i32>} : memref<1x8x256xf32, #tpu.memory_space<vmem>>, vector<1x8x256xf32>,
    } else {
    }
    %c0 = arith.constant 0 : index
    %c0_1 = arith.constant 0 : index
    %3 = vector.load %arg4[%c0, %c0_1] : memref<1x256xf32, #tpu.memory_space<vmem>>, vector<1x256xf32>
    %c0_2 = arith.constant 0 : index
    %c0_3 = arith.constant 0 : index
    %4 = vector.load %arg5[%c0_2, %c0_3] : memref<1x256xf32, #tpu.memory_space<vmem>>, vector<1x256xf32>
    %c0_4 = arith.constant 0 : index
    %c0_5 = arith.constant 0 : index
    %5 = vector.load %arg2[%c0_4, %c0_5] : memref<256x1xf32, #tpu.memory_space<vmem>>, vector<8x1xf32>
    %c0_6 = arith.constant 0 : index
    %c0_7 = arith.constant 0 : index
    %6 = vector.load %arg3[%c0_6, %c0_7] : memref<256x1xf32, #tpu.memory_space<vmem>>, vector<8x1xf32>
    %7 = vector.broadcast %5 : vector<8x1xf32> to vector<8x256xf32>
    %8 = vector.broadcast %3 : vector<1x256xf32> to vector<8x256xf32>
    %9 = arith.subf %7, %8 : vector<8x256xf32>
    %10 = vector.broadcast %6 : vector<8x1xf32> to vector<8x256xf32>
    %11 = vector.broadcast %4 : vector<1x256xf32> to vector<8x256xf32>
    %12 = arith.subf %10, %11 : vector<8x256xf32>
    %13 = arith.mulf %9, %9 : vector<8x256xf32>
    %14 = arith.mulf %12, %12 : vector<8x256xf32>
    %15 = arith.addf %13, %14 : vector<8x256xf32>
    %c0_8 = arith.constant 0 : index
    %c0_9 = arith.constant 0 : index
    %c0_10 = arith.constant 0 : index
    %16 = vector.load %arg6[%c0_8, %c0_9, %c0_10] : memref<1x256x1xf32, #tpu.memory_space<vmem>>, vector<1x8x1xf32>
    %17 = vector.shape_cast %16 : vector<1x8x1xf32> to vector<8x1xf32>
    %18 = vector.shape_cast %17 : vector<8x1xf32> to vector<8x1xf32>
    %19 = vector.broadcast %18 : vector<8x1xf32> to vector<8x256xf32>
    %cst = arith.constant 5.000000e-01 : f32
    %20 = vector.broadcast %cst : f32 to vector<8x256xf32>
    %21 = arith.cmpf ogt, %19, %20 : vector<8x256xf32>
    %c0_11 = arith.constant 0 : index
    %c0_12 = arith.constant 0 : index
    %c0_13 = arith.constant 0 : index
    %22 = vector.load %arg7[%c0_11, %c0_12, %c0_13] : memref<1x256x1xf32, #tpu.memory_space<vmem>>, vector<1x8x1xf32>
    %23 = vector.shape_cast %22 : vector<1x8x1xf32> to vector<8x1xf32>
    %24 = vector.shape_cast %23 : vector<8x1xf32> to vector<8x1xf32>
    %25 = vector.broadcast %24 : vector<8x1xf32> to vector<8x256xf32>
    %cst_14 = arith.constant 5.000000e-01 : f32
    %26 = vector.broadcast %cst_14 : f32 to vector<8x256xf32>
    %27 = arith.cmpf ogt, %25, %26 : vector<8x256xf32>
    %c0_15 = arith.constant 0 : index
    %c0_16 = arith.constant 0 : index
    %c0_17 = arith.constant 0 : index
    %28 = vector.load %arg10[%c0_15, %c0_16, %c0_17] : memref<1x8x256xf32, #tpu.memory_space<vmem>>, vector<1x8x256xf32>
    %29 = vector.shape_cast %28 : vector<1x8x256xf32> to vector<8x256xf32>
    %cst_18 = arith.constant 1.000000e+30 : f32
    %30 = vector.broadcast %cst_18 : f32 to vector<8x256xf32>
    %31 = arith.select %21, %30, %15 : vector<8x256xi1>, vector<8x256xf32>
    %32 = arith.minimumf %29, %31 : vector<8x256xf32>
    %c0_19 = arith.constant 0 : index
    %c0_20 = arith.constant 0 : index
    %c0_21 = arith.constant 0 : index
    %33 = vector.load %arg10[%c0_19, %c0_20, %c0_21] : memref<1x8x256xf32, #tpu.memory_space<vmem>>, vector<1x8x256xf32>
    %34 = vector.shape_cast %33 : vector<1x8x256xf32> to vector<8x256xf32>
    %35 = vector.shape_cast %32 : vector<8x256xf32> to vector<1x8x256xf32>
    tpu.vector_store %arg10[%c0_19, %c0_20, %c0_21], %35 {strides = array<i32>} : memref<1x8x256xf32, #tpu.memory_space<vmem>>, vector<1x8x256xf32>,
    %c0_22 = arith.constant 0 : index
    %c0_23 = arith.constant 0 : index
    %c0_24 = arith.constant 0 : index
    %36 = vector.load %arg11[%c0_22, %c0_23, %c0_24] : memref<1x8x256xf32, #tpu.memory_space<vmem>>, vector<1x8x256xf32>
    %37 = vector.shape_cast %36 : vector<1x8x256xf32> to vector<8x256xf32>
    %cst_25 = arith.constant 1.000000e+30 : f32
    %38 = vector.broadcast %cst_25 : f32 to vector<8x256xf32>
    %39 = arith.select %21, %15, %38 : vector<8x256xi1>, vector<8x256xf32>
    %40 = arith.minimumf %37, %39 : vector<8x256xf32>
    %c0_26 = arith.constant 0 : index
    %c0_27 = arith.constant 0 : index
    %c0_28 = arith.constant 0 : index
    %41 = vector.load %arg11[%c0_26, %c0_27, %c0_28] : memref<1x8x256xf32, #tpu.memory_space<vmem>>, vector<1x8x256xf32>
    %42 = vector.shape_cast %41 : vector<1x8x256xf32> to vector<8x256xf32>
    %43 = vector.shape_cast %40 : vector<8x256xf32> to vector<1x8x256xf32>
    tpu.vector_store %arg11[%c0_26, %c0_27, %c0_28], %43 {strides = array<i32>} : memref<1x8x256xf32, #tpu.memory_space<vmem>>, vector<1x8x256xf32>,
    %c0_29 = arith.constant 0 : index
    %c0_30 = arith.constant 0 : index
    %c0_31 = arith.constant 0 : index
    %44 = vector.load %arg12[%c0_29, %c0_30, %c0_31] : memref<1x8x256xf32, #tpu.memory_space<vmem>>, vector<1x8x256xf32>
    %45 = vector.shape_cast %44 : vector<1x8x256xf32> to vector<8x256xf32>
    %cst_32 = arith.constant 1.000000e+30 : f32
    %46 = vector.broadcast %cst_32 : f32 to vector<8x256xf32>
    %47 = arith.select %27, %46, %15 : vector<8x256xi1>, vector<8x256xf32>
    %48 = arith.minimumf %45, %47 : vector<8x256xf32>
    %c0_33 = arith.constant 0 : index
    %c0_34 = arith.constant 0 : index
    %c0_35 = arith.constant 0 : index
    %49 = vector.load %arg12[%c0_33, %c0_34, %c0_35] : memref<1x8x256xf32, #tpu.memory_space<vmem>>, vector<1x8x256xf32>
    %50 = vector.shape_cast %49 : vector<1x8x256xf32> to vector<8x256xf32>
    %51 = vector.shape_cast %48 : vector<8x256xf32> to vector<1x8x256xf32>
    tpu.vector_store %arg12[%c0_33, %c0_34, %c0_35], %51 {strides = array<i32>} : memref<1x8x256xf32, #tpu.memory_space<vmem>>, vector<1x8x256xf32>,
    %c0_36 = arith.constant 0 : index
    %c0_37 = arith.constant 0 : index
    %c0_38 = arith.constant 0 : index
    %52 = vector.load %arg13[%c0_36, %c0_37, %c0_38] : memref<1x8x256xf32, #tpu.memory_space<vmem>>, vector<1x8x256xf32>
    %53 = vector.shape_cast %52 : vector<1x8x256xf32> to vector<8x256xf32>
    %cst_39 = arith.constant 1.000000e+30 : f32
    %54 = vector.broadcast %cst_39 : f32 to vector<8x256xf32>
    %55 = arith.select %27, %15, %54 : vector<8x256xi1>, vector<8x256xf32>
    %56 = arith.minimumf %53, %55 : vector<8x256xf32>
    %c0_40 = arith.constant 0 : index
    %c0_41 = arith.constant 0 : index
    %c0_42 = arith.constant 0 : index
    %57 = vector.load %arg13[%c0_40, %c0_41, %c0_42] : memref<1x8x256xf32, #tpu.memory_space<vmem>>, vector<1x8x256xf32>
    %58 = vector.shape_cast %57 : vector<1x8x256xf32> to vector<8x256xf32>
    %59 = vector.shape_cast %56 : vector<8x256xf32> to vector<1x8x256xf32>
    tpu.vector_store %arg13[%c0_40, %c0_41, %c0_42], %59 {strides = array<i32>} : memref<1x8x256xf32, #tpu.memory_space<vmem>>, vector<1x8x256xf32>,
    %c8 = arith.constant 8 : index
    %c0_43 = arith.constant 0 : index
    %60 = vector.load %arg2[%c8, %c0_43] : memref<256x1xf32, #tpu.memory_space<vmem>>, vector<8x1xf32>
    %c8_44 = arith.constant 8 : index
    %c0_45 = arith.constant 0 : index
    %61 = vector.load %arg3[%c8_44, %c0_45] : memref<256x1xf32, #tpu.memory_space<vmem>>, vector<8x1xf32>
    %62 = vector.broadcast %60 : vector<8x1xf32> to vector<8x256xf32>
    %63 = vector.broadcast %3 : vector<1x256xf32> to vector<8x256xf32>
    %64 = arith.subf %62, %63 : vector<8x256xf32>
    %65 = vector.broadcast %61 : vector<8x1xf32> to vector<8x256xf32>
    %66 = vector.broadcast %4 : vector<1x256xf32> to vector<8x256xf32>
    %67 = arith.subf %65, %66 : vector<8x256xf32>
    %68 = arith.mulf %64, %64 : vector<8x256xf32>
    %69 = arith.mulf %67, %67 : vector<8x256xf32>
    %70 = arith.addf %68, %69 : vector<8x256xf32>
    %c0_46 = arith.constant 0 : index
    %c8_47 = arith.constant 8 : index
    %c0_48 = arith.constant 0 : index
    %71 = vector.load %arg6[%c0_46, %c8_47, %c0_48] : memref<1x256x1xf32, #tpu.memory_space<vmem>>, vector<1x8x1xf32>
    %72 = vector.shape_cast %71 : vector<1x8x1xf32> to vector<8x1xf32>
    %73 = vector.shape_cast %72 : vector<8x1xf32> to vector<8x1xf32>
    %74 = vector.broadcast %73 : vector<8x1xf32> to vector<8x256xf32>
    %cst_49 = arith.constant 5.000000e-01 : f32
    %75 = vector.broadcast %cst_49 : f32 to vector<8x256xf32>
    %76 = arith.cmpf ogt, %74, %75 : vector<8x256xf32>
    %c0_50 = arith.constant 0 : index
    %c8_51 = arith.constant 8 : index
    %c0_52 = arith.constant 0 : index
    %77 = vector.load %arg7[%c0_50, %c8_51, %c0_52] : memref<1x256x1xf32, #tpu.memory_space<vmem>>, vector<1x8x1xf32>
    %78 = vector.shape_cast %77 : vector<1x8x1xf32> to vector<8x1xf32>
    %79 = vector.shape_cast %78 : vector<8x1xf32> to vector<8x1xf32>
    %80 = vector.broadcast %79 : vector<8x1xf32> to vector<8x256xf32>
    %cst_53 = arith.constant 5.000000e-01 : f32
    %81 = vector.broadcast %cst_53 : f32 to vector<8x256xf32>
    %82 = arith.cmpf ogt, %80, %81 : vector<8x256xf32>
    %c0_54 = arith.constant 0 : index
    %c0_55 = arith.constant 0 : index
    %c0_56 = arith.constant 0 : index
    %83 = vector.load %arg10[%c0_54, %c0_55, %c0_56] : memref<1x8x256xf32, #tpu.memory_space<vmem>>, vector<1x8x256xf32>
    %84 = vector.shape_cast %83 : vector<1x8x256xf32> to vector<8x256xf32>
    %cst_57 = arith.constant 1.000000e+30 : f32
    %85 = vector.broadcast %cst_57 : f32 to vector<8x256xf32>
    %86 = arith.select %76, %85, %70 : vector<8x256xi1>, vector<8x256xf32>
    %87 = arith.minimumf %84, %86 : vector<8x256xf32>
    %c0_58 = arith.constant 0 : index
    %c0_59 = arith.constant 0 : index
    %c0_60 = arith.constant 0 : index
    %88 = vector.load %arg10[%c0_58, %c0_59, %c0_60] : memref<1x8x256xf32, #tpu.memory_space<vmem>>, vector<1x8x256xf32>
    %89 = vector.shape_cast %88 : vector<1x8x256xf32> to vector<8x256xf32>
    %90 = vector.shape_cast %87 : vector<8x256xf32> to vector<1x8x256xf32>
    tpu.vector_store %arg10[%c0_58, %c0_59, %c0_60], %90 {strides = array<i32>} : memref<1x8x256xf32, #tpu.memory_space<vmem>>, vector<1x8x256xf32>,
    %c0_61 = arith.constant 0 : index
    %c0_62 = arith.constant 0 : index
    %c0_63 = arith.constant 0 : index
    %91 = vector.load %arg11[%c0_61, %c0_62, %c0_63] : memref<1x8x256xf32, #tpu.memory_space<vmem>>, vector<1x8x256xf32>
    %92 = vector.shape_cast %91 : vector<1x8x256xf32> to vector<8x256xf32>
    %cst_64 = arith.constant 1.000000e+30 : f32
    %93 = vector.broadcast %cst_64 : f32 to vector<8x256xf32>
    %94 = arith.select %76, %70, %93 : vector<8x256xi1>, vector<8x256xf32>
    %95 = arith.minimumf %92, %94 : vector<8x256xf32>
    %c0_65 = arith.constant 0 : index
    %c0_66 = arith.constant 0 : index
    %c0_67 = arith.constant 0 : index
    %96 = vector.load %arg11[%c0_65, %c0_66, %c0_67] : memref<1x8x256xf32, #tpu.memory_space<vmem>>, vector<1x8x256xf32>
    %97 = vector.shape_cast %96 : vector<1x8x256xf32> to vector<8x256xf32>
    %98 = vector.shape_cast %95 : vector<8x256xf32> to vector<1x8x256xf32>
    tpu.vector_store %arg11[%c0_65, %c0_66, %c0_67], %98 {strides = array<i32>} : memref<1x8x256xf32, #tpu.memory_space<vmem>>, vector<1x8x256xf32>,
    %c0_68 = arith.constant 0 : index
    %c0_69 = arith.constant 0 : index
    %c0_70 = arith.constant 0 : index
    %99 = vector.load %arg12[%c0_68, %c0_69, %c0_70] : memref<1x8x256xf32, #tpu.memory_space<vmem>>, vector<1x8x256xf32>
    %100 = vector.shape_cast %99 : vector<1x8x256xf32> to vector<8x256xf32>
    %cst_71 = arith.constant 1.000000e+30 : f32
    %101 = vector.broadcast %cst_71 : f32 to vector<8x256xf32>
    %102 = arith.select %82, %101, %70 : vector<8x256xi1>, vector<8x256xf32>
    %103 = arith.minimumf %100, %102 : vector<8x256xf32>
    %c0_72 = arith.constant 0 : index
    %c0_73 = arith.constant 0 : index
    %c0_74 = arith.constant 0 : index
    %104 = vector.load %arg12[%c0_72, %c0_73, %c0_74] : memref<1x8x256xf32, #tpu.memory_space<vmem>>, vector<1x8x256xf32>
    %105 = vector.shape_cast %104 : vector<1x8x256xf32> to vector<8x256xf32>
    %106 = vector.shape_cast %103 : vector<8x256xf32> to vector<1x8x256xf32>
    tpu.vector_store %arg12[%c0_72, %c0_73, %c0_74], %106 {strides = array<i32>} : memref<1x8x256xf32, #tpu.memory_space<vmem>>, vector<1x8x256xf32>,
    %c0_75 = arith.constant 0 : index
    %c0_76 = arith.constant 0 : index
    %c0_77 = arith.constant 0 : index
    %107 = vector.load %arg13[%c0_75, %c0_76, %c0_77] : memref<1x8x256xf32, #tpu.memory_space<vmem>>, vector<1x8x256xf32>
    %108 = vector.shape_cast %107 : vector<1x8x256xf32> to vector<8x256xf32>
    %cst_78 = arith.constant 1.000000e+30 : f32
    %109 = vector.broadcast %cst_78 : f32 to vector<8x256xf32>
    %110 = arith.select %82, %70, %109 : vector<8x256xi1>, vector<8x256xf32>
    %111 = arith.minimumf %108, %110 : vector<8x256xf32>
    %c0_79 = arith.constant 0 : index
    %c0_80 = arith.constant 0 : index
    %c0_81 = arith.constant 0 : index
    %112 = vector.load %arg13[%c0_79, %c0_80, %c0_81] : memref<1x8x256xf32, #tpu.memory_space<vmem>>, vector<1x8x256xf32>
    %113 = vector.shape_cast %112 : vector<1x8x256xf32> to vector<8x256xf32>
    %114 = vector.shape_cast %111 : vector<8x256xf32> to vector<1x8x256xf32>
    tpu.vector_store %arg13[%c0_79, %c0_80, %c0_81], %114 {strides = array<i32>} : memref<1x8x256xf32, #tpu.memory_space<vmem>>, vector<1x8x256xf32>,
    %c16 = arith.constant 16 : index
    %c0_82 = arith.constant 0 : index
    %115 = vector.load %arg2[%c16, %c0_82] : memref<256x1xf32, #tpu.memory_space<vmem>>, vector<8x1xf32>
    %c16_83 = arith.constant 16 : index
    %c0_84 = arith.constant 0 : index
    %116 = vector.load %arg3[%c16_83, %c0_84] : memref<256x1xf32, #tpu.memory_space<vmem>>, vector<8x1xf32>
    %117 = vector.broadcast %115 : vector<8x1xf32> to vector<8x256xf32>
    %118 = vector.broadcast %3 : vector<1x256xf32> to vector<8x256xf32>
    %119 = arith.subf %117, %118 : vector<8x256xf32>
    %120 = vector.broadcast %116 : vector<8x1xf32> to vector<8x256xf32>
    %121 = vector.broadcast %4 : vector<1x256xf32> to vector<8x256xf32>
    %122 = arith.subf %120, %121 : vector<8x256xf32>
    %123 = arith.mulf %119, %119 : vector<8x256xf32>
    %124 = arith.mulf %122, %122 : vector<8x256xf32>
    %125 = arith.addf %123, %124 : vector<8x256xf32>
    %c0_85 = arith.constant 0 : index
    %c16_86 = arith.constant 16 : index
    %c0_87 = arith.constant 0 : index
    %126 = vector.load %arg6[%c0_85, %c16_86, %c0_87] : memref<1x256x1xf32, #tpu.memory_space<vmem>>, vector<1x8x1xf32>
    %127 = vector.shape_cast %126 : vector<1x8x1xf32> to vector<8x1xf32>
    %128 = vector.shape_cast %127 : vector<8x1xf32> to vector<8x1xf32>
    %129 = vector.broadcast %128 : vector<8x1xf32> to vector<8x256xf32>
    %cst_88 = arith.constant 5.000000e-01 : f32
    %130 = vector.broadcast %cst_88 : f32 to vector<8x256xf32>
    %131 = arith.cmpf ogt, %129, %130 : vector<8x256xf32>
    %c0_89 = arith.constant 0 : index
    %c16_90 = arith.constant 16 : index
    %c0_91 = arith.constant 0 : index
    %132 = vector.load %arg7[%c0_89, %c16_90, %c0_91] : memref<1x256x1xf32, #tpu.memory_space<vmem>>, vector<1x8x1xf32>
    %133 = vector.shape_cast %132 : vector<1x8x1xf32> to vector<8x1xf32>
    %134 = vector.shape_cast %133 : vector<8x1xf32> to vector<8x1xf32>
    %135 = vector.broadcast %134 : vector<8x1xf32> to vector<8x256xf32>
    %cst_92 = arith.constant 5.000000e-01 : f32
    %136 = vector.broadcast %cst_92 : f32 to vector<8x256xf32>
    %137 = arith.cmpf ogt, %135, %136 : vector<8x256xf32>
    %c0_93 = arith.constant 0 : index
    %c0_94 = arith.constant 0 : index
    %c0_95 = arith.constant 0 : index
    %138 = vector.load %arg10[%c0_93, %c0_94, %c0_95] : memref<1x8x256xf32, #tpu.memory_space<vmem>>, vector<1x8x256xf32>
    %139 = vector.shape_cast %138 : vector<1x8x256xf32> to vector<8x256xf32>
    %cst_96 = arith.constant 1.000000e+30 : f32
    %140 = vector.broadcast %cst_96 : f32 to vector<8x256xf32>
    %141 = arith.select %131, %140, %125 : vector<8x256xi1>, vector<8x256xf32>
    %142 = arith.minimumf %139, %141 : vector<8x256xf32>
    %c0_97 = arith.constant 0 : index
    %c0_98 = arith.constant 0 : index
    %c0_99 = arith.constant 0 : index
    %143 = vector.load %arg10[%c0_97, %c0_98, %c0_99] : memref<1x8x256xf32, #tpu.memory_space<vmem>>, vector<1x8x256xf32>
    %144 = vector.shape_cast %143 : vector<1x8x256xf32> to vector<8x256xf32>
    %145 = vector.shape_cast %142 : vector<8x256xf32> to vector<1x8x256xf32>
    tpu.vector_store %arg10[%c0_97, %c0_98, %c0_99], %145 {strides = array<i32>} : memref<1x8x256xf32, #tpu.memory_space<vmem>>, vector<1x8x256xf32>,
    %c0_100 = arith.constant 0 : index
    %c0_101 = arith.constant 0 : index
    %c0_102 = arith.constant 0 : index
    %146 = vector.load %arg11[%c0_100, %c0_101, %c0_102] : memref<1x8x256xf32, #tpu.memory_space<vmem>>, vector<1x8x256xf32>
    %147 = vector.shape_cast %146 : vector<1x8x256xf32> to vector<8x256xf32>
    %cst_103 = arith.constant 1.000000e+30 : f32
    %148 = vector.broadcast %cst_103 : f32 to vector<8x256xf32>
    %149 = arith.select %131, %125, %148 : vector<8x256xi1>, vector<8x256xf32>
    %150 = arith.minimumf %147, %149 : vector<8x256xf32>
    %c0_104 = arith.constant 0 : index
    %c0_105 = arith.constant 0 : index
    %c0_106 = arith.constant 0 : index
    %151 = vector.load %arg11[%c0_104, %c0_105, %c0_106] : memref<1x8x256xf32, #tpu.memory_space<vmem>>, vector<1x8x256xf32>
    %152 = vector.shape_cast %151 : vector<1x8x256xf32> to vector<8x256xf32>
    %153 = vector.shape_cast %150 : vector<8x256xf32> to vector<1x8x256xf32>
    tpu.vector_store %arg11[%c0_104, %c0_105, %c0_106], %153 {strides = array<i32>} : memref<1x8x256xf32, #tpu.memory_space<vmem>>, vector<1x8x256xf32>,
    %c0_107 = arith.constant 0 : index
    %c0_108 = arith.constant 0 : index
    %c0_109 = arith.constant 0 : index
    %154 = vector.load %arg12[%c0_107, %c0_108, %c0_109] : memref<1x8x256xf32, #tpu.memory_space<vmem>>, vector<1x8x256xf32>
    %155 = vector.shape_cast %154 : vector<1x8x256xf32> to vector<8x256xf32>
    %cst_110 = arith.constant 1.000000e+30 : f32
    %156 = vector.broadcast %cst_110 : f32 to vector<8x256xf32>
    %157 = arith.select %137, %156, %125 : vector<8x256xi1>, vector<8x256xf32>
    %158 = arith.minimumf %155, %157 : vector<8x256xf32>
    %c0_111 = arith.constant 0 : index
    %c0_112 = arith.constant 0 : index
    %c0_113 = arith.constant 0 : index
    %159 = vector.load %arg12[%c0_111, %c0_112, %c0_113] : memref<1x8x256xf32, #tpu.memory_space<vmem>>, vector<1x8x256xf32>
    %160 = vector.shape_cast %159 : vector<1x8x256xf32> to vector<8x256xf32>
    %161 = vector.shape_cast %158 : vector<8x256xf32> to vector<1x8x256xf32>
    tpu.vector_store %arg12[%c0_111, %c0_112, %c0_113], %161 {strides = array<i32>} : memref<1x8x256xf32, #tpu.memory_space<vmem>>, vector<1x8x256xf32>,
    %c0_114 = arith.constant 0 : index
    %c0_115 = arith.constant 0 : index
    %c0_116 = arith.constant 0 : index
    %162 = vector.load %arg13[%c0_114, %c0_115, %c0_116] : memref<1x8x256xf32, #tpu.memory_space<vmem>>, vector<1x8x256xf32>
    %163 = vector.shape_cast %162 : vector<1x8x256xf32> to vector<8x256xf32>
    %cst_117 = arith.constant 1.000000e+30 : f32
    %164 = vector.broadcast %cst_117 : f32 to vector<8x256xf32>
    %165 = arith.select %137, %125, %164 : vector<8x256xi1>, vector<8x256xf32>
    %166 = arith.minimumf %163, %165 : vector<8x256xf32>
    %c0_118 = arith.constant 0 : index
    %c0_119 = arith.constant 0 : index
    %c0_120 = arith.constant 0 : index
    %167 = vector.load %arg13[%c0_118, %c0_119, %c0_120] : memref<1x8x256xf32, #tpu.memory_space<vmem>>, vector<1x8x256xf32>
    %168 = vector.shape_cast %167 : vector<1x8x256xf32> to vector<8x256xf32>
    %169 = vector.shape_cast %166 : vector<8x256xf32> to vector<1x8x256xf32>
    tpu.vector_store %arg13[%c0_118, %c0_119, %c0_120], %169 {strides = array<i32>} : memref<1x8x256xf32, #tpu.memory_space<vmem>>, vector<1x8x256xf32>,
    %c24 = arith.constant 24 : index
    %c0_121 = arith.constant 0 : index
    %170 = vector.load %arg2[%c24, %c0_121] : memref<256x1xf32, #tpu.memory_space<vmem>>, vector<8x1xf32>
    %c24_122 = arith.constant 24 : index
    %c0_123 = arith.constant 0 : index
    %171 = vector.load %arg3[%c24_122, %c0_123] : memref<256x1xf32, #tpu.memory_space<vmem>>, vector<8x1xf32>
    %172 = vector.broadcast %170 : vector<8x1xf32> to vector<8x256xf32>
    %173 = vector.broadcast %3 : vector<1x256xf32> to vector<8x256xf32>
    %174 = arith.subf %172, %173 : vector<8x256xf32>
    %175 = vector.broadcast %171 : vector<8x1xf32> to vector<8x256xf32>
    %176 = vector.broadcast %4 : vector<1x256xf32> to vector<8x256xf32>
    %177 = arith.subf %175, %176 : vector<8x256xf32>
    %178 = arith.mulf %174, %174 : vector<8x256xf32>
    %179 = arith.mulf %177, %177 : vector<8x256xf32>
    %180 = arith.addf %178, %179 : vector<8x256xf32>
    %c0_124 = arith.constant 0 : index
    %c24_125 = arith.constant 24 : index
    %c0_126 = arith.constant 0 : index
    %181 = vector.load %arg6[%c0_124, %c24_125, %c0_126] : memref<1x256x1xf32, #tpu.memory_space<vmem>>, vector<1x8x1xf32>
    %182 = vector.shape_cast %181 : vector<1x8x1xf32> to vector<8x1xf32>
    %183 = vector.shape_cast %182 : vector<8x1xf32> to vector<8x1xf32>
    %184 = vector.broadcast %183 : vector<8x1xf32> to vector<8x256xf32>
    %cst_127 = arith.constant 5.000000e-01 : f32
    %185 = vector.broadcast %cst_127 : f32 to vector<8x256xf32>
    %186 = arith.cmpf ogt, %184, %185 : vector<8x256xf32>
    %c0_128 = arith.constant 0 : index
    %c24_129 = arith.constant 24 : index
    %c0_130 = arith.constant 0 : index
    %187 = vector.load %arg7[%c0_128, %c24_129, %c0_130] : memref<1x256x1xf32, #tpu.memory_space<vmem>>, vector<1x8x1xf32>
    %188 = vector.shape_cast %187 : vector<1x8x1xf32> to vector<8x1xf32>
    %189 = vector.shape_cast %188 : vector<8x1xf32> to vector<8x1xf32>
    %190 = vector.broadcast %189 : vector<8x1xf32> to vector<8x256xf32>
    %cst_131 = arith.constant 5.000000e-01 : f32
    %191 = vector.broadcast %cst_131 : f32 to vector<8x256xf32>
    %192 = arith.cmpf ogt, %190, %191 : vector<8x256xf32>
    %c0_132 = arith.constant 0 : index
    %c0_133 = arith.constant 0 : index
    %c0_134 = arith.constant 0 : index
    %193 = vector.load %arg10[%c0_132, %c0_133, %c0_134] : memref<1x8x256xf32, #tpu.memory_space<vmem>>, vector<1x8x256xf32>
    %194 = vector.shape_cast %193 : vector<1x8x256xf32> to vector<8x256xf32>
    %cst_135 = arith.constant 1.000000e+30 : f32
    %195 = vector.broadcast %cst_135 : f32 to vector<8x256xf32>
    %196 = arith.select %186, %195, %180 : vector<8x256xi1>, vector<8x256xf32>
    %197 = arith.minimumf %194, %196 : vector<8x256xf32>
    %c0_136 = arith.constant 0 : index
    %c0_137 = arith.constant 0 : index
    %c0_138 = arith.constant 0 : index
    %198 = vector.load %arg10[%c0_136, %c0_137, %c0_138] : memref<1x8x256xf32, #tpu.memory_space<vmem>>, vector<1x8x256xf32>
    %199 = vector.shape_cast %198 : vector<1x8x256xf32> to vector<8x256xf32>
    %200 = vector.shape_cast %197 : vector<8x256xf32> to vector<1x8x256xf32>
    tpu.vector_store %arg10[%c0_136, %c0_137, %c0_138], %200 {strides = array<i32>} : memref<1x8x256xf32, #tpu.memory_space<vmem>>, vector<1x8x256xf32>,
    %c0_139 = arith.constant 0 : index
    %c0_140 = arith.constant 0 : index
    %c0_141 = arith.constant 0 : index
    %201 = vector.load %arg11[%c0_139, %c0_140, %c0_141] : memref<1x8x256xf32, #tpu.memory_space<vmem>>, vector<1x8x256xf32>
    %202 = vector.shape_cast %201 : vector<1x8x256xf32> to vector<8x256xf32>
    %cst_142 = arith.constant 1.000000e+30 : f32
    %203 = vector.broadcast %cst_142 : f32 to vector<8x256xf32>
    %204 = arith.select %186, %180, %203 : vector<8x256xi1>, vector<8x256xf32>
    %205 = arith.minimumf %202, %204 : vector<8x256xf32>
    %c0_143 = arith.constant 0 : index
    %c0_144 = arith.constant 0 : index
    %c0_145 = arith.constant 0 : index
    %206 = vector.load %arg11[%c0_143, %c0_144, %c0_145] : memref<1x8x256xf32, #tpu.memory_space<vmem>>, vector<1x8x256xf32>
    %207 = vector.shape_cast %206 : vector<1x8x256xf32> to vector<8x256xf32>
    %208 = vector.shape_cast %205 : vector<8x256xf32> to vector<1x8x256xf32>
    tpu.vector_store %arg11[%c0_143, %c0_144, %c0_145], %208 {strides = array<i32>} : memref<1x8x256xf32, #tpu.memory_space<vmem>>, vector<1x8x256xf32>,
    %c0_146 = arith.constant 0 : index
    %c0_147 = arith.constant 0 : index
    %c0_148 = arith.constant 0 : index
    %209 = vector.load %arg12[%c0_146, %c0_147, %c0_148] : memref<1x8x256xf32, #tpu.memory_space<vmem>>, vector<1x8x256xf32>
    %210 = vector.shape_cast %209 : vector<1x8x256xf32> to vector<8x256xf32>
    %cst_149 = arith.constant 1.000000e+30 : f32
    %211 = vector.broadcast %cst_149 : f32 to vector<8x256xf32>
    %212 = arith.select %192, %211, %180 : vector<8x256xi1>, vector<8x256xf32>
    %213 = arith.minimumf %210, %212 : vector<8x256xf32>
    %c0_150 = arith.constant 0 : index
    %c0_151 = arith.constant 0 : index
    %c0_152 = arith.constant 0 : index
    %214 = vector.load %arg12[%c0_150, %c0_151, %c0_152] : memref<1x8x256xf32, #tpu.memory_space<vmem>>, vector<1x8x256xf32>
    %215 = vector.shape_cast %214 : vector<1x8x256xf32> to vector<8x256xf32>
    %216 = vector.shape_cast %213 : vector<8x256xf32> to vector<1x8x256xf32>
    tpu.vector_store %arg12[%c0_150, %c0_151, %c0_152], %216 {strides = array<i32>} : memref<1x8x256xf32, #tpu.memory_space<vmem>>, vector<1x8x256xf32>,
    %c0_153 = arith.constant 0 : index
    %c0_154 = arith.constant 0 : index
    %c0_155 = arith.constant 0 : index
    %217 = vector.load %arg13[%c0_153, %c0_154, %c0_155] : memref<1x8x256xf32, #tpu.memory_space<vmem>>, vector<1x8x256xf32>
    %218 = vector.shape_cast %217 : vector<1x8x256xf32> to vector<8x256xf32>
    %cst_156 = arith.constant 1.000000e+30 : f32
    %219 = vector.broadcast %cst_156 : f32 to vector<8x256xf32>
    %220 = arith.select %192, %180, %219 : vector<8x256xi1>, vector<8x256xf32>
    %221 = arith.minimumf %218, %220 : vector<8x256xf32>
    %c0_157 = arith.constant 0 : index
    %c0_158 = arith.constant 0 : index
    %c0_159 = arith.constant 0 : index
    %222 = vector.load %arg13[%c0_157, %c0_158, %c0_159] : memref<1x8x256xf32, #tpu.memory_space<vmem>>, vector<1x8x256xf32>
    %223 = vector.shape_cast %222 : vector<1x8x256xf32> to vector<8x256xf32>
    %224 = vector.shape_cast %221 : vector<8x256xf32> to vector<1x8x256xf32>
    tpu.vector_store %arg13[%c0_157, %c0_158, %c0_159], %224 {strides = array<i32>} : memref<1x8x256xf32, #tpu.memory_space<vmem>>, vector<1x8x256xf32>,
    %c32 = arith.constant 32 : index
    %c0_160 = arith.constant 0 : index
    %225 = vector.load %arg2[%c32, %c0_160] : memref<256x1xf32, #tpu.memory_space<vmem>>, vector<8x1xf32>
    %c32_161 = arith.constant 32 : index
    %c0_162 = arith.constant 0 : index
    %226 = vector.load %arg3[%c32_161, %c0_162] : memref<256x1xf32, #tpu.memory_space<vmem>>, vector<8x1xf32>
    %227 = vector.broadcast %225 : vector<8x1xf32> to vector<8x256xf32>
    %228 = vector.broadcast %3 : vector<1x256xf32> to vector<8x256xf32>
    %229 = arith.subf %227, %228 : vector<8x256xf32>
    %230 = vector.broadcast %226 : vector<8x1xf32> to vector<8x256xf32>
    %231 = vector.broadcast %4 : vector<1x256xf32> to vector<8x256xf32>
    %232 = arith.subf %230, %231 : vector<8x256xf32>
    %233 = arith.mulf %229, %229 : vector<8x256xf32>
    %234 = arith.mulf %232, %232 : vector<8x256xf32>
    %235 = arith.addf %233, %234 : vector<8x256xf32>
    %c0_163 = arith.constant 0 : index
    %c32_164 = arith.constant 32 : index
    %c0_165 = arith.constant 0 : index
    %236 = vector.load %arg6[%c0_163, %c32_164, %c0_165] : memref<1x256x1xf32, #tpu.memory_space<vmem>>, vector<1x8x1xf32>
    %237 = vector.shape_cast %236 : vector<1x8x1xf32> to vector<8x1xf32>
    %238 = vector.shape_cast %237 : vector<8x1xf32> to vector<8x1xf32>
    %239 = vector.broadcast %238 : vector<8x1xf32> to vector<8x256xf32>
    %cst_166 = arith.constant 5.000000e-01 : f32
    %240 = vector.broadcast %cst_166 : f32 to vector<8x256xf32>
    %241 = arith.cmpf ogt, %239, %240 : vector<8x256xf32>
    %c0_167 = arith.constant 0 : index
    %c32_168 = arith.constant 32 : index
    %c0_169 = arith.constant 0 : index
    %242 = vector.load %arg7[%c0_167, %c32_168, %c0_169] : memref<1x256x1xf32, #tpu.memory_space<vmem>>, vector<1x8x1xf32>
    %243 = vector.shape_cast %242 : vector<1x8x1xf32> to vector<8x1xf32>
    %244 = vector.shape_cast %243 : vector<8x1xf32> to vector<8x1xf32>
    %245 = vector.broadcast %244 : vector<8x1xf32> to vector<8x256xf32>
    %cst_170 = arith.constant 5.000000e-01 : f32
    %246 = vector.broadcast %cst_170 : f32 to vector<8x256xf32>
    %247 = arith.cmpf ogt, %245, %246 : vector<8x256xf32>
    %c0_171 = arith.constant 0 : index
    %c0_172 = arith.constant 0 : index
    %c0_173 = arith.constant 0 : index
    %248 = vector.load %arg10[%c0_171, %c0_172, %c0_173] : memref<1x8x256xf32, #tpu.memory_space<vmem>>, vector<1x8x256xf32>
    %249 = vector.shape_cast %248 : vector<1x8x256xf32> to vector<8x256xf32>
    %cst_174 = arith.constant 1.000000e+30 : f32
    %250 = vector.broadcast %cst_174 : f32 to vector<8x256xf32>
    %251 = arith.select %241, %250, %235 : vector<8x256xi1>, vector<8x256xf32>
    %252 = arith.minimumf %249, %251 : vector<8x256xf32>
    %c0_175 = arith.constant 0 : index
    %c0_176 = arith.constant 0 : index
    %c0_177 = arith.constant 0 : index
    %253 = vector.load %arg10[%c0_175, %c0_176, %c0_177] : memref<1x8x256xf32, #tpu.memory_space<vmem>>, vector<1x8x256xf32>
    %254 = vector.shape_cast %253 : vector<1x8x256xf32> to vector<8x256xf32>
    %255 = vector.shape_cast %252 : vector<8x256xf32> to vector<1x8x256xf32>
    tpu.vector_store %arg10[%c0_175, %c0_176, %c0_177], %255 {strides = array<i32>} : memref<1x8x256xf32, #tpu.memory_space<vmem>>, vector<1x8x256xf32>,
    %c0_178 = arith.constant 0 : index
    %c0_179 = arith.constant 0 : index
    %c0_180 = arith.constant 0 : index
    %256 = vector.load %arg11[%c0_178, %c0_179, %c0_180] : memref<1x8x256xf32, #tpu.memory_space<vmem>>, vector<1x8x256xf32>
    %257 = vector.shape_cast %256 : vector<1x8x256xf32> to vector<8x256xf32>
    %cst_181 = arith.constant 1.000000e+30 : f32
    %258 = vector.broadcast %cst_181 : f32 to vector<8x256xf32>
    %259 = arith.select %241, %235, %258 : vector<8x256xi1>, vector<8x256xf32>
    %260 = arith.minimumf %257, %259 : vector<8x256xf32>
    %c0_182 = arith.constant 0 : index
    %c0_183 = arith.constant 0 : index
    %c0_184 = arith.constant 0 : index
    %261 = vector.load %arg11[%c0_182, %c0_183, %c0_184] : memref<1x8x256xf32, #tpu.memory_space<vmem>>, vector<1x8x256xf32>
    %262 = vector.shape_cast %261 : vector<1x8x256xf32> to vector<8x256xf32>
    %263 = vector.shape_cast %260 : vector<8x256xf32> to vector<1x8x256xf32>
    tpu.vector_store %arg11[%c0_182, %c0_183, %c0_184], %263 {strides = array<i32>} : memref<1x8x256xf32, #tpu.memory_space<vmem>>, vector<1x8x256xf32>,
    %c0_185 = arith.constant 0 : index
    %c0_186 = arith.constant 0 : index
    %c0_187 = arith.constant 0 : index
    %264 = vector.load %arg12[%c0_185, %c0_186, %c0_187] : memref<1x8x256xf32, #tpu.memory_space<vmem>>, vector<1x8x256xf32>
    %265 = vector.shape_cast %264 : vector<1x8x256xf32> to vector<8x256xf32>
    %cst_188 = arith.constant 1.000000e+30 : f32
    %266 = vector.broadcast %cst_188 : f32 to vector<8x256xf32>
    %267 = arith.select %247, %266, %235 : vector<8x256xi1>, vector<8x256xf32>
    %268 = arith.minimumf %265, %267 : vector<8x256xf32>
    %c0_189 = arith.constant 0 : index
    %c0_190 = arith.constant 0 : index
    %c0_191 = arith.constant 0 : index
    %269 = vector.load %arg12[%c0_189, %c0_190, %c0_191] : memref<1x8x256xf32, #tpu.memory_space<vmem>>, vector<1x8x256xf32>
    %270 = vector.shape_cast %269 : vector<1x8x256xf32> to vector<8x256xf32>
    %271 = vector.shape_cast %268 : vector<8x256xf32> to vector<1x8x256xf32>
    tpu.vector_store %arg12[%c0_189, %c0_190, %c0_191], %271 {strides = array<i32>} : memref<1x8x256xf32, #tpu.memory_space<vmem>>, vector<1x8x256xf32>,
    %c0_192 = arith.constant 0 : index
    %c0_193 = arith.constant 0 : index
    %c0_194 = arith.constant 0 : index
    %272 = vector.load %arg13[%c0_192, %c0_193, %c0_194] : memref<1x8x256xf32, #tpu.memory_space<vmem>>, vector<1x8x256xf32>
    %273 = vector.shape_cast %272 : vector<1x8x256xf32> to vector<8x256xf32>
    %cst_195 = arith.constant 1.000000e+30 : f32
    %274 = vector.broadcast %cst_195 : f32 to vector<8x256xf32>
    %275 = arith.select %247, %235, %274 : vector<8x256xi1>, vector<8x256xf32>
    %276 = arith.minimumf %273, %275 : vector<8x256xf32>
    %c0_196 = arith.constant 0 : index
    %c0_197 = arith.constant 0 : index
    %c0_198 = arith.constant 0 : index
    %277 = vector.load %arg13[%c0_196, %c0_197, %c0_198] : memref<1x8x256xf32, #tpu.memory_space<vmem>>, vector<1x8x256xf32>
    %278 = vector.shape_cast %277 : vector<1x8x256xf32> to vector<8x256xf32>
    %279 = vector.shape_cast %276 : vector<8x256xf32> to vector<1x8x256xf32>
    tpu.vector_store %arg13[%c0_196, %c0_197, %c0_198], %279 {strides = array<i32>} : memref<1x8x256xf32, #tpu.memory_space<vmem>>, vector<1x8x256xf32>,
    %c40 = arith.constant 40 : index
    %c0_199 = arith.constant 0 : index
    %280 = vector.load %arg2[%c40, %c0_199] : memref<256x1xf32, #tpu.memory_space<vmem>>, vector<8x1xf32>
    %c40_200 = arith.constant 40 : index
    %c0_201 = arith.constant 0 : index
    %281 = vector.load %arg3[%c40_200, %c0_201] : memref<256x1xf32, #tpu.memory_space<vmem>>, vector<8x1xf32>
    %282 = vector.broadcast %280 : vector<8x1xf32> to vector<8x256xf32>
    %283 = vector.broadcast %3 : vector<1x256xf32> to vector<8x256xf32>
    %284 = arith.subf %282, %283 : vector<8x256xf32>
    %285 = vector.broadcast %281 : vector<8x1xf32> to vector<8x256xf32>
    %286 = vector.broadcast %4 : vector<1x256xf32> to vector<8x256xf32>
    %287 = arith.subf %285, %286 : vector<8x256xf32>
    %288 = arith.mulf %284, %284 : vector<8x256xf32>
    %289 = arith.mulf %287, %287 : vector<8x256xf32>
    %290 = arith.addf %288, %289 : vector<8x256xf32>
    %c0_202 = arith.constant 0 : index
    %c40_203 = arith.constant 40 : index
    %c0_204 = arith.constant 0 : index
    %291 = vector.load %arg6[%c0_202, %c40_203, %c0_204] : memref<1x256x1xf32, #tpu.memory_space<vmem>>, vector<1x8x1xf32>
    %292 = vector.shape_cast %291 : vector<1x8x1xf32> to vector<8x1xf32>
    %293 = vector.shape_cast %292 : vector<8x1xf32> to vector<8x1xf32>
    %294 = vector.broadcast %293 : vector<8x1xf32> to vector<8x256xf32>
    %cst_205 = arith.constant 5.000000e-01 : f32
    %295 = vector.broadcast %cst_205 : f32 to vector<8x256xf32>
    %296 = arith.cmpf ogt, %294, %295 : vector<8x256xf32>
    %c0_206 = arith.constant 0 : index
    %c40_207 = arith.constant 40 : index
    %c0_208 = arith.constant 0 : index
    %297 = vector.load %arg7[%c0_206, %c40_207, %c0_208] : memref<1x256x1xf32, #tpu.memory_space<vmem>>, vector<1x8x1xf32>
    %298 = vector.shape_cast %297 : vector<1x8x1xf32> to vector<8x1xf32>
    %299 = vector.shape_cast %298 : vector<8x1xf32> to vector<8x1xf32>
    %300 = vector.broadcast %299 : vector<8x1xf32> to vector<8x256xf32>
    %cst_209 = arith.constant 5.000000e-01 : f32
    %301 = vector.broadcast %cst_209 : f32 to vector<8x256xf32>
    %302 = arith.cmpf ogt, %300, %301 : vector<8x256xf32>
    %c0_210 = arith.constant 0 : index
    %c0_211 = arith.constant 0 : index
    %c0_212 = arith.constant 0 : index
    %303 = vector.load %arg10[%c0_210, %c0_211, %c0_212] : memref<1x8x256xf32, #tpu.memory_space<vmem>>, vector<1x8x256xf32>
    %304 = vector.shape_cast %303 : vector<1x8x256xf32> to vector<8x256xf32>
    %cst_213 = arith.constant 1.000000e+30 : f32
    %305 = vector.broadcast %cst_213 : f32 to vector<8x256xf32>
    %306 = arith.select %296, %305, %290 : vector<8x256xi1>, vector<8x256xf32>
    %307 = arith.minimumf %304, %306 : vector<8x256xf32>
    %c0_214 = arith.constant 0 : index
    %c0_215 = arith.constant 0 : index
    %c0_216 = arith.constant 0 : index
    %308 = vector.load %arg10[%c0_214, %c0_215, %c0_216] : memref<1x8x256xf32, #tpu.memory_space<vmem>>, vector<1x8x256xf32>
    %309 = vector.shape_cast %308 : vector<1x8x256xf32> to vector<8x256xf32>
    %310 = vector.shape_cast %307 : vector<8x256xf32> to vector<1x8x256xf32>
    tpu.vector_store %arg10[%c0_214, %c0_215, %c0_216], %310 {strides = array<i32>} : memref<1x8x256xf32, #tpu.memory_space<vmem>>, vector<1x8x256xf32>,
    %c0_217 = arith.constant 0 : index
    %c0_218 = arith.constant 0 : index
    %c0_219 = arith.constant 0 : index
    %311 = vector.load %arg11[%c0_217, %c0_218, %c0_219] : memref<1x8x256xf32, #tpu.memory_space<vmem>>, vector<1x8x256xf32>
    %312 = vector.shape_cast %311 : vector<1x8x256xf32> to vector<8x256xf32>
    %cst_220 = arith.constant 1.000000e+30 : f32
    %313 = vector.broadcast %cst_220 : f32 to vector<8x256xf32>
    %314 = arith.select %296, %290, %313 : vector<8x256xi1>, vector<8x256xf32>
    %315 = arith.minimumf %312, %314 : vector<8x256xf32>
    %c0_221 = arith.constant 0 : index
    %c0_222 = arith.constant 0 : index
    %c0_223 = arith.constant 0 : index
    %316 = vector.load %arg11[%c0_221, %c0_222, %c0_223] : memref<1x8x256xf32, #tpu.memory_space<vmem>>, vector<1x8x256xf32>
    %317 = vector.shape_cast %316 : vector<1x8x256xf32> to vector<8x256xf32>
    %318 = vector.shape_cast %315 : vector<8x256xf32> to vector<1x8x256xf32>
    tpu.vector_store %arg11[%c0_221, %c0_222, %c0_223], %318 {strides = array<i32>} : memref<1x8x256xf32, #tpu.memory_space<vmem>>, vector<1x8x256xf32>,
    %c0_224 = arith.constant 0 : index
    %c0_225 = arith.constant 0 : index
    %c0_226 = arith.constant 0 : index
    %319 = vector.load %arg12[%c0_224, %c0_225, %c0_226] : memref<1x8x256xf32, #tpu.memory_space<vmem>>, vector<1x8x256xf32>
    %320 = vector.shape_cast %319 : vector<1x8x256xf32> to vector<8x256xf32>
    %cst_227 = arith.constant 1.000000e+30 : f32
    %321 = vector.broadcast %cst_227 : f32 to vector<8x256xf32>
    %322 = arith.select %302, %321, %290 : vector<8x256xi1>, vector<8x256xf32>
    %323 = arith.minimumf %320, %322 : vector<8x256xf32>
    %c0_228 = arith.constant 0 : index
    %c0_229 = arith.constant 0 : index
    %c0_230 = arith.constant 0 : index
    %324 = vector.load %arg12[%c0_228, %c0_229, %c0_230] : memref<1x8x256xf32, #tpu.memory_space<vmem>>, vector<1x8x256xf32>
    %325 = vector.shape_cast %324 : vector<1x8x256xf32> to vector<8x256xf32>
    %326 = vector.shape_cast %323 : vector<8x256xf32> to vector<1x8x256xf32>
    tpu.vector_store %arg12[%c0_228, %c0_229, %c0_230], %326 {strides = array<i32>} : memref<1x8x256xf32, #tpu.memory_space<vmem>>, vector<1x8x256xf32>,
    %c0_231 = arith.constant 0 : index
    %c0_232 = arith.constant 0 : index
    %c0_233 = arith.constant 0 : index
    %327 = vector.load %arg13[%c0_231, %c0_232, %c0_233] : memref<1x8x256xf32, #tpu.memory_space<vmem>>, vector<1x8x256xf32>
    %328 = vector.shape_cast %327 : vector<1x8x256xf32> to vector<8x256xf32>
    %cst_234 = arith.constant 1.000000e+30 : f32
    %329 = vector.broadcast %cst_234 : f32 to vector<8x256xf32>
    %330 = arith.select %302, %290, %329 : vector<8x256xi1>, vector<8x256xf32>
    %331 = arith.minimumf %328, %330 : vector<8x256xf32>
    %c0_235 = arith.constant 0 : index
    %c0_236 = arith.constant 0 : index
    %c0_237 = arith.constant 0 : index
    %332 = vector.load %arg13[%c0_235, %c0_236, %c0_237] : memref<1x8x256xf32, #tpu.memory_space<vmem>>, vector<1x8x256xf32>
    %333 = vector.shape_cast %332 : vector<1x8x256xf32> to vector<8x256xf32>
    %334 = vector.shape_cast %331 : vector<8x256xf32> to vector<1x8x256xf32>
    tpu.vector_store %arg13[%c0_235, %c0_236, %c0_237], %334 {strides = array<i32>} : memref<1x8x256xf32, #tpu.memory_space<vmem>>, vector<1x8x256xf32>,
    %c48 = arith.constant 48 : index
    %c0_238 = arith.constant 0 : index
    %335 = vector.load %arg2[%c48, %c0_238] : memref<256x1xf32, #tpu.memory_space<vmem>>, vector<8x1xf32>
    %c48_239 = arith.constant 48 : index
    %c0_240 = arith.constant 0 : index
    %336 = vector.load %arg3[%c48_239, %c0_240] : memref<256x1xf32, #tpu.memory_space<vmem>>, vector<8x1xf32>
    %337 = vector.broadcast %335 : vector<8x1xf32> to vector<8x256xf32>
    %338 = vector.broadcast %3 : vector<1x256xf32> to vector<8x256xf32>
    %339 = arith.subf %337, %338 : vector<8x256xf32>
    %340 = vector.broadcast %336 : vector<8x1xf32> to vector<8x256xf32>
    %341 = vector.broadcast %4 : vector<1x256xf32> to vector<8x256xf32>
    %342 = arith.subf %340, %341 : vector<8x256xf32>
    %343 = arith.mulf %339, %339 : vector<8x256xf32>
    %344 = arith.mulf %342, %342 : vector<8x256xf32>
    %345 = arith.addf %343, %344 : vector<8x256xf32>
    %c0_241 = arith.constant 0 : index
    %c48_242 = arith.constant 48 : index
    %c0_243 = arith.constant 0 : index
    %346 = vector.load %arg6[%c0_241, %c48_242, %c0_243] : memref<1x256x1xf32, #tpu.memory_space<vmem>>, vector<1x8x1xf32>
    %347 = vector.shape_cast %346 : vector<1x8x1xf32> to vector<8x1xf32>
    %348 = vector.shape_cast %347 : vector<8x1xf32> to vector<8x1xf32>
    %349 = vector.broadcast %348 : vector<8x1xf32> to vector<8x256xf32>
    %cst_244 = arith.constant 5.000000e-01 : f32
    %350 = vector.broadcast %cst_244 : f32 to vector<8x256xf32>
    %351 = arith.cmpf ogt, %349, %350 : vector<8x256xf32>
    %c0_245 = arith.constant 0 : index
    %c48_246 = arith.constant 48 : index
    %c0_247 = arith.constant 0 : index
    %352 = vector.load %arg7[%c0_245, %c48_246, %c0_247] : memref<1x256x1xf32, #tpu.memory_space<vmem>>, vector<1x8x1xf32>
    %353 = vector.shape_cast %352 : vector<1x8x1xf32> to vector<8x1xf32>
    %354 = vector.shape_cast %353 : vector<8x1xf32> to vector<8x1xf32>
    %355 = vector.broadcast %354 : vector<8x1xf32> to vector<8x256xf32>
    %cst_248 = arith.constant 5.000000e-01 : f32
    %356 = vector.broadcast %cst_248 : f32 to vector<8x256xf32>
    %357 = arith.cmpf ogt, %355, %356 : vector<8x256xf32>
    %c0_249 = arith.constant 0 : index
    %c0_250 = arith.constant 0 : index
    %c0_251 = arith.constant 0 : index
    %358 = vector.load %arg10[%c0_249, %c0_250, %c0_251] : memref<1x8x256xf32, #tpu.memory_space<vmem>>, vector<1x8x256xf32>
    %359 = vector.shape_cast %358 : vector<1x8x256xf32> to vector<8x256xf32>
    %cst_252 = arith.constant 1.000000e+30 : f32
    %360 = vector.broadcast %cst_252 : f32 to vector<8x256xf32>
    %361 = arith.select %351, %360, %345 : vector<8x256xi1>, vector<8x256xf32>
    %362 = arith.minimumf %359, %361 : vector<8x256xf32>
    %c0_253 = arith.constant 0 : index
    %c0_254 = arith.constant 0 : index
    %c0_255 = arith.constant 0 : index
    %363 = vector.load %arg10[%c0_253, %c0_254, %c0_255] : memref<1x8x256xf32, #tpu.memory_space<vmem>>, vector<1x8x256xf32>
    %364 = vector.shape_cast %363 : vector<1x8x256xf32> to vector<8x256xf32>
    %365 = vector.shape_cast %362 : vector<8x256xf32> to vector<1x8x256xf32>
    tpu.vector_store %arg10[%c0_253, %c0_254, %c0_255], %365 {strides = array<i32>} : memref<1x8x256xf32, #tpu.memory_space<vmem>>, vector<1x8x256xf32>,
    %c0_256 = arith.constant 0 : index
    %c0_257 = arith.constant 0 : index
    %c0_258 = arith.constant 0 : index
    %366 = vector.load %arg11[%c0_256, %c0_257, %c0_258] : memref<1x8x256xf32, #tpu.memory_space<vmem>>, vector<1x8x256xf32>
    %367 = vector.shape_cast %366 : vector<1x8x256xf32> to vector<8x256xf32>
    %cst_259 = arith.constant 1.000000e+30 : f32
    %368 = vector.broadcast %cst_259 : f32 to vector<8x256xf32>
    %369 = arith.select %351, %345, %368 : vector<8x256xi1>, vector<8x256xf32>
    %370 = arith.minimumf %367, %369 : vector<8x256xf32>
    %c0_260 = arith.constant 0 : index
    %c0_261 = arith.constant 0 : index
    %c0_262 = arith.constant 0 : index
    %371 = vector.load %arg11[%c0_260, %c0_261, %c0_262] : memref<1x8x256xf32, #tpu.memory_space<vmem>>, vector<1x8x256xf32>
    %372 = vector.shape_cast %371 : vector<1x8x256xf32> to vector<8x256xf32>
    %373 = vector.shape_cast %370 : vector<8x256xf32> to vector<1x8x256xf32>
    tpu.vector_store %arg11[%c0_260, %c0_261, %c0_262], %373 {strides = array<i32>} : memref<1x8x256xf32, #tpu.memory_space<vmem>>, vector<1x8x256xf32>,
    %c0_263 = arith.constant 0 : index
    %c0_264 = arith.constant 0 : index
    %c0_265 = arith.constant 0 : index
    %374 = vector.load %arg12[%c0_263, %c0_264, %c0_265] : memref<1x8x256xf32, #tpu.memory_space<vmem>>, vector<1x8x256xf32>
    %375 = vector.shape_cast %374 : vector<1x8x256xf32> to vector<8x256xf32>
    %cst_266 = arith.constant 1.000000e+30 : f32
    %376 = vector.broadcast %cst_266 : f32 to vector<8x256xf32>
    %377 = arith.select %357, %376, %345 : vector<8x256xi1>, vector<8x256xf32>
    %378 = arith.minimumf %375, %377 : vector<8x256xf32>
    %c0_267 = arith.constant 0 : index
    %c0_268 = arith.constant 0 : index
    %c0_269 = arith.constant 0 : index
    %379 = vector.load %arg12[%c0_267, %c0_268, %c0_269] : memref<1x8x256xf32, #tpu.memory_space<vmem>>, vector<1x8x256xf32>
    %380 = vector.shape_cast %379 : vector<1x8x256xf32> to vector<8x256xf32>
    %381 = vector.shape_cast %378 : vector<8x256xf32> to vector<1x8x256xf32>
    tpu.vector_store %arg12[%c0_267, %c0_268, %c0_269], %381 {strides = array<i32>} : memref<1x8x256xf32, #tpu.memory_space<vmem>>, vector<1x8x256xf32>,
    %c0_270 = arith.constant 0 : index
    %c0_271 = arith.constant 0 : index
    %c0_272 = arith.constant 0 : index
    %382 = vector.load %arg13[%c0_270, %c0_271, %c0_272] : memref<1x8x256xf32, #tpu.memory_space<vmem>>, vector<1x8x256xf32>
    %383 = vector.shape_cast %382 : vector<1x8x256xf32> to vector<8x256xf32>
    %cst_273 = arith.constant 1.000000e+30 : f32
    %384 = vector.broadcast %cst_273 : f32 to vector<8x256xf32>
    %385 = arith.select %357, %345, %384 : vector<8x256xi1>, vector<8x256xf32>
    %386 = arith.minimumf %383, %385 : vector<8x256xf32>
    %c0_274 = arith.constant 0 : index
    %c0_275 = arith.constant 0 : index
    %c0_276 = arith.constant 0 : index
    %387 = vector.load %arg13[%c0_274, %c0_275, %c0_276] : memref<1x8x256xf32, #tpu.memory_space<vmem>>, vector<1x8x256xf32>
    %388 = vector.shape_cast %387 : vector<1x8x256xf32> to vector<8x256xf32>
    %389 = vector.shape_cast %386 : vector<8x256xf32> to vector<1x8x256xf32>
    tpu.vector_store %arg13[%c0_274, %c0_275, %c0_276], %389 {strides = array<i32>} : memref<1x8x256xf32, #tpu.memory_space<vmem>>, vector<1x8x256xf32>,
    %c56 = arith.constant 56 : index
    %c0_277 = arith.constant 0 : index
    %390 = vector.load %arg2[%c56, %c0_277] : memref<256x1xf32, #tpu.memory_space<vmem>>, vector<8x1xf32>
    %c56_278 = arith.constant 56 : index
    %c0_279 = arith.constant 0 : index
    %391 = vector.load %arg3[%c56_278, %c0_279] : memref<256x1xf32, #tpu.memory_space<vmem>>, vector<8x1xf32>
    %392 = vector.broadcast %390 : vector<8x1xf32> to vector<8x256xf32>
    %393 = vector.broadcast %3 : vector<1x256xf32> to vector<8x256xf32>
    %394 = arith.subf %392, %393 : vector<8x256xf32>
    %395 = vector.broadcast %391 : vector<8x1xf32> to vector<8x256xf32>
    %396 = vector.broadcast %4 : vector<1x256xf32> to vector<8x256xf32>
    %397 = arith.subf %395, %396 : vector<8x256xf32>
    %398 = arith.mulf %394, %394 : vector<8x256xf32>
    %399 = arith.mulf %397, %397 : vector<8x256xf32>
    %400 = arith.addf %398, %399 : vector<8x256xf32>
    %c0_280 = arith.constant 0 : index
    %c56_281 = arith.constant 56 : index
    %c0_282 = arith.constant 0 : index
    %401 = vector.load %arg6[%c0_280, %c56_281, %c0_282] : memref<1x256x1xf32, #tpu.memory_space<vmem>>, vector<1x8x1xf32>
    %402 = vector.shape_cast %401 : vector<1x8x1xf32> to vector<8x1xf32>
    %403 = vector.shape_cast %402 : vector<8x1xf32> to vector<8x1xf32>
    %404 = vector.broadcast %403 : vector<8x1xf32> to vector<8x256xf32>
    %cst_283 = arith.constant 5.000000e-01 : f32
    %405 = vector.broadcast %cst_283 : f32 to vector<8x256xf32>
    %406 = arith.cmpf ogt, %404, %405 : vector<8x256xf32>
    %c0_284 = arith.constant 0 : index
    %c56_285 = arith.constant 56 : index
    %c0_286 = arith.constant 0 : index
    %407 = vector.load %arg7[%c0_284, %c56_285, %c0_286] : memref<1x256x1xf32, #tpu.memory_space<vmem>>, vector<1x8x1xf32>
    %408 = vector.shape_cast %407 : vector<1x8x1xf32> to vector<8x1xf32>
    %409 = vector.shape_cast %408 : vector<8x1xf32> to vector<8x1xf32>
    %410 = vector.broadcast %409 : vector<8x1xf32> to vector<8x256xf32>
    %cst_287 = arith.constant 5.000000e-01 : f32
    %411 = vector.broadcast %cst_287 : f32 to vector<8x256xf32>
    %412 = arith.cmpf ogt, %410, %411 : vector<8x256xf32>
    %c0_288 = arith.constant 0 : index
    %c0_289 = arith.constant 0 : index
    %c0_290 = arith.constant 0 : index
    %413 = vector.load %arg10[%c0_288, %c0_289, %c0_290] : memref<1x8x256xf32, #tpu.memory_space<vmem>>, vector<1x8x256xf32>
    %414 = vector.shape_cast %413 : vector<1x8x256xf32> to vector<8x256xf32>
    %cst_291 = arith.constant 1.000000e+30 : f32
    %415 = vector.broadcast %cst_291 : f32 to vector<8x256xf32>
    %416 = arith.select %406, %415, %400 : vector<8x256xi1>, vector<8x256xf32>
    %417 = arith.minimumf %414, %416 : vector<8x256xf32>
    %c0_292 = arith.constant 0 : index
    %c0_293 = arith.constant 0 : index
    %c0_294 = arith.constant 0 : index
    %418 = vector.load %arg10[%c0_292, %c0_293, %c0_294] : memref<1x8x256xf32, #tpu.memory_space<vmem>>, vector<1x8x256xf32>
    %419 = vector.shape_cast %418 : vector<1x8x256xf32> to vector<8x256xf32>
    %420 = vector.shape_cast %417 : vector<8x256xf32> to vector<1x8x256xf32>
    tpu.vector_store %arg10[%c0_292, %c0_293, %c0_294], %420 {strides = array<i32>} : memref<1x8x256xf32, #tpu.memory_space<vmem>>, vector<1x8x256xf32>,
    %c0_295 = arith.constant 0 : index
    %c0_296 = arith.constant 0 : index
    %c0_297 = arith.constant 0 : index
    %421 = vector.load %arg11[%c0_295, %c0_296, %c0_297] : memref<1x8x256xf32, #tpu.memory_space<vmem>>, vector<1x8x256xf32>
    %422 = vector.shape_cast %421 : vector<1x8x256xf32> to vector<8x256xf32>
    %cst_298 = arith.constant 1.000000e+30 : f32
    %423 = vector.broadcast %cst_298 : f32 to vector<8x256xf32>
    %424 = arith.select %406, %400, %423 : vector<8x256xi1>, vector<8x256xf32>
    %425 = arith.minimumf %422, %424 : vector<8x256xf32>
    %c0_299 = arith.constant 0 : index
    %c0_300 = arith.constant 0 : index
    %c0_301 = arith.constant 0 : index
    %426 = vector.load %arg11[%c0_299, %c0_300, %c0_301] : memref<1x8x256xf32, #tpu.memory_space<vmem>>, vector<1x8x256xf32>
    %427 = vector.shape_cast %426 : vector<1x8x256xf32> to vector<8x256xf32>
    %428 = vector.shape_cast %425 : vector<8x256xf32> to vector<1x8x256xf32>
    tpu.vector_store %arg11[%c0_299, %c0_300, %c0_301], %428 {strides = array<i32>} : memref<1x8x256xf32, #tpu.memory_space<vmem>>, vector<1x8x256xf32>,
    %c0_302 = arith.constant 0 : index
    %c0_303 = arith.constant 0 : index
    %c0_304 = arith.constant 0 : index
    %429 = vector.load %arg12[%c0_302, %c0_303, %c0_304] : memref<1x8x256xf32, #tpu.memory_space<vmem>>, vector<1x8x256xf32>
    %430 = vector.shape_cast %429 : vector<1x8x256xf32> to vector<8x256xf32>
    %cst_305 = arith.constant 1.000000e+30 : f32
    %431 = vector.broadcast %cst_305 : f32 to vector<8x256xf32>
    %432 = arith.select %412, %431, %400 : vector<8x256xi1>, vector<8x256xf32>
    %433 = arith.minimumf %430, %432 : vector<8x256xf32>
    %c0_306 = arith.constant 0 : index
    %c0_307 = arith.constant 0 : index
    %c0_308 = arith.constant 0 : index
    %434 = vector.load %arg12[%c0_306, %c0_307, %c0_308] : memref<1x8x256xf32, #tpu.memory_space<vmem>>, vector<1x8x256xf32>
    %435 = vector.shape_cast %434 : vector<1x8x256xf32> to vector<8x256xf32>
    %436 = vector.shape_cast %433 : vector<8x256xf32> to vector<1x8x256xf32>
    tpu.vector_store %arg12[%c0_306, %c0_307, %c0_308], %436 {strides = array<i32>} : memref<1x8x256xf32, #tpu.memory_space<vmem>>, vector<1x8x256xf32>,
    %c0_309 = arith.constant 0 : index
    %c0_310 = arith.constant 0 : index
    %c0_311 = arith.constant 0 : index
    %437 = vector.load %arg13[%c0_309, %c0_310, %c0_311] : memref<1x8x256xf32, #tpu.memory_space<vmem>>, vector<1x8x256xf32>
    %438 = vector.shape_cast %437 : vector<1x8x256xf32> to vector<8x256xf32>
    %cst_312 = arith.constant 1.000000e+30 : f32
    %439 = vector.broadcast %cst_312 : f32 to vector<8x256xf32>
    %440 = arith.select %412, %400, %439 : vector<8x256xi1>, vector<8x256xf32>
    %441 = arith.minimumf %438, %440 : vector<8x256xf32>
    %c0_313 = arith.constant 0 : index
    %c0_314 = arith.constant 0 : index
    %c0_315 = arith.constant 0 : index
    %442 = vector.load %arg13[%c0_313, %c0_314, %c0_315] : memref<1x8x256xf32, #tpu.memory_space<vmem>>, vector<1x8x256xf32>
    %443 = vector.shape_cast %442 : vector<1x8x256xf32> to vector<8x256xf32>
    %444 = vector.shape_cast %441 : vector<8x256xf32> to vector<1x8x256xf32>
    tpu.vector_store %arg13[%c0_313, %c0_314, %c0_315], %444 {strides = array<i32>} : memref<1x8x256xf32, #tpu.memory_space<vmem>>, vector<1x8x256xf32>,
    %c64 = arith.constant 64 : index
    %c0_316 = arith.constant 0 : index
    %445 = vector.load %arg2[%c64, %c0_316] : memref<256x1xf32, #tpu.memory_space<vmem>>, vector<8x1xf32>
    %c64_317 = arith.constant 64 : index
    %c0_318 = arith.constant 0 : index
    %446 = vector.load %arg3[%c64_317, %c0_318] : memref<256x1xf32, #tpu.memory_space<vmem>>, vector<8x1xf32>
    %447 = vector.broadcast %445 : vector<8x1xf32> to vector<8x256xf32>
    %448 = vector.broadcast %3 : vector<1x256xf32> to vector<8x256xf32>
    %449 = arith.subf %447, %448 : vector<8x256xf32>
    %450 = vector.broadcast %446 : vector<8x1xf32> to vector<8x256xf32>
    %451 = vector.broadcast %4 : vector<1x256xf32> to vector<8x256xf32>
    %452 = arith.subf %450, %451 : vector<8x256xf32>
    %453 = arith.mulf %449, %449 : vector<8x256xf32>
    %454 = arith.mulf %452, %452 : vector<8x256xf32>
    %455 = arith.addf %453, %454 : vector<8x256xf32>
    %c0_319 = arith.constant 0 : index
    %c64_320 = arith.constant 64 : index
    %c0_321 = arith.constant 0 : index
    %456 = vector.load %arg6[%c0_319, %c64_320, %c0_321] : memref<1x256x1xf32, #tpu.memory_space<vmem>>, vector<1x8x1xf32>
    %457 = vector.shape_cast %456 : vector<1x8x1xf32> to vector<8x1xf32>
    %458 = vector.shape_cast %457 : vector<8x1xf32> to vector<8x1xf32>
    %459 = vector.broadcast %458 : vector<8x1xf32> to vector<8x256xf32>
    %cst_322 = arith.constant 5.000000e-01 : f32
    %460 = vector.broadcast %cst_322 : f32 to vector<8x256xf32>
    %461 = arith.cmpf ogt, %459, %460 : vector<8x256xf32>
    %c0_323 = arith.constant 0 : index
    %c64_324 = arith.constant 64 : index
    %c0_325 = arith.constant 0 : index
    %462 = vector.load %arg7[%c0_323, %c64_324, %c0_325] : memref<1x256x1xf32, #tpu.memory_space<vmem>>, vector<1x8x1xf32>
    %463 = vector.shape_cast %462 : vector<1x8x1xf32> to vector<8x1xf32>
    %464 = vector.shape_cast %463 : vector<8x1xf32> to vector<8x1xf32>
    %465 = vector.broadcast %464 : vector<8x1xf32> to vector<8x256xf32>
    %cst_326 = arith.constant 5.000000e-01 : f32
    %466 = vector.broadcast %cst_326 : f32 to vector<8x256xf32>
    %467 = arith.cmpf ogt, %465, %466 : vector<8x256xf32>
    %c0_327 = arith.constant 0 : index
    %c0_328 = arith.constant 0 : index
    %c0_329 = arith.constant 0 : index
    %468 = vector.load %arg10[%c0_327, %c0_328, %c0_329] : memref<1x8x256xf32, #tpu.memory_space<vmem>>, vector<1x8x256xf32>
    %469 = vector.shape_cast %468 : vector<1x8x256xf32> to vector<8x256xf32>
    %cst_330 = arith.constant 1.000000e+30 : f32
    %470 = vector.broadcast %cst_330 : f32 to vector<8x256xf32>
    %471 = arith.select %461, %470, %455 : vector<8x256xi1>, vector<8x256xf32>
    %472 = arith.minimumf %469, %471 : vector<8x256xf32>
    %c0_331 = arith.constant 0 : index
    %c0_332 = arith.constant 0 : index
    %c0_333 = arith.constant 0 : index
    %473 = vector.load %arg10[%c0_331, %c0_332, %c0_333] : memref<1x8x256xf32, #tpu.memory_space<vmem>>, vector<1x8x256xf32>
    %474 = vector.shape_cast %473 : vector<1x8x256xf32> to vector<8x256xf32>
    %475 = vector.shape_cast %472 : vector<8x256xf32> to vector<1x8x256xf32>
    tpu.vector_store %arg10[%c0_331, %c0_332, %c0_333], %475 {strides = array<i32>} : memref<1x8x256xf32, #tpu.memory_space<vmem>>, vector<1x8x256xf32>,
    %c0_334 = arith.constant 0 : index
    %c0_335 = arith.constant 0 : index
    %c0_336 = arith.constant 0 : index
    %476 = vector.load %arg11[%c0_334, %c0_335, %c0_336] : memref<1x8x256xf32, #tpu.memory_space<vmem>>, vector<1x8x256xf32>
    %477 = vector.shape_cast %476 : vector<1x8x256xf32> to vector<8x256xf32>
    %cst_337 = arith.constant 1.000000e+30 : f32
    %478 = vector.broadcast %cst_337 : f32 to vector<8x256xf32>
    %479 = arith.select %461, %455, %478 : vector<8x256xi1>, vector<8x256xf32>
    %480 = arith.minimumf %477, %479 : vector<8x256xf32>
    %c0_338 = arith.constant 0 : index
    %c0_339 = arith.constant 0 : index
    %c0_340 = arith.constant 0 : index
    %481 = vector.load %arg11[%c0_338, %c0_339, %c0_340] : memref<1x8x256xf32, #tpu.memory_space<vmem>>, vector<1x8x256xf32>
    %482 = vector.shape_cast %481 : vector<1x8x256xf32> to vector<8x256xf32>
    %483 = vector.shape_cast %480 : vector<8x256xf32> to vector<1x8x256xf32>
    tpu.vector_store %arg11[%c0_338, %c0_339, %c0_340], %483 {strides = array<i32>} : memref<1x8x256xf32, #tpu.memory_space<vmem>>, vector<1x8x256xf32>,
    %c0_341 = arith.constant 0 : index
    %c0_342 = arith.constant 0 : index
    %c0_343 = arith.constant 0 : index
    %484 = vector.load %arg12[%c0_341, %c0_342, %c0_343] : memref<1x8x256xf32, #tpu.memory_space<vmem>>, vector<1x8x256xf32>
    %485 = vector.shape_cast %484 : vector<1x8x256xf32> to vector<8x256xf32>
    %cst_344 = arith.constant 1.000000e+30 : f32
    %486 = vector.broadcast %cst_344 : f32 to vector<8x256xf32>
    %487 = arith.select %467, %486, %455 : vector<8x256xi1>, vector<8x256xf32>
    %488 = arith.minimumf %485, %487 : vector<8x256xf32>
    %c0_345 = arith.constant 0 : index
    %c0_346 = arith.constant 0 : index
    %c0_347 = arith.constant 0 : index
    %489 = vector.load %arg12[%c0_345, %c0_346, %c0_347] : memref<1x8x256xf32, #tpu.memory_space<vmem>>, vector<1x8x256xf32>
    %490 = vector.shape_cast %489 : vector<1x8x256xf32> to vector<8x256xf32>
    %491 = vector.shape_cast %488 : vector<8x256xf32> to vector<1x8x256xf32>
    tpu.vector_store %arg12[%c0_345, %c0_346, %c0_347], %491 {strides = array<i32>} : memref<1x8x256xf32, #tpu.memory_space<vmem>>, vector<1x8x256xf32>,
    %c0_348 = arith.constant 0 : index
    %c0_349 = arith.constant 0 : index
    %c0_350 = arith.constant 0 : index
    %492 = vector.load %arg13[%c0_348, %c0_349, %c0_350] : memref<1x8x256xf32, #tpu.memory_space<vmem>>, vector<1x8x256xf32>
    %493 = vector.shape_cast %492 : vector<1x8x256xf32> to vector<8x256xf32>
    %cst_351 = arith.constant 1.000000e+30 : f32
    %494 = vector.broadcast %cst_351 : f32 to vector<8x256xf32>
    %495 = arith.select %467, %455, %494 : vector<8x256xi1>, vector<8x256xf32>
    %496 = arith.minimumf %493, %495 : vector<8x256xf32>
    %c0_352 = arith.constant 0 : index
    %c0_353 = arith.constant 0 : index
    %c0_354 = arith.constant 0 : index
    %497 = vector.load %arg13[%c0_352, %c0_353, %c0_354] : memref<1x8x256xf32, #tpu.memory_space<vmem>>, vector<1x8x256xf32>
    %498 = vector.shape_cast %497 : vector<1x8x256xf32> to vector<8x256xf32>
    %499 = vector.shape_cast %496 : vector<8x256xf32> to vector<1x8x256xf32>
    tpu.vector_store %arg13[%c0_352, %c0_353, %c0_354], %499 {strides = array<i32>} : memref<1x8x256xf32, #tpu.memory_space<vmem>>, vector<1x8x256xf32>,
    %c72 = arith.constant 72 : index
    %c0_355 = arith.constant 0 : index
    %500 = vector.load %arg2[%c72, %c0_355] : memref<256x1xf32, #tpu.memory_space<vmem>>, vector<8x1xf32>
    %c72_356 = arith.constant 72 : index
    %c0_357 = arith.constant 0 : index
    %501 = vector.load %arg3[%c72_356, %c0_357] : memref<256x1xf32, #tpu.memory_space<vmem>>, vector<8x1xf32>
    %502 = vector.broadcast %500 : vector<8x1xf32> to vector<8x256xf32>
    %503 = vector.broadcast %3 : vector<1x256xf32> to vector<8x256xf32>
    %504 = arith.subf %502, %503 : vector<8x256xf32>
    %505 = vector.broadcast %501 : vector<8x1xf32> to vector<8x256xf32>
    %506 = vector.broadcast %4 : vector<1x256xf32> to vector<8x256xf32>
    %507 = arith.subf %505, %506 : vector<8x256xf32>
    %508 = arith.mulf %504, %504 : vector<8x256xf32>
    %509 = arith.mulf %507, %507 : vector<8x256xf32>
    %510 = arith.addf %508, %509 : vector<8x256xf32>
    %c0_358 = arith.constant 0 : index
    %c72_359 = arith.constant 72 : index
    %c0_360 = arith.constant 0 : index
    %511 = vector.load %arg6[%c0_358, %c72_359, %c0_360] : memref<1x256x1xf32, #tpu.memory_space<vmem>>, vector<1x8x1xf32>
    %512 = vector.shape_cast %511 : vector<1x8x1xf32> to vector<8x1xf32>
    %513 = vector.shape_cast %512 : vector<8x1xf32> to vector<8x1xf32>
    %514 = vector.broadcast %513 : vector<8x1xf32> to vector<8x256xf32>
    %cst_361 = arith.constant 5.000000e-01 : f32
    %515 = vector.broadcast %cst_361 : f32 to vector<8x256xf32>
    %516 = arith.cmpf ogt, %514, %515 : vector<8x256xf32>
    %c0_362 = arith.constant 0 : index
    %c72_363 = arith.constant 72 : index
    %c0_364 = arith.constant 0 : index
    %517 = vector.load %arg7[%c0_362, %c72_363, %c0_364] : memref<1x256x1xf32, #tpu.memory_space<vmem>>, vector<1x8x1xf32>
    %518 = vector.shape_cast %517 : vector<1x8x1xf32> to vector<8x1xf32>
    %519 = vector.shape_cast %518 : vector<8x1xf32> to vector<8x1xf32>
    %520 = vector.broadcast %519 : vector<8x1xf32> to vector<8x256xf32>
    %cst_365 = arith.constant 5.000000e-01 : f32
    %521 = vector.broadcast %cst_365 : f32 to vector<8x256xf32>
    %522 = arith.cmpf ogt, %520, %521 : vector<8x256xf32>
    %c0_366 = arith.constant 0 : index
    %c0_367 = arith.constant 0 : index
    %c0_368 = arith.constant 0 : index
    %523 = vector.load %arg10[%c0_366, %c0_367, %c0_368] : memref<1x8x256xf32, #tpu.memory_space<vmem>>, vector<1x8x256xf32>
    %524 = vector.shape_cast %523 : vector<1x8x256xf32> to vector<8x256xf32>
    %cst_369 = arith.constant 1.000000e+30 : f32
    %525 = vector.broadcast %cst_369 : f32 to vector<8x256xf32>
    %526 = arith.select %516, %525, %510 : vector<8x256xi1>, vector<8x256xf32>
    %527 = arith.minimumf %524, %526 : vector<8x256xf32>
    %c0_370 = arith.constant 0 : index
    %c0_371 = arith.constant 0 : index
    %c0_372 = arith.constant 0 : index
    %528 = vector.load %arg10[%c0_370, %c0_371, %c0_372] : memref<1x8x256xf32, #tpu.memory_space<vmem>>, vector<1x8x256xf32>
    %529 = vector.shape_cast %528 : vector<1x8x256xf32> to vector<8x256xf32>
    %530 = vector.shape_cast %527 : vector<8x256xf32> to vector<1x8x256xf32>
    tpu.vector_store %arg10[%c0_370, %c0_371, %c0_372], %530 {strides = array<i32>} : memref<1x8x256xf32, #tpu.memory_space<vmem>>, vector<1x8x256xf32>,
    %c0_373 = arith.constant 0 : index
    %c0_374 = arith.constant 0 : index
    %c0_375 = arith.constant 0 : index
    %531 = vector.load %arg11[%c0_373, %c0_374, %c0_375] : memref<1x8x256xf32, #tpu.memory_space<vmem>>, vector<1x8x256xf32>
    %532 = vector.shape_cast %531 : vector<1x8x256xf32> to vector<8x256xf32>
    %cst_376 = arith.constant 1.000000e+30 : f32
    %533 = vector.broadcast %cst_376 : f32 to vector<8x256xf32>
    %534 = arith.select %516, %510, %533 : vector<8x256xi1>, vector<8x256xf32>
    %535 = arith.minimumf %532, %534 : vector<8x256xf32>
    %c0_377 = arith.constant 0 : index
    %c0_378 = arith.constant 0 : index
    %c0_379 = arith.constant 0 : index
    %536 = vector.load %arg11[%c0_377, %c0_378, %c0_379] : memref<1x8x256xf32, #tpu.memory_space<vmem>>, vector<1x8x256xf32>
    %537 = vector.shape_cast %536 : vector<1x8x256xf32> to vector<8x256xf32>
    %538 = vector.shape_cast %535 : vector<8x256xf32> to vector<1x8x256xf32>
    tpu.vector_store %arg11[%c0_377, %c0_378, %c0_379], %538 {strides = array<i32>} : memref<1x8x256xf32, #tpu.memory_space<vmem>>, vector<1x8x256xf32>,
    %c0_380 = arith.constant 0 : index
    %c0_381 = arith.constant 0 : index
    %c0_382 = arith.constant 0 : index
    %539 = vector.load %arg12[%c0_380, %c0_381, %c0_382] : memref<1x8x256xf32, #tpu.memory_space<vmem>>, vector<1x8x256xf32>
    %540 = vector.shape_cast %539 : vector<1x8x256xf32> to vector<8x256xf32>
    %cst_383 = arith.constant 1.000000e+30 : f32
    %541 = vector.broadcast %cst_383 : f32 to vector<8x256xf32>
    %542 = arith.select %522, %541, %510 : vector<8x256xi1>, vector<8x256xf32>
    %543 = arith.minimumf %540, %542 : vector<8x256xf32>
    %c0_384 = arith.constant 0 : index
    %c0_385 = arith.constant 0 : index
    %c0_386 = arith.constant 0 : index
    %544 = vector.load %arg12[%c0_384, %c0_385, %c0_386] : memref<1x8x256xf32, #tpu.memory_space<vmem>>, vector<1x8x256xf32>
    %545 = vector.shape_cast %544 : vector<1x8x256xf32> to vector<8x256xf32>
    %546 = vector.shape_cast %543 : vector<8x256xf32> to vector<1x8x256xf32>
    tpu.vector_store %arg12[%c0_384, %c0_385, %c0_386], %546 {strides = array<i32>} : memref<1x8x256xf32, #tpu.memory_space<vmem>>, vector<1x8x256xf32>,
    %c0_387 = arith.constant 0 : index
    %c0_388 = arith.constant 0 : index
    %c0_389 = arith.constant 0 : index
    %547 = vector.load %arg13[%c0_387, %c0_388, %c0_389] : memref<1x8x256xf32, #tpu.memory_space<vmem>>, vector<1x8x256xf32>
    %548 = vector.shape_cast %547 : vector<1x8x256xf32> to vector<8x256xf32>
    %cst_390 = arith.constant 1.000000e+30 : f32
    %549 = vector.broadcast %cst_390 : f32 to vector<8x256xf32>
    %550 = arith.select %522, %510, %549 : vector<8x256xi1>, vector<8x256xf32>
    %551 = arith.minimumf %548, %550 : vector<8x256xf32>
    %c0_391 = arith.constant 0 : index
    %c0_392 = arith.constant 0 : index
    %c0_393 = arith.constant 0 : index
    %552 = vector.load %arg13[%c0_391, %c0_392, %c0_393] : memref<1x8x256xf32, #tpu.memory_space<vmem>>, vector<1x8x256xf32>
    %553 = vector.shape_cast %552 : vector<1x8x256xf32> to vector<8x256xf32>
    %554 = vector.shape_cast %551 : vector<8x256xf32> to vector<1x8x256xf32>
    tpu.vector_store %arg13[%c0_391, %c0_392, %c0_393], %554 {strides = array<i32>} : memref<1x8x256xf32, #tpu.memory_space<vmem>>, vector<1x8x256xf32>,
    %c80 = arith.constant 80 : index
    %c0_394 = arith.constant 0 : index
    %555 = vector.load %arg2[%c80, %c0_394] : memref<256x1xf32, #tpu.memory_space<vmem>>, vector<8x1xf32>
    %c80_395 = arith.constant 80 : index
    %c0_396 = arith.constant 0 : index
    %556 = vector.load %arg3[%c80_395, %c0_396] : memref<256x1xf32, #tpu.memory_space<vmem>>, vector<8x1xf32>
    %557 = vector.broadcast %555 : vector<8x1xf32> to vector<8x256xf32>
    %558 = vector.broadcast %3 : vector<1x256xf32> to vector<8x256xf32>
    %559 = arith.subf %557, %558 : vector<8x256xf32>
    %560 = vector.broadcast %556 : vector<8x1xf32> to vector<8x256xf32>
    %561 = vector.broadcast %4 : vector<1x256xf32> to vector<8x256xf32>
    %562 = arith.subf %560, %561 : vector<8x256xf32>
    %563 = arith.mulf %559, %559 : vector<8x256xf32>
    %564 = arith.mulf %562, %562 : vector<8x256xf32>
    %565 = arith.addf %563, %564 : vector<8x256xf32>
    %c0_397 = arith.constant 0 : index
    %c80_398 = arith.constant 80 : index
    %c0_399 = arith.constant 0 : index
    %566 = vector.load %arg6[%c0_397, %c80_398, %c0_399] : memref<1x256x1xf32, #tpu.memory_space<vmem>>, vector<1x8x1xf32>
    %567 = vector.shape_cast %566 : vector<1x8x1xf32> to vector<8x1xf32>
    %568 = vector.shape_cast %567 : vector<8x1xf32> to vector<8x1xf32>
    %569 = vector.broadcast %568 : vector<8x1xf32> to vector<8x256xf32>
    %cst_400 = arith.constant 5.000000e-01 : f32
    %570 = vector.broadcast %cst_400 : f32 to vector<8x256xf32>
    %571 = arith.cmpf ogt, %569, %570 : vector<8x256xf32>
    %c0_401 = arith.constant 0 : index
    %c80_402 = arith.constant 80 : index
    %c0_403 = arith.constant 0 : index
    %572 = vector.load %arg7[%c0_401, %c80_402, %c0_403] : memref<1x256x1xf32, #tpu.memory_space<vmem>>, vector<1x8x1xf32>
    %573 = vector.shape_cast %572 : vector<1x8x1xf32> to vector<8x1xf32>
    %574 = vector.shape_cast %573 : vector<8x1xf32> to vector<8x1xf32>
    %575 = vector.broadcast %574 : vector<8x1xf32> to vector<8x256xf32>
    %cst_404 = arith.constant 5.000000e-01 : f32
    %576 = vector.broadcast %cst_404 : f32 to vector<8x256xf32>
    %577 = arith.cmpf ogt, %575, %576 : vector<8x256xf32>
    %c0_405 = arith.constant 0 : index
    %c0_406 = arith.constant 0 : index
    %c0_407 = arith.constant 0 : index
    %578 = vector.load %arg10[%c0_405, %c0_406, %c0_407] : memref<1x8x256xf32, #tpu.memory_space<vmem>>, vector<1x8x256xf32>
    %579 = vector.shape_cast %578 : vector<1x8x256xf32> to vector<8x256xf32>
    %cst_408 = arith.constant 1.000000e+30 : f32
    %580 = vector.broadcast %cst_408 : f32 to vector<8x256xf32>
    %581 = arith.select %571, %580, %565 : vector<8x256xi1>, vector<8x256xf32>
    %582 = arith.minimumf %579, %581 : vector<8x256xf32>
    %c0_409 = arith.constant 0 : index
    %c0_410 = arith.constant 0 : index
    %c0_411 = arith.constant 0 : index
    %583 = vector.load %arg10[%c0_409, %c0_410, %c0_411] : memref<1x8x256xf32, #tpu.memory_space<vmem>>, vector<1x8x256xf32>
    %584 = vector.shape_cast %583 : vector<1x8x256xf32> to vector<8x256xf32>
    %585 = vector.shape_cast %582 : vector<8x256xf32> to vector<1x8x256xf32>
    tpu.vector_store %arg10[%c0_409, %c0_410, %c0_411], %585 {strides = array<i32>} : memref<1x8x256xf32, #tpu.memory_space<vmem>>, vector<1x8x256xf32>,
    %c0_412 = arith.constant 0 : index
    %c0_413 = arith.constant 0 : index
    %c0_414 = arith.constant 0 : index
    %586 = vector.load %arg11[%c0_412, %c0_413, %c0_414] : memref<1x8x256xf32, #tpu.memory_space<vmem>>, vector<1x8x256xf32>
    %587 = vector.shape_cast %586 : vector<1x8x256xf32> to vector<8x256xf32>
    %cst_415 = arith.constant 1.000000e+30 : f32
    %588 = vector.broadcast %cst_415 : f32 to vector<8x256xf32>
    %589 = arith.select %571, %565, %588 : vector<8x256xi1>, vector<8x256xf32>
    %590 = arith.minimumf %587, %589 : vector<8x256xf32>
    %c0_416 = arith.constant 0 : index
    %c0_417 = arith.constant 0 : index
    %c0_418 = arith.constant 0 : index
    %591 = vector.load %arg11[%c0_416, %c0_417, %c0_418] : memref<1x8x256xf32, #tpu.memory_space<vmem>>, vector<1x8x256xf32>
    %592 = vector.shape_cast %591 : vector<1x8x256xf32> to vector<8x256xf32>
    %593 = vector.shape_cast %590 : vector<8x256xf32> to vector<1x8x256xf32>
    tpu.vector_store %arg11[%c0_416, %c0_417, %c0_418], %593 {strides = array<i32>} : memref<1x8x256xf32, #tpu.memory_space<vmem>>, vector<1x8x256xf32>,
    %c0_419 = arith.constant 0 : index
    %c0_420 = arith.constant 0 : index
    %c0_421 = arith.constant 0 : index
    %594 = vector.load %arg12[%c0_419, %c0_420, %c0_421] : memref<1x8x256xf32, #tpu.memory_space<vmem>>, vector<1x8x256xf32>
    %595 = vector.shape_cast %594 : vector<1x8x256xf32> to vector<8x256xf32>
    %cst_422 = arith.constant 1.000000e+30 : f32
    %596 = vector.broadcast %cst_422 : f32 to vector<8x256xf32>
    %597 = arith.select %577, %596, %565 : vector<8x256xi1>, vector<8x256xf32>
    %598 = arith.minimumf %595, %597 : vector<8x256xf32>
    %c0_423 = arith.constant 0 : index
    %c0_424 = arith.constant 0 : index
    %c0_425 = arith.constant 0 : index
    %599 = vector.load %arg12[%c0_423, %c0_424, %c0_425] : memref<1x8x256xf32, #tpu.memory_space<vmem>>, vector<1x8x256xf32>
    %600 = vector.shape_cast %599 : vector<1x8x256xf32> to vector<8x256xf32>
    %601 = vector.shape_cast %598 : vector<8x256xf32> to vector<1x8x256xf32>
    tpu.vector_store %arg12[%c0_423, %c0_424, %c0_425], %601 {strides = array<i32>} : memref<1x8x256xf32, #tpu.memory_space<vmem>>, vector<1x8x256xf32>,
    %c0_426 = arith.constant 0 : index
    %c0_427 = arith.constant 0 : index
    %c0_428 = arith.constant 0 : index
    %602 = vector.load %arg13[%c0_426, %c0_427, %c0_428] : memref<1x8x256xf32, #tpu.memory_space<vmem>>, vector<1x8x256xf32>
    %603 = vector.shape_cast %602 : vector<1x8x256xf32> to vector<8x256xf32>
    %cst_429 = arith.constant 1.000000e+30 : f32
    %604 = vector.broadcast %cst_429 : f32 to vector<8x256xf32>
    %605 = arith.select %577, %565, %604 : vector<8x256xi1>, vector<8x256xf32>
    %606 = arith.minimumf %603, %605 : vector<8x256xf32>
    %c0_430 = arith.constant 0 : index
    %c0_431 = arith.constant 0 : index
    %c0_432 = arith.constant 0 : index
    %607 = vector.load %arg13[%c0_430, %c0_431, %c0_432] : memref<1x8x256xf32, #tpu.memory_space<vmem>>, vector<1x8x256xf32>
    %608 = vector.shape_cast %607 : vector<1x8x256xf32> to vector<8x256xf32>
    %609 = vector.shape_cast %606 : vector<8x256xf32> to vector<1x8x256xf32>
    tpu.vector_store %arg13[%c0_430, %c0_431, %c0_432], %609 {strides = array<i32>} : memref<1x8x256xf32, #tpu.memory_space<vmem>>, vector<1x8x256xf32>,
    %c88 = arith.constant 88 : index
    %c0_433 = arith.constant 0 : index
    %610 = vector.load %arg2[%c88, %c0_433] : memref<256x1xf32, #tpu.memory_space<vmem>>, vector<8x1xf32>
    %c88_434 = arith.constant 88 : index
    %c0_435 = arith.constant 0 : index
    %611 = vector.load %arg3[%c88_434, %c0_435] : memref<256x1xf32, #tpu.memory_space<vmem>>, vector<8x1xf32>
    %612 = vector.broadcast %610 : vector<8x1xf32> to vector<8x256xf32>
    %613 = vector.broadcast %3 : vector<1x256xf32> to vector<8x256xf32>
    %614 = arith.subf %612, %613 : vector<8x256xf32>
    %615 = vector.broadcast %611 : vector<8x1xf32> to vector<8x256xf32>
    %616 = vector.broadcast %4 : vector<1x256xf32> to vector<8x256xf32>
    %617 = arith.subf %615, %616 : vector<8x256xf32>
    %618 = arith.mulf %614, %614 : vector<8x256xf32>
    %619 = arith.mulf %617, %617 : vector<8x256xf32>
    %620 = arith.addf %618, %619 : vector<8x256xf32>
    %c0_436 = arith.constant 0 : index
    %c88_437 = arith.constant 88 : index
    %c0_438 = arith.constant 0 : index
    %621 = vector.load %arg6[%c0_436, %c88_437, %c0_438] : memref<1x256x1xf32, #tpu.memory_space<vmem>>, vector<1x8x1xf32>
    %622 = vector.shape_cast %621 : vector<1x8x1xf32> to vector<8x1xf32>
    %623 = vector.shape_cast %622 : vector<8x1xf32> to vector<8x1xf32>
    %624 = vector.broadcast %623 : vector<8x1xf32> to vector<8x256xf32>
    %cst_439 = arith.constant 5.000000e-01 : f32
    %625 = vector.broadcast %cst_439 : f32 to vector<8x256xf32>
    %626 = arith.cmpf ogt, %624, %625 : vector<8x256xf32>
    %c0_440 = arith.constant 0 : index
    %c88_441 = arith.constant 88 : index
    %c0_442 = arith.constant 0 : index
    %627 = vector.load %arg7[%c0_440, %c88_441, %c0_442] : memref<1x256x1xf32, #tpu.memory_space<vmem>>, vector<1x8x1xf32>
    %628 = vector.shape_cast %627 : vector<1x8x1xf32> to vector<8x1xf32>
    %629 = vector.shape_cast %628 : vector<8x1xf32> to vector<8x1xf32>
    %630 = vector.broadcast %629 : vector<8x1xf32> to vector<8x256xf32>
    %cst_443 = arith.constant 5.000000e-01 : f32
    %631 = vector.broadcast %cst_443 : f32 to vector<8x256xf32>
    %632 = arith.cmpf ogt, %630, %631 : vector<8x256xf32>
    %c0_444 = arith.constant 0 : index
    %c0_445 = arith.constant 0 : index
    %c0_446 = arith.constant 0 : index
    %633 = vector.load %arg10[%c0_444, %c0_445, %c0_446] : memref<1x8x256xf32, #tpu.memory_space<vmem>>, vector<1x8x256xf32>
    %634 = vector.shape_cast %633 : vector<1x8x256xf32> to vector<8x256xf32>
    %cst_447 = arith.constant 1.000000e+30 : f32
    %635 = vector.broadcast %cst_447 : f32 to vector<8x256xf32>
    %636 = arith.select %626, %635, %620 : vector<8x256xi1>, vector<8x256xf32>
    %637 = arith.minimumf %634, %636 : vector<8x256xf32>
    %c0_448 = arith.constant 0 : index
    %c0_449 = arith.constant 0 : index
    %c0_450 = arith.constant 0 : index
    %638 = vector.load %arg10[%c0_448, %c0_449, %c0_450] : memref<1x8x256xf32, #tpu.memory_space<vmem>>, vector<1x8x256xf32>
    %639 = vector.shape_cast %638 : vector<1x8x256xf32> to vector<8x256xf32>
    %640 = vector.shape_cast %637 : vector<8x256xf32> to vector<1x8x256xf32>
    tpu.vector_store %arg10[%c0_448, %c0_449, %c0_450], %640 {strides = array<i32>} : memref<1x8x256xf32, #tpu.memory_space<vmem>>, vector<1x8x256xf32>,
    %c0_451 = arith.constant 0 : index
    %c0_452 = arith.constant 0 : index
    %c0_453 = arith.constant 0 : index
    %641 = vector.load %arg11[%c0_451, %c0_452, %c0_453] : memref<1x8x256xf32, #tpu.memory_space<vmem>>, vector<1x8x256xf32>
    %642 = vector.shape_cast %641 : vector<1x8x256xf32> to vector<8x256xf32>
    %cst_454 = arith.constant 1.000000e+30 : f32
    %643 = vector.broadcast %cst_454 : f32 to vector<8x256xf32>
    %644 = arith.select %626, %620, %643 : vector<8x256xi1>, vector<8x256xf32>
    %645 = arith.minimumf %642, %644 : vector<8x256xf32>
    %c0_455 = arith.constant 0 : index
    %c0_456 = arith.constant 0 : index
    %c0_457 = arith.constant 0 : index
    %646 = vector.load %arg11[%c0_455, %c0_456, %c0_457] : memref<1x8x256xf32, #tpu.memory_space<vmem>>, vector<1x8x256xf32>
    %647 = vector.shape_cast %646 : vector<1x8x256xf32> to vector<8x256xf32>
    %648 = vector.shape_cast %645 : vector<8x256xf32> to vector<1x8x256xf32>
    tpu.vector_store %arg11[%c0_455, %c0_456, %c0_457], %648 {strides = array<i32>} : memref<1x8x256xf32, #tpu.memory_space<vmem>>, vector<1x8x256xf32>,
    %c0_458 = arith.constant 0 : index
    %c0_459 = arith.constant 0 : index
    %c0_460 = arith.constant 0 : index
    %649 = vector.load %arg12[%c0_458, %c0_459, %c0_460] : memref<1x8x256xf32, #tpu.memory_space<vmem>>, vector<1x8x256xf32>
    %650 = vector.shape_cast %649 : vector<1x8x256xf32> to vector<8x256xf32>
    %cst_461 = arith.constant 1.000000e+30 : f32
    %651 = vector.broadcast %cst_461 : f32 to vector<8x256xf32>
    %652 = arith.select %632, %651, %620 : vector<8x256xi1>, vector<8x256xf32>
    %653 = arith.minimumf %650, %652 : vector<8x256xf32>
    %c0_462 = arith.constant 0 : index
    %c0_463 = arith.constant 0 : index
    %c0_464 = arith.constant 0 : index
    %654 = vector.load %arg12[%c0_462, %c0_463, %c0_464] : memref<1x8x256xf32, #tpu.memory_space<vmem>>, vector<1x8x256xf32>
    %655 = vector.shape_cast %654 : vector<1x8x256xf32> to vector<8x256xf32>
    %656 = vector.shape_cast %653 : vector<8x256xf32> to vector<1x8x256xf32>
    tpu.vector_store %arg12[%c0_462, %c0_463, %c0_464], %656 {strides = array<i32>} : memref<1x8x256xf32, #tpu.memory_space<vmem>>, vector<1x8x256xf32>,
    %c0_465 = arith.constant 0 : index
    %c0_466 = arith.constant 0 : index
    %c0_467 = arith.constant 0 : index
    %657 = vector.load %arg13[%c0_465, %c0_466, %c0_467] : memref<1x8x256xf32, #tpu.memory_space<vmem>>, vector<1x8x256xf32>
    %658 = vector.shape_cast %657 : vector<1x8x256xf32> to vector<8x256xf32>
    %cst_468 = arith.constant 1.000000e+30 : f32
    %659 = vector.broadcast %cst_468 : f32 to vector<8x256xf32>
    %660 = arith.select %632, %620, %659 : vector<8x256xi1>, vector<8x256xf32>
    %661 = arith.minimumf %658, %660 : vector<8x256xf32>
    %c0_469 = arith.constant 0 : index
    %c0_470 = arith.constant 0 : index
    %c0_471 = arith.constant 0 : index
    %662 = vector.load %arg13[%c0_469, %c0_470, %c0_471] : memref<1x8x256xf32, #tpu.memory_space<vmem>>, vector<1x8x256xf32>
    %663 = vector.shape_cast %662 : vector<1x8x256xf32> to vector<8x256xf32>
    %664 = vector.shape_cast %661 : vector<8x256xf32> to vector<1x8x256xf32>
    tpu.vector_store %arg13[%c0_469, %c0_470, %c0_471], %664 {strides = array<i32>} : memref<1x8x256xf32, #tpu.memory_space<vmem>>, vector<1x8x256xf32>,
    %c96 = arith.constant 96 : index
    %c0_472 = arith.constant 0 : index
    %665 = vector.load %arg2[%c96, %c0_472] : memref<256x1xf32, #tpu.memory_space<vmem>>, vector<8x1xf32>
    %c96_473 = arith.constant 96 : index
    %c0_474 = arith.constant 0 : index
    %666 = vector.load %arg3[%c96_473, %c0_474] : memref<256x1xf32, #tpu.memory_space<vmem>>, vector<8x1xf32>
    %667 = vector.broadcast %665 : vector<8x1xf32> to vector<8x256xf32>
    %668 = vector.broadcast %3 : vector<1x256xf32> to vector<8x256xf32>
    %669 = arith.subf %667, %668 : vector<8x256xf32>
    %670 = vector.broadcast %666 : vector<8x1xf32> to vector<8x256xf32>
    %671 = vector.broadcast %4 : vector<1x256xf32> to vector<8x256xf32>
    %672 = arith.subf %670, %671 : vector<8x256xf32>
    %673 = arith.mulf %669, %669 : vector<8x256xf32>
    %674 = arith.mulf %672, %672 : vector<8x256xf32>
    %675 = arith.addf %673, %674 : vector<8x256xf32>
    %c0_475 = arith.constant 0 : index
    %c96_476 = arith.constant 96 : index
    %c0_477 = arith.constant 0 : index
    %676 = vector.load %arg6[%c0_475, %c96_476, %c0_477] : memref<1x256x1xf32, #tpu.memory_space<vmem>>, vector<1x8x1xf32>
    %677 = vector.shape_cast %676 : vector<1x8x1xf32> to vector<8x1xf32>
    %678 = vector.shape_cast %677 : vector<8x1xf32> to vector<8x1xf32>
    %679 = vector.broadcast %678 : vector<8x1xf32> to vector<8x256xf32>
    %cst_478 = arith.constant 5.000000e-01 : f32
    %680 = vector.broadcast %cst_478 : f32 to vector<8x256xf32>
    %681 = arith.cmpf ogt, %679, %680 : vector<8x256xf32>
    %c0_479 = arith.constant 0 : index
    %c96_480 = arith.constant 96 : index
    %c0_481 = arith.constant 0 : index
    %682 = vector.load %arg7[%c0_479, %c96_480, %c0_481] : memref<1x256x1xf32, #tpu.memory_space<vmem>>, vector<1x8x1xf32>
    %683 = vector.shape_cast %682 : vector<1x8x1xf32> to vector<8x1xf32>
    %684 = vector.shape_cast %683 : vector<8x1xf32> to vector<8x1xf32>
    %685 = vector.broadcast %684 : vector<8x1xf32> to vector<8x256xf32>
    %cst_482 = arith.constant 5.000000e-01 : f32
    %686 = vector.broadcast %cst_482 : f32 to vector<8x256xf32>
    %687 = arith.cmpf ogt, %685, %686 : vector<8x256xf32>
    %c0_483 = arith.constant 0 : index
    %c0_484 = arith.constant 0 : index
    %c0_485 = arith.constant 0 : index
    %688 = vector.load %arg10[%c0_483, %c0_484, %c0_485] : memref<1x8x256xf32, #tpu.memory_space<vmem>>, vector<1x8x256xf32>
    %689 = vector.shape_cast %688 : vector<1x8x256xf32> to vector<8x256xf32>
    %cst_486 = arith.constant 1.000000e+30 : f32
    %690 = vector.broadcast %cst_486 : f32 to vector<8x256xf32>
    %691 = arith.select %681, %690, %675 : vector<8x256xi1>, vector<8x256xf32>
    %692 = arith.minimumf %689, %691 : vector<8x256xf32>
    %c0_487 = arith.constant 0 : index
    %c0_488 = arith.constant 0 : index
    %c0_489 = arith.constant 0 : index
    %693 = vector.load %arg10[%c0_487, %c0_488, %c0_489] : memref<1x8x256xf32, #tpu.memory_space<vmem>>, vector<1x8x256xf32>
    %694 = vector.shape_cast %693 : vector<1x8x256xf32> to vector<8x256xf32>
    %695 = vector.shape_cast %692 : vector<8x256xf32> to vector<1x8x256xf32>
    tpu.vector_store %arg10[%c0_487, %c0_488, %c0_489], %695 {strides = array<i32>} : memref<1x8x256xf32, #tpu.memory_space<vmem>>, vector<1x8x256xf32>,
    %c0_490 = arith.constant 0 : index
    %c0_491 = arith.constant 0 : index
    %c0_492 = arith.constant 0 : index
    %696 = vector.load %arg11[%c0_490, %c0_491, %c0_492] : memref<1x8x256xf32, #tpu.memory_space<vmem>>, vector<1x8x256xf32>
    %697 = vector.shape_cast %696 : vector<1x8x256xf32> to vector<8x256xf32>
    %cst_493 = arith.constant 1.000000e+30 : f32
    %698 = vector.broadcast %cst_493 : f32 to vector<8x256xf32>
    %699 = arith.select %681, %675, %698 : vector<8x256xi1>, vector<8x256xf32>
    %700 = arith.minimumf %697, %699 : vector<8x256xf32>
    %c0_494 = arith.constant 0 : index
    %c0_495 = arith.constant 0 : index
    %c0_496 = arith.constant 0 : index
    %701 = vector.load %arg11[%c0_494, %c0_495, %c0_496] : memref<1x8x256xf32, #tpu.memory_space<vmem>>, vector<1x8x256xf32>
    %702 = vector.shape_cast %701 : vector<1x8x256xf32> to vector<8x256xf32>
    %703 = vector.shape_cast %700 : vector<8x256xf32> to vector<1x8x256xf32>
    tpu.vector_store %arg11[%c0_494, %c0_495, %c0_496], %703 {strides = array<i32>} : memref<1x8x256xf32, #tpu.memory_space<vmem>>, vector<1x8x256xf32>,
    %c0_497 = arith.constant 0 : index
    %c0_498 = arith.constant 0 : index
    %c0_499 = arith.constant 0 : index
    %704 = vector.load %arg12[%c0_497, %c0_498, %c0_499] : memref<1x8x256xf32, #tpu.memory_space<vmem>>, vector<1x8x256xf32>
    %705 = vector.shape_cast %704 : vector<1x8x256xf32> to vector<8x256xf32>
    %cst_500 = arith.constant 1.000000e+30 : f32
    %706 = vector.broadcast %cst_500 : f32 to vector<8x256xf32>
    %707 = arith.select %687, %706, %675 : vector<8x256xi1>, vector<8x256xf32>
    %708 = arith.minimumf %705, %707 : vector<8x256xf32>
    %c0_501 = arith.constant 0 : index
    %c0_502 = arith.constant 0 : index
    %c0_503 = arith.constant 0 : index
    %709 = vector.load %arg12[%c0_501, %c0_502, %c0_503] : memref<1x8x256xf32, #tpu.memory_space<vmem>>, vector<1x8x256xf32>
    %710 = vector.shape_cast %709 : vector<1x8x256xf32> to vector<8x256xf32>
    %711 = vector.shape_cast %708 : vector<8x256xf32> to vector<1x8x256xf32>
    tpu.vector_store %arg12[%c0_501, %c0_502, %c0_503], %711 {strides = array<i32>} : memref<1x8x256xf32, #tpu.memory_space<vmem>>, vector<1x8x256xf32>,
    %c0_504 = arith.constant 0 : index
    %c0_505 = arith.constant 0 : index
    %c0_506 = arith.constant 0 : index
    %712 = vector.load %arg13[%c0_504, %c0_505, %c0_506] : memref<1x8x256xf32, #tpu.memory_space<vmem>>, vector<1x8x256xf32>
    %713 = vector.shape_cast %712 : vector<1x8x256xf32> to vector<8x256xf32>
    %cst_507 = arith.constant 1.000000e+30 : f32
    %714 = vector.broadcast %cst_507 : f32 to vector<8x256xf32>
    %715 = arith.select %687, %675, %714 : vector<8x256xi1>, vector<8x256xf32>
    %716 = arith.minimumf %713, %715 : vector<8x256xf32>
    %c0_508 = arith.constant 0 : index
    %c0_509 = arith.constant 0 : index
    %c0_510 = arith.constant 0 : index
    %717 = vector.load %arg13[%c0_508, %c0_509, %c0_510] : memref<1x8x256xf32, #tpu.memory_space<vmem>>, vector<1x8x256xf32>
    %718 = vector.shape_cast %717 : vector<1x8x256xf32> to vector<8x256xf32>
    %719 = vector.shape_cast %716 : vector<8x256xf32> to vector<1x8x256xf32>
    tpu.vector_store %arg13[%c0_508, %c0_509, %c0_510], %719 {strides = array<i32>} : memref<1x8x256xf32, #tpu.memory_space<vmem>>, vector<1x8x256xf32>,
    %c104 = arith.constant 104 : index
    %c0_511 = arith.constant 0 : index
    %720 = vector.load %arg2[%c104, %c0_511] : memref<256x1xf32, #tpu.memory_space<vmem>>, vector<8x1xf32>
    %c104_512 = arith.constant 104 : index
    %c0_513 = arith.constant 0 : index
    %721 = vector.load %arg3[%c104_512, %c0_513] : memref<256x1xf32, #tpu.memory_space<vmem>>, vector<8x1xf32>
    %722 = vector.broadcast %720 : vector<8x1xf32> to vector<8x256xf32>
    %723 = vector.broadcast %3 : vector<1x256xf32> to vector<8x256xf32>
    %724 = arith.subf %722, %723 : vector<8x256xf32>
    %725 = vector.broadcast %721 : vector<8x1xf32> to vector<8x256xf32>
    %726 = vector.broadcast %4 : vector<1x256xf32> to vector<8x256xf32>
    %727 = arith.subf %725, %726 : vector<8x256xf32>
    %728 = arith.mulf %724, %724 : vector<8x256xf32>
    %729 = arith.mulf %727, %727 : vector<8x256xf32>
    %730 = arith.addf %728, %729 : vector<8x256xf32>
    %c0_514 = arith.constant 0 : index
    %c104_515 = arith.constant 104 : index
    %c0_516 = arith.constant 0 : index
    %731 = vector.load %arg6[%c0_514, %c104_515, %c0_516] : memref<1x256x1xf32, #tpu.memory_space<vmem>>, vector<1x8x1xf32>
    %732 = vector.shape_cast %731 : vector<1x8x1xf32> to vector<8x1xf32>
    %733 = vector.shape_cast %732 : vector<8x1xf32> to vector<8x1xf32>
    %734 = vector.broadcast %733 : vector<8x1xf32> to vector<8x256xf32>
    %cst_517 = arith.constant 5.000000e-01 : f32
    %735 = vector.broadcast %cst_517 : f32 to vector<8x256xf32>
    %736 = arith.cmpf ogt, %734, %735 : vector<8x256xf32>
    %c0_518 = arith.constant 0 : index
    %c104_519 = arith.constant 104 : index
    %c0_520 = arith.constant 0 : index
    %737 = vector.load %arg7[%c0_518, %c104_519, %c0_520] : memref<1x256x1xf32, #tpu.memory_space<vmem>>, vector<1x8x1xf32>
    %738 = vector.shape_cast %737 : vector<1x8x1xf32> to vector<8x1xf32>
    %739 = vector.shape_cast %738 : vector<8x1xf32> to vector<8x1xf32>
    %740 = vector.broadcast %739 : vector<8x1xf32> to vector<8x256xf32>
    %cst_521 = arith.constant 5.000000e-01 : f32
    %741 = vector.broadcast %cst_521 : f32 to vector<8x256xf32>
    %742 = arith.cmpf ogt, %740, %741 : vector<8x256xf32>
    %c0_522 = arith.constant 0 : index
    %c0_523 = arith.constant 0 : index
    %c0_524 = arith.constant 0 : index
    %743 = vector.load %arg10[%c0_522, %c0_523, %c0_524] : memref<1x8x256xf32, #tpu.memory_space<vmem>>, vector<1x8x256xf32>
    %744 = vector.shape_cast %743 : vector<1x8x256xf32> to vector<8x256xf32>
    %cst_525 = arith.constant 1.000000e+30 : f32
    %745 = vector.broadcast %cst_525 : f32 to vector<8x256xf32>
    %746 = arith.select %736, %745, %730 : vector<8x256xi1>, vector<8x256xf32>
    %747 = arith.minimumf %744, %746 : vector<8x256xf32>
    %c0_526 = arith.constant 0 : index
    %c0_527 = arith.constant 0 : index
    %c0_528 = arith.constant 0 : index
    %748 = vector.load %arg10[%c0_526, %c0_527, %c0_528] : memref<1x8x256xf32, #tpu.memory_space<vmem>>, vector<1x8x256xf32>
    %749 = vector.shape_cast %748 : vector<1x8x256xf32> to vector<8x256xf32>
    %750 = vector.shape_cast %747 : vector<8x256xf32> to vector<1x8x256xf32>
    tpu.vector_store %arg10[%c0_526, %c0_527, %c0_528], %750 {strides = array<i32>} : memref<1x8x256xf32, #tpu.memory_space<vmem>>, vector<1x8x256xf32>,
    %c0_529 = arith.constant 0 : index
    %c0_530 = arith.constant 0 : index
    %c0_531 = arith.constant 0 : index
    %751 = vector.load %arg11[%c0_529, %c0_530, %c0_531] : memref<1x8x256xf32, #tpu.memory_space<vmem>>, vector<1x8x256xf32>
    %752 = vector.shape_cast %751 : vector<1x8x256xf32> to vector<8x256xf32>
    %cst_532 = arith.constant 1.000000e+30 : f32
    %753 = vector.broadcast %cst_532 : f32 to vector<8x256xf32>
    %754 = arith.select %736, %730, %753 : vector<8x256xi1>, vector<8x256xf32>
    %755 = arith.minimumf %752, %754 : vector<8x256xf32>
    %c0_533 = arith.constant 0 : index
    %c0_534 = arith.constant 0 : index
    %c0_535 = arith.constant 0 : index
    %756 = vector.load %arg11[%c0_533, %c0_534, %c0_535] : memref<1x8x256xf32, #tpu.memory_space<vmem>>, vector<1x8x256xf32>
    %757 = vector.shape_cast %756 : vector<1x8x256xf32> to vector<8x256xf32>
    %758 = vector.shape_cast %755 : vector<8x256xf32> to vector<1x8x256xf32>
    tpu.vector_store %arg11[%c0_533, %c0_534, %c0_535], %758 {strides = array<i32>} : memref<1x8x256xf32, #tpu.memory_space<vmem>>, vector<1x8x256xf32>,
    %c0_536 = arith.constant 0 : index
    %c0_537 = arith.constant 0 : index
    %c0_538 = arith.constant 0 : index
    %759 = vector.load %arg12[%c0_536, %c0_537, %c0_538] : memref<1x8x256xf32, #tpu.memory_space<vmem>>, vector<1x8x256xf32>
    %760 = vector.shape_cast %759 : vector<1x8x256xf32> to vector<8x256xf32>
    %cst_539 = arith.constant 1.000000e+30 : f32
    %761 = vector.broadcast %cst_539 : f32 to vector<8x256xf32>
    %762 = arith.select %742, %761, %730 : vector<8x256xi1>, vector<8x256xf32>
    %763 = arith.minimumf %760, %762 : vector<8x256xf32>
    %c0_540 = arith.constant 0 : index
    %c0_541 = arith.constant 0 : index
    %c0_542 = arith.constant 0 : index
    %764 = vector.load %arg12[%c0_540, %c0_541, %c0_542] : memref<1x8x256xf32, #tpu.memory_space<vmem>>, vector<1x8x256xf32>
    %765 = vector.shape_cast %764 : vector<1x8x256xf32> to vector<8x256xf32>
    %766 = vector.shape_cast %763 : vector<8x256xf32> to vector<1x8x256xf32>
    tpu.vector_store %arg12[%c0_540, %c0_541, %c0_542], %766 {strides = array<i32>} : memref<1x8x256xf32, #tpu.memory_space<vmem>>, vector<1x8x256xf32>,
    %c0_543 = arith.constant 0 : index
    %c0_544 = arith.constant 0 : index
    %c0_545 = arith.constant 0 : index
    %767 = vector.load %arg13[%c0_543, %c0_544, %c0_545] : memref<1x8x256xf32, #tpu.memory_space<vmem>>, vector<1x8x256xf32>
    %768 = vector.shape_cast %767 : vector<1x8x256xf32> to vector<8x256xf32>
    %cst_546 = arith.constant 1.000000e+30 : f32
    %769 = vector.broadcast %cst_546 : f32 to vector<8x256xf32>
    %770 = arith.select %742, %730, %769 : vector<8x256xi1>, vector<8x256xf32>
    %771 = arith.minimumf %768, %770 : vector<8x256xf32>
    %c0_547 = arith.constant 0 : index
    %c0_548 = arith.constant 0 : index
    %c0_549 = arith.constant 0 : index
    %772 = vector.load %arg13[%c0_547, %c0_548, %c0_549] : memref<1x8x256xf32, #tpu.memory_space<vmem>>, vector<1x8x256xf32>
    %773 = vector.shape_cast %772 : vector<1x8x256xf32> to vector<8x256xf32>
    %774 = vector.shape_cast %771 : vector<8x256xf32> to vector<1x8x256xf32>
    tpu.vector_store %arg13[%c0_547, %c0_548, %c0_549], %774 {strides = array<i32>} : memref<1x8x256xf32, #tpu.memory_space<vmem>>, vector<1x8x256xf32>,
    %c112 = arith.constant 112 : index
    %c0_550 = arith.constant 0 : index
    %775 = vector.load %arg2[%c112, %c0_550] : memref<256x1xf32, #tpu.memory_space<vmem>>, vector<8x1xf32>
    %c112_551 = arith.constant 112 : index
    %c0_552 = arith.constant 0 : index
    %776 = vector.load %arg3[%c112_551, %c0_552] : memref<256x1xf32, #tpu.memory_space<vmem>>, vector<8x1xf32>
    %777 = vector.broadcast %775 : vector<8x1xf32> to vector<8x256xf32>
    %778 = vector.broadcast %3 : vector<1x256xf32> to vector<8x256xf32>
    %779 = arith.subf %777, %778 : vector<8x256xf32>
    %780 = vector.broadcast %776 : vector<8x1xf32> to vector<8x256xf32>
    %781 = vector.broadcast %4 : vector<1x256xf32> to vector<8x256xf32>
    %782 = arith.subf %780, %781 : vector<8x256xf32>
    %783 = arith.mulf %779, %779 : vector<8x256xf32>
    %784 = arith.mulf %782, %782 : vector<8x256xf32>
    %785 = arith.addf %783, %784 : vector<8x256xf32>
    %c0_553 = arith.constant 0 : index
    %c112_554 = arith.constant 112 : index
    %c0_555 = arith.constant 0 : index
    %786 = vector.load %arg6[%c0_553, %c112_554, %c0_555] : memref<1x256x1xf32, #tpu.memory_space<vmem>>, vector<1x8x1xf32>
    %787 = vector.shape_cast %786 : vector<1x8x1xf32> to vector<8x1xf32>
    %788 = vector.shape_cast %787 : vector<8x1xf32> to vector<8x1xf32>
    %789 = vector.broadcast %788 : vector<8x1xf32> to vector<8x256xf32>
    %cst_556 = arith.constant 5.000000e-01 : f32
    %790 = vector.broadcast %cst_556 : f32 to vector<8x256xf32>
    %791 = arith.cmpf ogt, %789, %790 : vector<8x256xf32>
    %c0_557 = arith.constant 0 : index
    %c112_558 = arith.constant 112 : index
    %c0_559 = arith.constant 0 : index
    %792 = vector.load %arg7[%c0_557, %c112_558, %c0_559] : memref<1x256x1xf32, #tpu.memory_space<vmem>>, vector<1x8x1xf32>
    %793 = vector.shape_cast %792 : vector<1x8x1xf32> to vector<8x1xf32>
    %794 = vector.shape_cast %793 : vector<8x1xf32> to vector<8x1xf32>
    %795 = vector.broadcast %794 : vector<8x1xf32> to vector<8x256xf32>
    %cst_560 = arith.constant 5.000000e-01 : f32
    %796 = vector.broadcast %cst_560 : f32 to vector<8x256xf32>
    %797 = arith.cmpf ogt, %795, %796 : vector<8x256xf32>
    %c0_561 = arith.constant 0 : index
    %c0_562 = arith.constant 0 : index
    %c0_563 = arith.constant 0 : index
    %798 = vector.load %arg10[%c0_561, %c0_562, %c0_563] : memref<1x8x256xf32, #tpu.memory_space<vmem>>, vector<1x8x256xf32>
    %799 = vector.shape_cast %798 : vector<1x8x256xf32> to vector<8x256xf32>
    %cst_564 = arith.constant 1.000000e+30 : f32
    %800 = vector.broadcast %cst_564 : f32 to vector<8x256xf32>
    %801 = arith.select %791, %800, %785 : vector<8x256xi1>, vector<8x256xf32>
    %802 = arith.minimumf %799, %801 : vector<8x256xf32>
    %c0_565 = arith.constant 0 : index
    %c0_566 = arith.constant 0 : index
    %c0_567 = arith.constant 0 : index
    %803 = vector.load %arg10[%c0_565, %c0_566, %c0_567] : memref<1x8x256xf32, #tpu.memory_space<vmem>>, vector<1x8x256xf32>
    %804 = vector.shape_cast %803 : vector<1x8x256xf32> to vector<8x256xf32>
    %805 = vector.shape_cast %802 : vector<8x256xf32> to vector<1x8x256xf32>
    tpu.vector_store %arg10[%c0_565, %c0_566, %c0_567], %805 {strides = array<i32>} : memref<1x8x256xf32, #tpu.memory_space<vmem>>, vector<1x8x256xf32>,
    %c0_568 = arith.constant 0 : index
    %c0_569 = arith.constant 0 : index
    %c0_570 = arith.constant 0 : index
    %806 = vector.load %arg11[%c0_568, %c0_569, %c0_570] : memref<1x8x256xf32, #tpu.memory_space<vmem>>, vector<1x8x256xf32>
    %807 = vector.shape_cast %806 : vector<1x8x256xf32> to vector<8x256xf32>
    %cst_571 = arith.constant 1.000000e+30 : f32
    %808 = vector.broadcast %cst_571 : f32 to vector<8x256xf32>
    %809 = arith.select %791, %785, %808 : vector<8x256xi1>, vector<8x256xf32>
    %810 = arith.minimumf %807, %809 : vector<8x256xf32>
    %c0_572 = arith.constant 0 : index
    %c0_573 = arith.constant 0 : index
    %c0_574 = arith.constant 0 : index
    %811 = vector.load %arg11[%c0_572, %c0_573, %c0_574] : memref<1x8x256xf32, #tpu.memory_space<vmem>>, vector<1x8x256xf32>
    %812 = vector.shape_cast %811 : vector<1x8x256xf32> to vector<8x256xf32>
    %813 = vector.shape_cast %810 : vector<8x256xf32> to vector<1x8x256xf32>
    tpu.vector_store %arg11[%c0_572, %c0_573, %c0_574], %813 {strides = array<i32>} : memref<1x8x256xf32, #tpu.memory_space<vmem>>, vector<1x8x256xf32>,
    %c0_575 = arith.constant 0 : index
    %c0_576 = arith.constant 0 : index
    %c0_577 = arith.constant 0 : index
    %814 = vector.load %arg12[%c0_575, %c0_576, %c0_577] : memref<1x8x256xf32, #tpu.memory_space<vmem>>, vector<1x8x256xf32>
    %815 = vector.shape_cast %814 : vector<1x8x256xf32> to vector<8x256xf32>
    %cst_578 = arith.constant 1.000000e+30 : f32
    %816 = vector.broadcast %cst_578 : f32 to vector<8x256xf32>
    %817 = arith.select %797, %816, %785 : vector<8x256xi1>, vector<8x256xf32>
    %818 = arith.minimumf %815, %817 : vector<8x256xf32>
    %c0_579 = arith.constant 0 : index
    %c0_580 = arith.constant 0 : index
    %c0_581 = arith.constant 0 : index
    %819 = vector.load %arg12[%c0_579, %c0_580, %c0_581] : memref<1x8x256xf32, #tpu.memory_space<vmem>>, vector<1x8x256xf32>
    %820 = vector.shape_cast %819 : vector<1x8x256xf32> to vector<8x256xf32>
    %821 = vector.shape_cast %818 : vector<8x256xf32> to vector<1x8x256xf32>
    tpu.vector_store %arg12[%c0_579, %c0_580, %c0_581], %821 {strides = array<i32>} : memref<1x8x256xf32, #tpu.memory_space<vmem>>, vector<1x8x256xf32>,
    %c0_582 = arith.constant 0 : index
    %c0_583 = arith.constant 0 : index
    %c0_584 = arith.constant 0 : index
    %822 = vector.load %arg13[%c0_582, %c0_583, %c0_584] : memref<1x8x256xf32, #tpu.memory_space<vmem>>, vector<1x8x256xf32>
    %823 = vector.shape_cast %822 : vector<1x8x256xf32> to vector<8x256xf32>
    %cst_585 = arith.constant 1.000000e+30 : f32
    %824 = vector.broadcast %cst_585 : f32 to vector<8x256xf32>
    %825 = arith.select %797, %785, %824 : vector<8x256xi1>, vector<8x256xf32>
    %826 = arith.minimumf %823, %825 : vector<8x256xf32>
    %c0_586 = arith.constant 0 : index
    %c0_587 = arith.constant 0 : index
    %c0_588 = arith.constant 0 : index
    %827 = vector.load %arg13[%c0_586, %c0_587, %c0_588] : memref<1x8x256xf32, #tpu.memory_space<vmem>>, vector<1x8x256xf32>
    %828 = vector.shape_cast %827 : vector<1x8x256xf32> to vector<8x256xf32>
    %829 = vector.shape_cast %826 : vector<8x256xf32> to vector<1x8x256xf32>
    tpu.vector_store %arg13[%c0_586, %c0_587, %c0_588], %829 {strides = array<i32>} : memref<1x8x256xf32, #tpu.memory_space<vmem>>, vector<1x8x256xf32>,
    %c120 = arith.constant 120 : index
    %c0_589 = arith.constant 0 : index
    %830 = vector.load %arg2[%c120, %c0_589] : memref<256x1xf32, #tpu.memory_space<vmem>>, vector<8x1xf32>
    %c120_590 = arith.constant 120 : index
    %c0_591 = arith.constant 0 : index
    %831 = vector.load %arg3[%c120_590, %c0_591] : memref<256x1xf32, #tpu.memory_space<vmem>>, vector<8x1xf32>
    %832 = vector.broadcast %830 : vector<8x1xf32> to vector<8x256xf32>
    %833 = vector.broadcast %3 : vector<1x256xf32> to vector<8x256xf32>
    %834 = arith.subf %832, %833 : vector<8x256xf32>
    %835 = vector.broadcast %831 : vector<8x1xf32> to vector<8x256xf32>
    %836 = vector.broadcast %4 : vector<1x256xf32> to vector<8x256xf32>
    %837 = arith.subf %835, %836 : vector<8x256xf32>
    %838 = arith.mulf %834, %834 : vector<8x256xf32>
    %839 = arith.mulf %837, %837 : vector<8x256xf32>
    %840 = arith.addf %838, %839 : vector<8x256xf32>
    %c0_592 = arith.constant 0 : index
    %c120_593 = arith.constant 120 : index
    %c0_594 = arith.constant 0 : index
    %841 = vector.load %arg6[%c0_592, %c120_593, %c0_594] : memref<1x256x1xf32, #tpu.memory_space<vmem>>, vector<1x8x1xf32>
    %842 = vector.shape_cast %841 : vector<1x8x1xf32> to vector<8x1xf32>
    %843 = vector.shape_cast %842 : vector<8x1xf32> to vector<8x1xf32>
    %844 = vector.broadcast %843 : vector<8x1xf32> to vector<8x256xf32>
    %cst_595 = arith.constant 5.000000e-01 : f32
    %845 = vector.broadcast %cst_595 : f32 to vector<8x256xf32>
    %846 = arith.cmpf ogt, %844, %845 : vector<8x256xf32>
    %c0_596 = arith.constant 0 : index
    %c120_597 = arith.constant 120 : index
    %c0_598 = arith.constant 0 : index
    %847 = vector.load %arg7[%c0_596, %c120_597, %c0_598] : memref<1x256x1xf32, #tpu.memory_space<vmem>>, vector<1x8x1xf32>
    %848 = vector.shape_cast %847 : vector<1x8x1xf32> to vector<8x1xf32>
    %849 = vector.shape_cast %848 : vector<8x1xf32> to vector<8x1xf32>
    %850 = vector.broadcast %849 : vector<8x1xf32> to vector<8x256xf32>
    %cst_599 = arith.constant 5.000000e-01 : f32
    %851 = vector.broadcast %cst_599 : f32 to vector<8x256xf32>
    %852 = arith.cmpf ogt, %850, %851 : vector<8x256xf32>
    %c0_600 = arith.constant 0 : index
    %c0_601 = arith.constant 0 : index
    %c0_602 = arith.constant 0 : index
    %853 = vector.load %arg10[%c0_600, %c0_601, %c0_602] : memref<1x8x256xf32, #tpu.memory_space<vmem>>, vector<1x8x256xf32>
    %854 = vector.shape_cast %853 : vector<1x8x256xf32> to vector<8x256xf32>
    %cst_603 = arith.constant 1.000000e+30 : f32
    %855 = vector.broadcast %cst_603 : f32 to vector<8x256xf32>
    %856 = arith.select %846, %855, %840 : vector<8x256xi1>, vector<8x256xf32>
    %857 = arith.minimumf %854, %856 : vector<8x256xf32>
    %c0_604 = arith.constant 0 : index
    %c0_605 = arith.constant 0 : index
    %c0_606 = arith.constant 0 : index
    %858 = vector.load %arg10[%c0_604, %c0_605, %c0_606] : memref<1x8x256xf32, #tpu.memory_space<vmem>>, vector<1x8x256xf32>
    %859 = vector.shape_cast %858 : vector<1x8x256xf32> to vector<8x256xf32>
    %860 = vector.shape_cast %857 : vector<8x256xf32> to vector<1x8x256xf32>
    tpu.vector_store %arg10[%c0_604, %c0_605, %c0_606], %860 {strides = array<i32>} : memref<1x8x256xf32, #tpu.memory_space<vmem>>, vector<1x8x256xf32>,
    %c0_607 = arith.constant 0 : index
    %c0_608 = arith.constant 0 : index
    %c0_609 = arith.constant 0 : index
    %861 = vector.load %arg11[%c0_607, %c0_608, %c0_609] : memref<1x8x256xf32, #tpu.memory_space<vmem>>, vector<1x8x256xf32>
    %862 = vector.shape_cast %861 : vector<1x8x256xf32> to vector<8x256xf32>
    %cst_610 = arith.constant 1.000000e+30 : f32
    %863 = vector.broadcast %cst_610 : f32 to vector<8x256xf32>
    %864 = arith.select %846, %840, %863 : vector<8x256xi1>, vector<8x256xf32>
    %865 = arith.minimumf %862, %864 : vector<8x256xf32>
    %c0_611 = arith.constant 0 : index
    %c0_612 = arith.constant 0 : index
    %c0_613 = arith.constant 0 : index
    %866 = vector.load %arg11[%c0_611, %c0_612, %c0_613] : memref<1x8x256xf32, #tpu.memory_space<vmem>>, vector<1x8x256xf32>
    %867 = vector.shape_cast %866 : vector<1x8x256xf32> to vector<8x256xf32>
    %868 = vector.shape_cast %865 : vector<8x256xf32> to vector<1x8x256xf32>
    tpu.vector_store %arg11[%c0_611, %c0_612, %c0_613], %868 {strides = array<i32>} : memref<1x8x256xf32, #tpu.memory_space<vmem>>, vector<1x8x256xf32>,
    %c0_614 = arith.constant 0 : index
    %c0_615 = arith.constant 0 : index
    %c0_616 = arith.constant 0 : index
    %869 = vector.load %arg12[%c0_614, %c0_615, %c0_616] : memref<1x8x256xf32, #tpu.memory_space<vmem>>, vector<1x8x256xf32>
    %870 = vector.shape_cast %869 : vector<1x8x256xf32> to vector<8x256xf32>
    %cst_617 = arith.constant 1.000000e+30 : f32
    %871 = vector.broadcast %cst_617 : f32 to vector<8x256xf32>
    %872 = arith.select %852, %871, %840 : vector<8x256xi1>, vector<8x256xf32>
    %873 = arith.minimumf %870, %872 : vector<8x256xf32>
    %c0_618 = arith.constant 0 : index
    %c0_619 = arith.constant 0 : index
    %c0_620 = arith.constant 0 : index
    %874 = vector.load %arg12[%c0_618, %c0_619, %c0_620] : memref<1x8x256xf32, #tpu.memory_space<vmem>>, vector<1x8x256xf32>
    %875 = vector.shape_cast %874 : vector<1x8x256xf32> to vector<8x256xf32>
    %876 = vector.shape_cast %873 : vector<8x256xf32> to vector<1x8x256xf32>
    tpu.vector_store %arg12[%c0_618, %c0_619, %c0_620], %876 {strides = array<i32>} : memref<1x8x256xf32, #tpu.memory_space<vmem>>, vector<1x8x256xf32>,
    %c0_621 = arith.constant 0 : index
    %c0_622 = arith.constant 0 : index
    %c0_623 = arith.constant 0 : index
    %877 = vector.load %arg13[%c0_621, %c0_622, %c0_623] : memref<1x8x256xf32, #tpu.memory_space<vmem>>, vector<1x8x256xf32>
    %878 = vector.shape_cast %877 : vector<1x8x256xf32> to vector<8x256xf32>
    %cst_624 = arith.constant 1.000000e+30 : f32
    %879 = vector.broadcast %cst_624 : f32 to vector<8x256xf32>
    %880 = arith.select %852, %840, %879 : vector<8x256xi1>, vector<8x256xf32>
    %881 = arith.minimumf %878, %880 : vector<8x256xf32>
    %c0_625 = arith.constant 0 : index
    %c0_626 = arith.constant 0 : index
    %c0_627 = arith.constant 0 : index
    %882 = vector.load %arg13[%c0_625, %c0_626, %c0_627] : memref<1x8x256xf32, #tpu.memory_space<vmem>>, vector<1x8x256xf32>
    %883 = vector.shape_cast %882 : vector<1x8x256xf32> to vector<8x256xf32>
    %884 = vector.shape_cast %881 : vector<8x256xf32> to vector<1x8x256xf32>
    tpu.vector_store %arg13[%c0_625, %c0_626, %c0_627], %884 {strides = array<i32>} : memref<1x8x256xf32, #tpu.memory_space<vmem>>, vector<1x8x256xf32>,
    %c128 = arith.constant 128 : index
    %c0_628 = arith.constant 0 : index
    %885 = vector.load %arg2[%c128, %c0_628] : memref<256x1xf32, #tpu.memory_space<vmem>>, vector<8x1xf32>
    %c128_629 = arith.constant 128 : index
    %c0_630 = arith.constant 0 : index
    %886 = vector.load %arg3[%c128_629, %c0_630] : memref<256x1xf32, #tpu.memory_space<vmem>>, vector<8x1xf32>
    %887 = vector.broadcast %885 : vector<8x1xf32> to vector<8x256xf32>
    %888 = vector.broadcast %3 : vector<1x256xf32> to vector<8x256xf32>
    %889 = arith.subf %887, %888 : vector<8x256xf32>
    %890 = vector.broadcast %886 : vector<8x1xf32> to vector<8x256xf32>
    %891 = vector.broadcast %4 : vector<1x256xf32> to vector<8x256xf32>
    %892 = arith.subf %890, %891 : vector<8x256xf32>
    %893 = arith.mulf %889, %889 : vector<8x256xf32>
    %894 = arith.mulf %892, %892 : vector<8x256xf32>
    %895 = arith.addf %893, %894 : vector<8x256xf32>
    %c0_631 = arith.constant 0 : index
    %c128_632 = arith.constant 128 : index
    %c0_633 = arith.constant 0 : index
    %896 = vector.load %arg6[%c0_631, %c128_632, %c0_633] : memref<1x256x1xf32, #tpu.memory_space<vmem>>, vector<1x8x1xf32>
    %897 = vector.shape_cast %896 : vector<1x8x1xf32> to vector<8x1xf32>
    %898 = vector.shape_cast %897 : vector<8x1xf32> to vector<8x1xf32>
    %899 = vector.broadcast %898 : vector<8x1xf32> to vector<8x256xf32>
    %cst_634 = arith.constant 5.000000e-01 : f32
    %900 = vector.broadcast %cst_634 : f32 to vector<8x256xf32>
    %901 = arith.cmpf ogt, %899, %900 : vector<8x256xf32>
    %c0_635 = arith.constant 0 : index
    %c128_636 = arith.constant 128 : index
    %c0_637 = arith.constant 0 : index
    %902 = vector.load %arg7[%c0_635, %c128_636, %c0_637] : memref<1x256x1xf32, #tpu.memory_space<vmem>>, vector<1x8x1xf32>
    %903 = vector.shape_cast %902 : vector<1x8x1xf32> to vector<8x1xf32>
    %904 = vector.shape_cast %903 : vector<8x1xf32> to vector<8x1xf32>
    %905 = vector.broadcast %904 : vector<8x1xf32> to vector<8x256xf32>
    %cst_638 = arith.constant 5.000000e-01 : f32
    %906 = vector.broadcast %cst_638 : f32 to vector<8x256xf32>
    %907 = arith.cmpf ogt, %905, %906 : vector<8x256xf32>
    %c0_639 = arith.constant 0 : index
    %c0_640 = arith.constant 0 : index
    %c0_641 = arith.constant 0 : index
    %908 = vector.load %arg10[%c0_639, %c0_640, %c0_641] : memref<1x8x256xf32, #tpu.memory_space<vmem>>, vector<1x8x256xf32>
    %909 = vector.shape_cast %908 : vector<1x8x256xf32> to vector<8x256xf32>
    %cst_642 = arith.constant 1.000000e+30 : f32
    %910 = vector.broadcast %cst_642 : f32 to vector<8x256xf32>
    %911 = arith.select %901, %910, %895 : vector<8x256xi1>, vector<8x256xf32>
    %912 = arith.minimumf %909, %911 : vector<8x256xf32>
    %c0_643 = arith.constant 0 : index
    %c0_644 = arith.constant 0 : index
    %c0_645 = arith.constant 0 : index
    %913 = vector.load %arg10[%c0_643, %c0_644, %c0_645] : memref<1x8x256xf32, #tpu.memory_space<vmem>>, vector<1x8x256xf32>
    %914 = vector.shape_cast %913 : vector<1x8x256xf32> to vector<8x256xf32>
    %915 = vector.shape_cast %912 : vector<8x256xf32> to vector<1x8x256xf32>
    tpu.vector_store %arg10[%c0_643, %c0_644, %c0_645], %915 {strides = array<i32>} : memref<1x8x256xf32, #tpu.memory_space<vmem>>, vector<1x8x256xf32>,
    %c0_646 = arith.constant 0 : index
    %c0_647 = arith.constant 0 : index
    %c0_648 = arith.constant 0 : index
    %916 = vector.load %arg11[%c0_646, %c0_647, %c0_648] : memref<1x8x256xf32, #tpu.memory_space<vmem>>, vector<1x8x256xf32>
    %917 = vector.shape_cast %916 : vector<1x8x256xf32> to vector<8x256xf32>
    %cst_649 = arith.constant 1.000000e+30 : f32
    %918 = vector.broadcast %cst_649 : f32 to vector<8x256xf32>
    %919 = arith.select %901, %895, %918 : vector<8x256xi1>, vector<8x256xf32>
    %920 = arith.minimumf %917, %919 : vector<8x256xf32>
    %c0_650 = arith.constant 0 : index
    %c0_651 = arith.constant 0 : index
    %c0_652 = arith.constant 0 : index
    %921 = vector.load %arg11[%c0_650, %c0_651, %c0_652] : memref<1x8x256xf32, #tpu.memory_space<vmem>>, vector<1x8x256xf32>
    %922 = vector.shape_cast %921 : vector<1x8x256xf32> to vector<8x256xf32>
    %923 = vector.shape_cast %920 : vector<8x256xf32> to vector<1x8x256xf32>
    tpu.vector_store %arg11[%c0_650, %c0_651, %c0_652], %923 {strides = array<i32>} : memref<1x8x256xf32, #tpu.memory_space<vmem>>, vector<1x8x256xf32>,
    %c0_653 = arith.constant 0 : index
    %c0_654 = arith.constant 0 : index
    %c0_655 = arith.constant 0 : index
    %924 = vector.load %arg12[%c0_653, %c0_654, %c0_655] : memref<1x8x256xf32, #tpu.memory_space<vmem>>, vector<1x8x256xf32>
    %925 = vector.shape_cast %924 : vector<1x8x256xf32> to vector<8x256xf32>
    %cst_656 = arith.constant 1.000000e+30 : f32
    %926 = vector.broadcast %cst_656 : f32 to vector<8x256xf32>
    %927 = arith.select %907, %926, %895 : vector<8x256xi1>, vector<8x256xf32>
    %928 = arith.minimumf %925, %927 : vector<8x256xf32>
    %c0_657 = arith.constant 0 : index
    %c0_658 = arith.constant 0 : index
    %c0_659 = arith.constant 0 : index
    %929 = vector.load %arg12[%c0_657, %c0_658, %c0_659] : memref<1x8x256xf32, #tpu.memory_space<vmem>>, vector<1x8x256xf32>
    %930 = vector.shape_cast %929 : vector<1x8x256xf32> to vector<8x256xf32>
    %931 = vector.shape_cast %928 : vector<8x256xf32> to vector<1x8x256xf32>
    tpu.vector_store %arg12[%c0_657, %c0_658, %c0_659], %931 {strides = array<i32>} : memref<1x8x256xf32, #tpu.memory_space<vmem>>, vector<1x8x256xf32>,
    %c0_660 = arith.constant 0 : index
    %c0_661 = arith.constant 0 : index
    %c0_662 = arith.constant 0 : index
    %932 = vector.load %arg13[%c0_660, %c0_661, %c0_662] : memref<1x8x256xf32, #tpu.memory_space<vmem>>, vector<1x8x256xf32>
    %933 = vector.shape_cast %932 : vector<1x8x256xf32> to vector<8x256xf32>
    %cst_663 = arith.constant 1.000000e+30 : f32
    %934 = vector.broadcast %cst_663 : f32 to vector<8x256xf32>
    %935 = arith.select %907, %895, %934 : vector<8x256xi1>, vector<8x256xf32>
    %936 = arith.minimumf %933, %935 : vector<8x256xf32>
    %c0_664 = arith.constant 0 : index
    %c0_665 = arith.constant 0 : index
    %c0_666 = arith.constant 0 : index
    %937 = vector.load %arg13[%c0_664, %c0_665, %c0_666] : memref<1x8x256xf32, #tpu.memory_space<vmem>>, vector<1x8x256xf32>
    %938 = vector.shape_cast %937 : vector<1x8x256xf32> to vector<8x256xf32>
    %939 = vector.shape_cast %936 : vector<8x256xf32> to vector<1x8x256xf32>
    tpu.vector_store %arg13[%c0_664, %c0_665, %c0_666], %939 {strides = array<i32>} : memref<1x8x256xf32, #tpu.memory_space<vmem>>, vector<1x8x256xf32>,
    %c136 = arith.constant 136 : index
    %c0_667 = arith.constant 0 : index
    %940 = vector.load %arg2[%c136, %c0_667] : memref<256x1xf32, #tpu.memory_space<vmem>>, vector<8x1xf32>
    %c136_668 = arith.constant 136 : index
    %c0_669 = arith.constant 0 : index
    %941 = vector.load %arg3[%c136_668, %c0_669] : memref<256x1xf32, #tpu.memory_space<vmem>>, vector<8x1xf32>
    %942 = vector.broadcast %940 : vector<8x1xf32> to vector<8x256xf32>
    %943 = vector.broadcast %3 : vector<1x256xf32> to vector<8x256xf32>
    %944 = arith.subf %942, %943 : vector<8x256xf32>
    %945 = vector.broadcast %941 : vector<8x1xf32> to vector<8x256xf32>
    %946 = vector.broadcast %4 : vector<1x256xf32> to vector<8x256xf32>
    %947 = arith.subf %945, %946 : vector<8x256xf32>
    %948 = arith.mulf %944, %944 : vector<8x256xf32>
    %949 = arith.mulf %947, %947 : vector<8x256xf32>
    %950 = arith.addf %948, %949 : vector<8x256xf32>
    %c0_670 = arith.constant 0 : index
    %c136_671 = arith.constant 136 : index
    %c0_672 = arith.constant 0 : index
    %951 = vector.load %arg6[%c0_670, %c136_671, %c0_672] : memref<1x256x1xf32, #tpu.memory_space<vmem>>, vector<1x8x1xf32>
    %952 = vector.shape_cast %951 : vector<1x8x1xf32> to vector<8x1xf32>
    %953 = vector.shape_cast %952 : vector<8x1xf32> to vector<8x1xf32>
    %954 = vector.broadcast %953 : vector<8x1xf32> to vector<8x256xf32>
    %cst_673 = arith.constant 5.000000e-01 : f32
    %955 = vector.broadcast %cst_673 : f32 to vector<8x256xf32>
    %956 = arith.cmpf ogt, %954, %955 : vector<8x256xf32>
    %c0_674 = arith.constant 0 : index
    %c136_675 = arith.constant 136 : index
    %c0_676 = arith.constant 0 : index
    %957 = vector.load %arg7[%c0_674, %c136_675, %c0_676] : memref<1x256x1xf32, #tpu.memory_space<vmem>>, vector<1x8x1xf32>
    %958 = vector.shape_cast %957 : vector<1x8x1xf32> to vector<8x1xf32>
    %959 = vector.shape_cast %958 : vector<8x1xf32> to vector<8x1xf32>
    %960 = vector.broadcast %959 : vector<8x1xf32> to vector<8x256xf32>
    %cst_677 = arith.constant 5.000000e-01 : f32
    %961 = vector.broadcast %cst_677 : f32 to vector<8x256xf32>
    %962 = arith.cmpf ogt, %960, %961 : vector<8x256xf32>
    %c0_678 = arith.constant 0 : index
    %c0_679 = arith.constant 0 : index
    %c0_680 = arith.constant 0 : index
    %963 = vector.load %arg10[%c0_678, %c0_679, %c0_680] : memref<1x8x256xf32, #tpu.memory_space<vmem>>, vector<1x8x256xf32>
    %964 = vector.shape_cast %963 : vector<1x8x256xf32> to vector<8x256xf32>
    %cst_681 = arith.constant 1.000000e+30 : f32
    %965 = vector.broadcast %cst_681 : f32 to vector<8x256xf32>
    %966 = arith.select %956, %965, %950 : vector<8x256xi1>, vector<8x256xf32>
    %967 = arith.minimumf %964, %966 : vector<8x256xf32>
    %c0_682 = arith.constant 0 : index
    %c0_683 = arith.constant 0 : index
    %c0_684 = arith.constant 0 : index
    %968 = vector.load %arg10[%c0_682, %c0_683, %c0_684] : memref<1x8x256xf32, #tpu.memory_space<vmem>>, vector<1x8x256xf32>
    %969 = vector.shape_cast %968 : vector<1x8x256xf32> to vector<8x256xf32>
    %970 = vector.shape_cast %967 : vector<8x256xf32> to vector<1x8x256xf32>
    tpu.vector_store %arg10[%c0_682, %c0_683, %c0_684], %970 {strides = array<i32>} : memref<1x8x256xf32, #tpu.memory_space<vmem>>, vector<1x8x256xf32>,
    %c0_685 = arith.constant 0 : index
    %c0_686 = arith.constant 0 : index
    %c0_687 = arith.constant 0 : index
    %971 = vector.load %arg11[%c0_685, %c0_686, %c0_687] : memref<1x8x256xf32, #tpu.memory_space<vmem>>, vector<1x8x256xf32>
    %972 = vector.shape_cast %971 : vector<1x8x256xf32> to vector<8x256xf32>
    %cst_688 = arith.constant 1.000000e+30 : f32
    %973 = vector.broadcast %cst_688 : f32 to vector<8x256xf32>
    %974 = arith.select %956, %950, %973 : vector<8x256xi1>, vector<8x256xf32>
    %975 = arith.minimumf %972, %974 : vector<8x256xf32>
    %c0_689 = arith.constant 0 : index
    %c0_690 = arith.constant 0 : index
    %c0_691 = arith.constant 0 : index
    %976 = vector.load %arg11[%c0_689, %c0_690, %c0_691] : memref<1x8x256xf32, #tpu.memory_space<vmem>>, vector<1x8x256xf32>
    %977 = vector.shape_cast %976 : vector<1x8x256xf32> to vector<8x256xf32>
    %978 = vector.shape_cast %975 : vector<8x256xf32> to vector<1x8x256xf32>
    tpu.vector_store %arg11[%c0_689, %c0_690, %c0_691], %978 {strides = array<i32>} : memref<1x8x256xf32, #tpu.memory_space<vmem>>, vector<1x8x256xf32>,
    %c0_692 = arith.constant 0 : index
    %c0_693 = arith.constant 0 : index
    %c0_694 = arith.constant 0 : index
    %979 = vector.load %arg12[%c0_692, %c0_693, %c0_694] : memref<1x8x256xf32, #tpu.memory_space<vmem>>, vector<1x8x256xf32>
    %980 = vector.shape_cast %979 : vector<1x8x256xf32> to vector<8x256xf32>
    %cst_695 = arith.constant 1.000000e+30 : f32
    %981 = vector.broadcast %cst_695 : f32 to vector<8x256xf32>
    %982 = arith.select %962, %981, %950 : vector<8x256xi1>, vector<8x256xf32>
    %983 = arith.minimumf %980, %982 : vector<8x256xf32>
    %c0_696 = arith.constant 0 : index
    %c0_697 = arith.constant 0 : index
    %c0_698 = arith.constant 0 : index
    %984 = vector.load %arg12[%c0_696, %c0_697, %c0_698] : memref<1x8x256xf32, #tpu.memory_space<vmem>>, vector<1x8x256xf32>
    %985 = vector.shape_cast %984 : vector<1x8x256xf32> to vector<8x256xf32>
    %986 = vector.shape_cast %983 : vector<8x256xf32> to vector<1x8x256xf32>
    tpu.vector_store %arg12[%c0_696, %c0_697, %c0_698], %986 {strides = array<i32>} : memref<1x8x256xf32, #tpu.memory_space<vmem>>, vector<1x8x256xf32>,
    %c0_699 = arith.constant 0 : index
    %c0_700 = arith.constant 0 : index
    %c0_701 = arith.constant 0 : index
    %987 = vector.load %arg13[%c0_699, %c0_700, %c0_701] : memref<1x8x256xf32, #tpu.memory_space<vmem>>, vector<1x8x256xf32>
    %988 = vector.shape_cast %987 : vector<1x8x256xf32> to vector<8x256xf32>
    %cst_702 = arith.constant 1.000000e+30 : f32
    %989 = vector.broadcast %cst_702 : f32 to vector<8x256xf32>
    %990 = arith.select %962, %950, %989 : vector<8x256xi1>, vector<8x256xf32>
    %991 = arith.minimumf %988, %990 : vector<8x256xf32>
    %c0_703 = arith.constant 0 : index
    %c0_704 = arith.constant 0 : index
    %c0_705 = arith.constant 0 : index
    %992 = vector.load %arg13[%c0_703, %c0_704, %c0_705] : memref<1x8x256xf32, #tpu.memory_space<vmem>>, vector<1x8x256xf32>
    %993 = vector.shape_cast %992 : vector<1x8x256xf32> to vector<8x256xf32>
    %994 = vector.shape_cast %991 : vector<8x256xf32> to vector<1x8x256xf32>
    tpu.vector_store %arg13[%c0_703, %c0_704, %c0_705], %994 {strides = array<i32>} : memref<1x8x256xf32, #tpu.memory_space<vmem>>, vector<1x8x256xf32>,
    %c144 = arith.constant 144 : index
    %c0_706 = arith.constant 0 : index
    %995 = vector.load %arg2[%c144, %c0_706] : memref<256x1xf32, #tpu.memory_space<vmem>>, vector<8x1xf32>
    %c144_707 = arith.constant 144 : index
    %c0_708 = arith.constant 0 : index
    %996 = vector.load %arg3[%c144_707, %c0_708] : memref<256x1xf32, #tpu.memory_space<vmem>>, vector<8x1xf32>
    %997 = vector.broadcast %995 : vector<8x1xf32> to vector<8x256xf32>
    %998 = vector.broadcast %3 : vector<1x256xf32> to vector<8x256xf32>
    %999 = arith.subf %997, %998 : vector<8x256xf32>
    %1000 = vector.broadcast %996 : vector<8x1xf32> to vector<8x256xf32>
    %1001 = vector.broadcast %4 : vector<1x256xf32> to vector<8x256xf32>
    %1002 = arith.subf %1000, %1001 : vector<8x256xf32>
    %1003 = arith.mulf %999, %999 : vector<8x256xf32>
    %1004 = arith.mulf %1002, %1002 : vector<8x256xf32>
    %1005 = arith.addf %1003, %1004 : vector<8x256xf32>
    %c0_709 = arith.constant 0 : index
    %c144_710 = arith.constant 144 : index
    %c0_711 = arith.constant 0 : index
    %1006 = vector.load %arg6[%c0_709, %c144_710, %c0_711] : memref<1x256x1xf32, #tpu.memory_space<vmem>>, vector<1x8x1xf32>
    %1007 = vector.shape_cast %1006 : vector<1x8x1xf32> to vector<8x1xf32>
    %1008 = vector.shape_cast %1007 : vector<8x1xf32> to vector<8x1xf32>
    %1009 = vector.broadcast %1008 : vector<8x1xf32> to vector<8x256xf32>
    %cst_712 = arith.constant 5.000000e-01 : f32
    %1010 = vector.broadcast %cst_712 : f32 to vector<8x256xf32>
    %1011 = arith.cmpf ogt, %1009, %1010 : vector<8x256xf32>
    %c0_713 = arith.constant 0 : index
    %c144_714 = arith.constant 144 : index
    %c0_715 = arith.constant 0 : index
    %1012 = vector.load %arg7[%c0_713, %c144_714, %c0_715] : memref<1x256x1xf32, #tpu.memory_space<vmem>>, vector<1x8x1xf32>
    %1013 = vector.shape_cast %1012 : vector<1x8x1xf32> to vector<8x1xf32>
    %1014 = vector.shape_cast %1013 : vector<8x1xf32> to vector<8x1xf32>
    %1015 = vector.broadcast %1014 : vector<8x1xf32> to vector<8x256xf32>
    %cst_716 = arith.constant 5.000000e-01 : f32
    %1016 = vector.broadcast %cst_716 : f32 to vector<8x256xf32>
    %1017 = arith.cmpf ogt, %1015, %1016 : vector<8x256xf32>
    %c0_717 = arith.constant 0 : index
    %c0_718 = arith.constant 0 : index
    %c0_719 = arith.constant 0 : index
    %1018 = vector.load %arg10[%c0_717, %c0_718, %c0_719] : memref<1x8x256xf32, #tpu.memory_space<vmem>>, vector<1x8x256xf32>
    %1019 = vector.shape_cast %1018 : vector<1x8x256xf32> to vector<8x256xf32>
    %cst_720 = arith.constant 1.000000e+30 : f32
    %1020 = vector.broadcast %cst_720 : f32 to vector<8x256xf32>
    %1021 = arith.select %1011, %1020, %1005 : vector<8x256xi1>, vector<8x256xf32>
    %1022 = arith.minimumf %1019, %1021 : vector<8x256xf32>
    %c0_721 = arith.constant 0 : index
    %c0_722 = arith.constant 0 : index
    %c0_723 = arith.constant 0 : index
    %1023 = vector.load %arg10[%c0_721, %c0_722, %c0_723] : memref<1x8x256xf32, #tpu.memory_space<vmem>>, vector<1x8x256xf32>
    %1024 = vector.shape_cast %1023 : vector<1x8x256xf32> to vector<8x256xf32>
    %1025 = vector.shape_cast %1022 : vector<8x256xf32> to vector<1x8x256xf32>
    tpu.vector_store %arg10[%c0_721, %c0_722, %c0_723], %1025 {strides = array<i32>} : memref<1x8x256xf32, #tpu.memory_space<vmem>>, vector<1x8x256xf32>,
    %c0_724 = arith.constant 0 : index
    %c0_725 = arith.constant 0 : index
    %c0_726 = arith.constant 0 : index
    %1026 = vector.load %arg11[%c0_724, %c0_725, %c0_726] : memref<1x8x256xf32, #tpu.memory_space<vmem>>, vector<1x8x256xf32>
    %1027 = vector.shape_cast %1026 : vector<1x8x256xf32> to vector<8x256xf32>
    %cst_727 = arith.constant 1.000000e+30 : f32
    %1028 = vector.broadcast %cst_727 : f32 to vector<8x256xf32>
    %1029 = arith.select %1011, %1005, %1028 : vector<8x256xi1>, vector<8x256xf32>
    %1030 = arith.minimumf %1027, %1029 : vector<8x256xf32>
    %c0_728 = arith.constant 0 : index
    %c0_729 = arith.constant 0 : index
    %c0_730 = arith.constant 0 : index
    %1031 = vector.load %arg11[%c0_728, %c0_729, %c0_730] : memref<1x8x256xf32, #tpu.memory_space<vmem>>, vector<1x8x256xf32>
    %1032 = vector.shape_cast %1031 : vector<1x8x256xf32> to vector<8x256xf32>
    %1033 = vector.shape_cast %1030 : vector<8x256xf32> to vector<1x8x256xf32>
    tpu.vector_store %arg11[%c0_728, %c0_729, %c0_730], %1033 {strides = array<i32>} : memref<1x8x256xf32, #tpu.memory_space<vmem>>, vector<1x8x256xf32>,
    %c0_731 = arith.constant 0 : index
    %c0_732 = arith.constant 0 : index
    %c0_733 = arith.constant 0 : index
    %1034 = vector.load %arg12[%c0_731, %c0_732, %c0_733] : memref<1x8x256xf32, #tpu.memory_space<vmem>>, vector<1x8x256xf32>
    %1035 = vector.shape_cast %1034 : vector<1x8x256xf32> to vector<8x256xf32>
    %cst_734 = arith.constant 1.000000e+30 : f32
    %1036 = vector.broadcast %cst_734 : f32 to vector<8x256xf32>
    %1037 = arith.select %1017, %1036, %1005 : vector<8x256xi1>, vector<8x256xf32>
    %1038 = arith.minimumf %1035, %1037 : vector<8x256xf32>
    %c0_735 = arith.constant 0 : index
    %c0_736 = arith.constant 0 : index
    %c0_737 = arith.constant 0 : index
    %1039 = vector.load %arg12[%c0_735, %c0_736, %c0_737] : memref<1x8x256xf32, #tpu.memory_space<vmem>>, vector<1x8x256xf32>
    %1040 = vector.shape_cast %1039 : vector<1x8x256xf32> to vector<8x256xf32>
    %1041 = vector.shape_cast %1038 : vector<8x256xf32> to vector<1x8x256xf32>
    tpu.vector_store %arg12[%c0_735, %c0_736, %c0_737], %1041 {strides = array<i32>} : memref<1x8x256xf32, #tpu.memory_space<vmem>>, vector<1x8x256xf32>,
    %c0_738 = arith.constant 0 : index
    %c0_739 = arith.constant 0 : index
    %c0_740 = arith.constant 0 : index
    %1042 = vector.load %arg13[%c0_738, %c0_739, %c0_740] : memref<1x8x256xf32, #tpu.memory_space<vmem>>, vector<1x8x256xf32>
    %1043 = vector.shape_cast %1042 : vector<1x8x256xf32> to vector<8x256xf32>
    %cst_741 = arith.constant 1.000000e+30 : f32
    %1044 = vector.broadcast %cst_741 : f32 to vector<8x256xf32>
    %1045 = arith.select %1017, %1005, %1044 : vector<8x256xi1>, vector<8x256xf32>
    %1046 = arith.minimumf %1043, %1045 : vector<8x256xf32>
    %c0_742 = arith.constant 0 : index
    %c0_743 = arith.constant 0 : index
    %c0_744 = arith.constant 0 : index
    %1047 = vector.load %arg13[%c0_742, %c0_743, %c0_744] : memref<1x8x256xf32, #tpu.memory_space<vmem>>, vector<1x8x256xf32>
    %1048 = vector.shape_cast %1047 : vector<1x8x256xf32> to vector<8x256xf32>
    %1049 = vector.shape_cast %1046 : vector<8x256xf32> to vector<1x8x256xf32>
    tpu.vector_store %arg13[%c0_742, %c0_743, %c0_744], %1049 {strides = array<i32>} : memref<1x8x256xf32, #tpu.memory_space<vmem>>, vector<1x8x256xf32>,
    %c152 = arith.constant 152 : index
    %c0_745 = arith.constant 0 : index
    %1050 = vector.load %arg2[%c152, %c0_745] : memref<256x1xf32, #tpu.memory_space<vmem>>, vector<8x1xf32>
    %c152_746 = arith.constant 152 : index
    %c0_747 = arith.constant 0 : index
    %1051 = vector.load %arg3[%c152_746, %c0_747] : memref<256x1xf32, #tpu.memory_space<vmem>>, vector<8x1xf32>
    %1052 = vector.broadcast %1050 : vector<8x1xf32> to vector<8x256xf32>
    %1053 = vector.broadcast %3 : vector<1x256xf32> to vector<8x256xf32>
    %1054 = arith.subf %1052, %1053 : vector<8x256xf32>
    %1055 = vector.broadcast %1051 : vector<8x1xf32> to vector<8x256xf32>
    %1056 = vector.broadcast %4 : vector<1x256xf32> to vector<8x256xf32>
    %1057 = arith.subf %1055, %1056 : vector<8x256xf32>
    %1058 = arith.mulf %1054, %1054 : vector<8x256xf32>
    %1059 = arith.mulf %1057, %1057 : vector<8x256xf32>
    %1060 = arith.addf %1058, %1059 : vector<8x256xf32>
    %c0_748 = arith.constant 0 : index
    %c152_749 = arith.constant 152 : index
    %c0_750 = arith.constant 0 : index
    %1061 = vector.load %arg6[%c0_748, %c152_749, %c0_750] : memref<1x256x1xf32, #tpu.memory_space<vmem>>, vector<1x8x1xf32>
    %1062 = vector.shape_cast %1061 : vector<1x8x1xf32> to vector<8x1xf32>
    %1063 = vector.shape_cast %1062 : vector<8x1xf32> to vector<8x1xf32>
    %1064 = vector.broadcast %1063 : vector<8x1xf32> to vector<8x256xf32>
    %cst_751 = arith.constant 5.000000e-01 : f32
    %1065 = vector.broadcast %cst_751 : f32 to vector<8x256xf32>
    %1066 = arith.cmpf ogt, %1064, %1065 : vector<8x256xf32>
    %c0_752 = arith.constant 0 : index
    %c152_753 = arith.constant 152 : index
    %c0_754 = arith.constant 0 : index
    %1067 = vector.load %arg7[%c0_752, %c152_753, %c0_754] : memref<1x256x1xf32, #tpu.memory_space<vmem>>, vector<1x8x1xf32>
    %1068 = vector.shape_cast %1067 : vector<1x8x1xf32> to vector<8x1xf32>
    %1069 = vector.shape_cast %1068 : vector<8x1xf32> to vector<8x1xf32>
    %1070 = vector.broadcast %1069 : vector<8x1xf32> to vector<8x256xf32>
    %cst_755 = arith.constant 5.000000e-01 : f32
    %1071 = vector.broadcast %cst_755 : f32 to vector<8x256xf32>
    %1072 = arith.cmpf ogt, %1070, %1071 : vector<8x256xf32>
    %c0_756 = arith.constant 0 : index
    %c0_757 = arith.constant 0 : index
    %c0_758 = arith.constant 0 : index
    %1073 = vector.load %arg10[%c0_756, %c0_757, %c0_758] : memref<1x8x256xf32, #tpu.memory_space<vmem>>, vector<1x8x256xf32>
    %1074 = vector.shape_cast %1073 : vector<1x8x256xf32> to vector<8x256xf32>
    %cst_759 = arith.constant 1.000000e+30 : f32
    %1075 = vector.broadcast %cst_759 : f32 to vector<8x256xf32>
    %1076 = arith.select %1066, %1075, %1060 : vector<8x256xi1>, vector<8x256xf32>
    %1077 = arith.minimumf %1074, %1076 : vector<8x256xf32>
    %c0_760 = arith.constant 0 : index
    %c0_761 = arith.constant 0 : index
    %c0_762 = arith.constant 0 : index
    %1078 = vector.load %arg10[%c0_760, %c0_761, %c0_762] : memref<1x8x256xf32, #tpu.memory_space<vmem>>, vector<1x8x256xf32>
    %1079 = vector.shape_cast %1078 : vector<1x8x256xf32> to vector<8x256xf32>
    %1080 = vector.shape_cast %1077 : vector<8x256xf32> to vector<1x8x256xf32>
    tpu.vector_store %arg10[%c0_760, %c0_761, %c0_762], %1080 {strides = array<i32>} : memref<1x8x256xf32, #tpu.memory_space<vmem>>, vector<1x8x256xf32>,
    %c0_763 = arith.constant 0 : index
    %c0_764 = arith.constant 0 : index
    %c0_765 = arith.constant 0 : index
    %1081 = vector.load %arg11[%c0_763, %c0_764, %c0_765] : memref<1x8x256xf32, #tpu.memory_space<vmem>>, vector<1x8x256xf32>
    %1082 = vector.shape_cast %1081 : vector<1x8x256xf32> to vector<8x256xf32>
    %cst_766 = arith.constant 1.000000e+30 : f32
    %1083 = vector.broadcast %cst_766 : f32 to vector<8x256xf32>
    %1084 = arith.select %1066, %1060, %1083 : vector<8x256xi1>, vector<8x256xf32>
    %1085 = arith.minimumf %1082, %1084 : vector<8x256xf32>
    %c0_767 = arith.constant 0 : index
    %c0_768 = arith.constant 0 : index
    %c0_769 = arith.constant 0 : index
    %1086 = vector.load %arg11[%c0_767, %c0_768, %c0_769] : memref<1x8x256xf32, #tpu.memory_space<vmem>>, vector<1x8x256xf32>
    %1087 = vector.shape_cast %1086 : vector<1x8x256xf32> to vector<8x256xf32>
    %1088 = vector.shape_cast %1085 : vector<8x256xf32> to vector<1x8x256xf32>
    tpu.vector_store %arg11[%c0_767, %c0_768, %c0_769], %1088 {strides = array<i32>} : memref<1x8x256xf32, #tpu.memory_space<vmem>>, vector<1x8x256xf32>,
    %c0_770 = arith.constant 0 : index
    %c0_771 = arith.constant 0 : index
    %c0_772 = arith.constant 0 : index
    %1089 = vector.load %arg12[%c0_770, %c0_771, %c0_772] : memref<1x8x256xf32, #tpu.memory_space<vmem>>, vector<1x8x256xf32>
    %1090 = vector.shape_cast %1089 : vector<1x8x256xf32> to vector<8x256xf32>
    %cst_773 = arith.constant 1.000000e+30 : f32
    %1091 = vector.broadcast %cst_773 : f32 to vector<8x256xf32>
    %1092 = arith.select %1072, %1091, %1060 : vector<8x256xi1>, vector<8x256xf32>
    %1093 = arith.minimumf %1090, %1092 : vector<8x256xf32>
    %c0_774 = arith.constant 0 : index
    %c0_775 = arith.constant 0 : index
    %c0_776 = arith.constant 0 : index
    %1094 = vector.load %arg12[%c0_774, %c0_775, %c0_776] : memref<1x8x256xf32, #tpu.memory_space<vmem>>, vector<1x8x256xf32>
    %1095 = vector.shape_cast %1094 : vector<1x8x256xf32> to vector<8x256xf32>
    %1096 = vector.shape_cast %1093 : vector<8x256xf32> to vector<1x8x256xf32>
    tpu.vector_store %arg12[%c0_774, %c0_775, %c0_776], %1096 {strides = array<i32>} : memref<1x8x256xf32, #tpu.memory_space<vmem>>, vector<1x8x256xf32>,
    %c0_777 = arith.constant 0 : index
    %c0_778 = arith.constant 0 : index
    %c0_779 = arith.constant 0 : index
    %1097 = vector.load %arg13[%c0_777, %c0_778, %c0_779] : memref<1x8x256xf32, #tpu.memory_space<vmem>>, vector<1x8x256xf32>
    %1098 = vector.shape_cast %1097 : vector<1x8x256xf32> to vector<8x256xf32>
    %cst_780 = arith.constant 1.000000e+30 : f32
    %1099 = vector.broadcast %cst_780 : f32 to vector<8x256xf32>
    %1100 = arith.select %1072, %1060, %1099 : vector<8x256xi1>, vector<8x256xf32>
    %1101 = arith.minimumf %1098, %1100 : vector<8x256xf32>
    %c0_781 = arith.constant 0 : index
    %c0_782 = arith.constant 0 : index
    %c0_783 = arith.constant 0 : index
    %1102 = vector.load %arg13[%c0_781, %c0_782, %c0_783] : memref<1x8x256xf32, #tpu.memory_space<vmem>>, vector<1x8x256xf32>
    %1103 = vector.shape_cast %1102 : vector<1x8x256xf32> to vector<8x256xf32>
    %1104 = vector.shape_cast %1101 : vector<8x256xf32> to vector<1x8x256xf32>
    tpu.vector_store %arg13[%c0_781, %c0_782, %c0_783], %1104 {strides = array<i32>} : memref<1x8x256xf32, #tpu.memory_space<vmem>>, vector<1x8x256xf32>,
    %c160 = arith.constant 160 : index
    %c0_784 = arith.constant 0 : index
    %1105 = vector.load %arg2[%c160, %c0_784] : memref<256x1xf32, #tpu.memory_space<vmem>>, vector<8x1xf32>
    %c160_785 = arith.constant 160 : index
    %c0_786 = arith.constant 0 : index
    %1106 = vector.load %arg3[%c160_785, %c0_786] : memref<256x1xf32, #tpu.memory_space<vmem>>, vector<8x1xf32>
    %1107 = vector.broadcast %1105 : vector<8x1xf32> to vector<8x256xf32>
    %1108 = vector.broadcast %3 : vector<1x256xf32> to vector<8x256xf32>
    %1109 = arith.subf %1107, %1108 : vector<8x256xf32>
    %1110 = vector.broadcast %1106 : vector<8x1xf32> to vector<8x256xf32>
    %1111 = vector.broadcast %4 : vector<1x256xf32> to vector<8x256xf32>
    %1112 = arith.subf %1110, %1111 : vector<8x256xf32>
    %1113 = arith.mulf %1109, %1109 : vector<8x256xf32>
    %1114 = arith.mulf %1112, %1112 : vector<8x256xf32>
    %1115 = arith.addf %1113, %1114 : vector<8x256xf32>
    %c0_787 = arith.constant 0 : index
    %c160_788 = arith.constant 160 : index
    %c0_789 = arith.constant 0 : index
    %1116 = vector.load %arg6[%c0_787, %c160_788, %c0_789] : memref<1x256x1xf32, #tpu.memory_space<vmem>>, vector<1x8x1xf32>
    %1117 = vector.shape_cast %1116 : vector<1x8x1xf32> to vector<8x1xf32>
    %1118 = vector.shape_cast %1117 : vector<8x1xf32> to vector<8x1xf32>
    %1119 = vector.broadcast %1118 : vector<8x1xf32> to vector<8x256xf32>
    %cst_790 = arith.constant 5.000000e-01 : f32
    %1120 = vector.broadcast %cst_790 : f32 to vector<8x256xf32>
    %1121 = arith.cmpf ogt, %1119, %1120 : vector<8x256xf32>
    %c0_791 = arith.constant 0 : index
    %c160_792 = arith.constant 160 : index
    %c0_793 = arith.constant 0 : index
    %1122 = vector.load %arg7[%c0_791, %c160_792, %c0_793] : memref<1x256x1xf32, #tpu.memory_space<vmem>>, vector<1x8x1xf32>
    %1123 = vector.shape_cast %1122 : vector<1x8x1xf32> to vector<8x1xf32>
    %1124 = vector.shape_cast %1123 : vector<8x1xf32> to vector<8x1xf32>
    %1125 = vector.broadcast %1124 : vector<8x1xf32> to vector<8x256xf32>
    %cst_794 = arith.constant 5.000000e-01 : f32
    %1126 = vector.broadcast %cst_794 : f32 to vector<8x256xf32>
    %1127 = arith.cmpf ogt, %1125, %1126 : vector<8x256xf32>
    %c0_795 = arith.constant 0 : index
    %c0_796 = arith.constant 0 : index
    %c0_797 = arith.constant 0 : index
    %1128 = vector.load %arg10[%c0_795, %c0_796, %c0_797] : memref<1x8x256xf32, #tpu.memory_space<vmem>>, vector<1x8x256xf32>
    %1129 = vector.shape_cast %1128 : vector<1x8x256xf32> to vector<8x256xf32>
    %cst_798 = arith.constant 1.000000e+30 : f32
    %1130 = vector.broadcast %cst_798 : f32 to vector<8x256xf32>
    %1131 = arith.select %1121, %1130, %1115 : vector<8x256xi1>, vector<8x256xf32>
    %1132 = arith.minimumf %1129, %1131 : vector<8x256xf32>
    %c0_799 = arith.constant 0 : index
    %c0_800 = arith.constant 0 : index
    %c0_801 = arith.constant 0 : index
    %1133 = vector.load %arg10[%c0_799, %c0_800, %c0_801] : memref<1x8x256xf32, #tpu.memory_space<vmem>>, vector<1x8x256xf32>
    %1134 = vector.shape_cast %1133 : vector<1x8x256xf32> to vector<8x256xf32>
    %1135 = vector.shape_cast %1132 : vector<8x256xf32> to vector<1x8x256xf32>
    tpu.vector_store %arg10[%c0_799, %c0_800, %c0_801], %1135 {strides = array<i32>} : memref<1x8x256xf32, #tpu.memory_space<vmem>>, vector<1x8x256xf32>,
    %c0_802 = arith.constant 0 : index
    %c0_803 = arith.constant 0 : index
    %c0_804 = arith.constant 0 : index
    %1136 = vector.load %arg11[%c0_802, %c0_803, %c0_804] : memref<1x8x256xf32, #tpu.memory_space<vmem>>, vector<1x8x256xf32>
    %1137 = vector.shape_cast %1136 : vector<1x8x256xf32> to vector<8x256xf32>
    %cst_805 = arith.constant 1.000000e+30 : f32
    %1138 = vector.broadcast %cst_805 : f32 to vector<8x256xf32>
    %1139 = arith.select %1121, %1115, %1138 : vector<8x256xi1>, vector<8x256xf32>
    %1140 = arith.minimumf %1137, %1139 : vector<8x256xf32>
    %c0_806 = arith.constant 0 : index
    %c0_807 = arith.constant 0 : index
    %c0_808 = arith.constant 0 : index
    %1141 = vector.load %arg11[%c0_806, %c0_807, %c0_808] : memref<1x8x256xf32, #tpu.memory_space<vmem>>, vector<1x8x256xf32>
    %1142 = vector.shape_cast %1141 : vector<1x8x256xf32> to vector<8x256xf32>
    %1143 = vector.shape_cast %1140 : vector<8x256xf32> to vector<1x8x256xf32>
    tpu.vector_store %arg11[%c0_806, %c0_807, %c0_808], %1143 {strides = array<i32>} : memref<1x8x256xf32, #tpu.memory_space<vmem>>, vector<1x8x256xf32>,
    %c0_809 = arith.constant 0 : index
    %c0_810 = arith.constant 0 : index
    %c0_811 = arith.constant 0 : index
    %1144 = vector.load %arg12[%c0_809, %c0_810, %c0_811] : memref<1x8x256xf32, #tpu.memory_space<vmem>>, vector<1x8x256xf32>
    %1145 = vector.shape_cast %1144 : vector<1x8x256xf32> to vector<8x256xf32>
    %cst_812 = arith.constant 1.000000e+30 : f32
    %1146 = vector.broadcast %cst_812 : f32 to vector<8x256xf32>
    %1147 = arith.select %1127, %1146, %1115 : vector<8x256xi1>, vector<8x256xf32>
    %1148 = arith.minimumf %1145, %1147 : vector<8x256xf32>
    %c0_813 = arith.constant 0 : index
    %c0_814 = arith.constant 0 : index
    %c0_815 = arith.constant 0 : index
    %1149 = vector.load %arg12[%c0_813, %c0_814, %c0_815] : memref<1x8x256xf32, #tpu.memory_space<vmem>>, vector<1x8x256xf32>
    %1150 = vector.shape_cast %1149 : vector<1x8x256xf32> to vector<8x256xf32>
    %1151 = vector.shape_cast %1148 : vector<8x256xf32> to vector<1x8x256xf32>
    tpu.vector_store %arg12[%c0_813, %c0_814, %c0_815], %1151 {strides = array<i32>} : memref<1x8x256xf32, #tpu.memory_space<vmem>>, vector<1x8x256xf32>,
    %c0_816 = arith.constant 0 : index
    %c0_817 = arith.constant 0 : index
    %c0_818 = arith.constant 0 : index
    %1152 = vector.load %arg13[%c0_816, %c0_817, %c0_818] : memref<1x8x256xf32, #tpu.memory_space<vmem>>, vector<1x8x256xf32>
    %1153 = vector.shape_cast %1152 : vector<1x8x256xf32> to vector<8x256xf32>
    %cst_819 = arith.constant 1.000000e+30 : f32
    %1154 = vector.broadcast %cst_819 : f32 to vector<8x256xf32>
    %1155 = arith.select %1127, %1115, %1154 : vector<8x256xi1>, vector<8x256xf32>
    %1156 = arith.minimumf %1153, %1155 : vector<8x256xf32>
    %c0_820 = arith.constant 0 : index
    %c0_821 = arith.constant 0 : index
    %c0_822 = arith.constant 0 : index
    %1157 = vector.load %arg13[%c0_820, %c0_821, %c0_822] : memref<1x8x256xf32, #tpu.memory_space<vmem>>, vector<1x8x256xf32>
    %1158 = vector.shape_cast %1157 : vector<1x8x256xf32> to vector<8x256xf32>
    %1159 = vector.shape_cast %1156 : vector<8x256xf32> to vector<1x8x256xf32>
    tpu.vector_store %arg13[%c0_820, %c0_821, %c0_822], %1159 {strides = array<i32>} : memref<1x8x256xf32, #tpu.memory_space<vmem>>, vector<1x8x256xf32>,
    %c168 = arith.constant 168 : index
    %c0_823 = arith.constant 0 : index
    %1160 = vector.load %arg2[%c168, %c0_823] : memref<256x1xf32, #tpu.memory_space<vmem>>, vector<8x1xf32>
    %c168_824 = arith.constant 168 : index
    %c0_825 = arith.constant 0 : index
    %1161 = vector.load %arg3[%c168_824, %c0_825] : memref<256x1xf32, #tpu.memory_space<vmem>>, vector<8x1xf32>
    %1162 = vector.broadcast %1160 : vector<8x1xf32> to vector<8x256xf32>
    %1163 = vector.broadcast %3 : vector<1x256xf32> to vector<8x256xf32>
    %1164 = arith.subf %1162, %1163 : vector<8x256xf32>
    %1165 = vector.broadcast %1161 : vector<8x1xf32> to vector<8x256xf32>
    %1166 = vector.broadcast %4 : vector<1x256xf32> to vector<8x256xf32>
    %1167 = arith.subf %1165, %1166 : vector<8x256xf32>
    %1168 = arith.mulf %1164, %1164 : vector<8x256xf32>
    %1169 = arith.mulf %1167, %1167 : vector<8x256xf32>
    %1170 = arith.addf %1168, %1169 : vector<8x256xf32>
    %c0_826 = arith.constant 0 : index
    %c168_827 = arith.constant 168 : index
    %c0_828 = arith.constant 0 : index
    %1171 = vector.load %arg6[%c0_826, %c168_827, %c0_828] : memref<1x256x1xf32, #tpu.memory_space<vmem>>, vector<1x8x1xf32>
    %1172 = vector.shape_cast %1171 : vector<1x8x1xf32> to vector<8x1xf32>
    %1173 = vector.shape_cast %1172 : vector<8x1xf32> to vector<8x1xf32>
    %1174 = vector.broadcast %1173 : vector<8x1xf32> to vector<8x256xf32>
    %cst_829 = arith.constant 5.000000e-01 : f32
    %1175 = vector.broadcast %cst_829 : f32 to vector<8x256xf32>
    %1176 = arith.cmpf ogt, %1174, %1175 : vector<8x256xf32>
    %c0_830 = arith.constant 0 : index
    %c168_831 = arith.constant 168 : index
    %c0_832 = arith.constant 0 : index
    %1177 = vector.load %arg7[%c0_830, %c168_831, %c0_832] : memref<1x256x1xf32, #tpu.memory_space<vmem>>, vector<1x8x1xf32>
    %1178 = vector.shape_cast %1177 : vector<1x8x1xf32> to vector<8x1xf32>
    %1179 = vector.shape_cast %1178 : vector<8x1xf32> to vector<8x1xf32>
    %1180 = vector.broadcast %1179 : vector<8x1xf32> to vector<8x256xf32>
    %cst_833 = arith.constant 5.000000e-01 : f32
    %1181 = vector.broadcast %cst_833 : f32 to vector<8x256xf32>
    %1182 = arith.cmpf ogt, %1180, %1181 : vector<8x256xf32>
    %c0_834 = arith.constant 0 : index
    %c0_835 = arith.constant 0 : index
    %c0_836 = arith.constant 0 : index
    %1183 = vector.load %arg10[%c0_834, %c0_835, %c0_836] : memref<1x8x256xf32, #tpu.memory_space<vmem>>, vector<1x8x256xf32>
    %1184 = vector.shape_cast %1183 : vector<1x8x256xf32> to vector<8x256xf32>
    %cst_837 = arith.constant 1.000000e+30 : f32
    %1185 = vector.broadcast %cst_837 : f32 to vector<8x256xf32>
    %1186 = arith.select %1176, %1185, %1170 : vector<8x256xi1>, vector<8x256xf32>
    %1187 = arith.minimumf %1184, %1186 : vector<8x256xf32>
    %c0_838 = arith.constant 0 : index
    %c0_839 = arith.constant 0 : index
    %c0_840 = arith.constant 0 : index
    %1188 = vector.load %arg10[%c0_838, %c0_839, %c0_840] : memref<1x8x256xf32, #tpu.memory_space<vmem>>, vector<1x8x256xf32>
    %1189 = vector.shape_cast %1188 : vector<1x8x256xf32> to vector<8x256xf32>
    %1190 = vector.shape_cast %1187 : vector<8x256xf32> to vector<1x8x256xf32>
    tpu.vector_store %arg10[%c0_838, %c0_839, %c0_840], %1190 {strides = array<i32>} : memref<1x8x256xf32, #tpu.memory_space<vmem>>, vector<1x8x256xf32>,
    %c0_841 = arith.constant 0 : index
    %c0_842 = arith.constant 0 : index
    %c0_843 = arith.constant 0 : index
    %1191 = vector.load %arg11[%c0_841, %c0_842, %c0_843] : memref<1x8x256xf32, #tpu.memory_space<vmem>>, vector<1x8x256xf32>
    %1192 = vector.shape_cast %1191 : vector<1x8x256xf32> to vector<8x256xf32>
    %cst_844 = arith.constant 1.000000e+30 : f32
    %1193 = vector.broadcast %cst_844 : f32 to vector<8x256xf32>
    %1194 = arith.select %1176, %1170, %1193 : vector<8x256xi1>, vector<8x256xf32>
    %1195 = arith.minimumf %1192, %1194 : vector<8x256xf32>
    %c0_845 = arith.constant 0 : index
    %c0_846 = arith.constant 0 : index
    %c0_847 = arith.constant 0 : index
    %1196 = vector.load %arg11[%c0_845, %c0_846, %c0_847] : memref<1x8x256xf32, #tpu.memory_space<vmem>>, vector<1x8x256xf32>
    %1197 = vector.shape_cast %1196 : vector<1x8x256xf32> to vector<8x256xf32>
    %1198 = vector.shape_cast %1195 : vector<8x256xf32> to vector<1x8x256xf32>
    tpu.vector_store %arg11[%c0_845, %c0_846, %c0_847], %1198 {strides = array<i32>} : memref<1x8x256xf32, #tpu.memory_space<vmem>>, vector<1x8x256xf32>,
    %c0_848 = arith.constant 0 : index
    %c0_849 = arith.constant 0 : index
    %c0_850 = arith.constant 0 : index
    %1199 = vector.load %arg12[%c0_848, %c0_849, %c0_850] : memref<1x8x256xf32, #tpu.memory_space<vmem>>, vector<1x8x256xf32>
    %1200 = vector.shape_cast %1199 : vector<1x8x256xf32> to vector<8x256xf32>
    %cst_851 = arith.constant 1.000000e+30 : f32
    %1201 = vector.broadcast %cst_851 : f32 to vector<8x256xf32>
    %1202 = arith.select %1182, %1201, %1170 : vector<8x256xi1>, vector<8x256xf32>
    %1203 = arith.minimumf %1200, %1202 : vector<8x256xf32>
    %c0_852 = arith.constant 0 : index
    %c0_853 = arith.constant 0 : index
    %c0_854 = arith.constant 0 : index
    %1204 = vector.load %arg12[%c0_852, %c0_853, %c0_854] : memref<1x8x256xf32, #tpu.memory_space<vmem>>, vector<1x8x256xf32>
    %1205 = vector.shape_cast %1204 : vector<1x8x256xf32> to vector<8x256xf32>
    %1206 = vector.shape_cast %1203 : vector<8x256xf32> to vector<1x8x256xf32>
    tpu.vector_store %arg12[%c0_852, %c0_853, %c0_854], %1206 {strides = array<i32>} : memref<1x8x256xf32, #tpu.memory_space<vmem>>, vector<1x8x256xf32>,
    %c0_855 = arith.constant 0 : index
    %c0_856 = arith.constant 0 : index
    %c0_857 = arith.constant 0 : index
    %1207 = vector.load %arg13[%c0_855, %c0_856, %c0_857] : memref<1x8x256xf32, #tpu.memory_space<vmem>>, vector<1x8x256xf32>
    %1208 = vector.shape_cast %1207 : vector<1x8x256xf32> to vector<8x256xf32>
    %cst_858 = arith.constant 1.000000e+30 : f32
    %1209 = vector.broadcast %cst_858 : f32 to vector<8x256xf32>
    %1210 = arith.select %1182, %1170, %1209 : vector<8x256xi1>, vector<8x256xf32>
    %1211 = arith.minimumf %1208, %1210 : vector<8x256xf32>
    %c0_859 = arith.constant 0 : index
    %c0_860 = arith.constant 0 : index
    %c0_861 = arith.constant 0 : index
    %1212 = vector.load %arg13[%c0_859, %c0_860, %c0_861] : memref<1x8x256xf32, #tpu.memory_space<vmem>>, vector<1x8x256xf32>
    %1213 = vector.shape_cast %1212 : vector<1x8x256xf32> to vector<8x256xf32>
    %1214 = vector.shape_cast %1211 : vector<8x256xf32> to vector<1x8x256xf32>
    tpu.vector_store %arg13[%c0_859, %c0_860, %c0_861], %1214 {strides = array<i32>} : memref<1x8x256xf32, #tpu.memory_space<vmem>>, vector<1x8x256xf32>,
    %c176 = arith.constant 176 : index
    %c0_862 = arith.constant 0 : index
    %1215 = vector.load %arg2[%c176, %c0_862] : memref<256x1xf32, #tpu.memory_space<vmem>>, vector<8x1xf32>
    %c176_863 = arith.constant 176 : index
    %c0_864 = arith.constant 0 : index
    %1216 = vector.load %arg3[%c176_863, %c0_864] : memref<256x1xf32, #tpu.memory_space<vmem>>, vector<8x1xf32>
    %1217 = vector.broadcast %1215 : vector<8x1xf32> to vector<8x256xf32>
    %1218 = vector.broadcast %3 : vector<1x256xf32> to vector<8x256xf32>
    %1219 = arith.subf %1217, %1218 : vector<8x256xf32>
    %1220 = vector.broadcast %1216 : vector<8x1xf32> to vector<8x256xf32>
    %1221 = vector.broadcast %4 : vector<1x256xf32> to vector<8x256xf32>
    %1222 = arith.subf %1220, %1221 : vector<8x256xf32>
    %1223 = arith.mulf %1219, %1219 : vector<8x256xf32>
    %1224 = arith.mulf %1222, %1222 : vector<8x256xf32>
    %1225 = arith.addf %1223, %1224 : vector<8x256xf32>
    %c0_865 = arith.constant 0 : index
    %c176_866 = arith.constant 176 : index
    %c0_867 = arith.constant 0 : index
    %1226 = vector.load %arg6[%c0_865, %c176_866, %c0_867] : memref<1x256x1xf32, #tpu.memory_space<vmem>>, vector<1x8x1xf32>
    %1227 = vector.shape_cast %1226 : vector<1x8x1xf32> to vector<8x1xf32>
    %1228 = vector.shape_cast %1227 : vector<8x1xf32> to vector<8x1xf32>
    %1229 = vector.broadcast %1228 : vector<8x1xf32> to vector<8x256xf32>
    %cst_868 = arith.constant 5.000000e-01 : f32
    %1230 = vector.broadcast %cst_868 : f32 to vector<8x256xf32>
    %1231 = arith.cmpf ogt, %1229, %1230 : vector<8x256xf32>
    %c0_869 = arith.constant 0 : index
    %c176_870 = arith.constant 176 : index
    %c0_871 = arith.constant 0 : index
    %1232 = vector.load %arg7[%c0_869, %c176_870, %c0_871] : memref<1x256x1xf32, #tpu.memory_space<vmem>>, vector<1x8x1xf32>
    %1233 = vector.shape_cast %1232 : vector<1x8x1xf32> to vector<8x1xf32>
    %1234 = vector.shape_cast %1233 : vector<8x1xf32> to vector<8x1xf32>
    %1235 = vector.broadcast %1234 : vector<8x1xf32> to vector<8x256xf32>
    %cst_872 = arith.constant 5.000000e-01 : f32
    %1236 = vector.broadcast %cst_872 : f32 to vector<8x256xf32>
    %1237 = arith.cmpf ogt, %1235, %1236 : vector<8x256xf32>
    %c0_873 = arith.constant 0 : index
    %c0_874 = arith.constant 0 : index
    %c0_875 = arith.constant 0 : index
    %1238 = vector.load %arg10[%c0_873, %c0_874, %c0_875] : memref<1x8x256xf32, #tpu.memory_space<vmem>>, vector<1x8x256xf32>
    %1239 = vector.shape_cast %1238 : vector<1x8x256xf32> to vector<8x256xf32>
    %cst_876 = arith.constant 1.000000e+30 : f32
    %1240 = vector.broadcast %cst_876 : f32 to vector<8x256xf32>
    %1241 = arith.select %1231, %1240, %1225 : vector<8x256xi1>, vector<8x256xf32>
    %1242 = arith.minimumf %1239, %1241 : vector<8x256xf32>
    %c0_877 = arith.constant 0 : index
    %c0_878 = arith.constant 0 : index
    %c0_879 = arith.constant 0 : index
    %1243 = vector.load %arg10[%c0_877, %c0_878, %c0_879] : memref<1x8x256xf32, #tpu.memory_space<vmem>>, vector<1x8x256xf32>
    %1244 = vector.shape_cast %1243 : vector<1x8x256xf32> to vector<8x256xf32>
    %1245 = vector.shape_cast %1242 : vector<8x256xf32> to vector<1x8x256xf32>
    tpu.vector_store %arg10[%c0_877, %c0_878, %c0_879], %1245 {strides = array<i32>} : memref<1x8x256xf32, #tpu.memory_space<vmem>>, vector<1x8x256xf32>,
    %c0_880 = arith.constant 0 : index
    %c0_881 = arith.constant 0 : index
    %c0_882 = arith.constant 0 : index
    %1246 = vector.load %arg11[%c0_880, %c0_881, %c0_882] : memref<1x8x256xf32, #tpu.memory_space<vmem>>, vector<1x8x256xf32>
    %1247 = vector.shape_cast %1246 : vector<1x8x256xf32> to vector<8x256xf32>
    %cst_883 = arith.constant 1.000000e+30 : f32
    %1248 = vector.broadcast %cst_883 : f32 to vector<8x256xf32>
    %1249 = arith.select %1231, %1225, %1248 : vector<8x256xi1>, vector<8x256xf32>
    %1250 = arith.minimumf %1247, %1249 : vector<8x256xf32>
    %c0_884 = arith.constant 0 : index
    %c0_885 = arith.constant 0 : index
    %c0_886 = arith.constant 0 : index
    %1251 = vector.load %arg11[%c0_884, %c0_885, %c0_886] : memref<1x8x256xf32, #tpu.memory_space<vmem>>, vector<1x8x256xf32>
    %1252 = vector.shape_cast %1251 : vector<1x8x256xf32> to vector<8x256xf32>
    %1253 = vector.shape_cast %1250 : vector<8x256xf32> to vector<1x8x256xf32>
    tpu.vector_store %arg11[%c0_884, %c0_885, %c0_886], %1253 {strides = array<i32>} : memref<1x8x256xf32, #tpu.memory_space<vmem>>, vector<1x8x256xf32>,
    %c0_887 = arith.constant 0 : index
    %c0_888 = arith.constant 0 : index
    %c0_889 = arith.constant 0 : index
    %1254 = vector.load %arg12[%c0_887, %c0_888, %c0_889] : memref<1x8x256xf32, #tpu.memory_space<vmem>>, vector<1x8x256xf32>
    %1255 = vector.shape_cast %1254 : vector<1x8x256xf32> to vector<8x256xf32>
    %cst_890 = arith.constant 1.000000e+30 : f32
    %1256 = vector.broadcast %cst_890 : f32 to vector<8x256xf32>
    %1257 = arith.select %1237, %1256, %1225 : vector<8x256xi1>, vector<8x256xf32>
    %1258 = arith.minimumf %1255, %1257 : vector<8x256xf32>
    %c0_891 = arith.constant 0 : index
    %c0_892 = arith.constant 0 : index
    %c0_893 = arith.constant 0 : index
    %1259 = vector.load %arg12[%c0_891, %c0_892, %c0_893] : memref<1x8x256xf32, #tpu.memory_space<vmem>>, vector<1x8x256xf32>
    %1260 = vector.shape_cast %1259 : vector<1x8x256xf32> to vector<8x256xf32>
    %1261 = vector.shape_cast %1258 : vector<8x256xf32> to vector<1x8x256xf32>
    tpu.vector_store %arg12[%c0_891, %c0_892, %c0_893], %1261 {strides = array<i32>} : memref<1x8x256xf32, #tpu.memory_space<vmem>>, vector<1x8x256xf32>,
    %c0_894 = arith.constant 0 : index
    %c0_895 = arith.constant 0 : index
    %c0_896 = arith.constant 0 : index
    %1262 = vector.load %arg13[%c0_894, %c0_895, %c0_896] : memref<1x8x256xf32, #tpu.memory_space<vmem>>, vector<1x8x256xf32>
    %1263 = vector.shape_cast %1262 : vector<1x8x256xf32> to vector<8x256xf32>
    %cst_897 = arith.constant 1.000000e+30 : f32
    %1264 = vector.broadcast %cst_897 : f32 to vector<8x256xf32>
    %1265 = arith.select %1237, %1225, %1264 : vector<8x256xi1>, vector<8x256xf32>
    %1266 = arith.minimumf %1263, %1265 : vector<8x256xf32>
    %c0_898 = arith.constant 0 : index
    %c0_899 = arith.constant 0 : index
    %c0_900 = arith.constant 0 : index
    %1267 = vector.load %arg13[%c0_898, %c0_899, %c0_900] : memref<1x8x256xf32, #tpu.memory_space<vmem>>, vector<1x8x256xf32>
    %1268 = vector.shape_cast %1267 : vector<1x8x256xf32> to vector<8x256xf32>
    %1269 = vector.shape_cast %1266 : vector<8x256xf32> to vector<1x8x256xf32>
    tpu.vector_store %arg13[%c0_898, %c0_899, %c0_900], %1269 {strides = array<i32>} : memref<1x8x256xf32, #tpu.memory_space<vmem>>, vector<1x8x256xf32>,
    %c184 = arith.constant 184 : index
    %c0_901 = arith.constant 0 : index
    %1270 = vector.load %arg2[%c184, %c0_901] : memref<256x1xf32, #tpu.memory_space<vmem>>, vector<8x1xf32>
    %c184_902 = arith.constant 184 : index
    %c0_903 = arith.constant 0 : index
    %1271 = vector.load %arg3[%c184_902, %c0_903] : memref<256x1xf32, #tpu.memory_space<vmem>>, vector<8x1xf32>
    %1272 = vector.broadcast %1270 : vector<8x1xf32> to vector<8x256xf32>
    %1273 = vector.broadcast %3 : vector<1x256xf32> to vector<8x256xf32>
    %1274 = arith.subf %1272, %1273 : vector<8x256xf32>
    %1275 = vector.broadcast %1271 : vector<8x1xf32> to vector<8x256xf32>
    %1276 = vector.broadcast %4 : vector<1x256xf32> to vector<8x256xf32>
    %1277 = arith.subf %1275, %1276 : vector<8x256xf32>
    %1278 = arith.mulf %1274, %1274 : vector<8x256xf32>
    %1279 = arith.mulf %1277, %1277 : vector<8x256xf32>
    %1280 = arith.addf %1278, %1279 : vector<8x256xf32>
    %c0_904 = arith.constant 0 : index
    %c184_905 = arith.constant 184 : index
    %c0_906 = arith.constant 0 : index
    %1281 = vector.load %arg6[%c0_904, %c184_905, %c0_906] : memref<1x256x1xf32, #tpu.memory_space<vmem>>, vector<1x8x1xf32>
    %1282 = vector.shape_cast %1281 : vector<1x8x1xf32> to vector<8x1xf32>
    %1283 = vector.shape_cast %1282 : vector<8x1xf32> to vector<8x1xf32>
    %1284 = vector.broadcast %1283 : vector<8x1xf32> to vector<8x256xf32>
    %cst_907 = arith.constant 5.000000e-01 : f32
    %1285 = vector.broadcast %cst_907 : f32 to vector<8x256xf32>
    %1286 = arith.cmpf ogt, %1284, %1285 : vector<8x256xf32>
    %c0_908 = arith.constant 0 : index
    %c184_909 = arith.constant 184 : index
    %c0_910 = arith.constant 0 : index
    %1287 = vector.load %arg7[%c0_908, %c184_909, %c0_910] : memref<1x256x1xf32, #tpu.memory_space<vmem>>, vector<1x8x1xf32>
    %1288 = vector.shape_cast %1287 : vector<1x8x1xf32> to vector<8x1xf32>
    %1289 = vector.shape_cast %1288 : vector<8x1xf32> to vector<8x1xf32>
    %1290 = vector.broadcast %1289 : vector<8x1xf32> to vector<8x256xf32>
    %cst_911 = arith.constant 5.000000e-01 : f32
    %1291 = vector.broadcast %cst_911 : f32 to vector<8x256xf32>
    %1292 = arith.cmpf ogt, %1290, %1291 : vector<8x256xf32>
    %c0_912 = arith.constant 0 : index
    %c0_913 = arith.constant 0 : index
    %c0_914 = arith.constant 0 : index
    %1293 = vector.load %arg10[%c0_912, %c0_913, %c0_914] : memref<1x8x256xf32, #tpu.memory_space<vmem>>, vector<1x8x256xf32>
    %1294 = vector.shape_cast %1293 : vector<1x8x256xf32> to vector<8x256xf32>
    %cst_915 = arith.constant 1.000000e+30 : f32
    %1295 = vector.broadcast %cst_915 : f32 to vector<8x256xf32>
    %1296 = arith.select %1286, %1295, %1280 : vector<8x256xi1>, vector<8x256xf32>
    %1297 = arith.minimumf %1294, %1296 : vector<8x256xf32>
    %c0_916 = arith.constant 0 : index
    %c0_917 = arith.constant 0 : index
    %c0_918 = arith.constant 0 : index
    %1298 = vector.load %arg10[%c0_916, %c0_917, %c0_918] : memref<1x8x256xf32, #tpu.memory_space<vmem>>, vector<1x8x256xf32>
    %1299 = vector.shape_cast %1298 : vector<1x8x256xf32> to vector<8x256xf32>
    %1300 = vector.shape_cast %1297 : vector<8x256xf32> to vector<1x8x256xf32>
    tpu.vector_store %arg10[%c0_916, %c0_917, %c0_918], %1300 {strides = array<i32>} : memref<1x8x256xf32, #tpu.memory_space<vmem>>, vector<1x8x256xf32>,
    %c0_919 = arith.constant 0 : index
    %c0_920 = arith.constant 0 : index
    %c0_921 = arith.constant 0 : index
    %1301 = vector.load %arg11[%c0_919, %c0_920, %c0_921] : memref<1x8x256xf32, #tpu.memory_space<vmem>>, vector<1x8x256xf32>
    %1302 = vector.shape_cast %1301 : vector<1x8x256xf32> to vector<8x256xf32>
    %cst_922 = arith.constant 1.000000e+30 : f32
    %1303 = vector.broadcast %cst_922 : f32 to vector<8x256xf32>
    %1304 = arith.select %1286, %1280, %1303 : vector<8x256xi1>, vector<8x256xf32>
    %1305 = arith.minimumf %1302, %1304 : vector<8x256xf32>
    %c0_923 = arith.constant 0 : index
    %c0_924 = arith.constant 0 : index
    %c0_925 = arith.constant 0 : index
    %1306 = vector.load %arg11[%c0_923, %c0_924, %c0_925] : memref<1x8x256xf32, #tpu.memory_space<vmem>>, vector<1x8x256xf32>
    %1307 = vector.shape_cast %1306 : vector<1x8x256xf32> to vector<8x256xf32>
    %1308 = vector.shape_cast %1305 : vector<8x256xf32> to vector<1x8x256xf32>
    tpu.vector_store %arg11[%c0_923, %c0_924, %c0_925], %1308 {strides = array<i32>} : memref<1x8x256xf32, #tpu.memory_space<vmem>>, vector<1x8x256xf32>,
    %c0_926 = arith.constant 0 : index
    %c0_927 = arith.constant 0 : index
    %c0_928 = arith.constant 0 : index
    %1309 = vector.load %arg12[%c0_926, %c0_927, %c0_928] : memref<1x8x256xf32, #tpu.memory_space<vmem>>, vector<1x8x256xf32>
    %1310 = vector.shape_cast %1309 : vector<1x8x256xf32> to vector<8x256xf32>
    %cst_929 = arith.constant 1.000000e+30 : f32
    %1311 = vector.broadcast %cst_929 : f32 to vector<8x256xf32>
    %1312 = arith.select %1292, %1311, %1280 : vector<8x256xi1>, vector<8x256xf32>
    %1313 = arith.minimumf %1310, %1312 : vector<8x256xf32>
    %c0_930 = arith.constant 0 : index
    %c0_931 = arith.constant 0 : index
    %c0_932 = arith.constant 0 : index
    %1314 = vector.load %arg12[%c0_930, %c0_931, %c0_932] : memref<1x8x256xf32, #tpu.memory_space<vmem>>, vector<1x8x256xf32>
    %1315 = vector.shape_cast %1314 : vector<1x8x256xf32> to vector<8x256xf32>
    %1316 = vector.shape_cast %1313 : vector<8x256xf32> to vector<1x8x256xf32>
    tpu.vector_store %arg12[%c0_930, %c0_931, %c0_932], %1316 {strides = array<i32>} : memref<1x8x256xf32, #tpu.memory_space<vmem>>, vector<1x8x256xf32>,
    %c0_933 = arith.constant 0 : index
    %c0_934 = arith.constant 0 : index
    %c0_935 = arith.constant 0 : index
    %1317 = vector.load %arg13[%c0_933, %c0_934, %c0_935] : memref<1x8x256xf32, #tpu.memory_space<vmem>>, vector<1x8x256xf32>
    %1318 = vector.shape_cast %1317 : vector<1x8x256xf32> to vector<8x256xf32>
    %cst_936 = arith.constant 1.000000e+30 : f32
    %1319 = vector.broadcast %cst_936 : f32 to vector<8x256xf32>
    %1320 = arith.select %1292, %1280, %1319 : vector<8x256xi1>, vector<8x256xf32>
    %1321 = arith.minimumf %1318, %1320 : vector<8x256xf32>
    %c0_937 = arith.constant 0 : index
    %c0_938 = arith.constant 0 : index
    %c0_939 = arith.constant 0 : index
    %1322 = vector.load %arg13[%c0_937, %c0_938, %c0_939] : memref<1x8x256xf32, #tpu.memory_space<vmem>>, vector<1x8x256xf32>
    %1323 = vector.shape_cast %1322 : vector<1x8x256xf32> to vector<8x256xf32>
    %1324 = vector.shape_cast %1321 : vector<8x256xf32> to vector<1x8x256xf32>
    tpu.vector_store %arg13[%c0_937, %c0_938, %c0_939], %1324 {strides = array<i32>} : memref<1x8x256xf32, #tpu.memory_space<vmem>>, vector<1x8x256xf32>,
    %c192 = arith.constant 192 : index
    %c0_940 = arith.constant 0 : index
    %1325 = vector.load %arg2[%c192, %c0_940] : memref<256x1xf32, #tpu.memory_space<vmem>>, vector<8x1xf32>
    %c192_941 = arith.constant 192 : index
    %c0_942 = arith.constant 0 : index
    %1326 = vector.load %arg3[%c192_941, %c0_942] : memref<256x1xf32, #tpu.memory_space<vmem>>, vector<8x1xf32>
    %1327 = vector.broadcast %1325 : vector<8x1xf32> to vector<8x256xf32>
    %1328 = vector.broadcast %3 : vector<1x256xf32> to vector<8x256xf32>
    %1329 = arith.subf %1327, %1328 : vector<8x256xf32>
    %1330 = vector.broadcast %1326 : vector<8x1xf32> to vector<8x256xf32>
    %1331 = vector.broadcast %4 : vector<1x256xf32> to vector<8x256xf32>
    %1332 = arith.subf %1330, %1331 : vector<8x256xf32>
    %1333 = arith.mulf %1329, %1329 : vector<8x256xf32>
    %1334 = arith.mulf %1332, %1332 : vector<8x256xf32>
    %1335 = arith.addf %1333, %1334 : vector<8x256xf32>
    %c0_943 = arith.constant 0 : index
    %c192_944 = arith.constant 192 : index
    %c0_945 = arith.constant 0 : index
    %1336 = vector.load %arg6[%c0_943, %c192_944, %c0_945] : memref<1x256x1xf32, #tpu.memory_space<vmem>>, vector<1x8x1xf32>
    %1337 = vector.shape_cast %1336 : vector<1x8x1xf32> to vector<8x1xf32>
    %1338 = vector.shape_cast %1337 : vector<8x1xf32> to vector<8x1xf32>
    %1339 = vector.broadcast %1338 : vector<8x1xf32> to vector<8x256xf32>
    %cst_946 = arith.constant 5.000000e-01 : f32
    %1340 = vector.broadcast %cst_946 : f32 to vector<8x256xf32>
    %1341 = arith.cmpf ogt, %1339, %1340 : vector<8x256xf32>
    %c0_947 = arith.constant 0 : index
    %c192_948 = arith.constant 192 : index
    %c0_949 = arith.constant 0 : index
    %1342 = vector.load %arg7[%c0_947, %c192_948, %c0_949] : memref<1x256x1xf32, #tpu.memory_space<vmem>>, vector<1x8x1xf32>
    %1343 = vector.shape_cast %1342 : vector<1x8x1xf32> to vector<8x1xf32>
    %1344 = vector.shape_cast %1343 : vector<8x1xf32> to vector<8x1xf32>
    %1345 = vector.broadcast %1344 : vector<8x1xf32> to vector<8x256xf32>
    %cst_950 = arith.constant 5.000000e-01 : f32
    %1346 = vector.broadcast %cst_950 : f32 to vector<8x256xf32>
    %1347 = arith.cmpf ogt, %1345, %1346 : vector<8x256xf32>
    %c0_951 = arith.constant 0 : index
    %c0_952 = arith.constant 0 : index
    %c0_953 = arith.constant 0 : index
    %1348 = vector.load %arg10[%c0_951, %c0_952, %c0_953] : memref<1x8x256xf32, #tpu.memory_space<vmem>>, vector<1x8x256xf32>
    %1349 = vector.shape_cast %1348 : vector<1x8x256xf32> to vector<8x256xf32>
    %cst_954 = arith.constant 1.000000e+30 : f32
    %1350 = vector.broadcast %cst_954 : f32 to vector<8x256xf32>
    %1351 = arith.select %1341, %1350, %1335 : vector<8x256xi1>, vector<8x256xf32>
    %1352 = arith.minimumf %1349, %1351 : vector<8x256xf32>
    %c0_955 = arith.constant 0 : index
    %c0_956 = arith.constant 0 : index
    %c0_957 = arith.constant 0 : index
    %1353 = vector.load %arg10[%c0_955, %c0_956, %c0_957] : memref<1x8x256xf32, #tpu.memory_space<vmem>>, vector<1x8x256xf32>
    %1354 = vector.shape_cast %1353 : vector<1x8x256xf32> to vector<8x256xf32>
    %1355 = vector.shape_cast %1352 : vector<8x256xf32> to vector<1x8x256xf32>
    tpu.vector_store %arg10[%c0_955, %c0_956, %c0_957], %1355 {strides = array<i32>} : memref<1x8x256xf32, #tpu.memory_space<vmem>>, vector<1x8x256xf32>,
    %c0_958 = arith.constant 0 : index
    %c0_959 = arith.constant 0 : index
    %c0_960 = arith.constant 0 : index
    %1356 = vector.load %arg11[%c0_958, %c0_959, %c0_960] : memref<1x8x256xf32, #tpu.memory_space<vmem>>, vector<1x8x256xf32>
    %1357 = vector.shape_cast %1356 : vector<1x8x256xf32> to vector<8x256xf32>
    %cst_961 = arith.constant 1.000000e+30 : f32
    %1358 = vector.broadcast %cst_961 : f32 to vector<8x256xf32>
    %1359 = arith.select %1341, %1335, %1358 : vector<8x256xi1>, vector<8x256xf32>
    %1360 = arith.minimumf %1357, %1359 : vector<8x256xf32>
    %c0_962 = arith.constant 0 : index
    %c0_963 = arith.constant 0 : index
    %c0_964 = arith.constant 0 : index
    %1361 = vector.load %arg11[%c0_962, %c0_963, %c0_964] : memref<1x8x256xf32, #tpu.memory_space<vmem>>, vector<1x8x256xf32>
    %1362 = vector.shape_cast %1361 : vector<1x8x256xf32> to vector<8x256xf32>
    %1363 = vector.shape_cast %1360 : vector<8x256xf32> to vector<1x8x256xf32>
    tpu.vector_store %arg11[%c0_962, %c0_963, %c0_964], %1363 {strides = array<i32>} : memref<1x8x256xf32, #tpu.memory_space<vmem>>, vector<1x8x256xf32>,
    %c0_965 = arith.constant 0 : index
    %c0_966 = arith.constant 0 : index
    %c0_967 = arith.constant 0 : index
    %1364 = vector.load %arg12[%c0_965, %c0_966, %c0_967] : memref<1x8x256xf32, #tpu.memory_space<vmem>>, vector<1x8x256xf32>
    %1365 = vector.shape_cast %1364 : vector<1x8x256xf32> to vector<8x256xf32>
    %cst_968 = arith.constant 1.000000e+30 : f32
    %1366 = vector.broadcast %cst_968 : f32 to vector<8x256xf32>
    %1367 = arith.select %1347, %1366, %1335 : vector<8x256xi1>, vector<8x256xf32>
    %1368 = arith.minimumf %1365, %1367 : vector<8x256xf32>
    %c0_969 = arith.constant 0 : index
    %c0_970 = arith.constant 0 : index
    %c0_971 = arith.constant 0 : index
    %1369 = vector.load %arg12[%c0_969, %c0_970, %c0_971] : memref<1x8x256xf32, #tpu.memory_space<vmem>>, vector<1x8x256xf32>
    %1370 = vector.shape_cast %1369 : vector<1x8x256xf32> to vector<8x256xf32>
    %1371 = vector.shape_cast %1368 : vector<8x256xf32> to vector<1x8x256xf32>
    tpu.vector_store %arg12[%c0_969, %c0_970, %c0_971], %1371 {strides = array<i32>} : memref<1x8x256xf32, #tpu.memory_space<vmem>>, vector<1x8x256xf32>,
    %c0_972 = arith.constant 0 : index
    %c0_973 = arith.constant 0 : index
    %c0_974 = arith.constant 0 : index
    %1372 = vector.load %arg13[%c0_972, %c0_973, %c0_974] : memref<1x8x256xf32, #tpu.memory_space<vmem>>, vector<1x8x256xf32>
    %1373 = vector.shape_cast %1372 : vector<1x8x256xf32> to vector<8x256xf32>
    %cst_975 = arith.constant 1.000000e+30 : f32
    %1374 = vector.broadcast %cst_975 : f32 to vector<8x256xf32>
    %1375 = arith.select %1347, %1335, %1374 : vector<8x256xi1>, vector<8x256xf32>
    %1376 = arith.minimumf %1373, %1375 : vector<8x256xf32>
    %c0_976 = arith.constant 0 : index
    %c0_977 = arith.constant 0 : index
    %c0_978 = arith.constant 0 : index
    %1377 = vector.load %arg13[%c0_976, %c0_977, %c0_978] : memref<1x8x256xf32, #tpu.memory_space<vmem>>, vector<1x8x256xf32>
    %1378 = vector.shape_cast %1377 : vector<1x8x256xf32> to vector<8x256xf32>
    %1379 = vector.shape_cast %1376 : vector<8x256xf32> to vector<1x8x256xf32>
    tpu.vector_store %arg13[%c0_976, %c0_977, %c0_978], %1379 {strides = array<i32>} : memref<1x8x256xf32, #tpu.memory_space<vmem>>, vector<1x8x256xf32>,
    %c200 = arith.constant 200 : index
    %c0_979 = arith.constant 0 : index
    %1380 = vector.load %arg2[%c200, %c0_979] : memref<256x1xf32, #tpu.memory_space<vmem>>, vector<8x1xf32>
    %c200_980 = arith.constant 200 : index
    %c0_981 = arith.constant 0 : index
    %1381 = vector.load %arg3[%c200_980, %c0_981] : memref<256x1xf32, #tpu.memory_space<vmem>>, vector<8x1xf32>
    %1382 = vector.broadcast %1380 : vector<8x1xf32> to vector<8x256xf32>
    %1383 = vector.broadcast %3 : vector<1x256xf32> to vector<8x256xf32>
    %1384 = arith.subf %1382, %1383 : vector<8x256xf32>
    %1385 = vector.broadcast %1381 : vector<8x1xf32> to vector<8x256xf32>
    %1386 = vector.broadcast %4 : vector<1x256xf32> to vector<8x256xf32>
    %1387 = arith.subf %1385, %1386 : vector<8x256xf32>
    %1388 = arith.mulf %1384, %1384 : vector<8x256xf32>
    %1389 = arith.mulf %1387, %1387 : vector<8x256xf32>
    %1390 = arith.addf %1388, %1389 : vector<8x256xf32>
    %c0_982 = arith.constant 0 : index
    %c200_983 = arith.constant 200 : index
    %c0_984 = arith.constant 0 : index
    %1391 = vector.load %arg6[%c0_982, %c200_983, %c0_984] : memref<1x256x1xf32, #tpu.memory_space<vmem>>, vector<1x8x1xf32>
    %1392 = vector.shape_cast %1391 : vector<1x8x1xf32> to vector<8x1xf32>
    %1393 = vector.shape_cast %1392 : vector<8x1xf32> to vector<8x1xf32>
    %1394 = vector.broadcast %1393 : vector<8x1xf32> to vector<8x256xf32>
    %cst_985 = arith.constant 5.000000e-01 : f32
    %1395 = vector.broadcast %cst_985 : f32 to vector<8x256xf32>
    %1396 = arith.cmpf ogt, %1394, %1395 : vector<8x256xf32>
    %c0_986 = arith.constant 0 : index
    %c200_987 = arith.constant 200 : index
    %c0_988 = arith.constant 0 : index
    %1397 = vector.load %arg7[%c0_986, %c200_987, %c0_988] : memref<1x256x1xf32, #tpu.memory_space<vmem>>, vector<1x8x1xf32>
    %1398 = vector.shape_cast %1397 : vector<1x8x1xf32> to vector<8x1xf32>
    %1399 = vector.shape_cast %1398 : vector<8x1xf32> to vector<8x1xf32>
    %1400 = vector.broadcast %1399 : vector<8x1xf32> to vector<8x256xf32>
    %cst_989 = arith.constant 5.000000e-01 : f32
    %1401 = vector.broadcast %cst_989 : f32 to vector<8x256xf32>
    %1402 = arith.cmpf ogt, %1400, %1401 : vector<8x256xf32>
    %c0_990 = arith.constant 0 : index
    %c0_991 = arith.constant 0 : index
    %c0_992 = arith.constant 0 : index
    %1403 = vector.load %arg10[%c0_990, %c0_991, %c0_992] : memref<1x8x256xf32, #tpu.memory_space<vmem>>, vector<1x8x256xf32>
    %1404 = vector.shape_cast %1403 : vector<1x8x256xf32> to vector<8x256xf32>
    %cst_993 = arith.constant 1.000000e+30 : f32
    %1405 = vector.broadcast %cst_993 : f32 to vector<8x256xf32>
    %1406 = arith.select %1396, %1405, %1390 : vector<8x256xi1>, vector<8x256xf32>
    %1407 = arith.minimumf %1404, %1406 : vector<8x256xf32>
    %c0_994 = arith.constant 0 : index
    %c0_995 = arith.constant 0 : index
    %c0_996 = arith.constant 0 : index
    %1408 = vector.load %arg10[%c0_994, %c0_995, %c0_996] : memref<1x8x256xf32, #tpu.memory_space<vmem>>, vector<1x8x256xf32>
    %1409 = vector.shape_cast %1408 : vector<1x8x256xf32> to vector<8x256xf32>
    %1410 = vector.shape_cast %1407 : vector<8x256xf32> to vector<1x8x256xf32>
    tpu.vector_store %arg10[%c0_994, %c0_995, %c0_996], %1410 {strides = array<i32>} : memref<1x8x256xf32, #tpu.memory_space<vmem>>, vector<1x8x256xf32>,
    %c0_997 = arith.constant 0 : index
    %c0_998 = arith.constant 0 : index
    %c0_999 = arith.constant 0 : index
    %1411 = vector.load %arg11[%c0_997, %c0_998, %c0_999] : memref<1x8x256xf32, #tpu.memory_space<vmem>>, vector<1x8x256xf32>
    %1412 = vector.shape_cast %1411 : vector<1x8x256xf32> to vector<8x256xf32>
    %cst_1000 = arith.constant 1.000000e+30 : f32
    %1413 = vector.broadcast %cst_1000 : f32 to vector<8x256xf32>
    %1414 = arith.select %1396, %1390, %1413 : vector<8x256xi1>, vector<8x256xf32>
    %1415 = arith.minimumf %1412, %1414 : vector<8x256xf32>
    %c0_1001 = arith.constant 0 : index
    %c0_1002 = arith.constant 0 : index
    %c0_1003 = arith.constant 0 : index
    %1416 = vector.load %arg11[%c0_1001, %c0_1002, %c0_1003] : memref<1x8x256xf32, #tpu.memory_space<vmem>>, vector<1x8x256xf32>
    %1417 = vector.shape_cast %1416 : vector<1x8x256xf32> to vector<8x256xf32>
    %1418 = vector.shape_cast %1415 : vector<8x256xf32> to vector<1x8x256xf32>
    tpu.vector_store %arg11[%c0_1001, %c0_1002, %c0_1003], %1418 {strides = array<i32>} : memref<1x8x256xf32, #tpu.memory_space<vmem>>, vector<1x8x256xf32>,
    %c0_1004 = arith.constant 0 : index
    %c0_1005 = arith.constant 0 : index
    %c0_1006 = arith.constant 0 : index
    %1419 = vector.load %arg12[%c0_1004, %c0_1005, %c0_1006] : memref<1x8x256xf32, #tpu.memory_space<vmem>>, vector<1x8x256xf32>
    %1420 = vector.shape_cast %1419 : vector<1x8x256xf32> to vector<8x256xf32>
    %cst_1007 = arith.constant 1.000000e+30 : f32
    %1421 = vector.broadcast %cst_1007 : f32 to vector<8x256xf32>
    %1422 = arith.select %1402, %1421, %1390 : vector<8x256xi1>, vector<8x256xf32>
    %1423 = arith.minimumf %1420, %1422 : vector<8x256xf32>
    %c0_1008 = arith.constant 0 : index
    %c0_1009 = arith.constant 0 : index
    %c0_1010 = arith.constant 0 : index
    %1424 = vector.load %arg12[%c0_1008, %c0_1009, %c0_1010] : memref<1x8x256xf32, #tpu.memory_space<vmem>>, vector<1x8x256xf32>
    %1425 = vector.shape_cast %1424 : vector<1x8x256xf32> to vector<8x256xf32>
    %1426 = vector.shape_cast %1423 : vector<8x256xf32> to vector<1x8x256xf32>
    tpu.vector_store %arg12[%c0_1008, %c0_1009, %c0_1010], %1426 {strides = array<i32>} : memref<1x8x256xf32, #tpu.memory_space<vmem>>, vector<1x8x256xf32>,
    %c0_1011 = arith.constant 0 : index
    %c0_1012 = arith.constant 0 : index
    %c0_1013 = arith.constant 0 : index
    %1427 = vector.load %arg13[%c0_1011, %c0_1012, %c0_1013] : memref<1x8x256xf32, #tpu.memory_space<vmem>>, vector<1x8x256xf32>
    %1428 = vector.shape_cast %1427 : vector<1x8x256xf32> to vector<8x256xf32>
    %cst_1014 = arith.constant 1.000000e+30 : f32
    %1429 = vector.broadcast %cst_1014 : f32 to vector<8x256xf32>
    %1430 = arith.select %1402, %1390, %1429 : vector<8x256xi1>, vector<8x256xf32>
    %1431 = arith.minimumf %1428, %1430 : vector<8x256xf32>
    %c0_1015 = arith.constant 0 : index
    %c0_1016 = arith.constant 0 : index
    %c0_1017 = arith.constant 0 : index
    %1432 = vector.load %arg13[%c0_1015, %c0_1016, %c0_1017] : memref<1x8x256xf32, #tpu.memory_space<vmem>>, vector<1x8x256xf32>
    %1433 = vector.shape_cast %1432 : vector<1x8x256xf32> to vector<8x256xf32>
    %1434 = vector.shape_cast %1431 : vector<8x256xf32> to vector<1x8x256xf32>
    tpu.vector_store %arg13[%c0_1015, %c0_1016, %c0_1017], %1434 {strides = array<i32>} : memref<1x8x256xf32, #tpu.memory_space<vmem>>, vector<1x8x256xf32>,
    %c208 = arith.constant 208 : index
    %c0_1018 = arith.constant 0 : index
    %1435 = vector.load %arg2[%c208, %c0_1018] : memref<256x1xf32, #tpu.memory_space<vmem>>, vector<8x1xf32>
    %c208_1019 = arith.constant 208 : index
    %c0_1020 = arith.constant 0 : index
    %1436 = vector.load %arg3[%c208_1019, %c0_1020] : memref<256x1xf32, #tpu.memory_space<vmem>>, vector<8x1xf32>
    %1437 = vector.broadcast %1435 : vector<8x1xf32> to vector<8x256xf32>
    %1438 = vector.broadcast %3 : vector<1x256xf32> to vector<8x256xf32>
    %1439 = arith.subf %1437, %1438 : vector<8x256xf32>
    %1440 = vector.broadcast %1436 : vector<8x1xf32> to vector<8x256xf32>
    %1441 = vector.broadcast %4 : vector<1x256xf32> to vector<8x256xf32>
    %1442 = arith.subf %1440, %1441 : vector<8x256xf32>
    %1443 = arith.mulf %1439, %1439 : vector<8x256xf32>
    %1444 = arith.mulf %1442, %1442 : vector<8x256xf32>
    %1445 = arith.addf %1443, %1444 : vector<8x256xf32>
    %c0_1021 = arith.constant 0 : index
    %c208_1022 = arith.constant 208 : index
    %c0_1023 = arith.constant 0 : index
    %1446 = vector.load %arg6[%c0_1021, %c208_1022, %c0_1023] : memref<1x256x1xf32, #tpu.memory_space<vmem>>, vector<1x8x1xf32>
    %1447 = vector.shape_cast %1446 : vector<1x8x1xf32> to vector<8x1xf32>
    %1448 = vector.shape_cast %1447 : vector<8x1xf32> to vector<8x1xf32>
    %1449 = vector.broadcast %1448 : vector<8x1xf32> to vector<8x256xf32>
    %cst_1024 = arith.constant 5.000000e-01 : f32
    %1450 = vector.broadcast %cst_1024 : f32 to vector<8x256xf32>
    %1451 = arith.cmpf ogt, %1449, %1450 : vector<8x256xf32>
    %c0_1025 = arith.constant 0 : index
    %c208_1026 = arith.constant 208 : index
    %c0_1027 = arith.constant 0 : index
    %1452 = vector.load %arg7[%c0_1025, %c208_1026, %c0_1027] : memref<1x256x1xf32, #tpu.memory_space<vmem>>, vector<1x8x1xf32>
    %1453 = vector.shape_cast %1452 : vector<1x8x1xf32> to vector<8x1xf32>
    %1454 = vector.shape_cast %1453 : vector<8x1xf32> to vector<8x1xf32>
    %1455 = vector.broadcast %1454 : vector<8x1xf32> to vector<8x256xf32>
    %cst_1028 = arith.constant 5.000000e-01 : f32
    %1456 = vector.broadcast %cst_1028 : f32 to vector<8x256xf32>
    %1457 = arith.cmpf ogt, %1455, %1456 : vector<8x256xf32>
    %c0_1029 = arith.constant 0 : index
    %c0_1030 = arith.constant 0 : index
    %c0_1031 = arith.constant 0 : index
    %1458 = vector.load %arg10[%c0_1029, %c0_1030, %c0_1031] : memref<1x8x256xf32, #tpu.memory_space<vmem>>, vector<1x8x256xf32>
    %1459 = vector.shape_cast %1458 : vector<1x8x256xf32> to vector<8x256xf32>
    %cst_1032 = arith.constant 1.000000e+30 : f32
    %1460 = vector.broadcast %cst_1032 : f32 to vector<8x256xf32>
    %1461 = arith.select %1451, %1460, %1445 : vector<8x256xi1>, vector<8x256xf32>
    %1462 = arith.minimumf %1459, %1461 : vector<8x256xf32>
    %c0_1033 = arith.constant 0 : index
    %c0_1034 = arith.constant 0 : index
    %c0_1035 = arith.constant 0 : index
    %1463 = vector.load %arg10[%c0_1033, %c0_1034, %c0_1035] : memref<1x8x256xf32, #tpu.memory_space<vmem>>, vector<1x8x256xf32>
    %1464 = vector.shape_cast %1463 : vector<1x8x256xf32> to vector<8x256xf32>
    %1465 = vector.shape_cast %1462 : vector<8x256xf32> to vector<1x8x256xf32>
    tpu.vector_store %arg10[%c0_1033, %c0_1034, %c0_1035], %1465 {strides = array<i32>} : memref<1x8x256xf32, #tpu.memory_space<vmem>>, vector<1x8x256xf32>,
    %c0_1036 = arith.constant 0 : index
    %c0_1037 = arith.constant 0 : index
    %c0_1038 = arith.constant 0 : index
    %1466 = vector.load %arg11[%c0_1036, %c0_1037, %c0_1038] : memref<1x8x256xf32, #tpu.memory_space<vmem>>, vector<1x8x256xf32>
    %1467 = vector.shape_cast %1466 : vector<1x8x256xf32> to vector<8x256xf32>
    %cst_1039 = arith.constant 1.000000e+30 : f32
    %1468 = vector.broadcast %cst_1039 : f32 to vector<8x256xf32>
    %1469 = arith.select %1451, %1445, %1468 : vector<8x256xi1>, vector<8x256xf32>
    %1470 = arith.minimumf %1467, %1469 : vector<8x256xf32>
    %c0_1040 = arith.constant 0 : index
    %c0_1041 = arith.constant 0 : index
    %c0_1042 = arith.constant 0 : index
    %1471 = vector.load %arg11[%c0_1040, %c0_1041, %c0_1042] : memref<1x8x256xf32, #tpu.memory_space<vmem>>, vector<1x8x256xf32>
    %1472 = vector.shape_cast %1471 : vector<1x8x256xf32> to vector<8x256xf32>
    %1473 = vector.shape_cast %1470 : vector<8x256xf32> to vector<1x8x256xf32>
    tpu.vector_store %arg11[%c0_1040, %c0_1041, %c0_1042], %1473 {strides = array<i32>} : memref<1x8x256xf32, #tpu.memory_space<vmem>>, vector<1x8x256xf32>,
    %c0_1043 = arith.constant 0 : index
    %c0_1044 = arith.constant 0 : index
    %c0_1045 = arith.constant 0 : index
    %1474 = vector.load %arg12[%c0_1043, %c0_1044, %c0_1045] : memref<1x8x256xf32, #tpu.memory_space<vmem>>, vector<1x8x256xf32>
    %1475 = vector.shape_cast %1474 : vector<1x8x256xf32> to vector<8x256xf32>
    %cst_1046 = arith.constant 1.000000e+30 : f32
    %1476 = vector.broadcast %cst_1046 : f32 to vector<8x256xf32>
    %1477 = arith.select %1457, %1476, %1445 : vector<8x256xi1>, vector<8x256xf32>
    %1478 = arith.minimumf %1475, %1477 : vector<8x256xf32>
    %c0_1047 = arith.constant 0 : index
    %c0_1048 = arith.constant 0 : index
    %c0_1049 = arith.constant 0 : index
    %1479 = vector.load %arg12[%c0_1047, %c0_1048, %c0_1049] : memref<1x8x256xf32, #tpu.memory_space<vmem>>, vector<1x8x256xf32>
    %1480 = vector.shape_cast %1479 : vector<1x8x256xf32> to vector<8x256xf32>
    %1481 = vector.shape_cast %1478 : vector<8x256xf32> to vector<1x8x256xf32>
    tpu.vector_store %arg12[%c0_1047, %c0_1048, %c0_1049], %1481 {strides = array<i32>} : memref<1x8x256xf32, #tpu.memory_space<vmem>>, vector<1x8x256xf32>,
    %c0_1050 = arith.constant 0 : index
    %c0_1051 = arith.constant 0 : index
    %c0_1052 = arith.constant 0 : index
    %1482 = vector.load %arg13[%c0_1050, %c0_1051, %c0_1052] : memref<1x8x256xf32, #tpu.memory_space<vmem>>, vector<1x8x256xf32>
    %1483 = vector.shape_cast %1482 : vector<1x8x256xf32> to vector<8x256xf32>
    %cst_1053 = arith.constant 1.000000e+30 : f32
    %1484 = vector.broadcast %cst_1053 : f32 to vector<8x256xf32>
    %1485 = arith.select %1457, %1445, %1484 : vector<8x256xi1>, vector<8x256xf32>
    %1486 = arith.minimumf %1483, %1485 : vector<8x256xf32>
    %c0_1054 = arith.constant 0 : index
    %c0_1055 = arith.constant 0 : index
    %c0_1056 = arith.constant 0 : index
    %1487 = vector.load %arg13[%c0_1054, %c0_1055, %c0_1056] : memref<1x8x256xf32, #tpu.memory_space<vmem>>, vector<1x8x256xf32>
    %1488 = vector.shape_cast %1487 : vector<1x8x256xf32> to vector<8x256xf32>
    %1489 = vector.shape_cast %1486 : vector<8x256xf32> to vector<1x8x256xf32>
    tpu.vector_store %arg13[%c0_1054, %c0_1055, %c0_1056], %1489 {strides = array<i32>} : memref<1x8x256xf32, #tpu.memory_space<vmem>>, vector<1x8x256xf32>,
    %c216 = arith.constant 216 : index
    %c0_1057 = arith.constant 0 : index
    %1490 = vector.load %arg2[%c216, %c0_1057] : memref<256x1xf32, #tpu.memory_space<vmem>>, vector<8x1xf32>
    %c216_1058 = arith.constant 216 : index
    %c0_1059 = arith.constant 0 : index
    %1491 = vector.load %arg3[%c216_1058, %c0_1059] : memref<256x1xf32, #tpu.memory_space<vmem>>, vector<8x1xf32>
    %1492 = vector.broadcast %1490 : vector<8x1xf32> to vector<8x256xf32>
    %1493 = vector.broadcast %3 : vector<1x256xf32> to vector<8x256xf32>
    %1494 = arith.subf %1492, %1493 : vector<8x256xf32>
    %1495 = vector.broadcast %1491 : vector<8x1xf32> to vector<8x256xf32>
    %1496 = vector.broadcast %4 : vector<1x256xf32> to vector<8x256xf32>
    %1497 = arith.subf %1495, %1496 : vector<8x256xf32>
    %1498 = arith.mulf %1494, %1494 : vector<8x256xf32>
    %1499 = arith.mulf %1497, %1497 : vector<8x256xf32>
    %1500 = arith.addf %1498, %1499 : vector<8x256xf32>
    %c0_1060 = arith.constant 0 : index
    %c216_1061 = arith.constant 216 : index
    %c0_1062 = arith.constant 0 : index
    %1501 = vector.load %arg6[%c0_1060, %c216_1061, %c0_1062] : memref<1x256x1xf32, #tpu.memory_space<vmem>>, vector<1x8x1xf32>
    %1502 = vector.shape_cast %1501 : vector<1x8x1xf32> to vector<8x1xf32>
    %1503 = vector.shape_cast %1502 : vector<8x1xf32> to vector<8x1xf32>
    %1504 = vector.broadcast %1503 : vector<8x1xf32> to vector<8x256xf32>
    %cst_1063 = arith.constant 5.000000e-01 : f32
    %1505 = vector.broadcast %cst_1063 : f32 to vector<8x256xf32>
    %1506 = arith.cmpf ogt, %1504, %1505 : vector<8x256xf32>
    %c0_1064 = arith.constant 0 : index
    %c216_1065 = arith.constant 216 : index
    %c0_1066 = arith.constant 0 : index
    %1507 = vector.load %arg7[%c0_1064, %c216_1065, %c0_1066] : memref<1x256x1xf32, #tpu.memory_space<vmem>>, vector<1x8x1xf32>
    %1508 = vector.shape_cast %1507 : vector<1x8x1xf32> to vector<8x1xf32>
    %1509 = vector.shape_cast %1508 : vector<8x1xf32> to vector<8x1xf32>
    %1510 = vector.broadcast %1509 : vector<8x1xf32> to vector<8x256xf32>
    %cst_1067 = arith.constant 5.000000e-01 : f32
    %1511 = vector.broadcast %cst_1067 : f32 to vector<8x256xf32>
    %1512 = arith.cmpf ogt, %1510, %1511 : vector<8x256xf32>
    %c0_1068 = arith.constant 0 : index
    %c0_1069 = arith.constant 0 : index
    %c0_1070 = arith.constant 0 : index
    %1513 = vector.load %arg10[%c0_1068, %c0_1069, %c0_1070] : memref<1x8x256xf32, #tpu.memory_space<vmem>>, vector<1x8x256xf32>
    %1514 = vector.shape_cast %1513 : vector<1x8x256xf32> to vector<8x256xf32>
    %cst_1071 = arith.constant 1.000000e+30 : f32
    %1515 = vector.broadcast %cst_1071 : f32 to vector<8x256xf32>
    %1516 = arith.select %1506, %1515, %1500 : vector<8x256xi1>, vector<8x256xf32>
    %1517 = arith.minimumf %1514, %1516 : vector<8x256xf32>
    %c0_1072 = arith.constant 0 : index
    %c0_1073 = arith.constant 0 : index
    %c0_1074 = arith.constant 0 : index
    %1518 = vector.load %arg10[%c0_1072, %c0_1073, %c0_1074] : memref<1x8x256xf32, #tpu.memory_space<vmem>>, vector<1x8x256xf32>
    %1519 = vector.shape_cast %1518 : vector<1x8x256xf32> to vector<8x256xf32>
    %1520 = vector.shape_cast %1517 : vector<8x256xf32> to vector<1x8x256xf32>
    tpu.vector_store %arg10[%c0_1072, %c0_1073, %c0_1074], %1520 {strides = array<i32>} : memref<1x8x256xf32, #tpu.memory_space<vmem>>, vector<1x8x256xf32>,
    %c0_1075 = arith.constant 0 : index
    %c0_1076 = arith.constant 0 : index
    %c0_1077 = arith.constant 0 : index
    %1521 = vector.load %arg11[%c0_1075, %c0_1076, %c0_1077] : memref<1x8x256xf32, #tpu.memory_space<vmem>>, vector<1x8x256xf32>
    %1522 = vector.shape_cast %1521 : vector<1x8x256xf32> to vector<8x256xf32>
    %cst_1078 = arith.constant 1.000000e+30 : f32
    %1523 = vector.broadcast %cst_1078 : f32 to vector<8x256xf32>
    %1524 = arith.select %1506, %1500, %1523 : vector<8x256xi1>, vector<8x256xf32>
    %1525 = arith.minimumf %1522, %1524 : vector<8x256xf32>
    %c0_1079 = arith.constant 0 : index
    %c0_1080 = arith.constant 0 : index
    %c0_1081 = arith.constant 0 : index
    %1526 = vector.load %arg11[%c0_1079, %c0_1080, %c0_1081] : memref<1x8x256xf32, #tpu.memory_space<vmem>>, vector<1x8x256xf32>
    %1527 = vector.shape_cast %1526 : vector<1x8x256xf32> to vector<8x256xf32>
    %1528 = vector.shape_cast %1525 : vector<8x256xf32> to vector<1x8x256xf32>
    tpu.vector_store %arg11[%c0_1079, %c0_1080, %c0_1081], %1528 {strides = array<i32>} : memref<1x8x256xf32, #tpu.memory_space<vmem>>, vector<1x8x256xf32>,
    %c0_1082 = arith.constant 0 : index
    %c0_1083 = arith.constant 0 : index
    %c0_1084 = arith.constant 0 : index
    %1529 = vector.load %arg12[%c0_1082, %c0_1083, %c0_1084] : memref<1x8x256xf32, #tpu.memory_space<vmem>>, vector<1x8x256xf32>
    %1530 = vector.shape_cast %1529 : vector<1x8x256xf32> to vector<8x256xf32>
    %cst_1085 = arith.constant 1.000000e+30 : f32
    %1531 = vector.broadcast %cst_1085 : f32 to vector<8x256xf32>
    %1532 = arith.select %1512, %1531, %1500 : vector<8x256xi1>, vector<8x256xf32>
    %1533 = arith.minimumf %1530, %1532 : vector<8x256xf32>
    %c0_1086 = arith.constant 0 : index
    %c0_1087 = arith.constant 0 : index
    %c0_1088 = arith.constant 0 : index
    %1534 = vector.load %arg12[%c0_1086, %c0_1087, %c0_1088] : memref<1x8x256xf32, #tpu.memory_space<vmem>>, vector<1x8x256xf32>
    %1535 = vector.shape_cast %1534 : vector<1x8x256xf32> to vector<8x256xf32>
    %1536 = vector.shape_cast %1533 : vector<8x256xf32> to vector<1x8x256xf32>
    tpu.vector_store %arg12[%c0_1086, %c0_1087, %c0_1088], %1536 {strides = array<i32>} : memref<1x8x256xf32, #tpu.memory_space<vmem>>, vector<1x8x256xf32>,
    %c0_1089 = arith.constant 0 : index
    %c0_1090 = arith.constant 0 : index
    %c0_1091 = arith.constant 0 : index
    %1537 = vector.load %arg13[%c0_1089, %c0_1090, %c0_1091] : memref<1x8x256xf32, #tpu.memory_space<vmem>>, vector<1x8x256xf32>
    %1538 = vector.shape_cast %1537 : vector<1x8x256xf32> to vector<8x256xf32>
    %cst_1092 = arith.constant 1.000000e+30 : f32
    %1539 = vector.broadcast %cst_1092 : f32 to vector<8x256xf32>
    %1540 = arith.select %1512, %1500, %1539 : vector<8x256xi1>, vector<8x256xf32>
    %1541 = arith.minimumf %1538, %1540 : vector<8x256xf32>
    %c0_1093 = arith.constant 0 : index
    %c0_1094 = arith.constant 0 : index
    %c0_1095 = arith.constant 0 : index
    %1542 = vector.load %arg13[%c0_1093, %c0_1094, %c0_1095] : memref<1x8x256xf32, #tpu.memory_space<vmem>>, vector<1x8x256xf32>
    %1543 = vector.shape_cast %1542 : vector<1x8x256xf32> to vector<8x256xf32>
    %1544 = vector.shape_cast %1541 : vector<8x256xf32> to vector<1x8x256xf32>
    tpu.vector_store %arg13[%c0_1093, %c0_1094, %c0_1095], %1544 {strides = array<i32>} : memref<1x8x256xf32, #tpu.memory_space<vmem>>, vector<1x8x256xf32>,
    %c224 = arith.constant 224 : index
    %c0_1096 = arith.constant 0 : index
    %1545 = vector.load %arg2[%c224, %c0_1096] : memref<256x1xf32, #tpu.memory_space<vmem>>, vector<8x1xf32>
    %c224_1097 = arith.constant 224 : index
    %c0_1098 = arith.constant 0 : index
    %1546 = vector.load %arg3[%c224_1097, %c0_1098] : memref<256x1xf32, #tpu.memory_space<vmem>>, vector<8x1xf32>
    %1547 = vector.broadcast %1545 : vector<8x1xf32> to vector<8x256xf32>
    %1548 = vector.broadcast %3 : vector<1x256xf32> to vector<8x256xf32>
    %1549 = arith.subf %1547, %1548 : vector<8x256xf32>
    %1550 = vector.broadcast %1546 : vector<8x1xf32> to vector<8x256xf32>
    %1551 = vector.broadcast %4 : vector<1x256xf32> to vector<8x256xf32>
    %1552 = arith.subf %1550, %1551 : vector<8x256xf32>
    %1553 = arith.mulf %1549, %1549 : vector<8x256xf32>
    %1554 = arith.mulf %1552, %1552 : vector<8x256xf32>
    %1555 = arith.addf %1553, %1554 : vector<8x256xf32>
    %c0_1099 = arith.constant 0 : index
    %c224_1100 = arith.constant 224 : index
    %c0_1101 = arith.constant 0 : index
    %1556 = vector.load %arg6[%c0_1099, %c224_1100, %c0_1101] : memref<1x256x1xf32, #tpu.memory_space<vmem>>, vector<1x8x1xf32>
    %1557 = vector.shape_cast %1556 : vector<1x8x1xf32> to vector<8x1xf32>
    %1558 = vector.shape_cast %1557 : vector<8x1xf32> to vector<8x1xf32>
    %1559 = vector.broadcast %1558 : vector<8x1xf32> to vector<8x256xf32>
    %cst_1102 = arith.constant 5.000000e-01 : f32
    %1560 = vector.broadcast %cst_1102 : f32 to vector<8x256xf32>
    %1561 = arith.cmpf ogt, %1559, %1560 : vector<8x256xf32>
    %c0_1103 = arith.constant 0 : index
    %c224_1104 = arith.constant 224 : index
    %c0_1105 = arith.constant 0 : index
    %1562 = vector.load %arg7[%c0_1103, %c224_1104, %c0_1105] : memref<1x256x1xf32, #tpu.memory_space<vmem>>, vector<1x8x1xf32>
    %1563 = vector.shape_cast %1562 : vector<1x8x1xf32> to vector<8x1xf32>
    %1564 = vector.shape_cast %1563 : vector<8x1xf32> to vector<8x1xf32>
    %1565 = vector.broadcast %1564 : vector<8x1xf32> to vector<8x256xf32>
    %cst_1106 = arith.constant 5.000000e-01 : f32
    %1566 = vector.broadcast %cst_1106 : f32 to vector<8x256xf32>
    %1567 = arith.cmpf ogt, %1565, %1566 : vector<8x256xf32>
    %c0_1107 = arith.constant 0 : index
    %c0_1108 = arith.constant 0 : index
    %c0_1109 = arith.constant 0 : index
    %1568 = vector.load %arg10[%c0_1107, %c0_1108, %c0_1109] : memref<1x8x256xf32, #tpu.memory_space<vmem>>, vector<1x8x256xf32>
    %1569 = vector.shape_cast %1568 : vector<1x8x256xf32> to vector<8x256xf32>
    %cst_1110 = arith.constant 1.000000e+30 : f32
    %1570 = vector.broadcast %cst_1110 : f32 to vector<8x256xf32>
    %1571 = arith.select %1561, %1570, %1555 : vector<8x256xi1>, vector<8x256xf32>
    %1572 = arith.minimumf %1569, %1571 : vector<8x256xf32>
    %c0_1111 = arith.constant 0 : index
    %c0_1112 = arith.constant 0 : index
    %c0_1113 = arith.constant 0 : index
    %1573 = vector.load %arg10[%c0_1111, %c0_1112, %c0_1113] : memref<1x8x256xf32, #tpu.memory_space<vmem>>, vector<1x8x256xf32>
    %1574 = vector.shape_cast %1573 : vector<1x8x256xf32> to vector<8x256xf32>
    %1575 = vector.shape_cast %1572 : vector<8x256xf32> to vector<1x8x256xf32>
    tpu.vector_store %arg10[%c0_1111, %c0_1112, %c0_1113], %1575 {strides = array<i32>} : memref<1x8x256xf32, #tpu.memory_space<vmem>>, vector<1x8x256xf32>,
    %c0_1114 = arith.constant 0 : index
    %c0_1115 = arith.constant 0 : index
    %c0_1116 = arith.constant 0 : index
    %1576 = vector.load %arg11[%c0_1114, %c0_1115, %c0_1116] : memref<1x8x256xf32, #tpu.memory_space<vmem>>, vector<1x8x256xf32>
    %1577 = vector.shape_cast %1576 : vector<1x8x256xf32> to vector<8x256xf32>
    %cst_1117 = arith.constant 1.000000e+30 : f32
    %1578 = vector.broadcast %cst_1117 : f32 to vector<8x256xf32>
    %1579 = arith.select %1561, %1555, %1578 : vector<8x256xi1>, vector<8x256xf32>
    %1580 = arith.minimumf %1577, %1579 : vector<8x256xf32>
    %c0_1118 = arith.constant 0 : index
    %c0_1119 = arith.constant 0 : index
    %c0_1120 = arith.constant 0 : index
    %1581 = vector.load %arg11[%c0_1118, %c0_1119, %c0_1120] : memref<1x8x256xf32, #tpu.memory_space<vmem>>, vector<1x8x256xf32>
    %1582 = vector.shape_cast %1581 : vector<1x8x256xf32> to vector<8x256xf32>
    %1583 = vector.shape_cast %1580 : vector<8x256xf32> to vector<1x8x256xf32>
    tpu.vector_store %arg11[%c0_1118, %c0_1119, %c0_1120], %1583 {strides = array<i32>} : memref<1x8x256xf32, #tpu.memory_space<vmem>>, vector<1x8x256xf32>,
    %c0_1121 = arith.constant 0 : index
    %c0_1122 = arith.constant 0 : index
    %c0_1123 = arith.constant 0 : index
    %1584 = vector.load %arg12[%c0_1121, %c0_1122, %c0_1123] : memref<1x8x256xf32, #tpu.memory_space<vmem>>, vector<1x8x256xf32>
    %1585 = vector.shape_cast %1584 : vector<1x8x256xf32> to vector<8x256xf32>
    %cst_1124 = arith.constant 1.000000e+30 : f32
    %1586 = vector.broadcast %cst_1124 : f32 to vector<8x256xf32>
    %1587 = arith.select %1567, %1586, %1555 : vector<8x256xi1>, vector<8x256xf32>
    %1588 = arith.minimumf %1585, %1587 : vector<8x256xf32>
    %c0_1125 = arith.constant 0 : index
    %c0_1126 = arith.constant 0 : index
    %c0_1127 = arith.constant 0 : index
    %1589 = vector.load %arg12[%c0_1125, %c0_1126, %c0_1127] : memref<1x8x256xf32, #tpu.memory_space<vmem>>, vector<1x8x256xf32>
    %1590 = vector.shape_cast %1589 : vector<1x8x256xf32> to vector<8x256xf32>
    %1591 = vector.shape_cast %1588 : vector<8x256xf32> to vector<1x8x256xf32>
    tpu.vector_store %arg12[%c0_1125, %c0_1126, %c0_1127], %1591 {strides = array<i32>} : memref<1x8x256xf32, #tpu.memory_space<vmem>>, vector<1x8x256xf32>,
    %c0_1128 = arith.constant 0 : index
    %c0_1129 = arith.constant 0 : index
    %c0_1130 = arith.constant 0 : index
    %1592 = vector.load %arg13[%c0_1128, %c0_1129, %c0_1130] : memref<1x8x256xf32, #tpu.memory_space<vmem>>, vector<1x8x256xf32>
    %1593 = vector.shape_cast %1592 : vector<1x8x256xf32> to vector<8x256xf32>
    %cst_1131 = arith.constant 1.000000e+30 : f32
    %1594 = vector.broadcast %cst_1131 : f32 to vector<8x256xf32>
    %1595 = arith.select %1567, %1555, %1594 : vector<8x256xi1>, vector<8x256xf32>
    %1596 = arith.minimumf %1593, %1595 : vector<8x256xf32>
    %c0_1132 = arith.constant 0 : index
    %c0_1133 = arith.constant 0 : index
    %c0_1134 = arith.constant 0 : index
    %1597 = vector.load %arg13[%c0_1132, %c0_1133, %c0_1134] : memref<1x8x256xf32, #tpu.memory_space<vmem>>, vector<1x8x256xf32>
    %1598 = vector.shape_cast %1597 : vector<1x8x256xf32> to vector<8x256xf32>
    %1599 = vector.shape_cast %1596 : vector<8x256xf32> to vector<1x8x256xf32>
    tpu.vector_store %arg13[%c0_1132, %c0_1133, %c0_1134], %1599 {strides = array<i32>} : memref<1x8x256xf32, #tpu.memory_space<vmem>>, vector<1x8x256xf32>,
    %c232 = arith.constant 232 : index
    %c0_1135 = arith.constant 0 : index
    %1600 = vector.load %arg2[%c232, %c0_1135] : memref<256x1xf32, #tpu.memory_space<vmem>>, vector<8x1xf32>
    %c232_1136 = arith.constant 232 : index
    %c0_1137 = arith.constant 0 : index
    %1601 = vector.load %arg3[%c232_1136, %c0_1137] : memref<256x1xf32, #tpu.memory_space<vmem>>, vector<8x1xf32>
    %1602 = vector.broadcast %1600 : vector<8x1xf32> to vector<8x256xf32>
    %1603 = vector.broadcast %3 : vector<1x256xf32> to vector<8x256xf32>
    %1604 = arith.subf %1602, %1603 : vector<8x256xf32>
    %1605 = vector.broadcast %1601 : vector<8x1xf32> to vector<8x256xf32>
    %1606 = vector.broadcast %4 : vector<1x256xf32> to vector<8x256xf32>
    %1607 = arith.subf %1605, %1606 : vector<8x256xf32>
    %1608 = arith.mulf %1604, %1604 : vector<8x256xf32>
    %1609 = arith.mulf %1607, %1607 : vector<8x256xf32>
    %1610 = arith.addf %1608, %1609 : vector<8x256xf32>
    %c0_1138 = arith.constant 0 : index
    %c232_1139 = arith.constant 232 : index
    %c0_1140 = arith.constant 0 : index
    %1611 = vector.load %arg6[%c0_1138, %c232_1139, %c0_1140] : memref<1x256x1xf32, #tpu.memory_space<vmem>>, vector<1x8x1xf32>
    %1612 = vector.shape_cast %1611 : vector<1x8x1xf32> to vector<8x1xf32>
    %1613 = vector.shape_cast %1612 : vector<8x1xf32> to vector<8x1xf32>
    %1614 = vector.broadcast %1613 : vector<8x1xf32> to vector<8x256xf32>
    %cst_1141 = arith.constant 5.000000e-01 : f32
    %1615 = vector.broadcast %cst_1141 : f32 to vector<8x256xf32>
    %1616 = arith.cmpf ogt, %1614, %1615 : vector<8x256xf32>
    %c0_1142 = arith.constant 0 : index
    %c232_1143 = arith.constant 232 : index
    %c0_1144 = arith.constant 0 : index
    %1617 = vector.load %arg7[%c0_1142, %c232_1143, %c0_1144] : memref<1x256x1xf32, #tpu.memory_space<vmem>>, vector<1x8x1xf32>
    %1618 = vector.shape_cast %1617 : vector<1x8x1xf32> to vector<8x1xf32>
    %1619 = vector.shape_cast %1618 : vector<8x1xf32> to vector<8x1xf32>
    %1620 = vector.broadcast %1619 : vector<8x1xf32> to vector<8x256xf32>
    %cst_1145 = arith.constant 5.000000e-01 : f32
    %1621 = vector.broadcast %cst_1145 : f32 to vector<8x256xf32>
    %1622 = arith.cmpf ogt, %1620, %1621 : vector<8x256xf32>
    %c0_1146 = arith.constant 0 : index
    %c0_1147 = arith.constant 0 : index
    %c0_1148 = arith.constant 0 : index
    %1623 = vector.load %arg10[%c0_1146, %c0_1147, %c0_1148] : memref<1x8x256xf32, #tpu.memory_space<vmem>>, vector<1x8x256xf32>
    %1624 = vector.shape_cast %1623 : vector<1x8x256xf32> to vector<8x256xf32>
    %cst_1149 = arith.constant 1.000000e+30 : f32
    %1625 = vector.broadcast %cst_1149 : f32 to vector<8x256xf32>
    %1626 = arith.select %1616, %1625, %1610 : vector<8x256xi1>, vector<8x256xf32>
    %1627 = arith.minimumf %1624, %1626 : vector<8x256xf32>
    %c0_1150 = arith.constant 0 : index
    %c0_1151 = arith.constant 0 : index
    %c0_1152 = arith.constant 0 : index
    %1628 = vector.load %arg10[%c0_1150, %c0_1151, %c0_1152] : memref<1x8x256xf32, #tpu.memory_space<vmem>>, vector<1x8x256xf32>
    %1629 = vector.shape_cast %1628 : vector<1x8x256xf32> to vector<8x256xf32>
    %1630 = vector.shape_cast %1627 : vector<8x256xf32> to vector<1x8x256xf32>
    tpu.vector_store %arg10[%c0_1150, %c0_1151, %c0_1152], %1630 {strides = array<i32>} : memref<1x8x256xf32, #tpu.memory_space<vmem>>, vector<1x8x256xf32>,
    %c0_1153 = arith.constant 0 : index
    %c0_1154 = arith.constant 0 : index
    %c0_1155 = arith.constant 0 : index
    %1631 = vector.load %arg11[%c0_1153, %c0_1154, %c0_1155] : memref<1x8x256xf32, #tpu.memory_space<vmem>>, vector<1x8x256xf32>
    %1632 = vector.shape_cast %1631 : vector<1x8x256xf32> to vector<8x256xf32>
    %cst_1156 = arith.constant 1.000000e+30 : f32
    %1633 = vector.broadcast %cst_1156 : f32 to vector<8x256xf32>
    %1634 = arith.select %1616, %1610, %1633 : vector<8x256xi1>, vector<8x256xf32>
    %1635 = arith.minimumf %1632, %1634 : vector<8x256xf32>
    %c0_1157 = arith.constant 0 : index
    %c0_1158 = arith.constant 0 : index
    %c0_1159 = arith.constant 0 : index
    %1636 = vector.load %arg11[%c0_1157, %c0_1158, %c0_1159] : memref<1x8x256xf32, #tpu.memory_space<vmem>>, vector<1x8x256xf32>
    %1637 = vector.shape_cast %1636 : vector<1x8x256xf32> to vector<8x256xf32>
    %1638 = vector.shape_cast %1635 : vector<8x256xf32> to vector<1x8x256xf32>
    tpu.vector_store %arg11[%c0_1157, %c0_1158, %c0_1159], %1638 {strides = array<i32>} : memref<1x8x256xf32, #tpu.memory_space<vmem>>, vector<1x8x256xf32>,
    %c0_1160 = arith.constant 0 : index
    %c0_1161 = arith.constant 0 : index
    %c0_1162 = arith.constant 0 : index
    %1639 = vector.load %arg12[%c0_1160, %c0_1161, %c0_1162] : memref<1x8x256xf32, #tpu.memory_space<vmem>>, vector<1x8x256xf32>
    %1640 = vector.shape_cast %1639 : vector<1x8x256xf32> to vector<8x256xf32>
    %cst_1163 = arith.constant 1.000000e+30 : f32
    %1641 = vector.broadcast %cst_1163 : f32 to vector<8x256xf32>
    %1642 = arith.select %1622, %1641, %1610 : vector<8x256xi1>, vector<8x256xf32>
    %1643 = arith.minimumf %1640, %1642 : vector<8x256xf32>
    %c0_1164 = arith.constant 0 : index
    %c0_1165 = arith.constant 0 : index
    %c0_1166 = arith.constant 0 : index
    %1644 = vector.load %arg12[%c0_1164, %c0_1165, %c0_1166] : memref<1x8x256xf32, #tpu.memory_space<vmem>>, vector<1x8x256xf32>
    %1645 = vector.shape_cast %1644 : vector<1x8x256xf32> to vector<8x256xf32>
    %1646 = vector.shape_cast %1643 : vector<8x256xf32> to vector<1x8x256xf32>
    tpu.vector_store %arg12[%c0_1164, %c0_1165, %c0_1166], %1646 {strides = array<i32>} : memref<1x8x256xf32, #tpu.memory_space<vmem>>, vector<1x8x256xf32>,
    %c0_1167 = arith.constant 0 : index
    %c0_1168 = arith.constant 0 : index
    %c0_1169 = arith.constant 0 : index
    %1647 = vector.load %arg13[%c0_1167, %c0_1168, %c0_1169] : memref<1x8x256xf32, #tpu.memory_space<vmem>>, vector<1x8x256xf32>
    %1648 = vector.shape_cast %1647 : vector<1x8x256xf32> to vector<8x256xf32>
    %cst_1170 = arith.constant 1.000000e+30 : f32
    %1649 = vector.broadcast %cst_1170 : f32 to vector<8x256xf32>
    %1650 = arith.select %1622, %1610, %1649 : vector<8x256xi1>, vector<8x256xf32>
    %1651 = arith.minimumf %1648, %1650 : vector<8x256xf32>
    %c0_1171 = arith.constant 0 : index
    %c0_1172 = arith.constant 0 : index
    %c0_1173 = arith.constant 0 : index
    %1652 = vector.load %arg13[%c0_1171, %c0_1172, %c0_1173] : memref<1x8x256xf32, #tpu.memory_space<vmem>>, vector<1x8x256xf32>
    %1653 = vector.shape_cast %1652 : vector<1x8x256xf32> to vector<8x256xf32>
    %1654 = vector.shape_cast %1651 : vector<8x256xf32> to vector<1x8x256xf32>
    tpu.vector_store %arg13[%c0_1171, %c0_1172, %c0_1173], %1654 {strides = array<i32>} : memref<1x8x256xf32, #tpu.memory_space<vmem>>, vector<1x8x256xf32>,
    %c240 = arith.constant 240 : index
    %c0_1174 = arith.constant 0 : index
    %1655 = vector.load %arg2[%c240, %c0_1174] : memref<256x1xf32, #tpu.memory_space<vmem>>, vector<8x1xf32>
    %c240_1175 = arith.constant 240 : index
    %c0_1176 = arith.constant 0 : index
    %1656 = vector.load %arg3[%c240_1175, %c0_1176] : memref<256x1xf32, #tpu.memory_space<vmem>>, vector<8x1xf32>
    %1657 = vector.broadcast %1655 : vector<8x1xf32> to vector<8x256xf32>
    %1658 = vector.broadcast %3 : vector<1x256xf32> to vector<8x256xf32>
    %1659 = arith.subf %1657, %1658 : vector<8x256xf32>
    %1660 = vector.broadcast %1656 : vector<8x1xf32> to vector<8x256xf32>
    %1661 = vector.broadcast %4 : vector<1x256xf32> to vector<8x256xf32>
    %1662 = arith.subf %1660, %1661 : vector<8x256xf32>
    %1663 = arith.mulf %1659, %1659 : vector<8x256xf32>
    %1664 = arith.mulf %1662, %1662 : vector<8x256xf32>
    %1665 = arith.addf %1663, %1664 : vector<8x256xf32>
    %c0_1177 = arith.constant 0 : index
    %c240_1178 = arith.constant 240 : index
    %c0_1179 = arith.constant 0 : index
    %1666 = vector.load %arg6[%c0_1177, %c240_1178, %c0_1179] : memref<1x256x1xf32, #tpu.memory_space<vmem>>, vector<1x8x1xf32>
    %1667 = vector.shape_cast %1666 : vector<1x8x1xf32> to vector<8x1xf32>
    %1668 = vector.shape_cast %1667 : vector<8x1xf32> to vector<8x1xf32>
    %1669 = vector.broadcast %1668 : vector<8x1xf32> to vector<8x256xf32>
    %cst_1180 = arith.constant 5.000000e-01 : f32
    %1670 = vector.broadcast %cst_1180 : f32 to vector<8x256xf32>
    %1671 = arith.cmpf ogt, %1669, %1670 : vector<8x256xf32>
    %c0_1181 = arith.constant 0 : index
    %c240_1182 = arith.constant 240 : index
    %c0_1183 = arith.constant 0 : index
    %1672 = vector.load %arg7[%c0_1181, %c240_1182, %c0_1183] : memref<1x256x1xf32, #tpu.memory_space<vmem>>, vector<1x8x1xf32>
    %1673 = vector.shape_cast %1672 : vector<1x8x1xf32> to vector<8x1xf32>
    %1674 = vector.shape_cast %1673 : vector<8x1xf32> to vector<8x1xf32>
    %1675 = vector.broadcast %1674 : vector<8x1xf32> to vector<8x256xf32>
    %cst_1184 = arith.constant 5.000000e-01 : f32
    %1676 = vector.broadcast %cst_1184 : f32 to vector<8x256xf32>
    %1677 = arith.cmpf ogt, %1675, %1676 : vector<8x256xf32>
    %c0_1185 = arith.constant 0 : index
    %c0_1186 = arith.constant 0 : index
    %c0_1187 = arith.constant 0 : index
    %1678 = vector.load %arg10[%c0_1185, %c0_1186, %c0_1187] : memref<1x8x256xf32, #tpu.memory_space<vmem>>, vector<1x8x256xf32>
    %1679 = vector.shape_cast %1678 : vector<1x8x256xf32> to vector<8x256xf32>
    %cst_1188 = arith.constant 1.000000e+30 : f32
    %1680 = vector.broadcast %cst_1188 : f32 to vector<8x256xf32>
    %1681 = arith.select %1671, %1680, %1665 : vector<8x256xi1>, vector<8x256xf32>
    %1682 = arith.minimumf %1679, %1681 : vector<8x256xf32>
    %c0_1189 = arith.constant 0 : index
    %c0_1190 = arith.constant 0 : index
    %c0_1191 = arith.constant 0 : index
    %1683 = vector.load %arg10[%c0_1189, %c0_1190, %c0_1191] : memref<1x8x256xf32, #tpu.memory_space<vmem>>, vector<1x8x256xf32>
    %1684 = vector.shape_cast %1683 : vector<1x8x256xf32> to vector<8x256xf32>
    %1685 = vector.shape_cast %1682 : vector<8x256xf32> to vector<1x8x256xf32>
    tpu.vector_store %arg10[%c0_1189, %c0_1190, %c0_1191], %1685 {strides = array<i32>} : memref<1x8x256xf32, #tpu.memory_space<vmem>>, vector<1x8x256xf32>,
    %c0_1192 = arith.constant 0 : index
    %c0_1193 = arith.constant 0 : index
    %c0_1194 = arith.constant 0 : index
    %1686 = vector.load %arg11[%c0_1192, %c0_1193, %c0_1194] : memref<1x8x256xf32, #tpu.memory_space<vmem>>, vector<1x8x256xf32>
    %1687 = vector.shape_cast %1686 : vector<1x8x256xf32> to vector<8x256xf32>
    %cst_1195 = arith.constant 1.000000e+30 : f32
    %1688 = vector.broadcast %cst_1195 : f32 to vector<8x256xf32>
    %1689 = arith.select %1671, %1665, %1688 : vector<8x256xi1>, vector<8x256xf32>
    %1690 = arith.minimumf %1687, %1689 : vector<8x256xf32>
    %c0_1196 = arith.constant 0 : index
    %c0_1197 = arith.constant 0 : index
    %c0_1198 = arith.constant 0 : index
    %1691 = vector.load %arg11[%c0_1196, %c0_1197, %c0_1198] : memref<1x8x256xf32, #tpu.memory_space<vmem>>, vector<1x8x256xf32>
    %1692 = vector.shape_cast %1691 : vector<1x8x256xf32> to vector<8x256xf32>
    %1693 = vector.shape_cast %1690 : vector<8x256xf32> to vector<1x8x256xf32>
    tpu.vector_store %arg11[%c0_1196, %c0_1197, %c0_1198], %1693 {strides = array<i32>} : memref<1x8x256xf32, #tpu.memory_space<vmem>>, vector<1x8x256xf32>,
    %c0_1199 = arith.constant 0 : index
    %c0_1200 = arith.constant 0 : index
    %c0_1201 = arith.constant 0 : index
    %1694 = vector.load %arg12[%c0_1199, %c0_1200, %c0_1201] : memref<1x8x256xf32, #tpu.memory_space<vmem>>, vector<1x8x256xf32>
    %1695 = vector.shape_cast %1694 : vector<1x8x256xf32> to vector<8x256xf32>
    %cst_1202 = arith.constant 1.000000e+30 : f32
    %1696 = vector.broadcast %cst_1202 : f32 to vector<8x256xf32>
    %1697 = arith.select %1677, %1696, %1665 : vector<8x256xi1>, vector<8x256xf32>
    %1698 = arith.minimumf %1695, %1697 : vector<8x256xf32>
    %c0_1203 = arith.constant 0 : index
    %c0_1204 = arith.constant 0 : index
    %c0_1205 = arith.constant 0 : index
    %1699 = vector.load %arg12[%c0_1203, %c0_1204, %c0_1205] : memref<1x8x256xf32, #tpu.memory_space<vmem>>, vector<1x8x256xf32>
    %1700 = vector.shape_cast %1699 : vector<1x8x256xf32> to vector<8x256xf32>
    %1701 = vector.shape_cast %1698 : vector<8x256xf32> to vector<1x8x256xf32>
    tpu.vector_store %arg12[%c0_1203, %c0_1204, %c0_1205], %1701 {strides = array<i32>} : memref<1x8x256xf32, #tpu.memory_space<vmem>>, vector<1x8x256xf32>,
    %c0_1206 = arith.constant 0 : index
    %c0_1207 = arith.constant 0 : index
    %c0_1208 = arith.constant 0 : index
    %1702 = vector.load %arg13[%c0_1206, %c0_1207, %c0_1208] : memref<1x8x256xf32, #tpu.memory_space<vmem>>, vector<1x8x256xf32>
    %1703 = vector.shape_cast %1702 : vector<1x8x256xf32> to vector<8x256xf32>
    %cst_1209 = arith.constant 1.000000e+30 : f32
    %1704 = vector.broadcast %cst_1209 : f32 to vector<8x256xf32>
    %1705 = arith.select %1677, %1665, %1704 : vector<8x256xi1>, vector<8x256xf32>
    %1706 = arith.minimumf %1703, %1705 : vector<8x256xf32>
    %c0_1210 = arith.constant 0 : index
    %c0_1211 = arith.constant 0 : index
    %c0_1212 = arith.constant 0 : index
    %1707 = vector.load %arg13[%c0_1210, %c0_1211, %c0_1212] : memref<1x8x256xf32, #tpu.memory_space<vmem>>, vector<1x8x256xf32>
    %1708 = vector.shape_cast %1707 : vector<1x8x256xf32> to vector<8x256xf32>
    %1709 = vector.shape_cast %1706 : vector<8x256xf32> to vector<1x8x256xf32>
    tpu.vector_store %arg13[%c0_1210, %c0_1211, %c0_1212], %1709 {strides = array<i32>} : memref<1x8x256xf32, #tpu.memory_space<vmem>>, vector<1x8x256xf32>,
    %c248 = arith.constant 248 : index
    %c0_1213 = arith.constant 0 : index
    %1710 = vector.load %arg2[%c248, %c0_1213] : memref<256x1xf32, #tpu.memory_space<vmem>>, vector<8x1xf32>
    %c248_1214 = arith.constant 248 : index
    %c0_1215 = arith.constant 0 : index
    %1711 = vector.load %arg3[%c248_1214, %c0_1215] : memref<256x1xf32, #tpu.memory_space<vmem>>, vector<8x1xf32>
    %1712 = vector.broadcast %1710 : vector<8x1xf32> to vector<8x256xf32>
    %1713 = vector.broadcast %3 : vector<1x256xf32> to vector<8x256xf32>
    %1714 = arith.subf %1712, %1713 : vector<8x256xf32>
    %1715 = vector.broadcast %1711 : vector<8x1xf32> to vector<8x256xf32>
    %1716 = vector.broadcast %4 : vector<1x256xf32> to vector<8x256xf32>
    %1717 = arith.subf %1715, %1716 : vector<8x256xf32>
    %1718 = arith.mulf %1714, %1714 : vector<8x256xf32>
    %1719 = arith.mulf %1717, %1717 : vector<8x256xf32>
    %1720 = arith.addf %1718, %1719 : vector<8x256xf32>
    %c0_1216 = arith.constant 0 : index
    %c248_1217 = arith.constant 248 : index
    %c0_1218 = arith.constant 0 : index
    %1721 = vector.load %arg6[%c0_1216, %c248_1217, %c0_1218] : memref<1x256x1xf32, #tpu.memory_space<vmem>>, vector<1x8x1xf32>
    %1722 = vector.shape_cast %1721 : vector<1x8x1xf32> to vector<8x1xf32>
    %1723 = vector.shape_cast %1722 : vector<8x1xf32> to vector<8x1xf32>
    %1724 = vector.broadcast %1723 : vector<8x1xf32> to vector<8x256xf32>
    %cst_1219 = arith.constant 5.000000e-01 : f32
    %1725 = vector.broadcast %cst_1219 : f32 to vector<8x256xf32>
    %1726 = arith.cmpf ogt, %1724, %1725 : vector<8x256xf32>
    %c0_1220 = arith.constant 0 : index
    %c248_1221 = arith.constant 248 : index
    %c0_1222 = arith.constant 0 : index
    %1727 = vector.load %arg7[%c0_1220, %c248_1221, %c0_1222] : memref<1x256x1xf32, #tpu.memory_space<vmem>>, vector<1x8x1xf32>
    %1728 = vector.shape_cast %1727 : vector<1x8x1xf32> to vector<8x1xf32>
    %1729 = vector.shape_cast %1728 : vector<8x1xf32> to vector<8x1xf32>
    %1730 = vector.broadcast %1729 : vector<8x1xf32> to vector<8x256xf32>
    %cst_1223 = arith.constant 5.000000e-01 : f32
    %1731 = vector.broadcast %cst_1223 : f32 to vector<8x256xf32>
    %1732 = arith.cmpf ogt, %1730, %1731 : vector<8x256xf32>
    %c0_1224 = arith.constant 0 : index
    %c0_1225 = arith.constant 0 : index
    %c0_1226 = arith.constant 0 : index
    %1733 = vector.load %arg10[%c0_1224, %c0_1225, %c0_1226] : memref<1x8x256xf32, #tpu.memory_space<vmem>>, vector<1x8x256xf32>
    %1734 = vector.shape_cast %1733 : vector<1x8x256xf32> to vector<8x256xf32>
    %cst_1227 = arith.constant 1.000000e+30 : f32
    %1735 = vector.broadcast %cst_1227 : f32 to vector<8x256xf32>
    %1736 = arith.select %1726, %1735, %1720 : vector<8x256xi1>, vector<8x256xf32>
    %1737 = arith.minimumf %1734, %1736 : vector<8x256xf32>
    %c0_1228 = arith.constant 0 : index
    %c0_1229 = arith.constant 0 : index
    %c0_1230 = arith.constant 0 : index
    %1738 = vector.load %arg10[%c0_1228, %c0_1229, %c0_1230] : memref<1x8x256xf32, #tpu.memory_space<vmem>>, vector<1x8x256xf32>
    %1739 = vector.shape_cast %1738 : vector<1x8x256xf32> to vector<8x256xf32>
    %1740 = vector.shape_cast %1737 : vector<8x256xf32> to vector<1x8x256xf32>
    tpu.vector_store %arg10[%c0_1228, %c0_1229, %c0_1230], %1740 {strides = array<i32>} : memref<1x8x256xf32, #tpu.memory_space<vmem>>, vector<1x8x256xf32>,
    %c0_1231 = arith.constant 0 : index
    %c0_1232 = arith.constant 0 : index
    %c0_1233 = arith.constant 0 : index
    %1741 = vector.load %arg11[%c0_1231, %c0_1232, %c0_1233] : memref<1x8x256xf32, #tpu.memory_space<vmem>>, vector<1x8x256xf32>
    %1742 = vector.shape_cast %1741 : vector<1x8x256xf32> to vector<8x256xf32>
    %cst_1234 = arith.constant 1.000000e+30 : f32
    %1743 = vector.broadcast %cst_1234 : f32 to vector<8x256xf32>
    %1744 = arith.select %1726, %1720, %1743 : vector<8x256xi1>, vector<8x256xf32>
    %1745 = arith.minimumf %1742, %1744 : vector<8x256xf32>
    %c0_1235 = arith.constant 0 : index
    %c0_1236 = arith.constant 0 : index
    %c0_1237 = arith.constant 0 : index
    %1746 = vector.load %arg11[%c0_1235, %c0_1236, %c0_1237] : memref<1x8x256xf32, #tpu.memory_space<vmem>>, vector<1x8x256xf32>
    %1747 = vector.shape_cast %1746 : vector<1x8x256xf32> to vector<8x256xf32>
    %1748 = vector.shape_cast %1745 : vector<8x256xf32> to vector<1x8x256xf32>
    tpu.vector_store %arg11[%c0_1235, %c0_1236, %c0_1237], %1748 {strides = array<i32>} : memref<1x8x256xf32, #tpu.memory_space<vmem>>, vector<1x8x256xf32>,
    %c0_1238 = arith.constant 0 : index
    %c0_1239 = arith.constant 0 : index
    %c0_1240 = arith.constant 0 : index
    %1749 = vector.load %arg12[%c0_1238, %c0_1239, %c0_1240] : memref<1x8x256xf32, #tpu.memory_space<vmem>>, vector<1x8x256xf32>
    %1750 = vector.shape_cast %1749 : vector<1x8x256xf32> to vector<8x256xf32>
    %cst_1241 = arith.constant 1.000000e+30 : f32
    %1751 = vector.broadcast %cst_1241 : f32 to vector<8x256xf32>
    %1752 = arith.select %1732, %1751, %1720 : vector<8x256xi1>, vector<8x256xf32>
    %1753 = arith.minimumf %1750, %1752 : vector<8x256xf32>
    %c0_1242 = arith.constant 0 : index
    %c0_1243 = arith.constant 0 : index
    %c0_1244 = arith.constant 0 : index
    %1754 = vector.load %arg12[%c0_1242, %c0_1243, %c0_1244] : memref<1x8x256xf32, #tpu.memory_space<vmem>>, vector<1x8x256xf32>
    %1755 = vector.shape_cast %1754 : vector<1x8x256xf32> to vector<8x256xf32>
    %1756 = vector.shape_cast %1753 : vector<8x256xf32> to vector<1x8x256xf32>
    tpu.vector_store %arg12[%c0_1242, %c0_1243, %c0_1244], %1756 {strides = array<i32>} : memref<1x8x256xf32, #tpu.memory_space<vmem>>, vector<1x8x256xf32>,
    %c0_1245 = arith.constant 0 : index
    %c0_1246 = arith.constant 0 : index
    %c0_1247 = arith.constant 0 : index
    %1757 = vector.load %arg13[%c0_1245, %c0_1246, %c0_1247] : memref<1x8x256xf32, #tpu.memory_space<vmem>>, vector<1x8x256xf32>
    %1758 = vector.shape_cast %1757 : vector<1x8x256xf32> to vector<8x256xf32>
    %cst_1248 = arith.constant 1.000000e+30 : f32
    %1759 = vector.broadcast %cst_1248 : f32 to vector<8x256xf32>
    %1760 = arith.select %1732, %1720, %1759 : vector<8x256xi1>, vector<8x256xf32>
    %1761 = arith.minimumf %1758, %1760 : vector<8x256xf32>
    %c0_1249 = arith.constant 0 : index
    %c0_1250 = arith.constant 0 : index
    %c0_1251 = arith.constant 0 : index
    %1762 = vector.load %arg13[%c0_1249, %c0_1250, %c0_1251] : memref<1x8x256xf32, #tpu.memory_space<vmem>>, vector<1x8x256xf32>
    %1763 = vector.shape_cast %1762 : vector<1x8x256xf32> to vector<8x256xf32>
    %1764 = vector.shape_cast %1761 : vector<8x256xf32> to vector<1x8x256xf32>
    tpu.vector_store %arg13[%c0_1249, %c0_1250, %c0_1251], %1764 {strides = array<i32>} : memref<1x8x256xf32, #tpu.memory_space<vmem>>, vector<1x8x256xf32>,
    %c0_i32_1252 = arith.constant 0 : i32
    %1765 = arith.cmpi eq, %arg1, %c0_i32_1252 : i32
    %1766 = arith.extui %1765 : i1 to i32
    %c0_i32_1253 = arith.constant 0 : i32
    %1767 = arith.cmpi ne, %1766, %c0_i32_1253 : i32
    scf.if %1767 {
      %cst_1254 = arith.constant 0.000000e+00 : f32
      %1768 = vector.broadcast %cst_1254 : f32 to vector<1x1xf32>
      %c0_1255 = arith.constant 0 : index
      %c0_1256 = arith.constant 0 : index
      %c0_1257 = arith.constant 0 : index
      %1769 = vector.load %arg10[%c0_1255, %c0_1256, %c0_1257] : memref<1x8x256xf32, #tpu.memory_space<vmem>>, vector<1x8x256xf32>
      %1770 = vector.shape_cast %1769 : vector<1x8x256xf32> to vector<8x256xf32>
      %c0_1258 = arith.constant 0 : index
      %c0_1259 = arith.constant 0 : index
      %c0_1260 = arith.constant 0 : index
      %1771 = vector.load %arg11[%c0_1258, %c0_1259, %c0_1260] : memref<1x8x256xf32, #tpu.memory_space<vmem>>, vector<1x8x256xf32>
      %1772 = vector.shape_cast %1771 : vector<1x8x256xf32> to vector<8x256xf32>
      %cst_1261 = arith.constant dense<0x7F800000> : vector<256xf32>
      %1773 = vector.multi_reduction <minimumf>, %1770, %cst_1261 [0] : vector<8x256xf32> to vector<256xf32>
      %1774 = vector.shape_cast %1773 : vector<256xf32> to vector<1x256xf32>
      %cst_1262 = arith.constant dense<0x7F800000> : vector<256xf32>
      %1775 = vector.multi_reduction <minimumf>, %1772, %cst_1262 [0] : vector<8x256xf32> to vector<256xf32>
      %1776 = vector.shape_cast %1775 : vector<256xf32> to vector<1x256xf32>
      %cst_1263 = arith.constant 5.000000e+29 : f32
      %1777 = vector.broadcast %cst_1263 : f32 to vector<1x256xf32>
      %1778 = arith.cmpf oge, %1774, %1777 : vector<1x256xf32>
      %1779 = math.sqrt %1774 : vector<1x256xf32>
      %cst_1264 = arith.constant 0.000000e+00 : f32
      %1780 = vector.broadcast %cst_1264 : f32 to vector<1x256xf32>
      %1781 = arith.select %1778, %1780, %1779 : vector<1x256xi1>, vector<1x256xf32>
      %cst_1265 = arith.constant 5.000000e+29 : f32
      %1782 = vector.broadcast %cst_1265 : f32 to vector<1x256xf32>
      %1783 = arith.cmpf oge, %1776, %1782 : vector<1x256xf32>
      %1784 = math.sqrt %1776 : vector<1x256xf32>
      %cst_1266 = arith.constant 0.000000e+00 : f32
      %1785 = vector.broadcast %cst_1266 : f32 to vector<1x256xf32>
      %1786 = arith.select %1783, %1785, %1784 : vector<1x256xi1>, vector<1x256xf32>
      %1787 = arith.addf %1781, %1786 : vector<1x256xf32>
      %c0_1267 = arith.constant 0 : index
      %c0_1268 = arith.constant 0 : index
      %c0_1269 = arith.constant 0 : index
      %1788 = vector.load %arg12[%c0_1267, %c0_1268, %c0_1269] : memref<1x8x256xf32, #tpu.memory_space<vmem>>, vector<1x8x256xf32>
      %1789 = vector.shape_cast %1788 : vector<1x8x256xf32> to vector<8x256xf32>
      %c0_1270 = arith.constant 0 : index
      %c0_1271 = arith.constant 0 : index
      %c0_1272 = arith.constant 0 : index
      %1790 = vector.load %arg13[%c0_1270, %c0_1271, %c0_1272] : memref<1x8x256xf32, #tpu.memory_space<vmem>>, vector<1x8x256xf32>
      %1791 = vector.shape_cast %1790 : vector<1x8x256xf32> to vector<8x256xf32>
      %cst_1273 = arith.constant dense<0x7F800000> : vector<256xf32>
      %1792 = vector.multi_reduction <minimumf>, %1789, %cst_1273 [0] : vector<8x256xf32> to vector<256xf32>
      %1793 = vector.shape_cast %1792 : vector<256xf32> to vector<1x256xf32>
      %cst_1274 = arith.constant dense<0x7F800000> : vector<256xf32>
      %1794 = vector.multi_reduction <minimumf>, %1791, %cst_1274 [0] : vector<8x256xf32> to vector<256xf32>
      %1795 = vector.shape_cast %1794 : vector<256xf32> to vector<1x256xf32>
      %cst_1275 = arith.constant 5.000000e+29 : f32
      %1796 = vector.broadcast %cst_1275 : f32 to vector<1x256xf32>
      %1797 = arith.cmpf oge, %1793, %1796 : vector<1x256xf32>
      %1798 = math.sqrt %1793 : vector<1x256xf32>
      %cst_1276 = arith.constant 0.000000e+00 : f32
      %1799 = vector.broadcast %cst_1276 : f32 to vector<1x256xf32>
      %1800 = arith.select %1797, %1799, %1798 : vector<1x256xi1>, vector<1x256xf32>
      %cst_1277 = arith.constant 5.000000e+29 : f32
      %1801 = vector.broadcast %cst_1277 : f32 to vector<1x256xf32>
      %1802 = arith.cmpf oge, %1795, %1801 : vector<1x256xf32>
      %1803 = math.sqrt %1795 : vector<1x256xf32>
      %cst_1278 = arith.constant 0.000000e+00 : f32
      %1804 = vector.broadcast %cst_1278 : f32 to vector<1x256xf32>
      %1805 = arith.select %1802, %1804, %1803 : vector<1x256xi1>, vector<1x256xf32>
      %1806 = arith.addf %1800, %1805 : vector<1x256xf32>
      %1807 = arith.mulf %1787, %1787 : vector<1x256xf32>
      %1808 = arith.mulf %1806, %1806 : vector<1x256xf32>
      %1809 = arith.addf %1807, %1808 : vector<1x256xf32>
      %c0_1279 = arith.constant 0 : index
      %c0_1280 = arith.constant 0 : index
      %c0_1281 = arith.constant 0 : index
      %1810 = vector.load %arg8[%c0_1279, %c0_1280, %c0_1281] : memref<1x1x256xf32, #tpu.memory_space<vmem>>, vector<1x1x256xf32>
      %1811 = vector.shape_cast %1810 : vector<1x1x256xf32> to vector<1x256xf32>
      %1812 = arith.mulf %1811, %1809 : vector<1x256xf32>
      %cst_1282 = arith.constant dense<0.000000e+00> : vector<1xf32>
      %1813 = vector.multi_reduction <add>, %1812, %cst_1282 [1] : vector<1x256xf32> to vector<1xf32>
      %1814 = vector.shape_cast %1813 : vector<1xf32> to vector<1x1xf32>
      %1815 = arith.addf %1768, %1814 : vector<1x1xf32>
      %c0_1283 = arith.constant 0 : index
      %c0_1284 = arith.constant 0 : index
      %c0_1285 = arith.constant 0 : index
      %1816 = vector.load %arg9[%c0_1283, %c0_1284, %c0_1285] : memref<1x1x1xf32, #tpu.memory_space<vmem>>, vector<1x1x1xf32>
      %1817 = vector.shape_cast %1816 : vector<1x1x1xf32> to vector<1x1xf32>
      %1818 = vector.shape_cast %1815 : vector<1x1xf32> to vector<1x1x1xf32>
      tpu.vector_store %arg9[%c0_1283, %c0_1284, %c0_1285], %1818 {strides = array<i32>} : memref<1x1x1xf32, #tpu.memory_space<vmem>>, vector<1x1x1xf32>,
    } else {
    }
    return
  }
  func.func @transform_0(%arg0: i32, %arg1: i32) -> (i32, i32) {
    %c0_i32 = arith.constant 0 : i32
    %c0_i32_0 = arith.constant 0 : i32
    return %arg1, %c0_i32 : i32, i32
  }
  func.func @transform_1(%arg0: i32, %arg1: i32) -> (i32, i32) {
    %c0_i32 = arith.constant 0 : i32
    %c0_i32_0 = arith.constant 0 : i32
    return %arg1, %c0_i32 : i32, i32
  }
  func.func @transform_2(%arg0: i32, %arg1: i32) -> (i32, i32) {
    %c0_i32 = arith.constant 0 : i32
    %c0_i32_0 = arith.constant 0 : i32
    %c0_i32_1 = arith.constant 0 : i32
    return %c0_i32, %c0_i32_0 : i32, i32
  }
  func.func @transform_3(%arg0: i32, %arg1: i32) -> (i32, i32) {
    %c0_i32 = arith.constant 0 : i32
    %c0_i32_0 = arith.constant 0 : i32
    %c0_i32_1 = arith.constant 0 : i32
    return %c0_i32, %c0_i32_0 : i32, i32
  }
  func.func @transform_4(%arg0: i32, %arg1: i32) -> (i32, i32, i32) {
    %c0_i32 = arith.constant 0 : i32
    %c0_i32_0 = arith.constant 0 : i32
    return %arg0, %arg1, %c0_i32 : i32, i32, i32
  }
  func.func @transform_5(%arg0: i32, %arg1: i32) -> (i32, i32, i32) {
    %c0_i32 = arith.constant 0 : i32
    %c0_i32_0 = arith.constant 0 : i32
    return %arg0, %arg1, %c0_i32 : i32, i32, i32
  }
  func.func @transform_6(%arg0: i32, %arg1: i32) -> (i32, i32, i32) {
    %c0_i32 = arith.constant 0 : i32
    %c0_i32_0 = arith.constant 0 : i32
    %c0_i32_1 = arith.constant 0 : i32
    return %arg0, %c0_i32, %c0_i32_0 : i32, i32, i32
  }
  func.func @transform_7(%arg0: i32, %arg1: i32) -> (i32, i32, i32) {
    %c0_i32 = arith.constant 0 : i32
    %c0_i32_0 = arith.constant 0 : i32
    %c0_i32_1 = arith.constant 0 : i32
    return %arg0, %c0_i32, %c0_i32_0 : i32, i32, i32
  }
}

</mosaic_0001>

<bundles_post_ra>
// kernel: tpu_custom_call.1
= control target key start
LH: loop header
LB: loop body
LE: loop exit
PB: predicated region body
PF: predicated region fallthrough
CT: control target
= control target key end

     0   :  { %s3041_s24 = smov 0   ;;  %s3043_s25 = smov 0   ;;  %s4229_s0 = inlined_call_operand.vmem [shape: f32[256,1], index: 0, kind: input, shape index: {}]   ;;  %s4230_s1 = inlined_call_operand.vmem [shape: f32[256,1], index: 1, kind: input, shape index: {}]   ;;  %s4231_s2 = inlined_call_operand.vmem [shape: f32[1,256], index: 2, kind: input, shape index: {}]   ;;  %s4232_s3 = inlined_call_operand.vmem [shape: f32[1,256], index: 3, kind: input, shape index: {}]   ;;  %s4233_s4 = inlined_call_operand.vmem [shape: f32[2,256,1], index: 4, kind: input, shape index: {}]   ;;  %s4234_s5 = inlined_call_operand.vmem [shape: f32[2,256,1], index: 5, kind: input, shape index: {}]   ;;  %s4235_s6 = inlined_call_operand.vmem [shape: f32[2,1,256], index: 6, kind: input, shape index: {}]   ;;  %s4236_s7 = inlined_call_operand.vmem [shape: f32[2,1,1], index: 7, kind: output, shape index: {}]  }
   0x1   :  { %s3045_s26 = smov 0  }
   0x2 LB: > { %s29_s27 = sadd.s32 1, %s2993_s25  ;;  %p2921_p0 = scmp.ge.s32.totalorder %s2997_s26, 1  ;;  %s2997_s26 = sphi %s3045_s26, %s17_s26   ;;  %s2993_s25 = sphi %s3043_s25, %s4238_s25   ;;  %s2989_s24 = sphi %s3041_s24, %s4237_s24  }
   0x3   : > { %p31_p1 = scmp.ge.s32.totalorder %s29_s27, 2  ;;  %p304_p2 = scmp.lt.s32.totalorder %s2997_s26, 3 }
   0x5   : > { %s4240_s27 = smov (%p31_p1, %s29_s27), 0  ;;  %p305_p3 = pnand %p2921_p0, %p304_p2 }
   0x6   : > { %v414_v0 = vld [vmem:[%s4229_s0] sm:$0xff] (!%p305_p3)  ;;  %p374_p4 = scmp.lt.s32.totalorder (!%p305_p3), %s2989_s24, 1  ;;  %v2999_v1 = vmov (!%p305_p3), 0   ;;  %v504_v4 = vld [vmem:[%s4229_s0 + $0x8] sm:$0xff] (!%p305_p3)  ;;  %v572_v8 = vld [vmem:[%s4229_s0 + $0x10] sm:$0xff] (!%p305_p3) }
   0x7   : > { %308 = sbr.rel (%p305_p3) target bundleno = 597 (0x255), region = 48  ;;  %2957 = vset.pattern.permute.xlu0 (!%p305_p3), %v2999_v1  ;;  %2958 = vset.pattern.permute.xlu1 (!%p305_p3), %v2999_v1  ;;  %v415_v2 = vld [vmem:[%s4230_s1] sm:$0xff] (!%p305_p3)  ;;  %v505_v7 = vld [vmem:[%s4230_s1 + $0x8] sm:$0xff] (!%p305_p3)  ;;  %v573_v11 = vld [vmem:[%s4230_s1 + $0x10] sm:$0xff] (!%p305_p3) }
   0x8   : > { %418 = vperm.xlu0 (!%p305_p3), %2957, %v414_v0   ;;  %v640_v12 = vld [vmem:[%s4229_s0 + $0x18] sm:$0xff] (!%p305_p3)  ;;  %v708_v16 = vld [vmem:[%s4229_s0 + $0x20] sm:$0xff] (!%p305_p3)  ;;  %v776_v20 = vld [vmem:[%s4229_s0 + $0x28] sm:$0xff] (!%p305_p3)  ;;  %v422_v0 = vlaneseq (!%p305_p3) }
   0x9   : > { %v641_v15 = vld [vmem:[%s4230_s1 + $0x18] sm:$0xff] (!%p305_p3)  ;;  %v709_v19 = vld [vmem:[%s4230_s1 + $0x20] sm:$0xff] (!%p305_p3)  ;;  %v777_v23 = vld [vmem:[%s4230_s1 + $0x28] sm:$0xff] (!%p305_p3) }
   0xa   : > { %v844_v24 = vld [vmem:[%s4229_s0 + $0x30] sm:$0xff] (!%p305_p3)  ;;  %v912_v28 = vld [vmem:[%s4229_s0 + $0x38] sm:$0xff] (!%p305_p3)  ;;  %v980_v32 = vld [vmem:[%s4229_s0 + $0x40] sm:$0xff] (!%p305_p3) }
   0xb   : > { %v845_v27 = vld [vmem:[%s4230_s1 + $0x30] sm:$0xff] (!%p305_p3)  ;;  %v913_v31 = vld [vmem:[%s4230_s1 + $0x38] sm:$0xff] (!%p305_p3)  ;;  %v981_v35 = vld [vmem:[%s4230_s1 + $0x40] sm:$0xff] (!%p305_p3) }
   0xc   : > { %436 = vperm.xlu0 (!%p305_p3), %2957, %v415_v2   ;;  %v1048_v36 = vld [vmem:[%s4229_s0 + $0x48] sm:$0xff] (!%p305_p3)  ;;  %v1116_v40 = vld [vmem:[%s4229_s0 + $0x50] sm:$0xff] (!%p305_p3)  ;;  %v1184_v44 = vld [vmem:[%s4229_s0 + $0x58] sm:$0xff] (!%p305_p3)  ;;  %v3202_v2 = vshrl.u32 (!%p305_p3), %v422_v0, 7 }
   0xd   : > { %v1049_v39 = vld [vmem:[%s4230_s1 + $0x48] sm:$0xff] (!%p305_p3)  ;;  %v1117_v43 = vld [vmem:[%s4230_s1 + $0x50] sm:$0xff] (!%p305_p3)  ;;  %v1185_v47 = vld [vmem:[%s4230_s1 + $0x58] sm:$0xff] (!%p305_p3) }
   0xe   : > { %s4242_s24 = smov (!%p374_p4, %s2989_s24), 1  ;;  %v1252_v48 = vld [vmem:[%s4229_s0 + $0x60] sm:$0xff]  ;;  %v1320_v52 = vld [vmem:[%s4229_s0 + $0x68] sm:$0xff]  ;;  %v1388_v56 = vld [vmem:[%s4229_s0 + $0x70] sm:$0xff] }
   0xf   : > { %s2929_s9 = sshll.u32 %s4242_s24, 8  ;;  %v1253_v51 = vld [vmem:[%s4230_s1 + $0x60] sm:$0xff]  ;;  %v1321_v55 = vld [vmem:[%s4230_s1 + $0x68] sm:$0xff]  ;;  %v1389_v59 = vld [vmem:[%s4230_s1 + $0x70] sm:$0xff]  ;;  %s399_s10 = scalar_lea.vmem %s4236_s7, %s4242_s24 }
  0x10   : > { %s3071_s12 = scalar_lea.vmem %s4233_s4, %s2929_s9  ;;  %s3076_s15 = scalar_lea.vmem %s4234_s5, %s2929_s9  ;;  %508 = vperm.xlu0 %2957, %v504_v4   ;;  %v1456_v60 = vld [vmem:[%s4229_s0 + $0x78] sm:$0xff]  ;;  %v1524_v1 = vld [vmem:[%s4229_s0 + $0x80] sm:$0xff] }
  0x11   : > { %v458_v3 = vld [vmem:[%s3071_s12] sm:$0xff]  ;;  %v526_v6 = vld [vmem:[%s3071_s12 + $0x8] sm:$0xff]  ;;  %v594_v10 = vld [vmem:[%s3071_s12 + $0x10] sm:$0xff] }
  0x12   : > { %461 = vperm.xlu1 %2958, %v458_v3   ;;  %v465_v5 = vld [vmem:[%s3076_s15] sm:$0xff]  ;;  %v533_v9 = vld [vmem:[%s3076_s15 + $0x8] sm:$0xff]  ;;  %v601_v13 = vld [vmem:[%s3076_s15 + $0x10] sm:$0xff] }
  0x13   : > { %v662_v14 = vld [vmem:[%s3071_s12 + $0x18] sm:$0xff]  ;;  %v730_v18 = vld [vmem:[%s3071_s12 + $0x20] sm:$0xff]  ;;  %v798_v22 = vld [vmem:[%s3071_s12 + $0x28] sm:$0xff] }
  0x14   : > { %529 = vperm.xlu0 %2957, %v526_v6   ;;  %v669_v17 = vld [vmem:[%s3076_s15 + $0x18] sm:$0xff]  ;;  %v737_v21 = vld [vmem:[%s3076_s15 + $0x20] sm:$0xff]  ;;  %v805_v25 = vld [vmem:[%s3076_s15 + $0x28] sm:$0xff]  ;;  %v3207_v6 = vsub.s32 0, %v3202_v2 }
  0x15   : > { %v866_v26 = vld [vmem:[%s3071_s12 + $0x30] sm:$0xff]  ;;  %v934_v30 = vld [vmem:[%s3071_s12 + $0x38] sm:$0xff]  ;;  %v1002_v34 = vld [vmem:[%s3071_s12 + $0x40] sm:$0xff] }
  0x16   : > { %468 = vperm.xlu1 %2958, %v465_v5   ;;  %v873_v29 = vld [vmem:[%s3076_s15 + $0x30] sm:$0xff]  ;;  %v941_v33 = vld [vmem:[%s3076_s15 + $0x38] sm:$0xff]  ;;  %v1009_v37 = vld [vmem:[%s3076_s15 + $0x40] sm:$0xff] }
  0x17   : > { %v1070_v38 = vld [vmem:[%s3071_s12 + $0x48] sm:$0xff]  ;;  %v1138_v42 = vld [vmem:[%s3071_s12 + $0x50] sm:$0xff]  ;;  %v1206_v46 = vld [vmem:[%s3071_s12 + $0x58] sm:$0xff] }
  0x18   : > { %576 = vperm.xlu0 %2957, %v572_v8   ;;  %v1077_v41 = vld [vmem:[%s3076_s15 + $0x48] sm:$0xff]  ;;  %v1145_v45 = vld [vmem:[%s3076_s15 + $0x50] sm:$0xff]  ;;  %v1213_v49 = vld [vmem:[%s3076_s15 + $0x58] sm:$0xff] }
  0x19   : > { %v1274_v50 = vld [vmem:[%s3071_s12 + $0x60] sm:$0xff]  ;;  %v1342_v54 = vld [vmem:[%s3071_s12 + $0x68] sm:$0xff]  ;;  %v1410_v58 = vld [vmem:[%s3071_s12 + $0x70] sm:$0xff] }
  0x1a   : > { %515 = vperm.xlu1 %2958, %v505_v7   ;;  %v1281_v53 = vld [vmem:[%s3076_s15 + $0x60] sm:$0xff]  ;;  %v1349_v57 = vld [vmem:[%s3076_s15 + $0x68] sm:$0xff]  ;;  %v1417_v61 = vld [vmem:[%s3076_s15 + $0x70] sm:$0xff]  ;;  %v3210_v7 = vsub.s32 1, %v3202_v2 }
  0x1b   : > { %v1478_v62 = vld [vmem:[%s3071_s12 + $0x78] sm:$0xff]  ;;  %v1546_v5 = vld [vmem:[%s3071_s12 + $0x80] sm:$0xff] }
  0x1c   : > { %597 = vperm.xlu0 %2957, %v594_v10   ;;  %v1457_v63 = vld [vmem:[%s4230_s1 + $0x78] sm:$0xff]  ;;  %v1525_v8 = vld [vmem:[%s4230_s1 + $0x80] sm:$0xff] }
  0x1d   : > { %v1485_v3 = vld [vmem:[%s3076_s15 + $0x78] sm:$0xff] }
  0x1e   : > { %536 = vperm.xlu1 %2958, %v533_v9   ;;  %v412_v9 = vld [vmem:[%s4231_s2] sm:$0x3] }
  0x20   : > { %644 = vperm.xlu0 %2957, %v640_v12  }
  0x22   : > { %583 = vperm.xlu1 %2958, %v573_v11   ;;  %v413_v11 = vld [vmem:[%s4232_s3] sm:$0x3] }
  0x24   : > { %665 = vperm.xlu0 %2957, %v662_v14   ;;  %v3225_v14 = vrot.slane %v412_v9, %v3207_v6 }
  0x26   : > { %604 = vperm.xlu1 %2958, %v601_v13   ;;  %v1592_v13 = vld [vmem:[%s4229_s0 + $0x88] sm:$0xff] }
  0x28   : > { %712 = vperm.xlu0 %2957, %v708_v16   ;;  %v3231_v16 = vrot.slane %v413_v11, %v3207_v6 }
  0x2a   : > { %651 = vperm.xlu1 %2958, %v641_v15   ;;  %v3228_v15 = vrot.slane %v412_v9, %v3210_v7 }
  0x2c   : > { %733 = vperm.xlu0 %2957, %v730_v18   ;;  %v1553_v18 = vld [vmem:[%s3076_s15 + $0x80] sm:$0xff] }
  0x2e   : > { %672 = vperm.xlu1 %2958, %v669_v17   ;;  %v3234_v17 = vrot.slane %v413_v11, %v3210_v7 }
  0x30   : > { %780 = vperm.xlu0 %2957, %v776_v20  }
  0x32   : > { %719 = vperm.xlu1 %2958, %v709_v19  }
  0x34   : > { %801 = vperm.xlu0 %2957, %v798_v22  }
  0x36   : > { %740 = vperm.xlu1 %2958, %v737_v21   ;;  %v1614_v21 = vld [vmem:[%s3071_s12 + $0x88] sm:$0xff] }
  0x38   : > { %848 = vperm.xlu0 %2957, %v844_v24  }
  0x3a   : > { %787 = vperm.xlu1 %2958, %v777_v23  }
  0x3c   : > { %869 = vperm.xlu0 %2957, %v866_v26   ;;  %v1593_v26 = vld [vmem:[%s4230_s1 + $0x88] sm:$0xff] }
  0x3e   : > { %808 = vperm.xlu1 %2958, %v805_v25  }
  0x40   : > { %916 = vperm.xlu0 %2957, %v912_v28  }
  0x42   : > { %855 = vperm.xlu1 %2958, %v845_v27  }
  0x44   : > { %937 = vperm.xlu0 %2957, %v934_v30  }
  0x46   : > { %876 = vperm.xlu1 %2958, %v873_v29   ;;  %v1660_v29 = vld [vmem:[%s4229_s0 + $0x90] sm:$0xff] }
  0x48   : > { %984 = vperm.xlu0 %2957, %v980_v32  }
  0x4a   : > { %923 = vperm.xlu1 %2958, %v913_v31  }
  0x4c   : > { %1005 = vperm.xlu0 %2957, %v1002_v34   ;;  %v1621_v34 = vld [vmem:[%s3076_s15 + $0x88] sm:$0xff] }
  0x4e   : > { %944 = vperm.xlu1 %2958, %v941_v33  }
  0x50   : > { %1052 = vperm.xlu0 %2957, %v1048_v36  }
  0x52   : > { %991 = vperm.xlu1 %2958, %v981_v35  }
  0x54   : > { %1073 = vperm.xlu0 %2957, %v1070_v38  }
  0x56   : > { %1012 = vperm.xlu1 %2958, %v1009_v37   ;;  %v1682_v37 = vld [vmem:[%s3071_s12 + $0x90] sm:$0xff] }
  0x58   : > { %1120 = vperm.xlu0 %2957, %v1116_v40  }
  0x5a   : > { %1059 = vperm.xlu1 %2958, %v1049_v39  }
  0x5c   : > { %1141 = vperm.xlu0 %2957, %v1138_v42  }
  0x5e   : > { %1080 = vperm.xlu1 %2958, %v1077_v41   ;;  %v1661_v41 = vld [vmem:[%s4230_s1 + $0x90] sm:$0xff] }
  0x60   : > { %1188 = vperm.xlu0 %2957, %v1184_v44  }
  0x62   : > { %1127 = vperm.xlu1 %2958, %v1117_v43  }
  0x64   : > { %1209 = vperm.xlu0 %2957, %v1206_v46  }
  0x66   : > { %1148 = vperm.xlu1 %2958, %v1145_v45  }
  0x68   : > { %1256 = vperm.xlu0 %2957, %v1252_v48  }
  0x6a   : > { %1195 = vperm.xlu1 %2958, %v1185_v47   ;;  %v1728_v47 = vld [vmem:[%s4229_s0 + $0x98] sm:$0xff] }
  0x6c   : > { %1277 = vperm.xlu0 %2957, %v1274_v50  }
  0x6e   : > { %1216 = vperm.xlu1 %2958, %v1213_v49  }
  0x70   : > { %1324 = vperm.xlu0 %2957, %v1320_v52  }
  0x72   : > { %1263 = vperm.xlu1 %2958, %v1253_v51   ;;  %v1689_v51 = vld [vmem:[%s3076_s15 + $0x90] sm:$0xff] }
  0x74   : > { %1345 = vperm.xlu0 %2957, %v1342_v54  }
  0x76   : > { %1284 = vperm.xlu1 %2958, %v1281_v53  }
  0x78   : > { %1392 = vperm.xlu0 %2957, %v1388_v56  }
  0x7a   : > { %1331 = vperm.xlu1 %2958, %v1321_v55  }
  0x7c   : > { %1413 = vperm.xlu0 %2957, %v1410_v58  }
  0x7e   : > { %1352 = vperm.xlu1 %2958, %v1349_v57  }
  0x80   : > { %1460 = vperm.xlu0 %2957, %v1456_v60  }
  0x82   : > { %1399 = vperm.xlu1 %2958, %v1389_v59   ;;  %v1750_v59 = vld [vmem:[%s3071_s12 + $0x98] sm:$0xff] }
  0x84   : > { %1481 = vperm.xlu0 %2957, %v1478_v62  }
  0x86   : > { %1420 = vperm.xlu1 %2958, %v1417_v61  }
  0x87   : > { %v419_v4 = vpop.permute.xlu0 %418 }
  0x88   : > { %1528 = vperm.xlu0 %2957, %v1524_v1   ;;  %v432_v22 = vsub.f32 %v419_v4, %v3225_v14  ;;  %v433_v23 = vsub.f32 %v419_v4, %v3228_v15 }
  0x8a   : > { %1467 = vperm.xlu1 %2958, %v1457_v63   ;;  %v452_v30 = vmul.f32 %v432_v22, %v432_v22  ;;  %v453_v31 = vmul.f32 %v433_v23, %v433_v23 }
  0x8b   : > { %v437_v10 = vpop.permute.xlu0 %436 }
  0x8c   : > { %1549 = vperm.xlu0 %2957, %v1546_v5   ;;  %v450_v24 = vsub.f32 %v437_v10, %v3231_v16  ;;  %v451_v25 = vsub.f32 %v437_v10, %v3234_v17  ;;  %v1729_v5 = vld [vmem:[%s4230_s1 + $0x98] sm:$0xff] }
  0x8e   : > { %1488 = vperm.xlu1 %2958, %v1485_v3   ;;  %v454_v32 = vmul.f32 %v450_v24, %v450_v24  ;;  %v455_v33 = vmul.f32 %v451_v25, %v451_v25  ;;  %v1797_v24 = vld [vmem:[%s4230_s1 + $0xa0] sm:$0xff] }
  0x8f   : > { %v509_v19 = vpop.permute.xlu0 %508 }
  0x90   : > { %1596 = vperm.xlu0 %2957, %v1592_v13   ;;  %v456_v38 = vadd.f32 %v454_v32, %v452_v30  ;;  %v457_v39 = vadd.f32 %v455_v33, %v453_v31  ;;  %v511_v43 = vsub.f32 %v509_v19, %v3225_v14  ;;  %v512_v46 = vsub.f32 %v509_v19, %v3228_v15 }
  0x91   : > { %v462_v12 = vpop.permute.xlu1 %461 }
  0x92   : > { %1535 = vperm.xlu1 %2958, %v1525_v8   ;;  %vm464_vm0 = vcmp.gt.f32.partialorder %v462_v12, 0.5  ;;  %v520_v55 = vmul.f32 %v511_v43, %v511_v43  ;;  %v521_v62 = vmul.f32 %v512_v46, %v512_v46 }
  0x93   : > { %v3247_v27 = vpop.permute.xlu0 %529  ;;  %v474_v48 = vsel %vm464_vm0, 1e+30, %v456_v38  ;;  %v3268_v49 = vsel %vm464_vm0, 1e+30, %v457_v39  ;;  %v482_v52 = vsel %vm464_vm0, %v456_v38, 1e+30 }
  0x94   : > { %1617 = vperm.xlu0 %2957, %v1614_v21   ;;  %v483_v54 = vsel %vm464_vm0, %v457_v39, 1e+30  ;;  %v476_v60 = vmin.f32 %v474_v48, 1e+30  ;;  %v477_v61 = vmin.f32 %v3268_v49, 1e+30 }
  0x95   : > { %v3237_v20 = vpop.permute.xlu1 %468  ;;  %v484_v8 = vmin.f32 %v482_v52, 1e+30  ;;  %v485_v9 = vmin.f32 %v483_v54, 1e+30  ;;  %vm532_vm3 = vcmp.gt.f32.partialorder %v3247_v27, 0.5 }
  0x96   : > { %1556 = vperm.xlu1 %2958, %v1553_v18   ;;  %vm471_vm1 = vcmp.gt.f32.partialorder %v3237_v20, 0.5 }
  0x97   : > { %v577_v35 = vpop.permute.xlu0 %576  ;;  %v490_v63 = vsel %vm471_vm1, 1e+30, %v456_v38  ;;  %v491_v0 = vsel %vm471_vm1, 1e+30, %v457_v39  ;;  %v498_v10 = vsel %vm471_vm1, %v456_v38, 1e+30 }
  0x98   : > { %1664 = vperm.xlu0 %2957, %v1660_v29   ;;  %v579_v3 = vsub.f32 %v577_v35, %v3225_v14  ;;  %v580_v11 = vsub.f32 %v577_v35, %v3228_v15  ;;  %v499_v13 = vsel %vm471_vm1, %v457_v39, 1e+30  ;;  %v492_v22 = vmin.f32 %v490_v63, 1e+30  ;;  %v1796_v29 = vld [vmem:[%s4229_s0 + $0xa0] sm:$0xff]  ;;  %v1932_v63 = vld [vmem:[%s4229_s0 + $0xb0] sm:$0xff] }
  0x99   : > { %v516_v28 = vpop.permute.xlu1 %515  ;;  %v493_v23 = vmin.f32 %v491_v0, 1e+30  ;;  %v500_v30 = vmin.f32 %v498_v10, 1e+30  ;;  %v501_v31 = vmin.f32 %v499_v13, 1e+30 }
  0x9a   : > { %1603 = vperm.xlu1 %2958, %v1593_v26   ;;  %v518_v40 = vsub.f32 %v516_v28, %v3231_v16  ;;  %v519_v44 = vsub.f32 %v516_v28, %v3234_v17  ;;  %v588_v28 = vmul.f32 %v579_v3, %v579_v3  ;;  %v589_v32 = vmul.f32 %v580_v11, %v580_v11 }
  0x9b   : > { %v3260_v42 = vpop.permute.xlu0 %597 }
  0x9c   : > { %1685 = vperm.xlu0 %2957, %v1682_v37   ;;  %v522_v50 = vmul.f32 %v518_v40, %v518_v40  ;;  %v523_v56 = vmul.f32 %v519_v44, %v519_v44  ;;  %vm600_vm4 = vcmp.gt.f32.partialorder %v3260_v42, 0.5 }
  0x9d   : > { %v3253_v36 = vpop.permute.xlu1 %536 }
  0x9e   : > { %1624 = vperm.xlu1 %2958, %v1621_v34   ;;  %v524_v1 = vadd.f32 %v522_v50, %v520_v55  ;;  %v525_v18 = vadd.f32 %v523_v56, %v521_v62  ;;  %vm539_vm2 = vcmp.gt.f32.partialorder %v3253_v36, 0.5  ;;  %v1864_v50 = vld [vmem:[%s4229_s0 + $0xa8] sm:$0xff] }
  0x9f   : > { %v645_v53 = vpop.permute.xlu0 %644 }
  0xa0   : > { %1732 = vperm.xlu0 %2957, %v1728_v47   ;;  %v542_v25 = vsel %vm532_vm3, 1e+30, %v524_v1  ;;  %v550_v26 = vsel %vm532_vm3, %v524_v1, 1e+30  ;;  %v558_v33 = vsel %vm539_vm2, 1e+30, %v524_v1  ;;  %v647_v44 = vsub.f32 %v645_v53, %v3225_v14 }
  0xa1   : > { %v584_v45 = vpop.permute.xlu1 %583  ;;  %v543_v34 = vsel %vm532_vm3, 1e+30, %v525_v18  ;;  %v551_v35 = vsel %vm532_vm3, %v525_v18, 1e+30  ;;  %v3306_v40 = vmin.f32 %v476_v60, %v542_v25  ;;  %v559_v43 = vsel %vm539_vm2, 1e+30, %v525_v18 }
  0xa2   : > { %1671 = vperm.xlu1 %2958, %v1661_v41   ;;  %v586_v57 = vsub.f32 %v584_v45, %v3231_v16  ;;  %v587_v4 = vsub.f32 %v584_v45, %v3234_v17  ;;  %v3308_v41 = vmin.f32 %v484_v8, %v550_v26  ;;  %v1865_v45 = vld [vmem:[%s4230_s1 + $0xa8] sm:$0xff]  ;;  %v566_v46 = vsel %vm539_vm2, %v524_v1, 1e+30  ;;  %v1818_v26 = vld [vmem:[%s3071_s12 + $0xa0] sm:$0xff] }
  0xa3   : > { %v3289_v12 = vpop.permute.xlu0 %665  ;;  %v567_v47 = vsel %vm539_vm2, %v525_v18, 1e+30  ;;  %v648_v49 = vsub.f32 %v645_v53, %v3228_v15  ;;  %v3326_v52 = vmin.f32 %v485_v9, %v551_v35  ;;  %v3332_v56 = vmin.f32 %v492_v22, %v558_v33 }
  0xa4   : > { %v590_v19 = vmul.f32 %v586_v57, %v586_v57  ;;  %1753 = vperm.xlu0 %2957, %v1750_v59   ;;  %v591_v20 = vmul.f32 %v587_v4, %v587_v4  ;;  %v3337_v59 = vmin.f32 %v493_v23, %v559_v43  ;;  %v3339_v60 = vmin.f32 %v500_v30, %v566_v46  ;;  %v1757_v4 = vld [vmem:[%s3076_s15 + $0x98] sm:$0xff]  ;;  %v1933_v30 = vld [vmem:[%s4230_s1 + $0xb0] sm:$0xff] }
  0xa5   : > { %v3273_v58 = vpop.permute.xlu1 %604  ;;  %v656_v62 = vmul.f32 %v647_v44, %v647_v44  ;;  %v657_v3 = vmul.f32 %v648_v49, %v648_v49  ;;  %vm668_vm6 = vcmp.gt.f32.partialorder %v3289_v12, 0.5  ;;  %v2000_v46 = vld [vmem:[%s4229_s0 + $0xb8] sm:$0xff]  ;;  %v1886_v12 = vld [vmem:[%s3071_s12 + $0xa8] sm:$0xff] }
  0xa6   : > { %1692 = vperm.xlu1 %2958, %v1689_v51   ;;  %v592_v37 = vadd.f32 %v590_v19, %v588_v28  ;;  %v593_v48 = vadd.f32 %v591_v20, %v589_v32  ;;  %v3324_v51 = vmin.f32 %v477_v61, %v543_v34  ;;  %vm607_vm5 = vcmp.gt.f32.partialorder %v3273_v58, 0.5 }
  0xa7   : > { %v713_v27 = vpop.permute.xlu0 %712  ;;  %v3341_v61 = vmin.f32 %v501_v31, %v567_v47 }
  0xa8   : > { %1807 = vperm.xlu0 %2957, %v1797_v24   ;;  %v610_v36 = vsel %vm600_vm4, 1e+30, %v592_v37  ;;  %v3348_v0 = vsel %vm600_vm4, 1e+30, %v593_v48  ;;  %v618_v1 = vsel %vm600_vm4, %v592_v37, 1e+30  ;;  %v715_v22 = vsub.f32 %v713_v27, %v3225_v14 }
  0xa9   : > { %v652_v21 = vpop.permute.xlu1 %651  ;;  %v3357_v8 = vsel %vm600_vm4, %v593_v48, 1e+30  ;;  %v626_v9 = vsel %vm607_vm5, 1e+30, %v592_v37  ;;  %v3363_v13 = vsel %vm607_vm5, 1e+30, %v593_v48  ;;  %v716_v23 = vsub.f32 %v713_v27, %v3228_v15 }
  0xaa   : > { %1739 = vperm.xlu1 %2958, %v1729_v5   ;;  %v654_v38 = vsub.f32 %v652_v21, %v3231_v16  ;;  %v655_v54 = vsub.f32 %v652_v21, %v3234_v17  ;;  %v612_v5 = vmin.f32 %v3306_v40, %v610_v36  ;;  %v634_v18 = vsel %vm607_vm5, %v592_v37, 1e+30 }
  0xab   : > { %v3330_v55 = vpop.permute.xlu0 %733  ;;  %v3369_v19 = vsel %vm607_vm5, %v593_v48, 1e+30  ;;  %v613_v28 = vmin.f32 %v3324_v51, %v3348_v0  ;;  %v620_v58 = vmin.f32 %v3308_v41, %v618_v1  ;;  %v621_v20 = vmin.f32 %v3326_v52, %v3357_v8  ;;  %v2001_v8 = vld [vmem:[%s4230_s1 + $0xb8] sm:$0xff] }
  0xac   : > { %v658_v53 = vmul.f32 %v654_v38, %v654_v38  ;;  %1875 = vperm.xlu0 %2957, %v1865_v45   ;;  %v659_v10 = vmul.f32 %v655_v54, %v655_v54  ;;  %v629_v34 = vmin.f32 %v3337_v59, %v3363_v13  ;;  %v636_v35 = vmin.f32 %v3339_v60, %v634_v18 }
  0xad   : > { %v3304_v39 = vpop.permute.xlu1 %672  ;;  %v637_v37 = vmin.f32 %v3341_v61, %v3369_v19  ;;  %v724_v43 = vmul.f32 %v715_v22, %v715_v22  ;;  %v725_v44 = vmul.f32 %v716_v23, %v716_v23  ;;  %vm736_vm8 = vcmp.gt.f32.partialorder %v3330_v55, 0.5  ;;  %v2068_v55 = vld [vmem:[%s4229_s0 + $0xc0] sm:$0xff] }
  0xae   : > { %1800 = vperm.xlu1 %2958, %v1796_v29   ;;  %v660_v42 = vadd.f32 %v658_v53, %v656_v62  ;;  %v628_v29 = vmin.f32 %v3332_v56, %v626_v9  ;;  %v661_v31 = vadd.f32 %v659_v10, %v657_v3  ;;  %vm675_vm7 = vcmp.gt.f32.partialorder %v3304_v39, 0.5 }
  0xaf   : > { %v781_v11 = vpop.permute.xlu0 %780 }
  0xb0   : > { %1936 = vperm.xlu0 %2957, %v1932_v63   ;;  %v678_v38 = vsel %vm668_vm6, 1e+30, %v660_v42  ;;  %v686_v41 = vsel %vm668_vm6, %v660_v42, 1e+30  ;;  %v694_v47 = vsel %vm675_vm7, 1e+30, %v660_v42  ;;  %v783_v49 = vsub.f32 %v781_v11, %v3225_v14 }
  0xb1   : > { %v720_v57 = vpop.permute.xlu1 %719  ;;  %v702_v48 = vsel %vm675_vm7, %v660_v42, 1e+30  ;;  %v679_v51 = vsel %vm668_vm6, 1e+30, %v661_v31  ;;  %v3412_v52 = vmin.f32 %v612_v5, %v678_v38  ;;  %v687_v53 = vsel %vm668_vm6, %v661_v31, 1e+30 }
  0xb2   : > { %1868 = vperm.xlu1 %2958, %v1864_v50   ;;  %v722_v24 = vsub.f32 %v720_v57, %v3231_v16  ;;  %v723_v25 = vsub.f32 %v720_v57, %v3234_v17  ;;  %v1825_v50 = vld [vmem:[%s3076_s15 + $0xa0] sm:$0xff]  ;;  %v3416_v57 = vmin.f32 %v620_v58, %v686_v41  ;;  %v695_v62 = vsel %vm675_vm7, 1e+30, %v661_v31 }
  0xb3   : > { %v3388_v27 = vpop.permute.xlu0 %801  ;;  %v3423_v63 = vmin.f32 %v628_v29, %v694_v47  ;;  %v3425_v0 = vmin.f32 %v636_v35, %v702_v48  ;;  %v784_v1 = vsub.f32 %v781_v11, %v3228_v15  ;;  %v3429_v3 = vmin.f32 %v613_v28, %v679_v51 }
  0xb4   : > { %v726_v32 = vmul.f32 %v722_v24, %v722_v24  ;;  %v727_v33 = vmul.f32 %v723_v25, %v723_v25  ;;  %1821 = vperm.xlu0 %2957, %v1818_v26   ;;  %v792_v5 = vmul.f32 %v783_v49, %v783_v49  ;;  %v3437_v9 = vmin.f32 %v621_v20, %v687_v53 }
  0xb5   : > { %v3371_v21 = vpop.permute.xlu1 %740  ;;  %v3451_v18 = vmin.f32 %v629_v34, %v695_v62  ;;  %v793_v25 = vmul.f32 %v784_v1, %v784_v1  ;;  %vm804_vm10 = vcmp.gt.f32.partialorder %v3388_v27, 0.5  ;;  %v2136_v27 = vld [vmem:[%s4229_s0 + $0xc8] sm:$0xff] }
  0xb6   : > { %1760 = vperm.xlu1 %2958, %v1757_v4   ;;  %v728_v54 = vadd.f32 %v726_v32, %v724_v43  ;;  %v729_v56 = vadd.f32 %v727_v33, %v725_v44  ;;  %v703_v4 = vsel %vm675_vm7, %v661_v31, 1e+30  ;;  %vm743_vm9 = vcmp.gt.f32.partialorder %v3371_v21, 0.5 }
  0xb7   : > { %v849_v36 = vpop.permute.xlu0 %848  ;;  %v3457_v24 = vmin.f32 %v637_v37, %v703_v4 }
  0xb8   : > { %2004 = vperm.xlu0 %2957, %v2000_v46   ;;  %v746_v10 = vsel %vm736_vm8, 1e+30, %v728_v54  ;;  %v3443_v11 = vsel %vm736_vm8, 1e+30, %v729_v56  ;;  %v3447_v39 = vsel %vm736_vm8, %v728_v54, 1e+30  ;;  %v851_v34 = vsub.f32 %v849_v36, %v3225_v14 }
  0xb9   : > { %v788_v40 = vpop.permute.xlu1 %787  ;;  %v3455_v19 = vsel %vm736_vm8, %v729_v56, 1e+30  ;;  %v762_v26 = vsel %vm743_vm9, 1e+30, %v728_v54  ;;  %v748_v28 = vmin.f32 %v3412_v52, %v746_v10  ;;  %v749_v58 = vmin.f32 %v3429_v3, %v3443_v11  ;;  %v1954_v46 = vld [vmem:[%s3071_s12 + $0xb0] sm:$0xff] }
  0xba   : > { %v790_v45 = vsub.f32 %v788_v40, %v3231_v16  ;;  %1943 = vperm.xlu1 %2958, %v1933_v30   ;;  %v791_v59 = vsub.f32 %v788_v40, %v3234_v17  ;;  %v756_v20 = vmin.f32 %v3416_v57, %v3447_v39  ;;  %v763_v29 = vsel %vm743_vm9, 1e+30, %v729_v56  ;;  %v1893_v30 = vld [vmem:[%s3076_s15 + $0xa8] sm:$0xff] }
  0xbb   : > { %v3449_v13 = vpop.permute.xlu0 %869  ;;  %v757_v31 = vmin.f32 %v3437_v9, %v3455_v19  ;;  %v770_v32 = vsel %vm743_vm9, %v728_v54, 1e+30  ;;  %v771_v33 = vsel %vm743_vm9, %v729_v56, 1e+30  ;;  %v764_v37 = vmin.f32 %v3423_v63, %v762_v26  ;;  %v1961_v9 = vld [vmem:[%s3076_s15 + $0xb0] sm:$0xff] }
  0xbc   : > { %v794_v60 = vmul.f32 %v790_v45, %v790_v45  ;;  %v795_v42 = vmul.f32 %v791_v59, %v791_v59  ;;  %1889 = vperm.xlu0 %2957, %v1886_v12   ;;  %v852_v41 = vsub.f32 %v849_v36, %v3228_v15  ;;  %v765_v44 = vmin.f32 %v3451_v18, %v763_v29 }
  0xbd   : > { %v3419_v61 = vpop.permute.xlu1 %808  ;;  %v772_v47 = vmin.f32 %v3425_v0, %v770_v32  ;;  %v773_v48 = vmin.f32 %v3457_v24, %v771_v33  ;;  %vm872_vm12 = vcmp.gt.f32.partialorder %v3449_v13, 0.5  ;;  %v860_v52 = vmul.f32 %v851_v34, %v851_v34 }
  0xbe   : > { %1828 = vperm.xlu1 %2958, %v1825_v50   ;;  %v796_v22 = vadd.f32 %v794_v60, %v792_v5  ;;  %v797_v38 = vadd.f32 %v795_v42, %v793_v25  ;;  %vm811_vm11 = vcmp.gt.f32.partialorder %v3419_v61, 0.5  ;;  %v2069_v50 = vld [vmem:[%s4230_s1 + $0xc0] sm:$0xff]  ;;  %v861_v59 = vmul.f32 %v852_v41, %v852_v41 }
  0xbf   : > { %v917_v35 = vpop.permute.xlu0 %916 }
  0xc0   : > { %v814_v40 = vsel %vm804_vm10, 1e+30, %v796_v22  ;;  %2072 = vperm.xlu0 %2957, %v2068_v55   ;;  %v822_v49 = vsel %vm804_vm10, %v796_v22, 1e+30  ;;  %v815_v53 = vsel %vm804_vm10, 1e+30, %v797_v38  ;;  %v919_v1 = vsub.f32 %v917_v35, %v3225_v14 }
  0xc1   : > { %v856_v23 = vpop.permute.xlu1 %855  ;;  %v3499_v51 = vmin.f32 %v748_v28, %v814_v40  ;;  %v823_v57 = vsel %vm804_vm10, %v797_v38, 1e+30  ;;  %v830_v60 = vsel %vm811_vm11, 1e+30, %v796_v22  ;;  %v831_v63 = vsel %vm811_vm11, 1e+30, %v797_v38 }
  0xc2   : > { %2011 = vperm.xlu1 %2958, %v2001_v8   ;;  %v858_v21 = vsub.f32 %v856_v23, %v3231_v16  ;;  %v859_v45 = vsub.f32 %v856_v23, %v3234_v17  ;;  %v838_v3 = vsel %vm811_vm11, %v796_v22, 1e+30  ;;  %v839_v4 = vsel %vm811_vm11, %v797_v38, 1e+30  ;;  %v2022_v28 = vld [vmem:[%s3071_s12 + $0xb8] sm:$0xff] }
  0xc3   : > { %v3501_v36 = vpop.permute.xlu0 %937  ;;  %v920_v8 = vsub.f32 %v917_v35, %v3228_v15  ;;  %v3522_v10 = vmin.f32 %v756_v20, %v822_v49  ;;  %v3524_v11 = vmin.f32 %v764_v37, %v830_v60  ;;  %v3527_v42 = vmin.f32 %v749_v58, %v815_v53 }
  0xc4   : > { %v862_v54 = vmul.f32 %v858_v21, %v858_v21  ;;  %v863_v56 = vmul.f32 %v859_v45, %v859_v45  ;;  %1957 = vperm.xlu0 %2957, %v1954_v46   ;;  %v3529_v23 = vmin.f32 %v757_v31, %v823_v57  ;;  %v3531_v22 = vmin.f32 %v765_v44, %v831_v63  ;;  %v2204_v46 = vld [vmem:[%s4229_s0 + $0xd0] sm:$0xff] }
  0xc5   : > { %v3484_v43 = vpop.permute.xlu1 %876  ;;  %v3536_v24 = vmin.f32 %v772_v47, %v838_v3  ;;  %v3538_v25 = vmin.f32 %v773_v48, %v839_v4  ;;  %v928_v55 = vmul.f32 %v919_v1, %v919_v1  ;;  %v929_v29 = vmul.f32 %v920_v8, %v920_v8 }
  0xc6   : > { %1896 = vperm.xlu1 %2958, %v1893_v30   ;;  %v864_v0 = vadd.f32 %v862_v54, %v860_v52  ;;  %v865_v5 = vadd.f32 %v863_v56, %v861_v59  ;;  %vm879_vm13 = vcmp.gt.f32.partialorder %v3484_v43, 0.5  ;;  %vm940_vm14 = vcmp.gt.f32.partialorder %v3501_v36, 0.5  ;;  %v2137_v30 = vld [vmem:[%s4230_s1 + $0xc8] sm:$0xff] }
  0xc7   : > { %v985_v19 = vpop.permute.xlu0 %984 }
  0xc8   : > { %2140 = vperm.xlu0 %2957, %v2136_v27   ;;  %v882_v26 = vsel %vm872_vm12, 1e+30, %v864_v0  ;;  %v883_v58 = vsel %vm872_vm12, 1e+30, %v865_v5  ;;  %v890_v20 = vsel %vm872_vm12, %v864_v0, 1e+30  ;;  %v987_v41 = vsub.f32 %v985_v19, %v3225_v14 }
  0xc9   : > { %v924_v62 = vpop.permute.xlu1 %923  ;;  %v891_v31 = vsel %vm872_vm12, %v865_v5, 1e+30  ;;  %v898_v32 = vsel %vm879_vm13, 1e+30, %v864_v0  ;;  %v884_v37 = vmin.f32 %v3499_v51, %v882_v26  ;;  %v899_v38 = vsel %vm879_vm13, 1e+30, %v865_v5 }
  0xca   : > { %v926_v12 = vsub.f32 %v924_v62, %v3231_v16  ;;  %2079 = vperm.xlu1 %2958, %v2069_v50   ;;  %v927_v39 = vsub.f32 %v924_v62, %v3234_v17  ;;  %v906_v40 = vsel %vm879_vm13, %v864_v0, 1e+30  ;;  %v885_v44 = vmin.f32 %v3527_v42, %v883_v58  ;;  %v2029_v51 = vld [vmem:[%s3076_s15 + $0xb8] sm:$0xff]  ;;  %v2090_v27 = vld [vmem:[%s3071_s12 + $0xc0] sm:$0xff] }
  0xcb   : > { %v3555_v35 = vpop.permute.xlu0 %1005  ;;  %v907_v21 = vsel %vm879_vm13, %v865_v5, 1e+30  ;;  %v892_v47 = vmin.f32 %v3522_v10, %v890_v20  ;;  %v893_v48 = vmin.f32 %v3529_v23, %v891_v31  ;;  %v900_v49 = vmin.f32 %v3524_v11, %v898_v32  ;;  %v2272_v58 = vld [vmem:[%s4229_s0 + $0xd8] sm:$0xff] }
  0xcc   : > { %v930_v18 = vmul.f32 %v926_v12, %v926_v12  ;;  %v931_v33 = vmul.f32 %v927_v39, %v927_v39  ;;  %2025 = vperm.xlu0 %2957, %v2022_v28   ;;  %v988_v50 = vsub.f32 %v985_v19, %v3228_v15  ;;  %v901_v43 = vmin.f32 %v3531_v22, %v899_v38 }
  0xcd   : > { %v3534_v61 = vpop.permute.xlu1 %944  ;;  %v908_v52 = vmin.f32 %v3536_v24, %v906_v40  ;;  %v909_v57 = vmin.f32 %v3538_v25, %v907_v21  ;;  %v996_v59 = vmul.f32 %v987_v41, %v987_v41  ;;  %vm1008_vm0 = vcmp.gt.f32.partialorder %v3555_v35, 0.5 }
  0xce   : > { %1964 = vperm.xlu1 %2958, %v1961_v9   ;;  %v932_v34 = vadd.f32 %v930_v18, %v928_v55  ;;  %v933_v45 = vadd.f32 %v931_v33, %v929_v29  ;;  %vm947_vm15 = vcmp.gt.f32.partialorder %v3534_v61, 0.5  ;;  %v997_v5 = vmul.f32 %v988_v50, %v988_v50  ;;  %v2205_v9 = vld [vmem:[%s4230_s1 + $0xd0] sm:$0xff] }
  0xcf   : > { %v1053_v53 = vpop.permute.xlu0 %1052 }
  0xd0   : > { %v950_v54 = vsel %vm940_vm14, 1e+30, %v932_v34  ;;  %v958_v56 = vsel %vm940_vm14, %v932_v34, 1e+30  ;;  %v966_v60 = vsel %vm947_vm15, 1e+30, %v932_v34  ;;  %2208 = vperm.xlu0 %2957, %v2204_v46   ;;  %v1055_v22 = vsub.f32 %v1053_v53, %v3225_v14 }
  0xd1   : > { %v992_v13 = vpop.permute.xlu1 %991  ;;  %v951_v63 = vsel %vm940_vm14, 1e+30, %v933_v45  ;;  %v959_v0 = vsel %vm940_vm14, %v933_v45, 1e+30  ;;  %v3592_v3 = vmin.f32 %v884_v37, %v950_v54  ;;  %v3594_v4 = vmin.f32 %v892_v47, %v958_v56 }
  0xd2   : > { %2147 = vperm.xlu1 %2958, %v2137_v30   ;;  %v994_v1 = vsub.f32 %v992_v13, %v3231_v16  ;;  %v995_v12 = vsub.f32 %v992_v13, %v3234_v17  ;;  %v967_v8 = vsel %vm947_vm15, 1e+30, %v933_v45  ;;  %v3601_v36 = vmin.f32 %v900_v49, %v966_v60  ;;  %v2097_v30 = vld [vmem:[%s3076_s15 + $0xc0] sm:$0xff] }
  0xd3   : > { %v974_v10 = vsel %vm947_vm15, %v932_v34, 1e+30  ;;  %v3605_v18 = vpop.permute.xlu0 %1073  ;;  %v3607_v19 = vmin.f32 %v885_v44, %v951_v63  ;;  %v3609_v42 = vmin.f32 %v893_v48, %v959_v0  ;;  %v975_v23 = vsel %vm947_vm15, %v933_v45, 1e+30  ;;  %v2158_v44 = vld [vmem:[%s3071_s12 + $0xc8] sm:$0xff] }
  0xd4   : > { %v998_v11 = vmul.f32 %v994_v1, %v994_v1  ;;  %v999_v39 = vmul.f32 %v995_v12, %v995_v12  ;;  %2093 = vperm.xlu0 %2957, %v2090_v27   ;;  %v1056_v55 = vsub.f32 %v1053_v53, %v3228_v15  ;;  %v969_v20 = vmin.f32 %v901_v43, %v967_v8  ;;  %v2340_v27 = vld [vmem:[%s4229_s0 + $0xe0] sm:$0xff] }
  0xd5   : > { %v1013_v62 = vpop.permute.xlu1 %1012  ;;  %v976_v29 = vmin.f32 %v908_v52, %v974_v10  ;;  %v977_v38 = vmin.f32 %v909_v57, %v975_v23  ;;  %v1064_v41 = vmul.f32 %v1055_v22, %v1055_v22  ;;  %vm1076_vm2 = vcmp.gt.f32.partialorder %v3605_v18, 0.5 }
  0xd6   : > { %2032 = vperm.xlu1 %2958, %v2029_v51   ;;  %v1000_v25 = vadd.f32 %v998_v11, %v996_v59  ;;  %v1001_v26 = vadd.f32 %v999_v39, %v997_v5  ;;  %vm1015_vm1 = vcmp.gt.f32.partialorder %v1013_v62, 0.5  ;;  %v1065_v21 = vmul.f32 %v1056_v55, %v1056_v55  ;;  %v2273_v51 = vld [vmem:[%s4230_s1 + $0xd8] sm:$0xff] }
  0xd7   : > { %v1121_v37 = vpop.permute.xlu0 %1120 }
  0xd8   : > { %v1018_v31 = vsel %vm1008_vm0, 1e+30, %v1000_v25  ;;  %v1019_v32 = vsel %vm1008_vm0, 1e+30, %v1001_v26  ;;  %v1026_v33 = vsel %vm1008_vm0, %v1000_v25, 1e+30  ;;  %2276 = vperm.xlu0 %2957, %v2272_v58   ;;  %v1123_v12 = vsub.f32 %v1121_v37, %v3225_v14 }
  0xd9   : > { %v1060_v24 = vpop.permute.xlu1 %1059  ;;  %v1027_v40 = vsel %vm1008_vm0, %v1001_v26, 1e+30  ;;  %v1034_v45 = vsel %vm1015_vm1, 1e+30, %v1000_v25  ;;  %v1035_v46 = vsel %vm1015_vm1, 1e+30, %v1001_v26  ;;  %v1020_v43 = vmin.f32 %v3592_v3, %v1018_v31 }
  0xda   : > { %v1062_v28 = vsub.f32 %v1060_v24, %v3231_v16  ;;  %2215 = vperm.xlu1 %2958, %v2205_v9   ;;  %v1063_v61 = vsub.f32 %v1060_v24, %v3234_v17  ;;  %v1042_v47 = vsel %vm1015_vm1, %v1000_v25, 1e+30  ;;  %v1036_v48 = vmin.f32 %v3601_v36, %v1034_v45  ;;  %v2165_v9 = vld [vmem:[%s3076_s15 + $0xc8] sm:$0xff]  ;;  %v2226_v58 = vld [vmem:[%s3071_s12 + $0xd0] sm:$0xff] }
  0xdb   : > { %v1037_v49 = vmin.f32 %v969_v20, %v1035_v46  ;;  %v1043_v35 = vsel %vm1015_vm1, %v1001_v26, 1e+30  ;;  %v1044_v50 = vmin.f32 %v976_v29, %v1042_v47  ;;  %v3640_v53 = vpop.permute.xlu0 %1141  ;;  %v1021_v57 = vmin.f32 %v3607_v19, %v1019_v32  ;;  %v2233_v46 = vld [vmem:[%s3076_s15 + $0xd0] sm:$0xff] }
  0xdc   : > { %v1066_v34 = vmul.f32 %v1062_v28, %v1062_v28  ;;  %v1045_v52 = vmin.f32 %v977_v38, %v1043_v35  ;;  %v1067_v54 = vmul.f32 %v1063_v61, %v1063_v61  ;;  %v1028_v59 = vmin.f32 %v3594_v4, %v1026_v33  ;;  %2161 = vperm.xlu0 %2957, %v2158_v44   ;;  %v2341_v61 = vld [vmem:[%s4230_s1 + $0xe0] sm:$0xff] }
  0xdd   : > { %v1081_v13 = vpop.permute.xlu1 %1080  ;;  %v1029_v60 = vmin.f32 %v3609_v42, %v1027_v40  ;;  %v1124_v5 = vsub.f32 %v1121_v37, %v3228_v15  ;;  %vm1144_vm4 = vcmp.gt.f32.partialorder %v3640_v53, 0.5 }
  0xde   : > { %2100 = vperm.xlu1 %2958, %v2097_v30   ;;  %v1068_v56 = vadd.f32 %v1066_v34, %v1064_v41  ;;  %vm1083_vm3 = vcmp.gt.f32.partialorder %v1081_v13, 0.5  ;;  %v1069_v63 = vadd.f32 %v1067_v54, %v1065_v21  ;;  %v1132_v30 = vmul.f32 %v1123_v12, %v1123_v12  ;;  %v2408_v13 = vld [vmem:[%s4229_s0 + $0xe8] sm:$0xff] }
  0xdf   : > { %v1189_v19 = vpop.permute.xlu0 %1188  ;;  %v1133_v31 = vmul.f32 %v1124_v5, %v1124_v5 }
  0xe0   : > { %v1086_v0 = vsel %vm1076_vm2, 1e+30, %v1068_v56  ;;  %v1094_v1 = vsel %vm1076_vm2, %v1068_v56, 1e+30  ;;  %v1102_v8 = vsel %vm1083_vm3, 1e+30, %v1068_v56  ;;  %2344 = vperm.xlu0 %2957, %v2340_v27   ;;  %v1191_v29 = vsub.f32 %v1189_v19, %v3225_v14 }
  0xe1   : > { %v1128_v62 = vpop.permute.xlu1 %1127  ;;  %v3653_v3 = vmin.f32 %v1020_v43, %v1086_v0  ;;  %v3655_v4 = vmin.f32 %v1028_v59, %v1094_v1  ;;  %v1087_v36 = vsel %vm1076_vm2, 1e+30, %v1069_v63  ;;  %v1095_v10 = vsel %vm1076_vm2, %v1069_v63, 1e+30  ;;  %v2409_v27 = vld [vmem:[%s4230_s1 + $0xe8] sm:$0xff] }
  0xe2   : > { %2283 = vperm.xlu1 %2958, %v2273_v51   ;;  %v1103_v11 = vsel %vm1083_vm3, 1e+30, %v1069_v63  ;;  %v3665_v39 = vmin.f32 %v1036_v48, %v1102_v8  ;;  %v3667_v42 = vmin.f32 %v1021_v57, %v1087_v36  ;;  %v3669_v23 = vmin.f32 %v1029_v60, %v1095_v10  ;;  %v2294_v57 = vld [vmem:[%s3071_s12 + $0xd8] sm:$0xff] }
  0xe3   : > { %v3671_v22 = vmin.f32 %v1037_v49, %v1103_v11  ;;  %v1110_v24 = vsel %vm1083_vm3, %v1068_v56, 1e+30  ;;  %v1111_v26 = vsel %vm1083_vm3, %v1069_v63, 1e+30  ;;  %v1130_v55 = vsub.f32 %v1128_v62, %v3231_v16  ;;  %v1210_v34 = vpop.permute.xlu0 %1209 }
  0xe4   : > { %v3675_v18 = vmin.f32 %v1044_v50, %v1110_v24  ;;  %v1131_v28 = vsub.f32 %v1128_v62, %v3234_v17  ;;  %v3680_v20 = vmin.f32 %v1045_v52, %v1111_v26  ;;  %2229 = vperm.xlu0 %2957, %v2226_v58   ;;  %v1192_v44 = vsub.f32 %v1189_v19, %v3228_v15  ;;  %v2301_v26 = vld [vmem:[%s3076_s15 + $0xd8] sm:$0xff] }
  0xe5   : > { %v1149_v25 = vpop.permute.xlu1 %1148  ;;  %v1134_v32 = vmul.f32 %v1130_v55, %v1130_v55  ;;  %v1200_v21 = vmul.f32 %v1191_v29, %v1191_v29  ;;  %vm1212_vm6 = vcmp.gt.f32.partialorder %v1210_v34, 0.5 }
  0xe6   : > { %2168 = vperm.xlu1 %2958, %v2165_v9   ;;  %v1135_v33 = vmul.f32 %v1131_v28, %v1131_v28  ;;  %vm1151_vm5 = vcmp.gt.f32.partialorder %v1149_v25, 0.5 }
  0xe7   : > { %v1136_v38 = vadd.f32 %v1134_v32, %v1132_v30  ;;  %v1257_v50 = vpop.permute.xlu0 %1256 }
  0xe8   : > { %v1137_v40 = vadd.f32 %v1135_v33, %v1133_v31  ;;  %2412 = vperm.xlu0 %2957, %v2408_v13   ;;  %v1259_v19 = vsub.f32 %v1257_v50, %v3225_v14  ;;  %v1260_v24 = vsub.f32 %v1257_v50, %v3228_v15 }
  0xe9   : > { %v1196_v37 = vpop.permute.xlu1 %1195  ;;  %v1154_v47 = vsel %vm1144_vm4, 1e+30, %v1136_v38  ;;  %v1162_v49 = vsel %vm1144_vm4, %v1136_v38, 1e+30  ;;  %v1170_v60 = vsel %vm1151_vm5, 1e+30, %v1136_v38 }
  0xea   : > { %v1198_v41 = vsub.f32 %v1196_v37, %v3231_v16  ;;  %2351 = vperm.xlu1 %2958, %v2341_v61   ;;  %v1199_v45 = vsub.f32 %v1196_v37, %v3234_v17  ;;  %v1155_v48 = vsel %vm1144_vm4, 1e+30, %v1137_v40  ;;  %v1156_v51 = vmin.f32 %v3653_v3, %v1154_v47 }
  0xeb   : > { %v1157_v43 = vmin.f32 %v3667_v42, %v1155_v48  ;;  %v1163_v52 = vsel %vm1144_vm4, %v1137_v40, 1e+30  ;;  %v1164_v54 = vmin.f32 %v3655_v4, %v1162_v49  ;;  %v1171_v62 = vsel %vm1151_vm5, 1e+30, %v1137_v40  ;;  %v1278_v9 = vpop.permute.xlu0 %1277  ;;  %v2476_v42 = vld [vmem:[%s4229_s0 + $0xf0] sm:$0xff] }
  0xec   : > { %v1202_v35 = vmul.f32 %v1198_v41, %v1198_v41  ;;  %v1165_v59 = vmin.f32 %v3669_v23, %v1163_v52  ;;  %v1178_v63 = vsel %vm1151_vm5, %v1136_v38, 1e+30  ;;  %v1172_v0 = vmin.f32 %v3665_v39, %v1170_v60  ;;  %2297 = vperm.xlu0 %2957, %v2294_v57   ;;  %v2369_v57 = vld [vmem:[%s3076_s15 + $0xe0] sm:$0xff] }
  0xed   : > { %v1217_v56 = vpop.permute.xlu1 %1216  ;;  %v1173_v1 = vmin.f32 %v3671_v22, %v1171_v62  ;;  %v1179_v53 = vsel %vm1151_vm5, %v1137_v40, 1e+30  ;;  %v1180_v12 = vmin.f32 %v3675_v18, %v1178_v63  ;;  %v1201_v3 = vmul.f32 %v1192_v44, %v1192_v44  ;;  %v2362_v40 = vld [vmem:[%s3071_s12 + $0xe0] sm:$0xff]  ;;  %v2477_v44 = vld [vmem:[%s4230_s1 + $0xf0] sm:$0xff] }
  0xee   : > { %2236 = vperm.xlu1 %2958, %v2233_v46   ;;  %v1181_v4 = vmin.f32 %v3680_v20, %v1179_v53  ;;  %v1203_v5 = vmul.f32 %v1199_v45, %v1199_v45  ;;  %v1204_v8 = vadd.f32 %v1202_v35, %v1200_v21  ;;  %vm1219_vm7 = vcmp.gt.f32.partialorder %v1217_v56, 0.5 }
  0xef   : > { %v1325_v20 = vpop.permute.xlu0 %1324  ;;  %v1268_v21 = vmul.f32 %v1259_v19, %v1259_v19  ;;  %v1269_v45 = vmul.f32 %v1260_v24, %v1260_v24  ;;  %vm1280_vm8 = vcmp.gt.f32.partialorder %v1278_v9, 0.5 }
  0xf0   : > { %v1205_v10 = vadd.f32 %v1203_v5, %v1201_v3  ;;  %v1222_v11 = vsel %vm1212_vm6, 1e+30, %v1204_v8  ;;  %v1230_v39 = vsel %vm1212_vm6, %v1204_v8, 1e+30  ;;  %v1238_v25 = vsel %vm1219_vm7, 1e+30, %v1204_v8  ;;  %2480 = vperm.xlu0 %2957, %v2476_v42  }
  0xf1   : > { %v1264_v36 = vpop.permute.xlu1 %1263  ;;  %v3724_v23 = vmin.f32 %v1156_v51, %v1222_v11  ;;  %v3726_v22 = vmin.f32 %v1164_v54, %v1230_v39  ;;  %v3734_v58 = vmin.f32 %v1172_v0, %v1238_v25  ;;  %v1246_v31 = vsel %vm1219_vm7, %v1204_v8, 1e+30  ;;  %v2545_v42 = vld [vmem:[%s4230_s1 + $0xf8] sm:$0xff] }
  0xf2   : > { %2419 = vperm.xlu1 %2958, %v2409_v27   ;;  %v1223_v18 = vsel %vm1212_vm6, 1e+30, %v1205_v10  ;;  %v1231_v55 = vsel %vm1212_vm6, %v1205_v10, 1e+30  ;;  %v1239_v28 = vsel %vm1219_vm7, 1e+30, %v1205_v10  ;;  %v3744_v34 = vmin.f32 %v1180_v12, %v1246_v31 }
  0xf3   : > { %v3736_v29 = vmin.f32 %v1157_v43, %v1223_v18  ;;  %v3738_v61 = vmin.f32 %v1165_v59, %v1231_v55  ;;  %v3740_v30 = vmin.f32 %v1173_v1, %v1239_v28  ;;  %v1247_v33 = vsel %vm1219_vm7, %v1205_v10, 1e+30  ;;  %v1346_v48 = vpop.permute.xlu0 %1345  ;;  %v2544_v43 = vld [vmem:[%s4229_s0 + $0xf8] sm:$0xff] }
  0xf4   : > { %v1266_v37 = vsub.f32 %v1264_v36, %v3231_v16  ;;  %v1267_v38 = vsub.f32 %v1264_v36, %v3234_v17  ;;  %v3749_v41 = vmin.f32 %v1181_v4, %v1247_v33  ;;  %v1327_v13 = vsub.f32 %v1325_v20, %v3225_v14  ;;  %2365 = vperm.xlu0 %2957, %v2362_v40   ;;  %v2430_v4 = vld [vmem:[%s3071_s12 + $0xe8] sm:$0xff] }
  0xf5   : > { %v1285_v32 = vpop.permute.xlu1 %1284  ;;  %v1328_v52 = vsub.f32 %v1325_v20, %v3228_v15  ;;  %vm1348_vm10 = vcmp.gt.f32.partialorder %v1346_v48, 0.5  ;;  %v2437_v33 = vld [vmem:[%s3076_s15 + $0xe8] sm:$0xff] }
  0xf6   : > { %2304 = vperm.xlu1 %2958, %v2301_v26   ;;  %v1270_v46 = vmul.f32 %v1266_v37, %v1266_v37  ;;  %v1271_v47 = vmul.f32 %v1267_v38, %v1267_v38  ;;  %v1336_v54 = vmul.f32 %v1327_v13, %v1327_v13  ;;  %vm1287_vm9 = vcmp.gt.f32.partialorder %v1285_v32, 0.5 }
  0xf7   : > { %v1393_v0 = vpop.permute.xlu0 %1392 }
  0xf8   : > { %v1272_v35 = vadd.f32 %v1270_v46, %v1268_v21  ;;  %v1273_v50 = vadd.f32 %v1271_v47, %v1269_v45  ;;  %2548 = vperm.xlu0 %2957, %v2544_v43   ;;  %v1395_v20 = vsub.f32 %v1393_v0, %v3225_v14  ;;  %v1396_v31 = vsub.f32 %v1393_v0, %v3228_v15 }
  0xf9   : > { %v1332_v49 = vpop.permute.xlu1 %1331 }
  0xfa   : > { %v1334_v51 = vsub.f32 %v1332_v49, %v3231_v16  ;;  %2487 = vperm.xlu1 %2958, %v2477_v44   ;;  %v1335_v56 = vsub.f32 %v1332_v49, %v3234_v17  ;;  %v1290_v59 = vsel %vm1280_vm8, 1e+30, %v1272_v35  ;;  %v1291_v60 = vsel %vm1280_vm8, 1e+30, %v1273_v50 }
  0xfb   : > { %v1298_v62 = vsel %vm1280_vm8, %v1272_v35, 1e+30  ;;  %v1292_v1 = vmin.f32 %v3724_v23, %v1290_v59  ;;  %v1293_v53 = vmin.f32 %v3736_v29, %v1291_v60  ;;  %v1299_v12 = vsel %vm1280_vm8, %v1273_v50, 1e+30  ;;  %v1414_v26 = vpop.permute.xlu0 %1413  ;;  %v2498_v29 = vld [vmem:[%s3071_s12 + $0xf0] sm:$0xff] }
  0xfc   : > { %v1338_v63 = vmul.f32 %v1334_v51, %v1334_v51  ;;  %v1300_v27 = vmin.f32 %v3726_v22, %v1298_v62  ;;  %v1301_v5 = vmin.f32 %v3738_v61, %v1299_v12  ;;  %v1306_v8 = vsel %vm1287_vm9, 1e+30, %v1272_v35  ;;  %2433 = vperm.xlu0 %2957, %v2430_v4  }
  0xfd   : > { %v1353_v3 = vpop.permute.xlu1 %1352  ;;  %v1307_v36 = vsel %vm1287_vm9, 1e+30, %v1273_v50  ;;  %v1314_v10 = vsel %vm1287_vm9, %v1272_v35, 1e+30  ;;  %v1308_v11 = vmin.f32 %v3734_v58, %v1306_v8  ;;  %v1315_v9 = vsel %vm1287_vm9, %v1273_v50, 1e+30 }
  0xfe   : > { %2372 = vperm.xlu1 %2958, %v2369_v57   ;;  %v1309_v39 = vmin.f32 %v3740_v30, %v1307_v36  ;;  %v1316_v19 = vmin.f32 %v3744_v34, %v1314_v10  ;;  %v1337_v23 = vmul.f32 %v1328_v52, %v1328_v52  ;;  %v1317_v22 = vmin.f32 %v3749_v41, %v1315_v9  ;;  %v2566_v50 = vld [vmem:[%s3071_s12 + $0xf8] sm:$0xff]  ;;  %v2505_v52 = vld [vmem:[%s3076_s15 + $0xf0] sm:$0xff]  ;;  %s2926_s12 = sshll.u32 %s4242_s24, 1 }
  0xff   : > { %v1339_v24 = vmul.f32 %v1335_v56, %v1335_v56  ;;  %v1340_v25 = vadd.f32 %v1338_v63, %v1336_v54  ;;  %vm1355_vm11 = vcmp.gt.f32.partialorder %v1353_v3, 0.5  ;;  %v1461_v41 = vpop.permute.xlu0 %1460  ;;  %v1404_v54 = vmul.f32 %v1395_v20, %v1395_v20  ;;  %v2573_v3 = vld [vmem:[%s3076_s15 + $0xf8] sm:$0xff]  ;;  %s396_s30 = scalar_lea.vmem %s4235_s6, %s2926_s12 }
 0x100   : > { %2501 = vperm.xlu0 %2957, %v2498_v29   ;;  %v1463_v43 = vsub.f32 %v1461_v41, %v3225_v14  ;;  %v1405_v56 = vmul.f32 %v1396_v31, %v1396_v31  ;;  %vm1416_vm12 = vcmp.gt.f32.partialorder %v1414_v26, 0.5 }
 0x101   : > { %v1400_v18 = vpop.permute.xlu1 %1399  ;;  %v1341_v55 = vadd.f32 %v1339_v24, %v1337_v23  ;;  %v1358_v28 = vsel %vm1348_vm10, 1e+30, %v1340_v25  ;;  %v1366_v58 = vsel %vm1348_vm10, %v1340_v25, 1e+30  ;;  %v1374_v32 = vsel %vm1355_vm11, 1e+30, %v1340_v25 }
 0x102   : > { %2555 = vperm.xlu1 %2958, %v2545_v42   ;;  %v3786_v61 = vmin.f32 %v1292_v1, %v1358_v28  ;;  %v3788_v30 = vmin.f32 %v1300_v27, %v1366_v58  ;;  %v3796_v40 = vmin.f32 %v1308_v11, %v1374_v32  ;;  %v1382_v45 = vsel %vm1355_vm11, %v1340_v25, 1e+30 }
 0x103   : > { %v1359_v34 = vsel %vm1348_vm10, 1e+30, %v1341_v55  ;;  %v1367_v37 = vsel %vm1348_vm10, %v1341_v55, 1e+30  ;;  %v1375_v38 = vsel %vm1355_vm11, 1e+30, %v1341_v55  ;;  %v3806_v48 = vmin.f32 %v1316_v19, %v1382_v45  ;;  %v1482_v60 = vpop.permute.xlu0 %1481 }
 0x104   : > { %v3798_v13 = vmin.f32 %v1293_v53, %v1359_v34  ;;  %v3800_v44 = vmin.f32 %v1301_v5, %v1367_v37  ;;  %v3802_v21 = vmin.f32 %v1309_v39, %v1375_v38  ;;  %v1383_v47 = vsel %vm1355_vm11, %v1341_v55, 1e+30  ;;  %2569 = vperm.xlu0 %2957, %v2566_v50  }
 0x105   : > { %v1421_v46 = vpop.permute.xlu1 %1420  ;;  %v1402_v49 = vsub.f32 %v1400_v18, %v3231_v16  ;;  %v1403_v35 = vsub.f32 %v1400_v18, %v3234_v17  ;;  %v3811_v51 = vmin.f32 %v1317_v22, %v1383_v47  ;;  %v1464_v53 = vsub.f32 %v1461_v41, %v3228_v15 }
 0x106   : > { %2440 = vperm.xlu1 %2958, %v2437_v33   ;;  %v1472_v12 = vmul.f32 %v1463_v43, %v1463_v43  ;;  %vm1423_vm13 = vcmp.gt.f32.partialorder %v1421_v46, 0.5  ;;  %vm1484_vm14 = vcmp.gt.f32.partialorder %v1482_v60, 0.5 }
 0x107   : > { %v1406_v57 = vmul.f32 %v1402_v49, %v1402_v49  ;;  %v1407_v59 = vmul.f32 %v1403_v35, %v1403_v35  ;;  %v1529_v10 = vpop.permute.xlu0 %1528  ;;  %v1473_v58 = vmul.f32 %v1464_v53, %v1464_v53 }
 0x108   : > { %v1531_v37 = vsub.f32 %v1529_v10, %v3225_v14  ;;  %v1532_v41 = vsub.f32 %v1529_v10, %v3228_v15 }
 0x109   : > { %v1468_v62 = vpop.permute.xlu1 %1467  ;;  %v1408_v63 = vadd.f32 %v1406_v57, %v1404_v54  ;;  %v1409_v0 = vadd.f32 %v1407_v59, %v1405_v56 }
 0x10a   : > { %v1470_v1 = vsub.f32 %v1468_v62, %v3231_v16  ;;  %2508 = vperm.xlu1 %2958, %v2505_v52   ;;  %v1471_v27 = vsub.f32 %v1468_v62, %v3234_v17  ;;  %v1540_v62 = vmul.f32 %v1531_v37, %v1531_v37 }
 0x10b   : > { %v1426_v4 = vsel %vm1416_vm12, 1e+30, %v1408_v63  ;;  %v1427_v5 = vsel %vm1416_vm12, 1e+30, %v1409_v0  ;;  %v1434_v8 = vsel %vm1416_vm12, %v1408_v63, 1e+30 }
 0x10c   : > { %v1474_v36 = vmul.f32 %v1470_v1, %v1470_v1  ;;  %v1428_v11 = vmin.f32 %v3786_v61, %v1426_v4  ;;  %v1429_v39 = vmin.f32 %v3798_v13, %v1427_v5  ;;  %v1435_v9 = vsel %vm1416_vm12, %v1409_v0, 1e+30 }
 0x10d   : > { %v1436_v19 = vmin.f32 %v3788_v30, %v1434_v8  ;;  %v1489_v42 = vpop.permute.xlu1 %1488  ;;  %v1437_v23 = vmin.f32 %v3800_v44, %v1435_v9  ;;  %v1442_v22 = vsel %vm1423_vm13, 1e+30, %v1408_v63  ;;  %v1443_v24 = vsel %vm1423_vm13, 1e+30, %v1409_v0  ;;  %v1550_v30 = vpop.permute.xlu0 %1549 }
 0x10e   : > { %v1450_v25 = vsel %vm1423_vm13, %v1408_v63, 1e+30  ;;  %2576 = vperm.xlu1 %2958, %v2573_v3   ;;  %v1444_v18 = vmin.f32 %v3796_v40, %v1442_v22  ;;  %v1445_v55 = vmin.f32 %v3802_v21, %v1443_v24  ;;  %v1451_v28 = vsel %vm1423_vm13, %v1409_v0, 1e+30 }
 0x10f   : > { %v1452_v26 = vmin.f32 %v3806_v48, %v1450_v25  ;;  %v1453_v20 = vmin.f32 %v3811_v51, %v1451_v28  ;;  %v1475_v29 = vmul.f32 %v1471_v27, %v1471_v27  ;;  %v1476_v61 = vadd.f32 %v1474_v36, %v1472_v12 }
 0x110   : > { %vm1491_vm15 = vcmp.gt.f32.partialorder %v1489_v42, 0.5  ;;  %v1541_v63 = vmul.f32 %v1532_v41, %v1532_v41  ;;  %vm1552_vm0 = vcmp.gt.f32.partialorder %v1550_v30, 0.5 }
 0x111   : > { %v1536_v31 = vpop.permute.xlu1 %1535  ;;  %v1477_v32 = vadd.f32 %v1475_v29, %v1473_v58  ;;  %v1494_v33 = vsel %vm1484_vm14, 1e+30, %v1476_v61  ;;  %v1502_v34 = vsel %vm1484_vm14, %v1476_v61, 1e+30  ;;  %v1510_v13 = vsel %vm1491_vm15, 1e+30, %v1476_v61  ;;  %v1597_v47 = vpop.permute.xlu0 %1596 }
 0x112   : > { %v3836_v38 = vmin.f32 %v1428_v11, %v1494_v33  ;;  %v3838_v40 = vmin.f32 %v1436_v19, %v1502_v34  ;;  %v3843_v46 = vmin.f32 %v1444_v18, %v1510_v13  ;;  %v1518_v50 = vsel %vm1491_vm15, %v1476_v61, 1e+30 }
 0x113   : > { %v1495_v44 = vsel %vm1484_vm14, 1e+30, %v1477_v32  ;;  %v1503_v21 = vsel %vm1484_vm14, %v1477_v32, 1e+30  ;;  %v1511_v45 = vsel %vm1491_vm15, 1e+30, %v1477_v32  ;;  %v3853_v52 = vmin.f32 %v1452_v26, %v1518_v50 }
 0x114   : > { %v3845_v48 = vmin.f32 %v1429_v39, %v1495_v44  ;;  %v3847_v49 = vmin.f32 %v1437_v23, %v1503_v21  ;;  %v3849_v35 = vmin.f32 %v1445_v55, %v1511_v45  ;;  %v1519_v43 = vsel %vm1491_vm15, %v1477_v32, 1e+30 }
 0x115   : > { %v1557_v51 = vpop.permute.xlu1 %1556  ;;  %v1538_v54 = vsub.f32 %v1536_v31, %v3231_v16  ;;  %v1539_v56 = vsub.f32 %v1536_v31, %v3234_v17  ;;  %v3857_v57 = vmin.f32 %v1453_v20, %v1519_v43  ;;  %v1599_v59 = vsub.f32 %v1597_v47, %v3225_v14  ;;  %v1618_v53 = vpop.permute.xlu0 %1617 }
 0x116   : > { %v1600_v60 = vsub.f32 %v1597_v47, %v3228_v15  ;;  %vm1559_vm1 = vcmp.gt.f32.partialorder %v1557_v51, 0.5  ;;  %vm1620_vm2 = vcmp.gt.f32.partialorder %v1618_v53, 0.5 }
 0x117   : > { %v1542_v0 = vmul.f32 %v1538_v54, %v1538_v54  ;;  %v1543_v1 = vmul.f32 %v1539_v56, %v1539_v56  ;;  %v1608_v5 = vmul.f32 %v1599_v59, %v1599_v59 }
 0x118   : > { %v1609_v8 = vmul.f32 %v1600_v60, %v1600_v60 }
 0x119   : > { %v1604_v12 = vpop.permute.xlu1 %1603  ;;  %v1544_v27 = vadd.f32 %v1542_v0, %v1540_v62  ;;  %v1545_v3 = vadd.f32 %v1543_v1, %v1541_v63  ;;  %v1665_v19 = vpop.permute.xlu0 %1664 }
 0x11a   : > { %v1606_v4 = vsub.f32 %v1604_v12, %v3231_v16  ;;  %v1607_v36 = vsub.f32 %v1604_v12, %v3234_v17  ;;  %v1667_v33 = vsub.f32 %v1665_v19, %v3225_v14  ;;  %v1668_v37 = vsub.f32 %v1665_v19, %v3228_v15 }
 0x11b   : > { %v1562_v10 = vsel %vm1552_vm0, 1e+30, %v1544_v27  ;;  %v1563_v11 = vsel %vm1552_vm0, 1e+30, %v1545_v3  ;;  %v1570_v39 = vsel %vm1552_vm0, %v1544_v27, 1e+30 }
 0x11c   : > { %v1610_v9 = vmul.f32 %v1606_v4, %v1606_v4  ;;  %v1564_v42 = vmin.f32 %v3836_v38, %v1562_v10  ;;  %v1565_v23 = vmin.f32 %v3845_v48, %v1563_v11  ;;  %v1571_v22 = vsel %vm1552_vm0, %v1545_v3, 1e+30 }
 0x11d   : > { %v1572_v24 = vmin.f32 %v3838_v40, %v1570_v39  ;;  %v1625_v25 = vpop.permute.xlu1 %1624  ;;  %v1573_v18 = vmin.f32 %v3847_v49, %v1571_v22  ;;  %v1578_v55 = vsel %vm1559_vm1, 1e+30, %v1544_v27  ;;  %v1579_v28 = vsel %vm1559_vm1, 1e+30, %v1545_v3  ;;  %v3876_v34 = vpop.permute.xlu0 %1685 }
 0x11e   : > { %v1586_v26 = vsel %vm1559_vm1, %v1544_v27, 1e+30  ;;  %v1580_v58 = vmin.f32 %v3843_v46, %v1578_v55  ;;  %v1581_v20 = vmin.f32 %v3849_v35, %v1579_v28  ;;  %v1587_v29 = vsel %vm1559_vm1, %v1545_v3, 1e+30 }
 0x11f   : > { %v1588_v61 = vmin.f32 %v3853_v52, %v1586_v26  ;;  %v1589_v30 = vmin.f32 %v3857_v57, %v1587_v29  ;;  %v1611_v31 = vmul.f32 %v1607_v36, %v1607_v36  ;;  %v1612_v32 = vadd.f32 %v1610_v9, %v1608_v5 }
 0x120   : > { %vm1627_vm3 = vcmp.gt.f32.partialorder %v1625_v25, 0.5  ;;  %v1676_v44 = vmul.f32 %v1667_v33, %v1667_v33  ;;  %v1677_v21 = vmul.f32 %v1668_v37, %v1668_v37  ;;  %vm1688_vm5 = vcmp.gt.f32.partialorder %v3876_v34, 0.5 }
 0x121   : > { %v1672_v38 = vpop.permute.xlu1 %1671  ;;  %v1613_v40 = vadd.f32 %v1611_v31, %v1609_v8  ;;  %v1630_v41 = vsel %vm1620_vm2, 1e+30, %v1612_v32  ;;  %v1638_v13 = vsel %vm1620_vm2, %v1612_v32, 1e+30  ;;  %v1646_v45 = vsel %vm1627_vm3, 1e+30, %v1612_v32  ;;  %v1733_v51 = vpop.permute.xlu0 %1732 }
 0x122   : > { %v1654_v46 = vsel %vm1627_vm3, %v1612_v32, 1e+30  ;;  %v1674_v47 = vsub.f32 %v1672_v38, %v3231_v16  ;;  %v3883_v50 = vmin.f32 %v1580_v58, %v1646_v45  ;;  %v1675_v56 = vsub.f32 %v1672_v38, %v3234_v17 }
 0x123   : > { %v1631_v48 = vsel %vm1620_vm2, 1e+30, %v1613_v40  ;;  %v1639_v49 = vsel %vm1620_vm2, %v1613_v40, 1e+30  ;;  %v1647_v35 = vsel %vm1627_vm3, 1e+30, %v1613_v40  ;;  %v3888_v54 = vmin.f32 %v1588_v61, %v1654_v46 }
 0x124   : > { %v3885_v43 = vmin.f32 %v1581_v20, %v1647_v35  ;;  %v1655_v52 = vsel %vm1627_vm3, %v1613_v40, 1e+30  ;;  %v1678_v60 = vmul.f32 %v1674_v47, %v1674_v47  ;;  %v1735_v62 = vsub.f32 %v1733_v51, %v3225_v14 }
 0x125   : > { %v1693_v57 = vpop.permute.xlu1 %1692  ;;  %v3891_v59 = vmin.f32 %v1589_v30, %v1655_v52  ;;  %v1736_v63 = vsub.f32 %v1733_v51, %v3228_v15  ;;  %v1679_v0 = vmul.f32 %v1675_v56, %v1675_v56  ;;  %v1632_v1 = vmin.f32 %v1564_v42, %v1630_v41  ;;  %v1754_v27 = vpop.permute.xlu0 %1753 }
 0x126   : > { %vm1695_vm4 = vcmp.gt.f32.partialorder %v1693_v57, 0.5  ;;  %v1633_v53 = vmin.f32 %v1565_v23, %v1631_v48  ;;  %v1680_v12 = vadd.f32 %v1678_v60, %v1676_v44  ;;  %v1640_v3 = vmin.f32 %v1572_v24, %v1638_v13 }
 0x127   : > { %v1681_v4 = vadd.f32 %v1679_v0, %v1677_v21  ;;  %v1744_v5 = vmul.f32 %v1735_v62, %v1735_v62  ;;  %v1745_v8 = vmul.f32 %v1736_v63, %v1736_v63  ;;  %v3896_v10 = vmin.f32 %v1573_v18, %v1639_v49 }
 0x128   : > { %v1714_v11 = vsel %vm1695_vm4, 1e+30, %v1680_v12  ;;  %v1722_v39 = vsel %vm1695_vm4, %v1680_v12, 1e+30  ;;  %v1698_v61 = vsel %vm1688_vm5, 1e+30, %v1680_v12 }
 0x129   : > { %v1740_v36 = vpop.permute.xlu1 %1739  ;;  %v1715_v42 = vsel %vm1695_vm4, 1e+30, %v1681_v4  ;;  %v1716_v23 = vmin.f32 %v3883_v50, %v1714_v11  ;;  %v1723_v22 = vsel %vm1695_vm4, %v1681_v4, 1e+30  ;;  %v1724_v24 = vmin.f32 %v3888_v54, %v1722_v39  ;;  %v1808_v26 = vpop.permute.xlu0 %1807 }
 0x12a   : > { %v1742_v9 = vsub.f32 %v1740_v36, %v3231_v16  ;;  %v1743_v19 = vsub.f32 %v1740_v36, %v3234_v17  ;;  %v1717_v25 = vmin.f32 %v3885_v43, %v1715_v42  ;;  %v1725_v18 = vmin.f32 %v3891_v59, %v1723_v22 }
 0x12b   : > { %v1810_v58 = vsub.f32 %v1808_v26, %v3231_v16  ;;  %v1811_v20 = vsub.f32 %v1808_v26, %v3234_v17  ;;  %v1699_v30 = vsel %vm1688_vm5, 1e+30, %v1681_v4  ;;  %v1700_v41 = vmin.f32 %v1632_v1, %v1698_v61 }
 0x12c   : > { %v1746_v55 = vmul.f32 %v1742_v9, %v1742_v9  ;;  %v1747_v28 = vmul.f32 %v1743_v19, %v1743_v19  ;;  %v1701_v13 = vmin.f32 %v1633_v53, %v1699_v30  ;;  %v1706_v46 = vsel %vm1688_vm5, %v1680_v12, 1e+30 }
 0x12d   : > { %v1801_v29 = vpop.permute.xlu1 %1800  ;;  %v1814_v38 = vmul.f32 %v1810_v58, %v1810_v58  ;;  %v1815_v40 = vmul.f32 %v1811_v20, %v1811_v20  ;;  %v1876_v45 = vpop.permute.xlu0 %1875  ;;  %v1707_v47 = vsel %vm1688_vm5, %v1681_v4, 1e+30  ;;  %v1708_v49 = vmin.f32 %v1640_v3, %v1706_v46 }
 0x12e   : > { %v1748_v31 = vadd.f32 %v1746_v55, %v1744_v5  ;;  %v1749_v32 = vadd.f32 %v1747_v28, %v1745_v8  ;;  %v1803_v33 = vsub.f32 %v1801_v29, %v3225_v14  ;;  %v1804_v37 = vsub.f32 %v1801_v29, %v3228_v15 }
 0x12f   : > { %v1709_v35 = vmin.f32 %v3896_v10, %v1707_v47  ;;  %vm1756_vm6 = vcmp.gt.f32.partialorder %v1754_v27, 0.5  ;;  %v1878_v43 = vsub.f32 %v1876_v45, %v3231_v16  ;;  %v1879_v34 = vsub.f32 %v1876_v45, %v3234_v17 }
 0x130   : > { %v1812_v44 = vmul.f32 %v1803_v33, %v1803_v33  ;;  %v1813_v21 = vmul.f32 %v1804_v37, %v1804_v37  ;;  %v1766_v52 = vsel %vm1756_vm6, 1e+30, %v1748_v31  ;;  %v1767_v54 = vsel %vm1756_vm6, 1e+30, %v1749_v32 }
 0x131   : > { %v1869_v48 = vpop.permute.xlu1 %1868  ;;  %v3922_v56 = vpop.permute.xlu0 %1936  ;;  %v1768_v57 = vmin.f32 %v1700_v41, %v1766_v52  ;;  %v1769_v59 = vmin.f32 %v1701_v13, %v1767_v54  ;;  %v1774_v62 = vsel %vm1756_vm6, %v1748_v31, 1e+30  ;;  %v1775_v63 = vsel %vm1756_vm6, %v1749_v32, 1e+30 }
 0x132   : > { %v1816_v50 = vadd.f32 %v1814_v38, %v1812_v44  ;;  %v1817_v51 = vadd.f32 %v1815_v40, %v1813_v21  ;;  %v1871_v0 = vsub.f32 %v1869_v48, %v3225_v14  ;;  %v1776_v1 = vmin.f32 %v1708_v49, %v1774_v62 }
 0x133   : > { %v1882_v53 = vmul.f32 %v1878_v43, %v1878_v43  ;;  %v1872_v12 = vsub.f32 %v1869_v48, %v3228_v15  ;;  %v1777_v9 = vmin.f32 %v1709_v35, %v1775_v63  ;;  %v1883_v61 = vmul.f32 %v1879_v34, %v1879_v34 }
 0x134   : > { %v1880_v42 = vmul.f32 %v1871_v0, %v1871_v0 }
 0x135   : > { %v1761_v60 = vpop.permute.xlu1 %1760  ;;  %v1822_v10 = vpop.permute.xlu0 %1821  ;;  %v1881_v30 = vmul.f32 %v1872_v12, %v1872_v12 }
 0x136   : > { %vm1763_vm7 = vcmp.gt.f32.partialorder %v1761_v60, 0.5  ;;  %vm1824_vm8 = vcmp.gt.f32.partialorder %v1822_v10, 0.5 }
 0x137   : > { %v1782_v27 = vsel %vm1763_vm7, 1e+30, %v1748_v31  ;;  %v1783_v3 = vsel %vm1763_vm7, 1e+30, %v1749_v32  ;;  %v1790_v8 = vsel %vm1763_vm7, %v1748_v31, 1e+30  ;;  %v1885_v33 = vadd.f32 %v1883_v61, %v1881_v30 }
 0x138   : > { %v1784_v4 = vmin.f32 %v1716_v23, %v1782_v27  ;;  %v1785_v5 = vmin.f32 %v1717_v25, %v1783_v3  ;;  %v1791_v36 = vsel %vm1763_vm7, %v1749_v32, 1e+30  ;;  %v1792_v11 = vmin.f32 %v1724_v24, %v1790_v8 }
 0x139   : > { %v1793_v39 = vmin.f32 %v1725_v18, %v1791_v36  ;;  %v1944_v19 = vpop.permute.xlu1 %1943  ;;  %v1834_v22 = vsel %vm1824_vm8, 1e+30, %v1816_v50  ;;  %v1835_v55 = vsel %vm1824_vm8, 1e+30, %v1817_v51  ;;  %v1842_v28 = vsel %vm1824_vm8, %v1816_v50, 1e+30  ;;  %v2005_v25 = vpop.permute.xlu0 %2004 }
 0x13a   : > { %v1836_v26 = vmin.f32 %v1768_v57, %v1834_v22  ;;  %v1837_v58 = vmin.f32 %v1769_v59, %v1835_v55  ;;  %v1843_v20 = vsel %vm1824_vm8, %v1817_v51, 1e+30  ;;  %v1844_v29 = vmin.f32 %v1776_v1, %v1842_v28 }
 0x13b   : > { %v1845_v23 = vmin.f32 %v1777_v9, %v1843_v20  ;;  %v1884_v32 = vadd.f32 %v1882_v53, %v1880_v42  ;;  %v1946_v60 = vsub.f32 %v1944_v19, %v3231_v16  ;;  %v1947_v62 = vsub.f32 %v1944_v19, %v3234_v17 }
 0x13c   : > { %v1939_v27 = vsub.f32 %v3922_v56, %v3225_v14  ;;  %v1940_v3 = vsub.f32 %v3922_v56, %v3228_v15  ;;  %v2008_v55 = vsub.f32 %v2005_v25, %v3228_v15 }
 0x13d   : > { %v1829_v31 = vpop.permute.xlu1 %1828  ;;  %v1890_v41 = vpop.permute.xlu0 %1889  ;;  %v1950_v8 = vmul.f32 %v1946_v60, %v1946_v60  ;;  %v1951_v36 = vmul.f32 %v1947_v62, %v1947_v62 }
 0x13e   : > { %vm1831_vm9 = vcmp.gt.f32.partialorder %v1829_v31, 0.5  ;;  %vm1892_vm10 = vcmp.gt.f32.partialorder %v1890_v41, 0.5  ;;  %v1948_v42 = vmul.f32 %v1939_v27, %v1939_v27  ;;  %v1949_v22 = vmul.f32 %v1940_v3, %v1940_v3 }
 0x13f   : > { %v1850_v24 = vsel %vm1831_vm9, 1e+30, %v1816_v50  ;;  %v1851_v18 = vsel %vm1831_vm9, 1e+30, %v1817_v51  ;;  %v1858_v40 = vsel %vm1831_vm9, %v1816_v50, 1e+30 }
 0x140   : > { %v1852_v37 = vmin.f32 %v1784_v4, %v1850_v24  ;;  %v1853_v38 = vmin.f32 %v1785_v5, %v1851_v18  ;;  %v1859_v13 = vsel %vm1831_vm9, %v1817_v51, 1e+30  ;;  %v1860_v44 = vmin.f32 %v1792_v11, %v1858_v40 }
 0x141   : > { %v2012_v21 = vpop.permute.xlu1 %2011  ;;  %v1861_v45 = vmin.f32 %v1793_v39, %v1859_v13  ;;  %v1902_v46 = vsel %vm1892_vm10, 1e+30, %v1884_v32  ;;  %v1903_v47 = vsel %vm1892_vm10, 1e+30, %v1885_v33  ;;  %v1910_v48 = vsel %vm1892_vm10, %v1884_v32, 1e+30  ;;  %v2073_v57 = vpop.permute.xlu0 %2072 }
 0x142   : > { %v3927_v49 = vmin.f32 %v1836_v26, %v1902_v46  ;;  %v3929_v35 = vmin.f32 %v1837_v58, %v1903_v47  ;;  %v1911_v43 = vsel %vm1892_vm10, %v1885_v33, 1e+30  ;;  %v3931_v52 = vmin.f32 %v1844_v29, %v1910_v48 }
 0x143   : > { %v3933_v54 = vmin.f32 %v1845_v23, %v1911_v43  ;;  %v2007_v11 = vsub.f32 %v2005_v25, %v3225_v14  ;;  %v2014_v39 = vsub.f32 %v2012_v21, %v3231_v16  ;;  %v2015_v9 = vsub.f32 %v2012_v21, %v3234_v17 }
 0x144   : > { %v1952_v56 = vadd.f32 %v1950_v8, %v1948_v42  ;;  %v1953_v28 = vadd.f32 %v1951_v36, %v1949_v22  ;;  %v2075_v26 = vsub.f32 %v2073_v57, %v3225_v14  ;;  %v2076_v58 = vsub.f32 %v2073_v57, %v3228_v15 }
 0x145   : > { %v1897_v50 = vpop.permute.xlu1 %1896  ;;  %v1958_v0 = vpop.permute.xlu0 %1957  ;;  %v2016_v29 = vmul.f32 %v2007_v11, %v2007_v11  ;;  %v2018_v61 = vmul.f32 %v2014_v39, %v2014_v39  ;;  %v2019_v30 = vmul.f32 %v2015_v9, %v2015_v9 }
 0x146   : > { %vm1899_vm11 = vcmp.gt.f32.partialorder %v1897_v50, 0.5  ;;  %vm1960_vm12 = vcmp.gt.f32.partialorder %v1958_v0, 0.5  ;;  %v2084_v41 = vmul.f32 %v2075_v26, %v2075_v26  ;;  %v2085_v13 = vmul.f32 %v2076_v58, %v2076_v58 }
 0x147   : > { %v1918_v51 = vsel %vm1899_vm11, 1e+30, %v1884_v32  ;;  %v1919_v59 = vsel %vm1899_vm11, 1e+30, %v1885_v33  ;;  %v1926_v1 = vsel %vm1899_vm11, %v1884_v32, 1e+30  ;;  %v2017_v32 = vmul.f32 %v2008_v55, %v2008_v55 }
 0x148   : > { %v3937_v63 = vmin.f32 %v1852_v37, %v1918_v51  ;;  %v3939_v34 = vmin.f32 %v1853_v38, %v1919_v59  ;;  %v1927_v53 = vsel %vm1899_vm11, %v1885_v33, 1e+30  ;;  %v3945_v4 = vmin.f32 %v1860_v44, %v1926_v1 }
 0x149   : > { %v2080_v12 = vpop.permute.xlu1 %2079  ;;  %v3947_v5 = vmin.f32 %v1861_v45, %v1927_v53  ;;  %v2141_v10 = vpop.permute.xlu0 %2140  ;;  %v1970_v24 = vsel %vm1960_vm12, 1e+30, %v1952_v56  ;;  %v1971_v18 = vsel %vm1960_vm12, 1e+30, %v1953_v28  ;;  %v1978_v33 = vsel %vm1960_vm12, %v1952_v56, 1e+30 }
 0x14a   : > { %v2082_v23 = vsub.f32 %v2080_v12, %v3231_v16  ;;  %v1979_v37 = vsel %vm1960_vm12, %v1953_v28, 1e+30  ;;  %v2083_v25 = vsub.f32 %v2080_v12, %v3234_v17  ;;  %v2143_v38 = vsub.f32 %v2141_v10, %v3225_v14 }
 0x14b   : > { %v2144_v40 = vsub.f32 %v2141_v10, %v3228_v15  ;;  %v2020_v21 = vadd.f32 %v2018_v61, %v2016_v29  ;;  %v2021_v45 = vadd.f32 %v2019_v30, %v2017_v32  ;;  %v1972_v46 = vmin.f32 %v3927_v49, %v1970_v24 }
 0x14c   : > { %v2086_v47 = vmul.f32 %v2082_v23, %v2082_v23  ;;  %v1973_v43 = vmin.f32 %v3929_v35, %v1971_v18  ;;  %v1980_v57 = vmin.f32 %v3931_v52, %v1978_v33  ;;  %v1981_v50 = vmin.f32 %v3933_v54, %v1979_v37 }
 0x14d   : > { %v1965_v19 = vpop.permute.xlu1 %1964  ;;  %v2026_v20 = vpop.permute.xlu0 %2025  ;;  %v2087_v51 = vmul.f32 %v2083_v25, %v2083_v25  ;;  %v2152_v59 = vmul.f32 %v2143_v38, %v2143_v38  ;;  %v2153_v60 = vmul.f32 %v2144_v40, %v2144_v40 }
 0x14e   : > { %vm1967_vm13 = vcmp.gt.f32.partialorder %v1965_v19, 0.5  ;;  %vm2028_vm14 = vcmp.gt.f32.partialorder %v2026_v20, 0.5  ;;  %v2088_v35 = vadd.f32 %v2086_v47, %v2084_v41 }
 0x14f   : > { %v1986_v62 = vsel %vm1967_vm13, 1e+30, %v1952_v56  ;;  %v1987_v0 = vsel %vm1967_vm13, 1e+30, %v1953_v28  ;;  %v1994_v1 = vsel %vm1967_vm13, %v1952_v56, 1e+30  ;;  %v2089_v39 = vadd.f32 %v2087_v51, %v2085_v13 }
 0x150   : > { %v1995_v49 = vsel %vm1967_vm13, %v1953_v28, 1e+30  ;;  %v2038_v27 = vsel %vm2028_vm14, 1e+30, %v2020_v21  ;;  %v2039_v52 = vsel %vm2028_vm14, 1e+30, %v2021_v45  ;;  %v1988_v9 = vmin.f32 %v3937_v63, %v1986_v62 }
 0x151   : > { %v2148_v31 = vpop.permute.xlu1 %2147  ;;  %v2209_v44 = vpop.permute.xlu0 %2208  ;;  %v2046_v3 = vsel %vm2028_vm14, %v2020_v21, 1e+30  ;;  %v2047_v8 = vsel %vm2028_vm14, %v2021_v45, 1e+30  ;;  %v1989_v19 = vmin.f32 %v3939_v34, %v1987_v0  ;;  %v1996_v42 = vmin.f32 %v3945_v4, %v1994_v1 }
 0x152   : > { %v2150_v53 = vsub.f32 %v2148_v31, %v3231_v16  ;;  %v2151_v36 = vsub.f32 %v2148_v31, %v3234_v17  ;;  %v2211_v10 = vsub.f32 %v2209_v44, %v3225_v14  ;;  %v2212_v11 = vsub.f32 %v2209_v44, %v3228_v15 }
 0x153   : > { %v1997_v22 = vmin.f32 %v3947_v5, %v1995_v49  ;;  %v3975_v55 = vmin.f32 %v1972_v46, %v2038_v27  ;;  %v3977_v26 = vmin.f32 %v1973_v43, %v2039_v52  ;;  %v3979_v58 = vmin.f32 %v1980_v57, %v2046_v3 }
 0x154   : > { %v2154_v56 = vmul.f32 %v2150_v53, %v2150_v53  ;;  %v3981_v20 = vmin.f32 %v1981_v50, %v2047_v8  ;;  %v2155_v63 = vmul.f32 %v2151_v36, %v2151_v36  ;;  %v2220_v61 = vmul.f32 %v2211_v10, %v2211_v10 }
 0x155   : > { %v2033_v48 = vpop.permute.xlu1 %2032  ;;  %v2094_v12 = vpop.permute.xlu0 %2093  ;;  %v2221_v34 = vmul.f32 %v2212_v11, %v2212_v11 }
 0x156   : > { %vm2035_vm15 = vcmp.gt.f32.partialorder %v2033_v48, 0.5  ;;  %vm2096_vm0 = vcmp.gt.f32.partialorder %v2094_v12, 0.5  ;;  %v2156_v32 = vadd.f32 %v2154_v56, %v2152_v59  ;;  %v2157_v44 = vadd.f32 %v2155_v63, %v2153_v60 }
 0x157   : > { %v2054_v30 = vsel %vm2035_vm15, 1e+30, %v2020_v21  ;;  %v2055_v4 = vsel %vm2035_vm15, 1e+30, %v2021_v45  ;;  %v2062_v5 = vsel %vm2035_vm15, %v2020_v21, 1e+30 }
 0x158   : > { %v2063_v23 = vsel %vm2035_vm15, %v2021_v45, 1e+30  ;;  %v2106_v24 = vsel %vm2096_vm0, 1e+30, %v2088_v35  ;;  %v2107_v18 = vsel %vm2096_vm0, 1e+30, %v2089_v39  ;;  %v3991_v46 = vmin.f32 %v1988_v9, %v2054_v30 }
 0x159   : > { %v2216_v54 = vpop.permute.xlu1 %2215  ;;  %v2277_v28 = vpop.permute.xlu0 %2276  ;;  %v2114_v33 = vsel %vm2096_vm0, %v2088_v35, 1e+30  ;;  %v2115_v25 = vsel %vm2096_vm0, %v2089_v39, 1e+30  ;;  %v3993_v21 = vmin.f32 %v1989_v19, %v2055_v4  ;;  %v3995_v45 = vmin.f32 %v1996_v42, %v2062_v5 }
 0x15a   : > { %v2218_v31 = vsub.f32 %v2216_v54, %v3231_v16  ;;  %v2219_v38 = vsub.f32 %v2216_v54, %v3234_v17  ;;  %v2279_v40 = vsub.f32 %v2277_v28, %v3225_v14  ;;  %v2280_v41 = vsub.f32 %v2277_v28, %v3228_v15 }
 0x15b   : > { %v3997_v47 = vmin.f32 %v1997_v22, %v2063_v23  ;;  %v2108_v48 = vmin.f32 %v3975_v55, %v2106_v24  ;;  %v2109_v57 = vmin.f32 %v3977_v26, %v2107_v18  ;;  %v2116_v50 = vmin.f32 %v3979_v58, %v2114_v33 }
 0x15c   : > { %v2222_v43 = vmul.f32 %v2218_v31, %v2218_v31  ;;  %v2117_v51 = vmin.f32 %v3981_v20, %v2115_v25  ;;  %v2223_v60 = vmul.f32 %v2219_v38, %v2219_v38  ;;  %v2288_v62 = vmul.f32 %v2279_v40, %v2279_v40 }
 0x15d   : > { %v2101_v29 = vpop.permute.xlu1 %2100  ;;  %v2162_v37 = vpop.permute.xlu0 %2161  ;;  %v2289_v0 = vmul.f32 %v2280_v41, %v2280_v41 }
 0x15e   : > { %vm2103_vm1 = vcmp.gt.f32.partialorder %v2101_v29, 0.5  ;;  %vm2164_vm2 = vcmp.gt.f32.partialorder %v2162_v37, 0.5  ;;  %v2224_v3 = vadd.f32 %v2222_v43, %v2220_v61  ;;  %v2225_v22 = vadd.f32 %v2223_v60, %v2221_v34 }
 0x15f   : > { %v2122_v1 = vsel %vm2103_vm1, 1e+30, %v2088_v35  ;;  %v2123_v53 = vsel %vm2103_vm1, 1e+30, %v2089_v39  ;;  %v2130_v12 = vsel %vm2103_vm1, %v2088_v35, 1e+30 }
 0x160   : > { %v2131_v27 = vsel %vm2103_vm1, %v2089_v39, 1e+30  ;;  %v2174_v54 = vsel %vm2164_vm2, 1e+30, %v2156_v32  ;;  %v2175_v8 = vsel %vm2164_vm2, 1e+30, %v2157_v44  ;;  %v2124_v55 = vmin.f32 %v3991_v46, %v2122_v1 }
 0x161   : > { %v2284_v13 = vpop.permute.xlu1 %2283  ;;  %v2345_v59 = vpop.permute.xlu0 %2344  ;;  %v2182_v36 = vsel %vm2164_vm2, %v2156_v32, 1e+30  ;;  %v2183_v10 = vsel %vm2164_vm2, %v2157_v44, 1e+30  ;;  %v2125_v35 = vmin.f32 %v3993_v21, %v2123_v53  ;;  %v2132_v56 = vmin.f32 %v3995_v45, %v2130_v12 }
 0x162   : > { %v2286_v52 = vsub.f32 %v2284_v13, %v3231_v16  ;;  %v2287_v11 = vsub.f32 %v2284_v13, %v3234_v17  ;;  %v2347_v9 = vsub.f32 %v2345_v59, %v3225_v14  ;;  %v2348_v19 = vsub.f32 %v2345_v59, %v3228_v15 }
 0x163   : > { %v2133_v28 = vmin.f32 %v3997_v47, %v2131_v27  ;;  %v4015_v26 = vmin.f32 %v2108_v48, %v2174_v54  ;;  %v4017_v20 = vmin.f32 %v2109_v57, %v2175_v8  ;;  %v4019_v29 = vmin.f32 %v2116_v50, %v2182_v36 }
 0x164   : > { %v2290_v58 = vmul.f32 %v2286_v52, %v2286_v52  ;;  %v4021_v63 = vmin.f32 %v2117_v51, %v2183_v10  ;;  %v2291_v61 = vmul.f32 %v2287_v11, %v2287_v11  ;;  %v2356_v34 = vmul.f32 %v2347_v9, %v2347_v9 }
 0x165   : > { %v2169_v49 = vpop.permute.xlu1 %2168  ;;  %v2230_v42 = vpop.permute.xlu0 %2229  ;;  %v2357_v30 = vmul.f32 %v2348_v19, %v2348_v19 }
 0x166   : > { %vm2171_vm3 = vcmp.gt.f32.partialorder %v2169_v49, 0.5  ;;  %vm2232_vm4 = vcmp.gt.f32.partialorder %v2230_v42, 0.5  ;;  %v2292_v37 = vadd.f32 %v2290_v58, %v2288_v62  ;;  %v2293_v45 = vadd.f32 %v2291_v61, %v2289_v0 }
 0x167   : > { %v2190_v4 = vsel %vm2171_vm3, 1e+30, %v2156_v32  ;;  %v2191_v23 = vsel %vm2171_vm3, 1e+30, %v2157_v44  ;;  %v2198_v31 = vsel %vm2171_vm3, %v2156_v32, 1e+30 }
 0x168   : > { %v2199_v24 = vsel %vm2171_vm3, %v2157_v44, 1e+30  ;;  %v2242_v25 = vsel %vm2232_vm4, 1e+30, %v2224_v3  ;;  %v2243_v38 = vsel %vm2232_vm4, 1e+30, %v2225_v22  ;;  %v2192_v47 = vmin.f32 %v2124_v55, %v2190_v4 }
 0x169   : > { %v2352_v39 = vpop.permute.xlu1 %2351  ;;  %v2413_v5 = vpop.permute.xlu0 %2412  ;;  %v2250_v40 = vsel %vm2232_vm4, %v2224_v3, 1e+30  ;;  %v2251_v41 = vsel %vm2232_vm4, %v2225_v22, 1e+30  ;;  %v4031_v48 = vmin.f32 %v2125_v35, %v2191_v23  ;;  %v4033_v44 = vmin.f32 %v2132_v56, %v2198_v31 }
 0x16a   : > { %v2354_v18 = vsub.f32 %v2352_v39, %v3231_v16  ;;  %v2355_v13 = vsub.f32 %v2352_v39, %v3234_v17  ;;  %v2415_v46 = vsub.f32 %v2413_v5, %v3225_v14  ;;  %v2416_v21 = vsub.f32 %v2413_v5, %v3228_v15 }
 0x16b   : > { %v4035_v43 = vmin.f32 %v2133_v28, %v2199_v24  ;;  %v2244_v57 = vmin.f32 %v4015_v26, %v2242_v25  ;;  %v2245_v59 = vmin.f32 %v4017_v20, %v2243_v38  ;;  %v2252_v60 = vmin.f32 %v4019_v29, %v2250_v40 }
 0x16c   : > { %v2358_v50 = vmul.f32 %v2354_v18, %v2354_v18  ;;  %v2253_v62 = vmin.f32 %v4021_v63, %v2251_v41  ;;  %v2359_v0 = vmul.f32 %v2355_v13, %v2355_v13  ;;  %v2424_v1 = vmul.f32 %v2415_v46, %v2415_v46 }
 0x16d   : > { %v2237_v33 = vpop.permute.xlu1 %2236  ;;  %v2298_v32 = vpop.permute.xlu0 %2297  ;;  %v2425_v49 = vmul.f32 %v2416_v21, %v2416_v21 }
 0x16e   : > { %vm2239_vm5 = vcmp.gt.f32.partialorder %v2237_v33, 0.5  ;;  %vm2300_vm6 = vcmp.gt.f32.partialorder %v2298_v32, 0.5  ;;  %v4046_v36 = vadd.f32 %v2358_v50, %v2356_v34  ;;  %v2361_v35 = vadd.f32 %v2359_v0, %v2357_v30 }
 0x16f   : > { %v2258_v53 = vsel %vm2239_vm5, 1e+30, %v2224_v3  ;;  %v2259_v12 = vsel %vm2239_vm5, 1e+30, %v2225_v22  ;;  %v2266_v27 = vsel %vm2239_vm5, %v2224_v3, 1e+30 }
 0x170   : > { %v2267_v10 = vsel %vm2239_vm5, %v2225_v22, 1e+30  ;;  %v2310_v11 = vsel %vm2300_vm6, 1e+30, %v2292_v37  ;;  %v2311_v9 = vsel %vm2300_vm6, 1e+30, %v2293_v45  ;;  %v2260_v26 = vmin.f32 %v2192_v47, %v2258_v53 }
 0x171   : > { %v2420_v51 = vpop.permute.xlu1 %2419  ;;  %v2481_v8 = vpop.permute.xlu0 %2480  ;;  %v2318_v42 = vsel %vm2300_vm6, %v2292_v37, 1e+30  ;;  %v2319_v39 = vsel %vm2300_vm6, %v2293_v45, 1e+30  ;;  %v2261_v22 = vmin.f32 %v4031_v48, %v2259_v12  ;;  %v2268_v58 = vmin.f32 %v4033_v44, %v2266_v27 }
 0x172   : > { %v2422_v52 = vsub.f32 %v2420_v51, %v3231_v16  ;;  %v2423_v54 = vsub.f32 %v2420_v51, %v3234_v17  ;;  %v2483_v55 = vsub.f32 %v2481_v8, %v3225_v14  ;;  %v2484_v3 = vsub.f32 %v2481_v8, %v3228_v15 }
 0x173   : > { %v2269_v63 = vmin.f32 %v4035_v43, %v2267_v10  ;;  %v2312_v61 = vmin.f32 %v2244_v57, %v2310_v11  ;;  %v2313_v34 = vmin.f32 %v2245_v59, %v2311_v9  ;;  %v4059_v4 = vmin.f32 %v2252_v60, %v2318_v42 }
 0x174   : > { %v2426_v56 = vmul.f32 %v2422_v52, %v2422_v52  ;;  %v2427_v28 = vmul.f32 %v2423_v54, %v2423_v54  ;;  %v4061_v30 = vmin.f32 %v2253_v62, %v2319_v39  ;;  %v2492_v23 = vmul.f32 %v2483_v55, %v2483_v55 }
 0x175   : > { %v2305_v19 = vpop.permute.xlu1 %2304  ;;  %v2366_v29 = vpop.permute.xlu0 %2365  ;;  %v2493_v31 = vmul.f32 %v2484_v3, %v2484_v3 }
 0x176   : > { %vm2307_vm7 = vcmp.gt.f32.partialorder %v2305_v19, 0.5  ;;  %vm2368_vm8 = vcmp.gt.f32.partialorder %v2366_v29, 0.5  ;;  %v4063_v24 = vadd.f32 %v2426_v56, %v2424_v1  ;;  %v4065_v18 = vadd.f32 %v2427_v28, %v2425_v49 }
 0x177   : > { %v2326_v20 = vsel %vm2307_vm7, 1e+30, %v2292_v37  ;;  %v2327_v33 = vsel %vm2307_vm7, 1e+30, %v2293_v45  ;;  %v2334_v38 = vsel %vm2307_vm7, %v2292_v37, 1e+30 }
 0x178   : > { %v4068_v25 = vmin.f32 %v2260_v26, %v2326_v20  ;;  %v2335_v40 = vsel %vm2307_vm7, %v2293_v45, 1e+30  ;;  %v2378_v21 = vsel %vm2368_vm8, 1e+30, %v4046_v36  ;;  %v2379_v47 = vsel %vm2368_vm8, 1e+30, %v2361_v35 }
 0x179   : > { %v2488_v5 = vpop.permute.xlu1 %2487  ;;  %v2549_v46 = vpop.permute.xlu0 %2548  ;;  %v2386_v48 = vsel %vm2368_vm8, %v4046_v36, 1e+30  ;;  %v2387_v43 = vsel %vm2368_vm8, %v2361_v35, 1e+30  ;;  %v2329_v37 = vmin.f32 %v2261_v22, %v2327_v33  ;;  %v2336_v45 = vmin.f32 %v2268_v58, %v2334_v38 }
 0x17a   : > { %v2490_v41 = vsub.f32 %v2488_v5, %v3231_v16  ;;  %v2491_v13 = vsub.f32 %v2488_v5, %v3234_v17  ;;  %v2551_v32 = vsub.f32 %v2549_v46, %v3225_v14  ;;  %v2552_v50 = vsub.f32 %v2549_v46, %v3228_v15 }
 0x17b   : > { %v4078_v51 = vmin.f32 %v2269_v63, %v2335_v40  ;;  %v2380_v60 = vmin.f32 %v2312_v61, %v2378_v21  ;;  %v2381_v62 = vmin.f32 %v2313_v34, %v2379_v47  ;;  %v2388_v14 = vmin.f32 %v4059_v4, %v2386_v48 }
 0x17c   : > { %v2494_v57 = vmul.f32 %v2490_v41, %v2490_v41  ;;  %v2495_v59 = vmul.f32 %v2491_v13, %v2491_v13  ;;  %v2389_v53 = vmin.f32 %v4061_v30, %v2387_v43  ;;  %v2560_v12 = vmul.f32 %v2551_v32, %v2551_v32 }
 0x17d   : > { %v2373_v44 = vpop.permute.xlu1 %2372  ;;  %v2434_v49 = vpop.permute.xlu0 %2433  ;;  %v2561_v52 = vmul.f32 %v2552_v50, %v2552_v50 }
 0x17e   : > { %vm2375_vm9 = vcmp.gt.f32.partialorder %v2373_v44, 0.5  ;;  %vm2436_vm10 = vcmp.gt.f32.partialorder %v2434_v49, 0.5  ;;  %v4085_v27 = vadd.f32 %v2494_v57, %v2492_v23  ;;  %v4091_v10 = vadd.f32 %v2495_v59, %v2493_v31 }
 0x17f   : > { %v2394_v0 = vsel %vm2375_vm9, 1e+30, %v4046_v36  ;;  %v2395_v1 = vsel %vm2375_vm9, 1e+30, %v2361_v35  ;;  %v2446_v54 = vsel %vm2436_vm10, 1e+30, %v4063_v24 }
 0x180   : > { %v2447_v8 = vsel %vm2436_vm10, 1e+30, %v4065_v18  ;;  %v2396_v11 = vmin.f32 %v4068_v25, %v2394_v0  ;;  %v2397_v9 = vmin.f32 %v2329_v37, %v2395_v1  ;;  %v2402_v19 = vsel %vm2375_vm9, %v4046_v36, 1e+30 }
 0x181   : > { %v2556_v15 = vpop.permute.xlu1 %2555  ;;  %v2403_v42 = vsel %vm2375_vm9, %v2361_v35, 1e+30  ;;  %v2454_v55 = vsel %vm2436_vm10, %v4063_v24, 1e+30  ;;  %v2502_v56 = vpop.permute.xlu0 %2501  ;;  %v2448_v28 = vmin.f32 %v2380_v60, %v2446_v54  ;;  %v2449_v26 = vmin.f32 %v2381_v62, %v2447_v8 }
 0x182   : > { %v2558_v3 = vsub.f32 %v2556_v15, %v3231_v16  ;;  %v2559_v39 = vsub.f32 %v2556_v15, %v3234_v17  ;;  %v2455_v22 = vsel %vm2436_vm10, %v4065_v18, 1e+30  ;;  %vm2504_vm11 = vcmp.gt.f32.partialorder %v2502_v56, 0.5 }
 0x183   : > { %v2514_v36 = vsel %vm2504_vm11, 1e+30, %v4085_v27  ;;  %v2515_v35 = vsel %vm2504_vm11, 1e+30, %v4091_v10  ;;  %v2404_v63 = vmin.f32 %v2336_v45, %v2402_v19  ;;  %v2405_v61 = vmin.f32 %v4078_v51, %v2403_v42 }
 0x184   : > { %v2562_v20 = vmul.f32 %v2558_v3, %v2558_v3  ;;  %v2563_v29 = vmul.f32 %v2559_v39, %v2559_v39  ;;  %v2456_v16 = vmin.f32 %v2388_v14, %v2454_v55  ;;  %v2522_v17 = vsel %vm2504_vm11, %v4085_v27, 1e+30 }
 0x185   : > { %v2441_v58 = vpop.permute.xlu1 %2440  ;;  %v2457_v34 = vmin.f32 %v2389_v53, %v2455_v22  ;;  %v2516_v4 = vmin.f32 %v2448_v28, %v2514_v36  ;;  %v2517_v5 = vmin.f32 %v2449_v26, %v2515_v35  ;;  %v2523_v30 = vsel %vm2504_vm11, %v4091_v10, 1e+30  ;;  %v2570_v23 = vpop.permute.xlu0 %2569 }
 0x186   : > { %v2564_v31 = vadd.f32 %v2562_v20, %v2560_v12  ;;  %v2565_v33 = vadd.f32 %v2563_v29, %v2561_v52  ;;  %vm2443_vm12 = vcmp.gt.f32.partialorder %v2441_v58, 0.5  ;;  %vm2572_vm13 = vcmp.gt.f32.partialorder %v2570_v23, 0.5 }
 0x187   : > { %v2524_v38 = vmin.f32 %v2456_v16, %v2522_v17  ;;  %v2462_v40 = vsel %vm2443_vm12, 1e+30, %v4063_v24  ;;  %v2463_v41 = vsel %vm2443_vm12, 1e+30, %v4065_v18  ;;  %v2470_v13 = vsel %vm2443_vm12, %v4063_v24, 1e+30 }
 0x188   : > { %v2525_v46 = vmin.f32 %v2457_v34, %v2523_v30  ;;  %v2464_v21 = vmin.f32 %v2396_v11, %v2462_v40  ;;  %v2465_v47 = vmin.f32 %v2397_v9, %v2463_v41  ;;  %v2471_v48 = vsel %vm2443_vm12, %v4065_v18, 1e+30 }
 0x189   : > { %v2509_v25 = vpop.permute.xlu1 %2508  ;;  %v2472_v32 = vmin.f32 %v2404_v63, %v2470_v13  ;;  %v2582_v44 = vsel %vm2572_vm13, 1e+30, %v2564_v31  ;;  %v2583_v43 = vsel %vm2572_vm13, 1e+30, %v2565_v33  ;;  %v2590_v57 = vsel %vm2572_vm13, %v2564_v31, 1e+30 }
 0x18a   : > { %v2584_v50 = vmin.f32 %v2516_v4, %v2582_v44  ;;  %v2585_v37 = vmin.f32 %v2517_v5, %v2583_v43  ;;  %v2591_v45 = vsel %vm2572_vm13, %v2565_v33, 1e+30  ;;  %v2592_v51 = vmin.f32 %v2524_v38, %v2590_v57 }
 0x18b   : > { %v2473_v60 = vmin.f32 %v2405_v61, %v2471_v48  ;;  %v2593_v24 = vmin.f32 %v2525_v46, %v2591_v45  ;;  %vm2511_vm14 = vcmp.gt.f32.partialorder %v2509_v25, 0.5 }
 0x18c   : > { %v2619_v62 = vrot.slane %v2584_v50, 4  ;;  %v2625_v0 = vrot.slane %v2585_v37, 4  ;;  %v2631_v18 = vrot.slane %v2592_v51, 4  ;;  %v2530_v1 = vsel %vm2511_vm14, 1e+30, %v4085_v27 }
 0x18d   : > { %v2577_v59 = vpop.permute.xlu1 %2576  ;;  %v2637_v49 = vrot.slane %v2593_v24, 4  ;;  %v2531_v14 = vsel %vm2511_vm14, 1e+30, %v4091_v10  ;;  %v2532_v53 = vmin.f32 %v2464_v21, %v2530_v1  ;;  %v2538_v12 = vsel %vm2511_vm14, %v4085_v27, 1e+30 }
 0x18e   : > { %vm2579_vm15 = vcmp.gt.f32.partialorder %v2577_v59, 0.5  ;;  %v2620_v15 = vmin.f32 %v2584_v50, %v2619_v62  ;;  %v2626_v52 = vmin.f32 %v2585_v37, %v2625_v0  ;;  %v2632_v54 = vmin.f32 %v2592_v51, %v2631_v18 }
 0x18f   : > { %v2533_v8 = vmin.f32 %v2465_v47, %v2531_v14  ;;  %v2638_v11 = vmin.f32 %v2593_v24, %v2637_v49  ;;  %v2539_v9 = vsel %vm2511_vm14, %v4091_v10, 1e+30  ;;  %v2540_v19 = vmin.f32 %v2472_v32, %v2538_v12 }
 0x190   : > { %v2598_v42 = vsel %vm2579_vm15, 1e+30, %v2564_v31  ;;  %v2621_v55 = vrot.slane %v2620_v15, 2  ;;  %v2627_v3 = vrot.slane %v2626_v52, 2  ;;  %v2633_v39 = vrot.slane %v2632_v54, 2 }
 0x191   : > { %v2541_v56 = vmin.f32 %v2473_v60, %v2539_v9  ;;  %v2639_v28 = vrot.slane %v2638_v11, 2  ;;  %v2599_v26 = vsel %vm2579_vm15, 1e+30, %v2565_v33  ;;  %v2600_v22 = vmin.f32 %v2532_v53, %v2598_v42 }
 0x192   : > { %v2606_v27 = vsel %vm2579_vm15, %v2564_v31, 1e+30  ;;  %v2622_v58 = vmin.f32 %v2620_v15, %v2621_v55  ;;  %v2628_v20 = vmin.f32 %v2626_v52, %v2627_v3  ;;  %v2634_v29 = vmin.f32 %v2632_v54, %v2633_v39 }
 0x193   : > { %v2601_v36 = vmin.f32 %v2533_v8, %v2599_v26  ;;  %v2640_v35 = vmin.f32 %v2638_v11, %v2639_v28  ;;  %v2607_v10 = vsel %vm2579_vm15, %v2565_v33, 1e+30  ;;  %v2608_v63 = vmin.f32 %v2540_v19, %v2606_v27 }
 0x194   : > { %v2685_v61 = vrot.slane %v2600_v22, 4  ;;  %v2623_v16 = vrot.slane %v2622_v58, 1  ;;  %v2629_v17 = vrot.slane %v2628_v20, 1  ;;  %v2635_v34 = vrot.slane %v2634_v29, 1 }
 0x195   : > { %v2609_v4 = vmin.f32 %v2541_v56, %v2607_v10  ;;  %v2641_v5 = vrot.slane %v2640_v35, 1  ;;  %v2691_v23 = vrot.slane %v2601_v36, 4  ;;  %v2697_v25 = vrot.slane %v2608_v63, 4 }
 0x196   : > { %v2686_v30 = vmin.f32 %v2600_v22, %v2685_v61  ;;  %v2624_v38 = vmin.f32 %v2622_v58, %v2623_v16  ;;  %v4124_v40 = vmin.f32 %v2628_v20, %v2629_v17  ;;  %v4126_v31 = vmin.f32 %v2634_v29, %v2635_v34 }
 0x197   : > { %v2703_v41 = vrot.slane %v2609_v4, 4  ;;  %v4128_v13 = vmin.f32 %v2640_v35, %v2641_v5  ;;  %v2692_v33 = vmin.f32 %v2601_v36, %v2691_v23  ;;  %v2698_v21 = vmin.f32 %v2608_v63, %v2697_v25 }
 0x198   : > { %v2687_v46 = vrot.slane %v2686_v30, 2  ;;  %2959 = vrsqrt.f32 %v2624_v38  ;;  %vm2643_vm0 = vcmp.ge.f32.partialorder %v2624_v38, 5e+29  ;;  %v3000_v1 = vmov 1966171168  }
 0x199   : > { %v2704_v47 = vmin.f32 %v2609_v4, %v2703_v41  ;;  %2961 = vrsqrt.f32 %v4124_v40  ;;  %v2693_v32 = vrot.slane %v2692_v33, 2  ;;  %v2699_v44 = vrot.slane %v2698_v21, 2 }
 0x19a   : > { %v2688_v48 = vmin.f32 %v2686_v30, %v2687_v46  ;;  %2963 = vrsqrt.f32 %v4126_v31  ;;  %v4142_v49 = vunpack.c.l.s4 %v3000_v1  ;;  %vm2644_vm1 = vcmp.ge.f32.partialorder %v4124_v40, 5e+29 }
 0x19b   : > { %v2705_v43 = vrot.slane %v2704_v47, 2  ;;  %2965 = vrsqrt.f32 %v4128_v13  ;;  %v2694_v50 = vmin.f32 %v2692_v33, %v2693_v32  ;;  %v2700_v37 = vmin.f32 %v2698_v21, %v2699_v44 }
 0x19c   : > { %v2689_v57 = vrot.slane %v2688_v48, 1  ;;  %vm2647_vm2 = vcmp.eq.f32.partialorder %v2624_v38, inf  ;;  %vm2649_vm3 = vcmp.eq.f32.partialorder %v2624_v38, 0.0  ;;  %v2650_v53 = vand.u32 2147483648, %v2624_v38 }
 0x19d   : > { %v2706_v45 = vmin.f32 %v2704_v47, %v2705_v43  ;;  %v2695_v59 = vrot.slane %v2694_v50, 1  ;;  %v2701_v60 = vrot.slane %v2700_v37, 1  ;;  %vm2654_vm4 = vcmp.eq.f32.partialorder %v4124_v40, inf }
 0x19e   : > { %v4133_v51 = vmin.f32 %v2688_v48, %v2689_v57  ;;  %vm2656_vm5 = vcmp.eq.f32.partialorder %v4124_v40, 0.0  ;;  %v2657_v52 = vand.u32 2147483648, %v4124_v40  ;;  %vm2661_vm6 = vcmp.ge.f32.partialorder %v4126_v31, 5e+29 }
 0x19f   : > { %v2707_v24 = vrot.slane %v2706_v45, 1  ;;  %v4135_v62 = vmin.f32 %v2694_v50, %v2695_v59  ;;  %v4137_v0 = vmin.f32 %v2700_v37, %v2701_v60  ;;  %vm2662_vm7 = vcmp.ge.f32.partialorder %v4128_v13, 5e+29 }
 0x1a0   : > { %2967 = vrsqrt.f32 %v4133_v51  ;;  %vm2665_vm8 = vcmp.eq.f32.partialorder %v4126_v31, inf  ;;  %vm2667_vm9 = vcmp.eq.f32.partialorder %v4126_v31, 0.0  ;;  %v2668_v42 = vand.u32 2147483648, %v4126_v31 }
 0x1a1   : > { %v4140_v18 = vmin.f32 %v2706_v45, %v2707_v24  ;;  %2969 = vrsqrt.f32 %v4135_v62  ;;  %vm2672_vm10 = vcmp.eq.f32.partialorder %v4128_v13, inf  ;;  %vm2674_vm11 = vcmp.eq.f32.partialorder %v4128_v13, 0.0 }
 0x1a2   : > { %v2960_v14 = vpop.eup %2959  ;;  %2971 = vrsqrt.f32 %v4137_v0  ;;  %v2675_v22 = vand.u32 2147483648, %v4128_v13  ;;  %vm2709_vm12 = vcmp.ge.f32.partialorder %v4133_v51, 5e+29  ;;  %vm2710_vm13 = vcmp.ge.f32.partialorder %v4135_v62, 5e+29 }
 0x1a3   : > { %v2962_v12 = vpop.eup %2961  ;;  %2973 = vrsqrt.f32 %v4140_v18  ;;  %v2646_v15 = vmul.f32 %v2960_v14, %v2624_v38  ;;  %vm2713_vm14 = vcmp.eq.f32.partialorder %v4133_v51, inf  ;;  %vm2715_vm15 = vcmp.eq.f32.partialorder %v4133_v51, 0.0 }
 0x1a4   : > { %v2964_v54 = vpop.eup %2963  ;;  %v2653_v8 = vmul.f32 %v2962_v12, %v4124_v40  ;;  %v2716_v34 = vand.u32 2147483648, %v4133_v51  ;;  %v2723_v23 = vand.u32 2147483648, %v4135_v62  ;;  %v2734_v41 = vand.u32 2147483648, %v4137_v0  ;;  %v2753_v12 = vld [vmem:[%s396_s30] sm:$0x3] }
 0x1a5   : > { %v2966_v11 = vpop.eup %2965  ;;  %v2648_v9 = vsel %vm2647_vm2, %v2624_v38, %v2646_v15  ;;  %v2664_v19 = vmul.f32 %v2964_v54, %v4126_v31  ;;  %vm2727_vm2 = vcmp.ge.f32.partialorder %v4137_v0, 5e+29  ;;  %v2741_v47 = vand.u32 2147483648, %v4140_v18 }
 0x1a6   : > { %v2651_v55 = vsel %vm2649_vm3, %v2650_v53, %v2648_v9  ;;  %v2655_v3 = vsel %vm2654_vm4, %v4124_v40, %v2653_v8  ;;  %v2671_v39 = vmul.f32 %v2966_v11, %v4128_v13  ;;  %vm2731_vm3 = vcmp.eq.f32.partialorder %v4137_v0, inf }
 0x1a7   : > { %v2658_v56 = vsel %vm2656_vm5, %v2657_v52, %v2655_v3  ;;  %v2659_v28 = vsel %vm2643_vm0, 0.0, %v2651_v55  ;;  %v2666_v26 = vsel %vm2665_vm8, %v4126_v31, %v2664_v19  ;;  %vm2720_vm0 = vcmp.eq.f32.partialorder %v4135_v62, inf }
 0x1a8   : > { %v2660_v27 = vsel %vm2644_vm1, 0.0, %v2658_v56  ;;  %v2669_v58 = vsel %vm2667_vm9, %v2668_v42, %v2666_v26  ;;  %v2673_v20 = vsel %vm2672_vm10, %v4128_v13, %v2671_v39  ;;  %vm2722_vm1 = vcmp.eq.f32.partialorder %v4135_v62, 0.0 }
 0x1a9   : > { %v2676_v36 = vsel %vm2674_vm11, %v2675_v22, %v2673_v20  ;;  %v2677_v35 = vsel %vm2661_vm6, 0.0, %v2669_v58  ;;  %vm2733_vm4 = vcmp.eq.f32.partialorder %v4137_v0, 0.0  ;;  %vm2738_vm5 = vcmp.eq.f32.partialorder %v4140_v18, inf }
 0x1aa   : > { %v2968_v29 = vpop.eup %2967  ;;  %v2678_v10 = vsel %vm2662_vm7, 0.0, %v2676_v36  ;;  %v2679_v63 = vadd.f32 %v2677_v35, %v2659_v28  ;;  %vm2740_vm6 = vcmp.eq.f32.partialorder %v4140_v18, 0.0  ;;  %vm2728_vm7 = vcmp.ge.f32.partialorder %v4140_v18, 5e+29 }
 0x1ab   : > { %v2712_v61 = vmul.f32 %v2968_v29, %v4133_v51  ;;  %v2970_v16 = vpop.eup %2969  ;;  %v2680_v17 = vadd.f32 %v2678_v10, %v2660_v27  ;;  %vm2784_vm8 = vcmask 1040384   ;;  %vm2791_vm9 = vcmask 0  }
 0x1ac   : > { %v2972_v4 = vpop.eup %2971  ;;  %v2719_v30 = vmul.f32 %v2970_v16, %v4135_v62  ;;  %v2747_v59 = vmul.f32 %v2679_v63, %v2679_v63 }
 0x1ad   : > { %v2714_v5 = vsel %vm2713_vm14, %v4133_v51, %v2712_v61  ;;  %v2974_v25 = vpop.eup %2973  ;;  %v2730_v40 = vmul.f32 %v2972_v4, %v4137_v0  ;;  %v2759_v51 = vunpack.c.0.s8 %v4142_v49  ;;  %v2748_v24 = vmul.f32 %v2680_v17, %v2680_v17 }
 0x1ae   : > { %v2717_v38 = vsel %vm2715_vm15, %v2716_v34, %v2714_v5  ;;  %v2721_v31 = vsel %vm2720_vm0, %v4135_v62, %v2719_v30  ;;  %v2737_v13 = vmul.f32 %v2974_v25, %v4140_v18 }
 0x1af   : > { %v2724_v46 = vsel %vm2722_vm1, %v2723_v23, %v2721_v31  ;;  %v2725_v33 = vsel %vm2709_vm12, 0.0, %v2717_v38  ;;  %v2732_v21 = vsel %vm2731_vm3, %v4137_v0, %v2730_v40  ;;  %v2762_v53 = vsub.s32 %v2759_v51, %v3202_v2 }
 0x1b0   : > { %v2726_v48 = vsel %vm2710_vm13, 0.0, %v2724_v46  ;;  %v2735_v32 = vsel %vm2733_vm4, %v2734_v41, %v2732_v21  ;;  %v2739_v44 = vsel %vm2738_vm5, %v4140_v18, %v2737_v13 }
 0x1b1   : > { %v2742_v43 = vsel %vm2740_vm6, %v2741_v47, %v2739_v44  ;;  %v2743_v57 = vsel %vm2727_vm2, 0.0, %v2735_v32 }
 0x1b2   : > { %v2744_v50 = vsel %vm2728_vm7, 0.0, %v2742_v43  ;;  %v2745_v37 = vadd.f32 %v2743_v57, %v2725_v33 }
 0x1b3   : > { %v2746_v45 = vadd.f32 %v2744_v50, %v2726_v48 }
 0x1b4   : > { %v2749_v60 = vmul.f32 %v2745_v37, %v2745_v37 }
 0x1b5   : > { %v2750_v62 = vmul.f32 %v2746_v45, %v2746_v45 }
 0x1b6   : > { %v2751_v1 = vadd.f32 %v2749_v60, %v2747_v59 }
 0x1b7   : > { %v2752_v14 = vadd.f32 %v2750_v62, %v2748_v24 }
 0x1b9   : > { %v2756_v0 = vcombine.low %v2751_v1, %v2752_v14 }
 0x1bb   : > { %v2763_v18 = vrot.slane %v2756_v0, %v2762_v53 }
 0x1bd   : > { %v2770_v15 = vrot.slane %v2763_v18, %v2762_v53 }
 0x1bf   : > { %v2772_v52 = vmul.f32 %v2770_v15, %v2753_v12 }
 0x1c1   : > { %v2777_v49 = vrot.slane %v2772_v52, %v3207_v6  ;;  %v2781_v54 = vrot.slane %v2772_v52, %v3210_v7 }
 0x1c3   : > { %v2785_v8 = vsel %vm2784_vm8, %v2777_v49, 0.0  ;;  %v2786_v11 = vsel %vm2784_vm8, %v2781_v54, 0.0 }
 0x1c4   : > { %v2787_v9 = vadd.f32 %v2786_v11, %v2785_v8 }
 0x1c6   : > { %2788 = vadd.xlane.f32.xlu0 %v2787_v9 }
 0x253   : > { %v2789_v2 = vpop.xlane.xlu0 %2788 }
 0x254   : > { %2792 = vst.msk [vmem:[%s399_s10] sm:$0x1] %vm2791_vm9, %v2789_v2 }
 0x255 PF: > { %s17_s26 = sadd.s32 1, %s2997_s26   ;;  %s4237_s24 = smov %s2993_s25 }
 0x256   : > { %p14_p5 = scmp.ge.s32.totalorder %s17_s26, 4   ;;  %s4238_s25 = smov %s4240_s27 }
 0x258   :  { %16 = sbr.rel (!%p14_p5) target bundleno = 2 (0x2), region = 98 }

</bundles_post_ra>
